<compile_context>
chip_gen: v7x
topology: tpu7x:2x2x1
jax: 0.10.0
libtpu: 0.0.40
codegen_flags: <defaults>
</compile_context>

<pallas_src>
import jax
import jax.numpy as jnp
from jax.experimental import pallas as pl
from jax.experimental.pallas import tpu as pltpu

N_EXPRESSIONS = 76
SUBSPACE_DIM = 32
E_PAD = 128                      # lane-dense padded expression count


def _leaky(x, slope):
    return jnp.where(x >= 0, x, slope * x)


# ----------------------------------------------------------------------------------
# Pallas kernel: full forward pass (convNet -> fullNet -> attention -> mapping bmm)
# one grid step == `TB` batch elements (their full sequences), N = TB * seq_len.
# ----------------------------------------------------------------------------------
def _a2e_kernel(audio_ref, map_ref, segsel_ref, pm_ref, nm_ref, bd_ref, lbt_ref,
                cw1, cb1, cw2, cb2, cw3, cb3, cw4, cb4,
                fw1, fb1, fw2, fb2, fw3, fb3,
                aw1, ab1, aw2, ab2, aw3, ab3, aw4, ab4, aw5, ab5,
                out_ref):
    f32, bf16 = jnp.float32, jnp.bfloat16
    H, N, _ = audio_ref.shape                       # 16, TB*L, 32 (padded channels)

    # ---- convNet: 4x Conv2d(k=(3,1), s=(2,1), p=(1,0)) + LeakyReLU -------------------
    # Tap-accumulated matmuls (no 3*C_in im2col concat); rows = H_out*N >= 128.
    x = audio_ref[...]                              # (H, N, 32) bf16
    for w_ref, b_ref, slope in ((cw1, cb1, 0.02), (cw2, cb2, 0.02),
                                (cw3, cb3, 0.2), (cw4, cb4, 0.2)):
        C_in = x.shape[-1]
        C_out = w_ref.shape[2]
        assert H % 2 == 0, "stride-2 conv expects an even number of frequency rows"
        H_out = H // 2
        xr = x.reshape(H_out, 2, N, C_in)
        even = xr[:, 0].reshape(H_out * N, C_in)            # rows 2h   (tap 1)
        odd3 = xr[:, 1]                                     # rows 2h+1 (tap 2)
        y = (jnp.dot(even, w_ref[1], preferred_element_type=f32)
             + jnp.dot(odd3.reshape(H_out * N, C_in), w_ref[2],
                       preferred_element_type=f32)
             + b_ref[...])
        if H_out > 1:                                       # rows 2h-1 (tap 0); zero at h=0
            prev = jnp.concatenate(
                [jnp.zeros((1, N, C_in), x.dtype), odd3[:-1]], axis=0
            ).reshape(H_out * N, C_in)
            y = y + jnp.dot(prev, w_ref[0], preferred_element_type=f32)
        x = _leaky(y, slope).astype(bf16).reshape(H_out, N, C_out)
        H = H_out
    assert H == 1, "convNet must collapse all frequency rows to exactly one"
    feat = x.reshape(N, x.shape[-1])                        # (N, 64) bf16

    # ---- fullNet: 64 -> 128 -> 64 -> 32 (LeakyReLU 0.02, 0.02, Tanh) ----------------
    h1 = _leaky(jnp.dot(feat, fw1[...], preferred_element_type=f32) + fb1[...], 0.02)
    h2 = _leaky(jnp.dot(h1.astype(bf16), fw2[...], preferred_element_type=f32) + fb2[...], 0.02)
    z = jnp.tanh(jnp.dot(h2.astype(bf16), fw3[...], preferred_element_type=f32) + fb3[...])
    # z: (N, 32) f32 -- kept row-major for the attention-weighted reduction below.

    # ---- attentionConvNet: 5x Conv1d(k=3, p=1) + LeakyReLU, lane-dense (C, N) -------
    a = jnp.transpose(z)                                    # (32, N) f32, N on lanes
    pm = pm_ref[...]                                        # (1, N): 0 where l == 0
    nm = nm_ref[...]                                        # (1, N): 0 where l == L-1
    for w_ref, b_ref in ((aw1, ab1), (aw2, ab2), (aw3, ab3), (aw4, ab4), (aw5, ab5)):
        prev = (pltpu.roll(a, 1, 1) * pm).astype(bf16)      # x[l-1], zeroed at seq starts
        nxt = (pltpu.roll(a, N - 1, 1) * nm).astype(bf16)   # x[l+1], zeroed at seq ends
        cen = a.astype(bf16)
        y = (jnp.dot(w_ref[0], prev, preferred_element_type=f32)
             + jnp.dot(w_ref[1], cen, preferred_element_type=f32)
             + jnp.dot(w_ref[2], nxt, preferred_element_type=f32)
             + b_ref[...])                                  # (C_out, N) f32
        a = _leaky(y, 0.02)
    # a: (1, N) f32  (attention conv output, one value per flattened position)

    # ---- attentionNet: Linear(L->L) + softmax over L, done in the flat lane domain --
    # bd = block_diag(lw^T) so logits[b*L + j] = sum_l a[b*L + l] * lw[j, l].
    logits = jnp.dot(a, bd_ref[...], preferred_element_type=f32) + lbt_ref[...]   # (1, N)
    ex = jnp.exp(logits - jnp.max(logits, axis=1, keepdims=True))
    exsel = segsel_ref[...] * ex                            # (TB, N), per-sequence rows
    s_b = jnp.sum(exsel, axis=1, keepdims=True)             # (TB, 1) softmax denominators
    rs = jnp.dot(exsel, z, preferred_element_type=f32) * pl.reciprocal(s_b, approx=True)
    # rs: (TB, 32) == bmm(z^T, softmax(attention))

    # ---- out = 10 * bmm(mapping, rs)  (batched dot, lane-dense 128-wide store) ------
    outp = 10.0 * jnp.einsum('bxc,bce->bxe', rs[:, None, :], map_ref[...],
                             preferred_element_type=f32)    # (TB, 1, 128)
    out_ref[...] = outp.reshape(out_ref.shape).astype(out_ref.dtype)


# ----------------------------------------------------------------------------------
# Wrapper: parameter re-layout (all layout plumbing done here, in XLA) + pallas_call
# ----------------------------------------------------------------------------------
def expression_estimator_attention(audio, identity_id, params, *, batch_tile=None):
    b, L, H0, Ca = audio.shape
    assert H0 == 16, "convNet (4 stride-2 convs) requires exactly 16 frequency rows"
    f32, bf16 = jnp.float32, jnp.bfloat16
    C_pad = 32

    # --- batch tiling: target >=128 flattened rows per grid step; round the tile up
    #     to a multiple of 8 (TPU sublane granularity) unless it covers the batch ----
    if batch_tile is None:
        batch_tile = -(-128 // L)                    # ceil(128 / L)
        batch_tile = ((batch_tile + 7) // 8) * 8
    TB = int(min(batch_tile, b))
    b_pad = -(-b // TB) * TB
    N = TB * L
    assert TB == b_pad or TB % 8 == 0, \
        "batch_tile must be a multiple of 8 (or cover the whole batch)"

    if b_pad != b:   # ragged batch: zero-pad; padded rows are independent and sliced off
        audio = jnp.pad(audio, ((0, b_pad - b), (0, 0), (0, 0), (0, 0)))
        identity_id = jnp.pad(identity_id, (0, b_pad - b))

    # audio -> (H=16, b_pad*L, 32) bf16 (channel dim zero-padded 29 -> 32)
    audio_k = jnp.transpose(audio, (2, 0, 1, 3)).reshape(H0, b_pad * L, Ca)
    audio_k = jnp.pad(audio_k, ((0, 0), (0, 0), (0, C_pad - Ca))).astype(bf16)

    # index_select + pre-transpose mapping, expressions zero-padded 76 -> 128
    map_sel = jnp.transpose(params['mapping'][0][identity_id], (0, 2, 1))
    map_sel = jnp.pad(map_sel, ((0, 0), (0, 0), (0, E_PAD - N_EXPRESSIONS))).astype(f32)

    # attention-path constants for the flat (TB*L on lanes) formulation
    eye_tb = jnp.eye(TB, dtype=f32)
    segsel = jnp.kron(eye_tb, jnp.ones((1, L), f32))                  # (TB, N) segment select
    bd = jnp.kron(eye_tb, params['lw'].T.astype(f32))                 # (N, N) block-diag lw^T
    lbt = jnp.tile(params['lb'].astype(f32), TB).reshape(1, N)        # tiled Linear bias
    lpos = jnp.arange(N) % L
    pm = (lpos != 0).astype(f32).reshape(1, N)                        # keep-mask for x[l-1]
    nm = (lpos != L - 1).astype(f32).reshape(1, N)                    # keep-mask for x[l+1]

    def c2w(w, c_in_pad):   # Conv2d weight (O, C, 3, 1) -> (3, c_in_pad, O), bf16
        wt = jnp.transpose(w[:, :, :, 0], (2, 1, 0))                  # (3, C_in, C_out)
        wt = jnp.pad(wt, ((0, 0), (0, c_in_pad - wt.shape[1]), (0, 0)))
        return wt.astype(bf16)

    def c1w(w):             # Conv1d weight (O, C, 3) -> (3, O, C), bf16
        return jnp.transpose(w, (2, 0, 1)).astype(bf16)

    def rb(v):              # bias -> (1, C) f32 row
        return v.reshape(1, -1).astype(f32)

    def cb(v):              # bias -> (C, 1) f32 column
        return v.reshape(-1, 1).astype(f32)

    weights = [
        c2w(params['cw1'], C_pad), rb(params['cb1']),
        c2w(params['cw2'], 32), rb(params['cb2']),
        c2w(params['cw3'], 32), rb(params['cb3']),
        c2w(params['cw4'], 64), rb(params['cb4']),
        params['fw1'].T.astype(bf16), rb(params['fb1']),
        params['fw2'].T.astype(bf16), rb(params['fb2']),
        params['fw3'].T.astype(bf16), rb(params['fb3']),
        c1w(params['aw1']), cb(params['ab1']),
        c1w(params['aw2']), cb(params['ab2']),
        c1w(params['aw3']), cb(params['ab3']),
        c1w(params['aw4']), cb(params['ab4']),
        c1w(params['aw5']), cb(params['ab5']),
    ]
    consts = [segsel, pm, nm, bd, lbt]

    def full_spec(arr):     # whole-array block, resident across all grid steps
        nd = arr.ndim
        return pl.BlockSpec(arr.shape, lambda i: (0,) * nd)

    in_specs = [
        pl.BlockSpec((H0, N, C_pad), lambda i: (0, i, 0)),            # audio tile
        pl.BlockSpec((TB, SUBSPACE_DIM, E_PAD), lambda i: (i, 0, 0)), # mapping tile
    ] + [full_spec(c) for c in consts] + [full_spec(w) for w in weights]

    out = pl.pallas_call(
        _a2e_kernel,
        out_shape=jax.ShapeDtypeStruct((b_pad, E_PAD), f32),
        grid_spec=pltpu.PrefetchScalarGridSpec(
            num_scalar_prefetch=0,
            grid=(b_pad // TB,),
            in_specs=in_specs,
            out_specs=pl.BlockSpec((TB, E_PAD), lambda i: (i, 0)),    # lane-dense store
        ),
        compiler_params=pltpu.CompilerParams(
            dimension_semantics=("parallel",),     # v7x: split batch tiles across 2 TCs
            vmem_limit_bytes=32 * 1024 * 1024,
        ),
    )(audio_k, map_sel, *consts, *weights)
    return out[:b, :N_EXPRESSIONS]


# ----------------------------------------------------------------------------------
# Deterministic synthetic parameters (PyTorch nn.Module shapes)
# ----------------------------------------------------------------------------------
def init_params(key, n_identities, seq_len):
    keys = jax.random.split(key, 32)

    def w(i, shape, scale=0.1):
        return scale * jax.random.normal(keys[i], shape, jnp.float32)

    return {
        'cw1': w(0, (32, 29, 3, 1)), 'cb1': w(1, (32,), 0.05),
        'cw2': w(2, (32, 32, 3, 1)), 'cb2': w(3, (32,), 0.05),
        'cw3': w(4, (64, 32, 3, 1)), 'cb3': w(5, (64,), 0.05),
        'cw4': w(6, (64, 64, 3, 1)), 'cb4': w(7, (64,), 0.05),
        'fw1': w(8, (128, 64)), 'fb1': w(9, (128,), 0.05),
        'fw2': w(10, (64, 128)), 'fb2': w(11, (64,), 0.05),
        'fw3': w(12, (SUBSPACE_DIM, 64)), 'fb3': w(13, (SUBSPACE_DIM,), 0.05),
        'mapping': jax.random.normal(
            keys[14], (1, n_identities, N_EXPRESSIONS, SUBSPACE_DIM), jnp.float32),
        'aw1': w(15, (16, 32, 3)), 'ab1': w(16, (16,), 0.05),
        'aw2': w(17, (8, 16, 3)), 'ab2': w(18, (8,), 0.05),
        'aw3': w(19, (4, 8, 3)), 'ab3': w(20, (4,), 0.05),
        'aw4': w(21, (2, 4, 3)), 'ab4': w(22, (2,), 0.05),
        'aw5': w(23, (1, 2, 3)), 'ab5': w(24, (1,), 0.05),
        'lw': w(25, (seq_len, seq_len)), 'lb': w(26, (seq_len,), 0.05),
    }


# ----------------------------------------------------------------------------------
# Pure-JAX reference (mirrors the PyTorch NCHW semantics) for validation
# ----------------------------------------------------------------------------------
def reference_forward(audio, identity_id, P):
    b, L = audio.shape[0], audio.shape[1]
    x = jnp.transpose(audio.reshape(b * L, 16, 29), (0, 2, 1))[..., None]  # (N,29,16,1)

    def conv2d(x, w, bias):
        y = jax.lax.conv_general_dilated(
            x, w, window_strides=(2, 1), padding=((1, 1), (0, 0)),
            dimension_numbers=('NCHW', 'OIHW', 'NCHW'))
        return y + bias[None, :, None, None]

    h = _leaky(conv2d(x, P['cw1'], P['cb1']), 0.02)
    h = _leaky(conv2d(h, P['cw2'], P['cb2']), 0.02)
    h = _leaky(conv2d(h, P['cw3'], P['cb3']), 0.2)
    h = _leaky(conv2d(h, P['cw4'], P['cb4']), 0.2)
    feat = h.reshape(b * L, 64)
    h1 = _leaky(feat @ P['fw1'].T + P['fb1'], 0.02)
    h2 = _leaky(h1 @ P['fw2'].T + P['fb2'], 0.02)
    z = jnp.tanh(h2 @ P['fw3'].T + P['fb3'])
    zT = jnp.transpose(z.reshape(b, L, SUBSPACE_DIM), (0, 2, 1))           # (b, 32, L)

    def conv1d(x, w, bias):
        y = jax.lax.conv_general_dilated(
            x[..., None], w[..., None], window_strides=(1, 1),
            padding=((1, 1), (0, 0)),
            dimension_numbers=('NCHW', 'OIHW', 'NCHW'))[..., 0]
        return y + bias[None, :, None]

    a = zT
    for wk, bk in (('aw1', 'ab1'), ('aw2', 'ab2'), ('aw3', 'ab3'),
                   ('aw4', 'ab4'), ('aw5', 'ab5')):
        a = _leaky(conv1d(a, P[wk], P[bk]), 0.02)
    e = a.reshape(b, L) @ P['lw'].T + P['lb']
    att = jax.nn.softmax(e, axis=1)[..., None]                             # (b, L, 1)
    rs = jnp.matmul(zT, att)                                               # (b, 32, 1)
    mapping = P['mapping'][0][identity_id]                                 # (b, 76, 32)
    return 10.0 * jnp.matmul(mapping, rs)[:, :, 0]                         # (b, 76)


if __name__ == "__main__":
    b, seq_len, n_identities = 32, 8, 4                  # TB auto = 16 -> grid of 2 steps
    key = jax.random.PRNGKey(0)
    k_audio, k_param = jax.random.split(key)

    audio = jax.random.normal(k_audio, (b, seq_len, 16, 29), jnp.float32)
    identity_id = (jnp.arange(b) % n_identities).astype(jnp.int32)
    params = init_params(k_param, n_identities, seq_len)

    out = expression_estimator_attention(audio, identity_id, params)
    out = jax.block_until_ready(out)
    assert out.shape == (b, N_EXPRESSIONS)

    with jax.default_matmul_precision('float32'):
        ref = jax.block_until_ready(reference_forward(audio, identity_id, params))
    rel_err = float(jnp.max(jnp.abs(out - ref)) / (jnp.max(jnp.abs(ref)) + 1e-6))
    # tolerance accounts for bf16 matmul inputs along the conv / fullNet / attention-conv path
    assert rel_err < 3e-2, f"relative error too large: {rel_err}"

    print("KERNEL_OK")
</pallas_src>

<mosaic_0001>
module attributes {stable_mosaic.version = 11 : i64} {
  func.func @_a2e_kernel(%arg0: i32, %arg1: memref<16x128x32xbf16, #tpu.memory_space<vmem>>, %arg2: memref<16x32x128xf32, #tpu.memory_space<vmem>>, %arg3: memref<16x128xf32, #tpu.memory_space<vmem>>, %arg4: memref<1x128xf32, #tpu.memory_space<vmem>>, %arg5: memref<1x128xf32, #tpu.memory_space<vmem>>, %arg6: memref<128x128xf32, #tpu.memory_space<vmem>>, %arg7: memref<1x128xf32, #tpu.memory_space<vmem>>, %arg8: memref<3x32x32xbf16, #tpu.memory_space<vmem>>, %arg9: memref<1x32xf32, #tpu.memory_space<vmem>>, %arg10: memref<3x32x32xbf16, #tpu.memory_space<vmem>>, %arg11: memref<1x32xf32, #tpu.memory_space<vmem>>, %arg12: memref<3x32x64xbf16, #tpu.memory_space<vmem>>, %arg13: memref<1x64xf32, #tpu.memory_space<vmem>>, %arg14: memref<3x64x64xbf16, #tpu.memory_space<vmem>>, %arg15: memref<1x64xf32, #tpu.memory_space<vmem>>, %arg16: memref<64x128xbf16, #tpu.memory_space<vmem>>, %arg17: memref<1x128xf32, #tpu.memory_space<vmem>>, %arg18: memref<128x64xbf16, #tpu.memory_space<vmem>>, %arg19: memref<1x64xf32, #tpu.memory_space<vmem>>, %arg20: memref<64x32xbf16, #tpu.memory_space<vmem>>, %arg21: memref<1x32xf32, #tpu.memory_space<vmem>>, %arg22: memref<3x16x32xbf16, #tpu.memory_space<vmem>>, %arg23: memref<16x1xf32, #tpu.memory_space<vmem>>, %arg24: memref<3x8x16xbf16, #tpu.memory_space<vmem>>, %arg25: memref<8x1xf32, #tpu.memory_space<vmem>>, %arg26: memref<3x4x8xbf16, #tpu.memory_space<vmem>>, %arg27: memref<4x1xf32, #tpu.memory_space<vmem>>, %arg28: memref<3x2x4xbf16, #tpu.memory_space<vmem>>, %arg29: memref<2x1xf32, #tpu.memory_space<vmem>>, %arg30: memref<3x1x2xbf16, #tpu.memory_space<vmem>>, %arg31: memref<1x1xf32, #tpu.memory_space<vmem>>, %arg32: memref<16x128xf32, #tpu.memory_space<vmem>>) attributes {dimension_semantics = [#tpu.dimension_semantics<parallel>], iteration_bounds = array<i64: 2>, scalar_prefetch = 0 : i64, scratch_operands = 0 : i64, tpu.core_type = #tpu.core_type<tc>, window_params = [{transform_indices = @transform_0, window_bounds = array<i64: 16, 128, 32>}, {transform_indices = @transform_1, window_bounds = array<i64: 16, 32, 128>}, {pipeline_mode = #tpu.pipeline_mode<synchronous>, transform_indices = @transform_2, window_bounds = array<i64: 16, 128>}, {pipeline_mode = #tpu.pipeline_mode<synchronous>, transform_indices = @transform_3, window_bounds = array<i64: 1, 128>}, {pipeline_mode = #tpu.pipeline_mode<synchronous>, transform_indices = @transform_4, window_bounds = array<i64: 1, 128>}, {pipeline_mode = #tpu.pipeline_mode<synchronous>, transform_indices = @transform_5, window_bounds = array<i64: 128, 128>}, {pipeline_mode = #tpu.pipeline_mode<synchronous>, transform_indices = @transform_6, window_bounds = array<i64: 1, 128>}, {pipeline_mode = #tpu.pipeline_mode<synchronous>, transform_indices = @transform_7, window_bounds = array<i64: 3, 32, 32>}, {pipeline_mode = #tpu.pipeline_mode<synchronous>, transform_indices = @transform_8, window_bounds = array<i64: 1, 32>}, {pipeline_mode = #tpu.pipeline_mode<synchronous>, transform_indices = @transform_9, window_bounds = array<i64: 3, 32, 32>}, {pipeline_mode = #tpu.pipeline_mode<synchronous>, transform_indices = @transform_10, window_bounds = array<i64: 1, 32>}, {pipeline_mode = #tpu.pipeline_mode<synchronous>, transform_indices = @transform_11, window_bounds = array<i64: 3, 32, 64>}, {pipeline_mode = #tpu.pipeline_mode<synchronous>, transform_indices = @transform_12, window_bounds = array<i64: 1, 64>}, {pipeline_mode = #tpu.pipeline_mode<synchronous>, transform_indices = @transform_13, window_bounds = array<i64: 3, 64, 64>}, {pipeline_mode = #tpu.pipeline_mode<synchronous>, transform_indices = @transform_14, window_bounds = array<i64: 1, 64>}, {pipeline_mode = #tpu.pipeline_mode<synchronous>, transform_indices = @transform_15, window_bounds = array<i64: 64, 128>}, {pipeline_mode = #tpu.pipeline_mode<synchronous>, transform_indices = @transform_16, window_bounds = array<i64: 1, 128>}, {pipeline_mode = #tpu.pipeline_mode<synchronous>, transform_indices = @transform_17, window_bounds = array<i64: 128, 64>}, {pipeline_mode = #tpu.pipeline_mode<synchronous>, transform_indices = @transform_18, window_bounds = array<i64: 1, 64>}, {pipeline_mode = #tpu.pipeline_mode<synchronous>, transform_indices = @transform_19, window_bounds = array<i64: 64, 32>}, {pipeline_mode = #tpu.pipeline_mode<synchronous>, transform_indices = @transform_20, window_bounds = array<i64: 1, 32>}, {pipeline_mode = #tpu.pipeline_mode<synchronous>, transform_indices = @transform_21, window_bounds = array<i64: 3, 16, 32>}, {pipeline_mode = #tpu.pipeline_mode<synchronous>, transform_indices = @transform_22, window_bounds = array<i64: 16, 1>}, {pipeline_mode = #tpu.pipeline_mode<synchronous>, transform_indices = @transform_23, window_bounds = array<i64: 3, 8, 16>}, {pipeline_mode = #tpu.pipeline_mode<synchronous>, transform_indices = @transform_24, window_bounds = array<i64: 8, 1>}, {pipeline_mode = #tpu.pipeline_mode<synchronous>, transform_indices = @transform_25, window_bounds = array<i64: 3, 4, 8>}, {pipeline_mode = #tpu.pipeline_mode<synchronous>, transform_indices = @transform_26, window_bounds = array<i64: 4, 1>}, {pipeline_mode = #tpu.pipeline_mode<synchronous>, transform_indices = @transform_27, window_bounds = array<i64: 3, 2, 4>}, {pipeline_mode = #tpu.pipeline_mode<synchronous>, transform_indices = @transform_28, window_bounds = array<i64: 2, 1>}, {pipeline_mode = #tpu.pipeline_mode<synchronous>, transform_indices = @transform_29, window_bounds = array<i64: 3, 1, 2>}, {pipeline_mode = #tpu.pipeline_mode<synchronous>, transform_indices = @transform_30, window_bounds = array<i64: 1, 1>}, {transform_indices = @transform_31, window_bounds = array<i64: 16, 128>}]} {
    %c0 = arith.constant 0 : index
    %c0_0 = arith.constant 0 : index
    %c0_1 = arith.constant 0 : index
    %0 = vector.load %arg1[%c0, %c0_0, %c0_1] : memref<16x128x32xbf16, #tpu.memory_space<vmem>>, vector<16x128x32xbf16>
    %1 = vector.shape_cast %0 : vector<16x128x32xbf16> to vector<8x2x128x32xbf16>
    %2 = vector.extract_strided_slice %1 {offsets = [0, 0, 0, 0], sizes = [8, 1, 128, 32], strides = [1, 1, 1, 1]} : vector<8x2x128x32xbf16> to vector<8x1x128x32xbf16>
    %3 = vector.shape_cast %2 : vector<8x1x128x32xbf16> to vector<8x128x32xbf16>
    %4 = vector.shape_cast %3 : vector<8x128x32xbf16> to vector<1024x32xbf16>
    %5 = vector.extract_strided_slice %1 {offsets = [0, 1, 0, 0], sizes = [8, 1, 128, 32], strides = [1, 1, 1, 1]} : vector<8x2x128x32xbf16> to vector<8x1x128x32xbf16>
    %6 = vector.shape_cast %5 : vector<8x1x128x32xbf16> to vector<8x128x32xbf16>
    %c1 = arith.constant 1 : index
    %c0_2 = arith.constant 0 : index
    %c0_3 = arith.constant 0 : index
    %7 = vector.load %arg8[%c1, %c0_2, %c0_3] : memref<3x32x32xbf16, #tpu.memory_space<vmem>>, vector<1x32x32xbf16>
    %8 = vector.shape_cast %7 : vector<1x32x32xbf16> to vector<32x32xbf16>
    %cst = arith.constant dense<0.000000e+00> : vector<1024x32xf32>
    %9 = tpu.matmul %4, %8, %cst {dimension_numbers = #tpu.dot_dimension_numbers<[1], [0], [0], [1], [0, 0, 1, 1], [], []>} : vector<1024x32xbf16>, vector<32x32xbf16>, vector<1024x32xf32> -> vector<1024x32xf32>
    %10 = vector.shape_cast %6 : vector<8x128x32xbf16> to vector<1024x32xbf16>
    %c2 = arith.constant 2 : index
    %c0_4 = arith.constant 0 : index
    %c0_5 = arith.constant 0 : index
    %11 = vector.load %arg8[%c2, %c0_4, %c0_5] : memref<3x32x32xbf16, #tpu.memory_space<vmem>>, vector<1x32x32xbf16>
    %12 = vector.shape_cast %11 : vector<1x32x32xbf16> to vector<32x32xbf16>
    %cst_6 = arith.constant dense<0.000000e+00> : vector<1024x32xf32>
    %13 = tpu.matmul %10, %12, %cst_6 {dimension_numbers = #tpu.dot_dimension_numbers<[1], [0], [0], [1], [0, 0, 1, 1], [], []>} : vector<1024x32xbf16>, vector<32x32xbf16>, vector<1024x32xf32> -> vector<1024x32xf32>
    %14 = arith.addf %9, %13 : vector<1024x32xf32>
    %c0_7 = arith.constant 0 : index
    %c0_8 = arith.constant 0 : index
    %15 = vector.load %arg9[%c0_7, %c0_8] : memref<1x32xf32, #tpu.memory_space<vmem>>, vector<1x32xf32>
    %16 = vector.broadcast %15 : vector<1x32xf32> to vector<1024x32xf32>
    %17 = arith.addf %14, %16 : vector<1024x32xf32>
    %cst_9 = arith.constant 0.000000e+00 : bf16
    %18 = vector.broadcast %cst_9 : bf16 to vector<1x128x32xbf16>
    %19 = vector.extract_strided_slice %6 {offsets = [0, 0, 0], sizes = [7, 128, 32], strides = [1, 1, 1]} : vector<8x128x32xbf16> to vector<7x128x32xbf16>
    %20 = tpu.concatenate %18, %19 in 0 : vector<1x128x32xbf16>, vector<7x128x32xbf16> -> vector<8x128x32xbf16>
    %21 = vector.shape_cast %20 : vector<8x128x32xbf16> to vector<1024x32xbf16>
    %c0_10 = arith.constant 0 : index
    %c0_11 = arith.constant 0 : index
    %c0_12 = arith.constant 0 : index
    %22 = vector.load %arg8[%c0_10, %c0_11, %c0_12] : memref<3x32x32xbf16, #tpu.memory_space<vmem>>, vector<1x32x32xbf16>
    %23 = vector.shape_cast %22 : vector<1x32x32xbf16> to vector<32x32xbf16>
    %cst_13 = arith.constant dense<0.000000e+00> : vector<1024x32xf32>
    %24 = tpu.matmul %21, %23, %cst_13 {dimension_numbers = #tpu.dot_dimension_numbers<[1], [0], [0], [1], [0, 0, 1, 1], [], []>} : vector<1024x32xbf16>, vector<32x32xbf16>, vector<1024x32xf32> -> vector<1024x32xf32>
    %25 = arith.addf %17, %24 : vector<1024x32xf32>
    %cst_14 = arith.constant 0.000000e+00 : f32
    %26 = vector.broadcast %cst_14 : f32 to vector<1024x32xf32>
    %27 = arith.cmpf oge, %25, %26 : vector<1024x32xf32>
    %cst_15 = arith.constant 2.000000e-02 : f32
    %28 = vector.broadcast %cst_15 : f32 to vector<1024x32xf32>
    %29 = arith.mulf %28, %25 : vector<1024x32xf32>
    %30 = arith.select %27, %25, %29 : vector<1024x32xi1>, vector<1024x32xf32>
    %31 = arith.truncf %30 : vector<1024x32xf32> to vector<1024x32xbf16>
    %32 = vector.shape_cast %31 : vector<1024x32xbf16> to vector<8x128x32xbf16>
    %33 = vector.shape_cast %32 : vector<8x128x32xbf16> to vector<4x2x128x32xbf16>
    %34 = vector.extract_strided_slice %33 {offsets = [0, 0, 0, 0], sizes = [4, 1, 128, 32], strides = [1, 1, 1, 1]} : vector<4x2x128x32xbf16> to vector<4x1x128x32xbf16>
    %35 = vector.shape_cast %34 : vector<4x1x128x32xbf16> to vector<4x128x32xbf16>
    %36 = vector.shape_cast %35 : vector<4x128x32xbf16> to vector<512x32xbf16>
    %37 = vector.extract_strided_slice %33 {offsets = [0, 1, 0, 0], sizes = [4, 1, 128, 32], strides = [1, 1, 1, 1]} : vector<4x2x128x32xbf16> to vector<4x1x128x32xbf16>
    %38 = vector.shape_cast %37 : vector<4x1x128x32xbf16> to vector<4x128x32xbf16>
    %c1_16 = arith.constant 1 : index
    %c0_17 = arith.constant 0 : index
    %c0_18 = arith.constant 0 : index
    %39 = vector.load %arg10[%c1_16, %c0_17, %c0_18] : memref<3x32x32xbf16, #tpu.memory_space<vmem>>, vector<1x32x32xbf16>
    %40 = vector.shape_cast %39 : vector<1x32x32xbf16> to vector<32x32xbf16>
    %cst_19 = arith.constant dense<0.000000e+00> : vector<512x32xf32>
    %41 = tpu.matmul %36, %40, %cst_19 {dimension_numbers = #tpu.dot_dimension_numbers<[1], [0], [0], [1], [0, 0, 1, 1], [], []>} : vector<512x32xbf16>, vector<32x32xbf16>, vector<512x32xf32> -> vector<512x32xf32>
    %42 = vector.shape_cast %38 : vector<4x128x32xbf16> to vector<512x32xbf16>
    %c2_20 = arith.constant 2 : index
    %c0_21 = arith.constant 0 : index
    %c0_22 = arith.constant 0 : index
    %43 = vector.load %arg10[%c2_20, %c0_21, %c0_22] : memref<3x32x32xbf16, #tpu.memory_space<vmem>>, vector<1x32x32xbf16>
    %44 = vector.shape_cast %43 : vector<1x32x32xbf16> to vector<32x32xbf16>
    %cst_23 = arith.constant dense<0.000000e+00> : vector<512x32xf32>
    %45 = tpu.matmul %42, %44, %cst_23 {dimension_numbers = #tpu.dot_dimension_numbers<[1], [0], [0], [1], [0, 0, 1, 1], [], []>} : vector<512x32xbf16>, vector<32x32xbf16>, vector<512x32xf32> -> vector<512x32xf32>
    %46 = arith.addf %41, %45 : vector<512x32xf32>
    %c0_24 = arith.constant 0 : index
    %c0_25 = arith.constant 0 : index
    %47 = vector.load %arg11[%c0_24, %c0_25] : memref<1x32xf32, #tpu.memory_space<vmem>>, vector<1x32xf32>
    %48 = vector.broadcast %47 : vector<1x32xf32> to vector<512x32xf32>
    %49 = arith.addf %46, %48 : vector<512x32xf32>
    %cst_26 = arith.constant 0.000000e+00 : bf16
    %50 = vector.broadcast %cst_26 : bf16 to vector<1x128x32xbf16>
    %51 = vector.extract_strided_slice %38 {offsets = [0, 0, 0], sizes = [3, 128, 32], strides = [1, 1, 1]} : vector<4x128x32xbf16> to vector<3x128x32xbf16>
    %52 = tpu.concatenate %50, %51 in 0 : vector<1x128x32xbf16>, vector<3x128x32xbf16> -> vector<4x128x32xbf16>
    %53 = vector.shape_cast %52 : vector<4x128x32xbf16> to vector<512x32xbf16>
    %c0_27 = arith.constant 0 : index
    %c0_28 = arith.constant 0 : index
    %c0_29 = arith.constant 0 : index
    %54 = vector.load %arg10[%c0_27, %c0_28, %c0_29] : memref<3x32x32xbf16, #tpu.memory_space<vmem>>, vector<1x32x32xbf16>
    %55 = vector.shape_cast %54 : vector<1x32x32xbf16> to vector<32x32xbf16>
    %cst_30 = arith.constant dense<0.000000e+00> : vector<512x32xf32>
    %56 = tpu.matmul %53, %55, %cst_30 {dimension_numbers = #tpu.dot_dimension_numbers<[1], [0], [0], [1], [0, 0, 1, 1], [], []>} : vector<512x32xbf16>, vector<32x32xbf16>, vector<512x32xf32> -> vector<512x32xf32>
    %57 = arith.addf %49, %56 : vector<512x32xf32>
    %cst_31 = arith.constant 0.000000e+00 : f32
    %58 = vector.broadcast %cst_31 : f32 to vector<512x32xf32>
    %59 = arith.cmpf oge, %57, %58 : vector<512x32xf32>
    %cst_32 = arith.constant 2.000000e-02 : f32
    %60 = vector.broadcast %cst_32 : f32 to vector<512x32xf32>
    %61 = arith.mulf %60, %57 : vector<512x32xf32>
    %62 = arith.select %59, %57, %61 : vector<512x32xi1>, vector<512x32xf32>
    %63 = arith.truncf %62 : vector<512x32xf32> to vector<512x32xbf16>
    %64 = vector.shape_cast %63 : vector<512x32xbf16> to vector<4x128x32xbf16>
    %65 = vector.shape_cast %64 : vector<4x128x32xbf16> to vector<2x2x128x32xbf16>
    %66 = vector.extract_strided_slice %65 {offsets = [0, 0, 0, 0], sizes = [2, 1, 128, 32], strides = [1, 1, 1, 1]} : vector<2x2x128x32xbf16> to vector<2x1x128x32xbf16>
    %67 = vector.shape_cast %66 : vector<2x1x128x32xbf16> to vector<2x128x32xbf16>
    %68 = vector.shape_cast %67 : vector<2x128x32xbf16> to vector<256x32xbf16>
    %69 = vector.extract_strided_slice %65 {offsets = [0, 1, 0, 0], sizes = [2, 1, 128, 32], strides = [1, 1, 1, 1]} : vector<2x2x128x32xbf16> to vector<2x1x128x32xbf16>
    %70 = vector.shape_cast %69 : vector<2x1x128x32xbf16> to vector<2x128x32xbf16>
    %c1_33 = arith.constant 1 : index
    %c0_34 = arith.constant 0 : index
    %c0_35 = arith.constant 0 : index
    %71 = vector.load %arg12[%c1_33, %c0_34, %c0_35] : memref<3x32x64xbf16, #tpu.memory_space<vmem>>, vector<1x32x64xbf16>
    %72 = vector.shape_cast %71 : vector<1x32x64xbf16> to vector<32x64xbf16>
    %cst_36 = arith.constant dense<0.000000e+00> : vector<256x64xf32>
    %73 = tpu.matmul %68, %72, %cst_36 {dimension_numbers = #tpu.dot_dimension_numbers<[1], [0], [0], [1], [0, 0, 1, 1], [], []>} : vector<256x32xbf16>, vector<32x64xbf16>, vector<256x64xf32> -> vector<256x64xf32>
    %74 = vector.shape_cast %70 : vector<2x128x32xbf16> to vector<256x32xbf16>
    %c2_37 = arith.constant 2 : index
    %c0_38 = arith.constant 0 : index
    %c0_39 = arith.constant 0 : index
    %75 = vector.load %arg12[%c2_37, %c0_38, %c0_39] : memref<3x32x64xbf16, #tpu.memory_space<vmem>>, vector<1x32x64xbf16>
    %76 = vector.shape_cast %75 : vector<1x32x64xbf16> to vector<32x64xbf16>
    %cst_40 = arith.constant dense<0.000000e+00> : vector<256x64xf32>
    %77 = tpu.matmul %74, %76, %cst_40 {dimension_numbers = #tpu.dot_dimension_numbers<[1], [0], [0], [1], [0, 0, 1, 1], [], []>} : vector<256x32xbf16>, vector<32x64xbf16>, vector<256x64xf32> -> vector<256x64xf32>
    %78 = arith.addf %73, %77 : vector<256x64xf32>
    %c0_41 = arith.constant 0 : index
    %c0_42 = arith.constant 0 : index
    %79 = vector.load %arg13[%c0_41, %c0_42] : memref<1x64xf32, #tpu.memory_space<vmem>>, vector<1x64xf32>
    %80 = vector.broadcast %79 : vector<1x64xf32> to vector<256x64xf32>
    %81 = arith.addf %78, %80 : vector<256x64xf32>
    %cst_43 = arith.constant 0.000000e+00 : bf16
    %82 = vector.broadcast %cst_43 : bf16 to vector<1x128x32xbf16>
    %83 = vector.extract_strided_slice %70 {offsets = [0, 0, 0], sizes = [1, 128, 32], strides = [1, 1, 1]} : vector<2x128x32xbf16> to vector<1x128x32xbf16>
    %84 = tpu.concatenate %82, %83 in 0 : vector<1x128x32xbf16>, vector<1x128x32xbf16> -> vector<2x128x32xbf16>
    %85 = vector.shape_cast %84 : vector<2x128x32xbf16> to vector<256x32xbf16>
    %c0_44 = arith.constant 0 : index
    %c0_45 = arith.constant 0 : index
    %c0_46 = arith.constant 0 : index
    %86 = vector.load %arg12[%c0_44, %c0_45, %c0_46] : memref<3x32x64xbf16, #tpu.memory_space<vmem>>, vector<1x32x64xbf16>
    %87 = vector.shape_cast %86 : vector<1x32x64xbf16> to vector<32x64xbf16>
    %cst_47 = arith.constant dense<0.000000e+00> : vector<256x64xf32>
    %88 = tpu.matmul %85, %87, %cst_47 {dimension_numbers = #tpu.dot_dimension_numbers<[1], [0], [0], [1], [0, 0, 1, 1], [], []>} : vector<256x32xbf16>, vector<32x64xbf16>, vector<256x64xf32> -> vector<256x64xf32>
    %89 = arith.addf %81, %88 : vector<256x64xf32>
    %cst_48 = arith.constant 0.000000e+00 : f32
    %90 = vector.broadcast %cst_48 : f32 to vector<256x64xf32>
    %91 = arith.cmpf oge, %89, %90 : vector<256x64xf32>
    %cst_49 = arith.constant 2.000000e-01 : f32
    %92 = vector.broadcast %cst_49 : f32 to vector<256x64xf32>
    %93 = arith.mulf %92, %89 : vector<256x64xf32>
    %94 = arith.select %91, %89, %93 : vector<256x64xi1>, vector<256x64xf32>
    %95 = arith.truncf %94 : vector<256x64xf32> to vector<256x64xbf16>
    %96 = vector.shape_cast %95 : vector<256x64xbf16> to vector<2x128x64xbf16>
    %97 = vector.shape_cast %96 : vector<2x128x64xbf16> to vector<1x2x128x64xbf16>
    %98 = vector.extract_strided_slice %97 {offsets = [0, 0, 0, 0], sizes = [1, 1, 128, 64], strides = [1, 1, 1, 1]} : vector<1x2x128x64xbf16> to vector<1x1x128x64xbf16>
    %99 = vector.shape_cast %98 : vector<1x1x128x64xbf16> to vector<1x128x64xbf16>
    %100 = vector.shape_cast %99 : vector<1x128x64xbf16> to vector<128x64xbf16>
    %101 = vector.extract_strided_slice %97 {offsets = [0, 1, 0, 0], sizes = [1, 1, 128, 64], strides = [1, 1, 1, 1]} : vector<1x2x128x64xbf16> to vector<1x1x128x64xbf16>
    %102 = vector.shape_cast %101 : vector<1x1x128x64xbf16> to vector<1x128x64xbf16>
    %c1_50 = arith.constant 1 : index
    %c0_51 = arith.constant 0 : index
    %c0_52 = arith.constant 0 : index
    %103 = vector.load %arg14[%c1_50, %c0_51, %c0_52] : memref<3x64x64xbf16, #tpu.memory_space<vmem>>, vector<1x64x64xbf16>
    %104 = vector.shape_cast %103 : vector<1x64x64xbf16> to vector<64x64xbf16>
    %cst_53 = arith.constant dense<0.000000e+00> : vector<128x64xf32>
    %105 = tpu.matmul %100, %104, %cst_53 {dimension_numbers = #tpu.dot_dimension_numbers<[1], [0], [0], [1], [0, 0, 1, 1], [], []>} : vector<128x64xbf16>, vector<64x64xbf16>, vector<128x64xf32> -> vector<128x64xf32>
    %106 = vector.shape_cast %102 : vector<1x128x64xbf16> to vector<128x64xbf16>
    %c2_54 = arith.constant 2 : index
    %c0_55 = arith.constant 0 : index
    %c0_56 = arith.constant 0 : index
    %107 = vector.load %arg14[%c2_54, %c0_55, %c0_56] : memref<3x64x64xbf16, #tpu.memory_space<vmem>>, vector<1x64x64xbf16>
    %108 = vector.shape_cast %107 : vector<1x64x64xbf16> to vector<64x64xbf16>
    %cst_57 = arith.constant dense<0.000000e+00> : vector<128x64xf32>
    %109 = tpu.matmul %106, %108, %cst_57 {dimension_numbers = #tpu.dot_dimension_numbers<[1], [0], [0], [1], [0, 0, 1, 1], [], []>} : vector<128x64xbf16>, vector<64x64xbf16>, vector<128x64xf32> -> vector<128x64xf32>
    %110 = arith.addf %105, %109 : vector<128x64xf32>
    %c0_58 = arith.constant 0 : index
    %c0_59 = arith.constant 0 : index
    %111 = vector.load %arg15[%c0_58, %c0_59] : memref<1x64xf32, #tpu.memory_space<vmem>>, vector<1x64xf32>
    %112 = vector.broadcast %111 : vector<1x64xf32> to vector<128x64xf32>
    %113 = arith.addf %110, %112 : vector<128x64xf32>
    %cst_60 = arith.constant 0.000000e+00 : f32
    %114 = vector.broadcast %cst_60 : f32 to vector<128x64xf32>
    %115 = arith.cmpf oge, %113, %114 : vector<128x64xf32>
    %cst_61 = arith.constant 2.000000e-01 : f32
    %116 = vector.broadcast %cst_61 : f32 to vector<128x64xf32>
    %117 = arith.mulf %116, %113 : vector<128x64xf32>
    %118 = arith.select %115, %113, %117 : vector<128x64xi1>, vector<128x64xf32>
    %119 = arith.truncf %118 : vector<128x64xf32> to vector<128x64xbf16>
    %120 = vector.shape_cast %119 : vector<128x64xbf16> to vector<1x128x64xbf16>
    %121 = vector.shape_cast %120 : vector<1x128x64xbf16> to vector<128x64xbf16>
    %c0_62 = arith.constant 0 : index
    %c0_63 = arith.constant 0 : index
    %122 = vector.load %arg16[%c0_62, %c0_63] : memref<64x128xbf16, #tpu.memory_space<vmem>>, vector<64x128xbf16>
    %cst_64 = arith.constant dense<0.000000e+00> : vector<128x128xf32>
    %123 = tpu.matmul %121, %122, %cst_64 {dimension_numbers = #tpu.dot_dimension_numbers<[1], [0], [0], [1], [0, 0, 1, 1], [], []>} : vector<128x64xbf16>, vector<64x128xbf16>, vector<128x128xf32> -> vector<128x128xf32>
    %c0_65 = arith.constant 0 : index
    %c0_66 = arith.constant 0 : index
    %124 = vector.load %arg17[%c0_65, %c0_66] : memref<1x128xf32, #tpu.memory_space<vmem>>, vector<1x128xf32>
    %125 = vector.broadcast %124 : vector<1x128xf32> to vector<128x128xf32>
    %126 = arith.addf %123, %125 : vector<128x128xf32>
    %cst_67 = arith.constant 0.000000e+00 : f32
    %127 = vector.broadcast %cst_67 : f32 to vector<128x128xf32>
    %128 = arith.cmpf oge, %126, %127 : vector<128x128xf32>
    %cst_68 = arith.constant 2.000000e-02 : f32
    %129 = vector.broadcast %cst_68 : f32 to vector<128x128xf32>
    %130 = arith.mulf %129, %126 : vector<128x128xf32>
    %131 = arith.select %128, %126, %130 : vector<128x128xi1>, vector<128x128xf32>
    %132 = arith.truncf %131 : vector<128x128xf32> to vector<128x128xbf16>
    %c0_69 = arith.constant 0 : index
    %c0_70 = arith.constant 0 : index
    %133 = vector.load %arg18[%c0_69, %c0_70] : memref<128x64xbf16, #tpu.memory_space<vmem>>, vector<128x64xbf16>
    %cst_71 = arith.constant dense<0.000000e+00> : vector<128x64xf32>
    %134 = tpu.matmul %132, %133, %cst_71 {dimension_numbers = #tpu.dot_dimension_numbers<[1], [0], [0], [1], [0, 0, 1, 1], [], []>} : vector<128x128xbf16>, vector<128x64xbf16>, vector<128x64xf32> -> vector<128x64xf32>
    %c0_72 = arith.constant 0 : index
    %c0_73 = arith.constant 0 : index
    %135 = vector.load %arg19[%c0_72, %c0_73] : memref<1x64xf32, #tpu.memory_space<vmem>>, vector<1x64xf32>
    %136 = vector.broadcast %135 : vector<1x64xf32> to vector<128x64xf32>
    %137 = arith.addf %134, %136 : vector<128x64xf32>
    %cst_74 = arith.constant 0.000000e+00 : f32
    %138 = vector.broadcast %cst_74 : f32 to vector<128x64xf32>
    %139 = arith.cmpf oge, %137, %138 : vector<128x64xf32>
    %cst_75 = arith.constant 2.000000e-02 : f32
    %140 = vector.broadcast %cst_75 : f32 to vector<128x64xf32>
    %141 = arith.mulf %140, %137 : vector<128x64xf32>
    %142 = arith.select %139, %137, %141 : vector<128x64xi1>, vector<128x64xf32>
    %143 = arith.truncf %142 : vector<128x64xf32> to vector<128x64xbf16>
    %c0_76 = arith.constant 0 : index
    %c0_77 = arith.constant 0 : index
    %144 = vector.load %arg20[%c0_76, %c0_77] : memref<64x32xbf16, #tpu.memory_space<vmem>>, vector<64x32xbf16>
    %cst_78 = arith.constant dense<0.000000e+00> : vector<128x32xf32>
    %145 = tpu.matmul %143, %144, %cst_78 {dimension_numbers = #tpu.dot_dimension_numbers<[1], [0], [0], [1], [0, 0, 1, 1], [], []>} : vector<128x64xbf16>, vector<64x32xbf16>, vector<128x32xf32> -> vector<128x32xf32>
    %c0_79 = arith.constant 0 : index
    %c0_80 = arith.constant 0 : index
    %146 = vector.load %arg21[%c0_79, %c0_80] : memref<1x32xf32, #tpu.memory_space<vmem>>, vector<1x32xf32>
    %147 = vector.broadcast %146 : vector<1x32xf32> to vector<128x32xf32>
    %148 = arith.addf %145, %147 : vector<128x32xf32>
    %149 = math.tanh %148 : vector<128x32xf32>
    %150 = tpu.transpose %149, [1, 0] : vector<128x32xf32> -> vector<32x128xf32>
    %c0_81 = arith.constant 0 : index
    %c0_82 = arith.constant 0 : index
    %151 = vector.load %arg4[%c0_81, %c0_82] : memref<1x128xf32, #tpu.memory_space<vmem>>, vector<1x128xf32>
    %c0_83 = arith.constant 0 : index
    %c0_84 = arith.constant 0 : index
    %152 = vector.load %arg5[%c0_83, %c0_84] : memref<1x128xf32, #tpu.memory_space<vmem>>, vector<1x128xf32>
    %c1_i32 = arith.constant 1 : i32
    %153 = tpu.dynamic_rotate %150 by %c1_i32 dim 1 : vector<32x128xf32>, i32 -> vector<32x128xf32>
    %154 = vector.broadcast %151 : vector<1x128xf32> to vector<32x128xf32>
    %155 = arith.mulf %153, %154 : vector<32x128xf32>
    %156 = arith.truncf %155 : vector<32x128xf32> to vector<32x128xbf16>
    %c127_i32 = arith.constant 127 : i32
    %157 = tpu.dynamic_rotate %150 by %c127_i32 dim 1 : vector<32x128xf32>, i32 -> vector<32x128xf32>
    %158 = vector.broadcast %152 : vector<1x128xf32> to vector<32x128xf32>
    %159 = arith.mulf %157, %158 : vector<32x128xf32>
    %160 = arith.truncf %159 : vector<32x128xf32> to vector<32x128xbf16>
    %161 = arith.truncf %150 : vector<32x128xf32> to vector<32x128xbf16>
    %c0_85 = arith.constant 0 : index
    %c0_86 = arith.constant 0 : index
    %c0_87 = arith.constant 0 : index
    %162 = vector.load %arg22[%c0_85, %c0_86, %c0_87] : memref<3x16x32xbf16, #tpu.memory_space<vmem>>, vector<1x16x32xbf16>
    %163 = vector.shape_cast %162 : vector<1x16x32xbf16> to vector<16x32xbf16>
    %cst_88 = arith.constant dense<0.000000e+00> : vector<16x128xf32>
    %164 = tpu.matmul %163, %156, %cst_88 {dimension_numbers = #tpu.dot_dimension_numbers<[1], [0], [0], [1], [0, 0, 1, 1], [], []>} : vector<16x32xbf16>, vector<32x128xbf16>, vector<16x128xf32> -> vector<16x128xf32>
    %c1_89 = arith.constant 1 : index
    %c0_90 = arith.constant 0 : index
    %c0_91 = arith.constant 0 : index
    %165 = vector.load %arg22[%c1_89, %c0_90, %c0_91] : memref<3x16x32xbf16, #tpu.memory_space<vmem>>, vector<1x16x32xbf16>
    %166 = vector.shape_cast %165 : vector<1x16x32xbf16> to vector<16x32xbf16>
    %cst_92 = arith.constant dense<0.000000e+00> : vector<16x128xf32>
    %167 = tpu.matmul %166, %161, %cst_92 {dimension_numbers = #tpu.dot_dimension_numbers<[1], [0], [0], [1], [0, 0, 1, 1], [], []>} : vector<16x32xbf16>, vector<32x128xbf16>, vector<16x128xf32> -> vector<16x128xf32>
    %168 = arith.addf %164, %167 : vector<16x128xf32>
    %c2_93 = arith.constant 2 : index
    %c0_94 = arith.constant 0 : index
    %c0_95 = arith.constant 0 : index
    %169 = vector.load %arg22[%c2_93, %c0_94, %c0_95] : memref<3x16x32xbf16, #tpu.memory_space<vmem>>, vector<1x16x32xbf16>
    %170 = vector.shape_cast %169 : vector<1x16x32xbf16> to vector<16x32xbf16>
    %cst_96 = arith.constant dense<0.000000e+00> : vector<16x128xf32>
    %171 = tpu.matmul %170, %160, %cst_96 {dimension_numbers = #tpu.dot_dimension_numbers<[1], [0], [0], [1], [0, 0, 1, 1], [], []>} : vector<16x32xbf16>, vector<32x128xbf16>, vector<16x128xf32> -> vector<16x128xf32>
    %172 = arith.addf %168, %171 : vector<16x128xf32>
    %c0_97 = arith.constant 0 : index
    %c0_98 = arith.constant 0 : index
    %173 = vector.load %arg23[%c0_97, %c0_98] : memref<16x1xf32, #tpu.memory_space<vmem>>, vector<16x1xf32>
    %174 = vector.broadcast %173 : vector<16x1xf32> to vector<16x128xf32>
    %175 = arith.addf %172, %174 : vector<16x128xf32>
    %cst_99 = arith.constant 0.000000e+00 : f32
    %176 = vector.broadcast %cst_99 : f32 to vector<16x128xf32>
    %177 = arith.cmpf oge, %175, %176 : vector<16x128xf32>
    %cst_100 = arith.constant 2.000000e-02 : f32
    %178 = vector.broadcast %cst_100 : f32 to vector<16x128xf32>
    %179 = arith.mulf %178, %175 : vector<16x128xf32>
    %180 = arith.select %177, %175, %179 : vector<16x128xi1>, vector<16x128xf32>
    %c1_i32_101 = arith.constant 1 : i32
    %181 = tpu.dynamic_rotate %180 by %c1_i32_101 dim 1 : vector<16x128xf32>, i32 -> vector<16x128xf32>
    %182 = vector.broadcast %151 : vector<1x128xf32> to vector<16x128xf32>
    %183 = arith.mulf %181, %182 : vector<16x128xf32>
    %184 = arith.truncf %183 : vector<16x128xf32> to vector<16x128xbf16>
    %c127_i32_102 = arith.constant 127 : i32
    %185 = tpu.dynamic_rotate %180 by %c127_i32_102 dim 1 : vector<16x128xf32>, i32 -> vector<16x128xf32>
    %186 = vector.broadcast %152 : vector<1x128xf32> to vector<16x128xf32>
    %187 = arith.mulf %185, %186 : vector<16x128xf32>
    %188 = arith.truncf %187 : vector<16x128xf32> to vector<16x128xbf16>
    %189 = arith.truncf %180 : vector<16x128xf32> to vector<16x128xbf16>
    %c0_103 = arith.constant 0 : index
    %c0_104 = arith.constant 0 : index
    %c0_105 = arith.constant 0 : index
    %190 = vector.load %arg24[%c0_103, %c0_104, %c0_105] : memref<3x8x16xbf16, #tpu.memory_space<vmem>>, vector<1x8x16xbf16>
    %191 = vector.shape_cast %190 : vector<1x8x16xbf16> to vector<8x16xbf16>
    %cst_106 = arith.constant dense<0.000000e+00> : vector<8x128xf32>
    %192 = tpu.matmul %191, %184, %cst_106 {dimension_numbers = #tpu.dot_dimension_numbers<[1], [0], [0], [1], [0, 0, 1, 1], [], []>} : vector<8x16xbf16>, vector<16x128xbf16>, vector<8x128xf32> -> vector<8x128xf32>
    %c1_107 = arith.constant 1 : index
    %c0_108 = arith.constant 0 : index
    %c0_109 = arith.constant 0 : index
    %193 = vector.load %arg24[%c1_107, %c0_108, %c0_109] : memref<3x8x16xbf16, #tpu.memory_space<vmem>>, vector<1x8x16xbf16>
    %194 = vector.shape_cast %193 : vector<1x8x16xbf16> to vector<8x16xbf16>
    %cst_110 = arith.constant dense<0.000000e+00> : vector<8x128xf32>
    %195 = tpu.matmul %194, %189, %cst_110 {dimension_numbers = #tpu.dot_dimension_numbers<[1], [0], [0], [1], [0, 0, 1, 1], [], []>} : vector<8x16xbf16>, vector<16x128xbf16>, vector<8x128xf32> -> vector<8x128xf32>
    %196 = arith.addf %192, %195 : vector<8x128xf32>
    %c2_111 = arith.constant 2 : index
    %c0_112 = arith.constant 0 : index
    %c0_113 = arith.constant 0 : index
    %197 = vector.load %arg24[%c2_111, %c0_112, %c0_113] : memref<3x8x16xbf16, #tpu.memory_space<vmem>>, vector<1x8x16xbf16>
    %198 = vector.shape_cast %197 : vector<1x8x16xbf16> to vector<8x16xbf16>
    %cst_114 = arith.constant dense<0.000000e+00> : vector<8x128xf32>
    %199 = tpu.matmul %198, %188, %cst_114 {dimension_numbers = #tpu.dot_dimension_numbers<[1], [0], [0], [1], [0, 0, 1, 1], [], []>} : vector<8x16xbf16>, vector<16x128xbf16>, vector<8x128xf32> -> vector<8x128xf32>
    %200 = arith.addf %196, %199 : vector<8x128xf32>
    %c0_115 = arith.constant 0 : index
    %c0_116 = arith.constant 0 : index
    %201 = vector.load %arg25[%c0_115, %c0_116] : memref<8x1xf32, #tpu.memory_space<vmem>>, vector<8x1xf32>
    %202 = vector.broadcast %201 : vector<8x1xf32> to vector<8x128xf32>
    %203 = arith.addf %200, %202 : vector<8x128xf32>
    %cst_117 = arith.constant 0.000000e+00 : f32
    %204 = vector.broadcast %cst_117 : f32 to vector<8x128xf32>
    %205 = arith.cmpf oge, %203, %204 : vector<8x128xf32>
    %cst_118 = arith.constant 2.000000e-02 : f32
    %206 = vector.broadcast %cst_118 : f32 to vector<8x128xf32>
    %207 = arith.mulf %206, %203 : vector<8x128xf32>
    %208 = arith.select %205, %203, %207 : vector<8x128xi1>, vector<8x128xf32>
    %c1_i32_119 = arith.constant 1 : i32
    %209 = tpu.dynamic_rotate %208 by %c1_i32_119 dim 1 : vector<8x128xf32>, i32 -> vector<8x128xf32>
    %210 = vector.broadcast %151 : vector<1x128xf32> to vector<8x128xf32>
    %211 = arith.mulf %209, %210 : vector<8x128xf32>
    %212 = arith.truncf %211 : vector<8x128xf32> to vector<8x128xbf16>
    %c127_i32_120 = arith.constant 127 : i32
    %213 = tpu.dynamic_rotate %208 by %c127_i32_120 dim 1 : vector<8x128xf32>, i32 -> vector<8x128xf32>
    %214 = vector.broadcast %152 : vector<1x128xf32> to vector<8x128xf32>
    %215 = arith.mulf %213, %214 : vector<8x128xf32>
    %216 = arith.truncf %215 : vector<8x128xf32> to vector<8x128xbf16>
    %217 = arith.truncf %208 : vector<8x128xf32> to vector<8x128xbf16>
    %c0_121 = arith.constant 0 : index
    %c0_122 = arith.constant 0 : index
    %c0_123 = arith.constant 0 : index
    %218 = vector.load %arg26[%c0_121, %c0_122, %c0_123] : memref<3x4x8xbf16, #tpu.memory_space<vmem>>, vector<1x4x8xbf16>
    %219 = vector.shape_cast %218 : vector<1x4x8xbf16> to vector<4x8xbf16>
    %cst_124 = arith.constant dense<0.000000e+00> : vector<4x128xf32>
    %220 = tpu.matmul %219, %212, %cst_124 {dimension_numbers = #tpu.dot_dimension_numbers<[1], [0], [0], [1], [0, 0, 1, 1], [], []>} : vector<4x8xbf16>, vector<8x128xbf16>, vector<4x128xf32> -> vector<4x128xf32>
    %c1_125 = arith.constant 1 : index
    %c0_126 = arith.constant 0 : index
    %c0_127 = arith.constant 0 : index
    %221 = vector.load %arg26[%c1_125, %c0_126, %c0_127] : memref<3x4x8xbf16, #tpu.memory_space<vmem>>, vector<1x4x8xbf16>
    %222 = vector.shape_cast %221 : vector<1x4x8xbf16> to vector<4x8xbf16>
    %cst_128 = arith.constant dense<0.000000e+00> : vector<4x128xf32>
    %223 = tpu.matmul %222, %217, %cst_128 {dimension_numbers = #tpu.dot_dimension_numbers<[1], [0], [0], [1], [0, 0, 1, 1], [], []>} : vector<4x8xbf16>, vector<8x128xbf16>, vector<4x128xf32> -> vector<4x128xf32>
    %224 = arith.addf %220, %223 : vector<4x128xf32>
    %c2_129 = arith.constant 2 : index
    %c0_130 = arith.constant 0 : index
    %c0_131 = arith.constant 0 : index
    %225 = vector.load %arg26[%c2_129, %c0_130, %c0_131] : memref<3x4x8xbf16, #tpu.memory_space<vmem>>, vector<1x4x8xbf16>
    %226 = vector.shape_cast %225 : vector<1x4x8xbf16> to vector<4x8xbf16>
    %cst_132 = arith.constant dense<0.000000e+00> : vector<4x128xf32>
    %227 = tpu.matmul %226, %216, %cst_132 {dimension_numbers = #tpu.dot_dimension_numbers<[1], [0], [0], [1], [0, 0, 1, 1], [], []>} : vector<4x8xbf16>, vector<8x128xbf16>, vector<4x128xf32> -> vector<4x128xf32>
    %228 = arith.addf %224, %227 : vector<4x128xf32>
    %c0_133 = arith.constant 0 : index
    %c0_134 = arith.constant 0 : index
    %229 = vector.load %arg27[%c0_133, %c0_134] : memref<4x1xf32, #tpu.memory_space<vmem>>, vector<4x1xf32>
    %230 = vector.broadcast %229 : vector<4x1xf32> to vector<4x128xf32>
    %231 = arith.addf %228, %230 : vector<4x128xf32>
    %cst_135 = arith.constant 0.000000e+00 : f32
    %232 = vector.broadcast %cst_135 : f32 to vector<4x128xf32>
    %233 = arith.cmpf oge, %231, %232 : vector<4x128xf32>
    %cst_136 = arith.constant 2.000000e-02 : f32
    %234 = vector.broadcast %cst_136 : f32 to vector<4x128xf32>
    %235 = arith.mulf %234, %231 : vector<4x128xf32>
    %236 = arith.select %233, %231, %235 : vector<4x128xi1>, vector<4x128xf32>
    %c1_i32_137 = arith.constant 1 : i32
    %237 = tpu.dynamic_rotate %236 by %c1_i32_137 dim 1 : vector<4x128xf32>, i32 -> vector<4x128xf32>
    %238 = vector.broadcast %151 : vector<1x128xf32> to vector<4x128xf32>
    %239 = arith.mulf %237, %238 : vector<4x128xf32>
    %240 = arith.truncf %239 : vector<4x128xf32> to vector<4x128xbf16>
    %c127_i32_138 = arith.constant 127 : i32
    %241 = tpu.dynamic_rotate %236 by %c127_i32_138 dim 1 : vector<4x128xf32>, i32 -> vector<4x128xf32>
    %242 = vector.broadcast %152 : vector<1x128xf32> to vector<4x128xf32>
    %243 = arith.mulf %241, %242 : vector<4x128xf32>
    %244 = arith.truncf %243 : vector<4x128xf32> to vector<4x128xbf16>
    %245 = arith.truncf %236 : vector<4x128xf32> to vector<4x128xbf16>
    %c0_139 = arith.constant 0 : index
    %c0_140 = arith.constant 0 : index
    %c0_141 = arith.constant 0 : index
    %246 = vector.load %arg28[%c0_139, %c0_140, %c0_141] : memref<3x2x4xbf16, #tpu.memory_space<vmem>>, vector<1x2x4xbf16>
    %247 = vector.shape_cast %246 : vector<1x2x4xbf16> to vector<2x4xbf16>
    %cst_142 = arith.constant dense<0.000000e+00> : vector<2x128xf32>
    %248 = tpu.matmul %247, %240, %cst_142 {dimension_numbers = #tpu.dot_dimension_numbers<[1], [0], [0], [1], [0, 0, 1, 1], [], []>} : vector<2x4xbf16>, vector<4x128xbf16>, vector<2x128xf32> -> vector<2x128xf32>
    %c1_143 = arith.constant 1 : index
    %c0_144 = arith.constant 0 : index
    %c0_145 = arith.constant 0 : index
    %249 = vector.load %arg28[%c1_143, %c0_144, %c0_145] : memref<3x2x4xbf16, #tpu.memory_space<vmem>>, vector<1x2x4xbf16>
    %250 = vector.shape_cast %249 : vector<1x2x4xbf16> to vector<2x4xbf16>
    %cst_146 = arith.constant dense<0.000000e+00> : vector<2x128xf32>
    %251 = tpu.matmul %250, %245, %cst_146 {dimension_numbers = #tpu.dot_dimension_numbers<[1], [0], [0], [1], [0, 0, 1, 1], [], []>} : vector<2x4xbf16>, vector<4x128xbf16>, vector<2x128xf32> -> vector<2x128xf32>
    %252 = arith.addf %248, %251 : vector<2x128xf32>
    %c2_147 = arith.constant 2 : index
    %c0_148 = arith.constant 0 : index
    %c0_149 = arith.constant 0 : index
    %253 = vector.load %arg28[%c2_147, %c0_148, %c0_149] : memref<3x2x4xbf16, #tpu.memory_space<vmem>>, vector<1x2x4xbf16>
    %254 = vector.shape_cast %253 : vector<1x2x4xbf16> to vector<2x4xbf16>
    %cst_150 = arith.constant dense<0.000000e+00> : vector<2x128xf32>
    %255 = tpu.matmul %254, %244, %cst_150 {dimension_numbers = #tpu.dot_dimension_numbers<[1], [0], [0], [1], [0, 0, 1, 1], [], []>} : vector<2x4xbf16>, vector<4x128xbf16>, vector<2x128xf32> -> vector<2x128xf32>
    %256 = arith.addf %252, %255 : vector<2x128xf32>
    %c0_151 = arith.constant 0 : index
    %c0_152 = arith.constant 0 : index
    %257 = vector.load %arg29[%c0_151, %c0_152] : memref<2x1xf32, #tpu.memory_space<vmem>>, vector<2x1xf32>
    %258 = vector.broadcast %257 : vector<2x1xf32> to vector<2x128xf32>
    %259 = arith.addf %256, %258 : vector<2x128xf32>
    %cst_153 = arith.constant 0.000000e+00 : f32
    %260 = vector.broadcast %cst_153 : f32 to vector<2x128xf32>
    %261 = arith.cmpf oge, %259, %260 : vector<2x128xf32>
    %cst_154 = arith.constant 2.000000e-02 : f32
    %262 = vector.broadcast %cst_154 : f32 to vector<2x128xf32>
    %263 = arith.mulf %262, %259 : vector<2x128xf32>
    %264 = arith.select %261, %259, %263 : vector<2x128xi1>, vector<2x128xf32>
    %c1_i32_155 = arith.constant 1 : i32
    %265 = tpu.dynamic_rotate %264 by %c1_i32_155 dim 1 : vector<2x128xf32>, i32 -> vector<2x128xf32>
    %266 = vector.broadcast %151 : vector<1x128xf32> to vector<2x128xf32>
    %267 = arith.mulf %265, %266 : vector<2x128xf32>
    %268 = arith.truncf %267 : vector<2x128xf32> to vector<2x128xbf16>
    %c127_i32_156 = arith.constant 127 : i32
    %269 = tpu.dynamic_rotate %264 by %c127_i32_156 dim 1 : vector<2x128xf32>, i32 -> vector<2x128xf32>
    %270 = vector.broadcast %152 : vector<1x128xf32> to vector<2x128xf32>
    %271 = arith.mulf %269, %270 : vector<2x128xf32>
    %272 = arith.truncf %271 : vector<2x128xf32> to vector<2x128xbf16>
    %273 = arith.truncf %264 : vector<2x128xf32> to vector<2x128xbf16>
    %c0_157 = arith.constant 0 : index
    %c0_158 = arith.constant 0 : index
    %c0_159 = arith.constant 0 : index
    %274 = vector.load %arg30[%c0_157, %c0_158, %c0_159] : memref<3x1x2xbf16, #tpu.memory_space<vmem>>, vector<1x1x2xbf16>
    %275 = vector.shape_cast %274 : vector<1x1x2xbf16> to vector<1x2xbf16>
    %cst_160 = arith.constant dense<0.000000e+00> : vector<1x128xf32>
    %276 = tpu.matmul %275, %268, %cst_160 {dimension_numbers = #tpu.dot_dimension_numbers<[1], [0], [0], [1], [0, 0, 1, 1], [], []>} : vector<1x2xbf16>, vector<2x128xbf16>, vector<1x128xf32> -> vector<1x128xf32>
    %c1_161 = arith.constant 1 : index
    %c0_162 = arith.constant 0 : index
    %c0_163 = arith.constant 0 : index
    %277 = vector.load %arg30[%c1_161, %c0_162, %c0_163] : memref<3x1x2xbf16, #tpu.memory_space<vmem>>, vector<1x1x2xbf16>
    %278 = vector.shape_cast %277 : vector<1x1x2xbf16> to vector<1x2xbf16>
    %cst_164 = arith.constant dense<0.000000e+00> : vector<1x128xf32>
    %279 = tpu.matmul %278, %273, %cst_164 {dimension_numbers = #tpu.dot_dimension_numbers<[1], [0], [0], [1], [0, 0, 1, 1], [], []>} : vector<1x2xbf16>, vector<2x128xbf16>, vector<1x128xf32> -> vector<1x128xf32>
    %280 = arith.addf %276, %279 : vector<1x128xf32>
    %c2_165 = arith.constant 2 : index
    %c0_166 = arith.constant 0 : index
    %c0_167 = arith.constant 0 : index
    %281 = vector.load %arg30[%c2_165, %c0_166, %c0_167] : memref<3x1x2xbf16, #tpu.memory_space<vmem>>, vector<1x1x2xbf16>
    %282 = vector.shape_cast %281 : vector<1x1x2xbf16> to vector<1x2xbf16>
    %cst_168 = arith.constant dense<0.000000e+00> : vector<1x128xf32>
    %283 = tpu.matmul %282, %272, %cst_168 {dimension_numbers = #tpu.dot_dimension_numbers<[1], [0], [0], [1], [0, 0, 1, 1], [], []>} : vector<1x2xbf16>, vector<2x128xbf16>, vector<1x128xf32> -> vector<1x128xf32>
    %284 = arith.addf %280, %283 : vector<1x128xf32>
    %c0_169 = arith.constant 0 : index
    %c0_170 = arith.constant 0 : index
    %285 = vector.load %arg31[%c0_169, %c0_170] : memref<1x1xf32, #tpu.memory_space<vmem>>, vector<1x1xf32>
    %286 = vector.broadcast %285 : vector<1x1xf32> to vector<1x128xf32>
    %287 = arith.addf %284, %286 : vector<1x128xf32>
    %cst_171 = arith.constant 0.000000e+00 : f32
    %288 = vector.broadcast %cst_171 : f32 to vector<1x128xf32>
    %289 = arith.cmpf oge, %287, %288 : vector<1x128xf32>
    %cst_172 = arith.constant 2.000000e-02 : f32
    %290 = vector.broadcast %cst_172 : f32 to vector<1x128xf32>
    %291 = arith.mulf %290, %287 : vector<1x128xf32>
    %292 = arith.select %289, %287, %291 : vector<1x128xi1>, vector<1x128xf32>
    %c0_173 = arith.constant 0 : index
    %c0_174 = arith.constant 0 : index
    %293 = vector.load %arg6[%c0_173, %c0_174] : memref<128x128xf32, #tpu.memory_space<vmem>>, vector<128x128xf32>
    %cst_175 = arith.constant dense<0.000000e+00> : vector<1x128xf32>
    %294 = tpu.matmul %292, %293, %cst_175 {dimension_numbers = #tpu.dot_dimension_numbers<[1], [0], [0], [1], [0, 0, 1, 1], [], []>} : vector<1x128xf32>, vector<128x128xf32>, vector<1x128xf32> -> vector<1x128xf32>
    %c0_176 = arith.constant 0 : index
    %c0_177 = arith.constant 0 : index
    %295 = vector.load %arg7[%c0_176, %c0_177] : memref<1x128xf32, #tpu.memory_space<vmem>>, vector<1x128xf32>
    %296 = arith.addf %294, %295 : vector<1x128xf32>
    %cst_178 = arith.constant dense<0xFF800000> : vector<1xf32>
    %297 = vector.multi_reduction <maximumf>, %296, %cst_178 [1] : vector<1x128xf32> to vector<1xf32>
    %298 = vector.shape_cast %297 : vector<1xf32> to vector<1x1xf32>
    %299 = vector.broadcast %298 : vector<1x1xf32> to vector<1x128xf32>
    %300 = arith.subf %296, %299 : vector<1x128xf32>
    %301 = math.exp %300 : vector<1x128xf32>
    %c0_179 = arith.constant 0 : index
    %c0_180 = arith.constant 0 : index
    %302 = vector.load %arg3[%c0_179, %c0_180] : memref<16x128xf32, #tpu.memory_space<vmem>>, vector<16x128xf32>
    %303 = vector.broadcast %301 : vector<1x128xf32> to vector<16x128xf32>
    %304 = arith.mulf %302, %303 : vector<16x128xf32>
    %cst_181 = arith.constant dense<0.000000e+00> : vector<16xf32>
    %305 = vector.multi_reduction <add>, %304, %cst_181 [1] : vector<16x128xf32> to vector<16xf32>
    %306 = vector.shape_cast %305 : vector<16xf32> to vector<16x1xf32>
    %cst_182 = arith.constant dense<0.000000e+00> : vector<16x32xf32>
    %307 = tpu.matmul %304, %149, %cst_182 {dimension_numbers = #tpu.dot_dimension_numbers<[1], [0], [0], [1], [0, 0, 1, 1], [], []>} : vector<16x128xf32>, vector<128x32xf32>, vector<16x32xf32> -> vector<16x32xf32>
    %308 = tpu.reciprocal %306 {approx = true} : vector<16x1xf32> -> vector<16x1xf32>
    %309 = vector.broadcast %308 : vector<16x1xf32> to vector<16x32xf32>
    %310 = arith.mulf %307, %309 : vector<16x32xf32>
    %311 = vector.shape_cast %310 : vector<16x32xf32> to vector<16x1x32xf32>
    %c0_183 = arith.constant 0 : index
    %c0_184 = arith.constant 0 : index
    %c0_185 = arith.constant 0 : index
    %312 = vector.load %arg2[%c0_183, %c0_184, %c0_185] : memref<16x32x128xf32, #tpu.memory_space<vmem>>, vector<16x32x128xf32>
    "tpu.trace_start"() <{level = 10 : i32, message = "bxc,bce->bxe"}> : () -> ()
    %cst_186 = arith.constant dense<0.000000e+00> : vector<16x1x128xf32>
    %313 = tpu.matmul %311, %312, %cst_186 {dimension_numbers = #tpu.dot_dimension_numbers<[2], [1], [1], [2], [0, 0, 0, 1, 1, 2], [0], [0]>} : vector<16x1x32xf32>, vector<16x32x128xf32>, vector<16x1x128xf32> -> vector<16x1x128xf32>
    "tpu.trace_stop"() : () -> ()
    %cst_187 = arith.constant 1.000000e+01 : f32
    %314 = vector.broadcast %cst_187 : f32 to vector<16x1x128xf32>
    %315 = arith.mulf %314, %313 : vector<16x1x128xf32>
    %316 = vector.shape_cast %315 : vector<16x1x128xf32> to vector<16x128xf32>
    %c0_188 = arith.constant 0 : index
    %c0_189 = arith.constant 0 : index
    %317 = vector.load %arg32[%c0_188, %c0_189] : memref<16x128xf32, #tpu.memory_space<vmem>>, vector<16x128xf32>
    tpu.vector_store %arg32[%c0_188, %c0_189], %316 {strides = array<i32>} : memref<16x128xf32, #tpu.memory_space<vmem>>, vector<16x128xf32>,
    return
  }
  func.func @transform_0(%arg0: i32) -> (i32, i32, i32) {
    %c0_i32 = arith.constant 0 : i32
    %c0_i32_0 = arith.constant 0 : i32
    %c0_i32_1 = arith.constant 0 : i32
    return %c0_i32, %arg0, %c0_i32_0 : i32, i32, i32
  }
  func.func @transform_1(%arg0: i32) -> (i32, i32, i32) {
    %c0_i32 = arith.constant 0 : i32
    %c0_i32_0 = arith.constant 0 : i32
    %c0_i32_1 = arith.constant 0 : i32
    return %arg0, %c0_i32, %c0_i32_0 : i32, i32, i32
  }
  func.func @transform_2(%arg0: i32) -> (i32, i32) {
    %c0_i32 = arith.constant 0 : i32
    %c0_i32_0 = arith.constant 0 : i32
    %c0_i32_1 = arith.constant 0 : i32
    return %c0_i32, %c0_i32_0 : i32, i32
  }
  func.func @transform_3(%arg0: i32) -> (i32, i32) {
    %c0_i32 = arith.constant 0 : i32
    %c0_i32_0 = arith.constant 0 : i32
    %c0_i32_1 = arith.constant 0 : i32
    return %c0_i32, %c0_i32_0 : i32, i32
  }
  func.func @transform_4(%arg0: i32) -> (i32, i32) {
    %c0_i32 = arith.constant 0 : i32
    %c0_i32_0 = arith.constant 0 : i32
    %c0_i32_1 = arith.constant 0 : i32
    return %c0_i32, %c0_i32_0 : i32, i32
  }
  func.func @transform_5(%arg0: i32) -> (i32, i32) {
    %c0_i32 = arith.constant 0 : i32
    %c0_i32_0 = arith.constant 0 : i32
    %c0_i32_1 = arith.constant 0 : i32
    return %c0_i32, %c0_i32_0 : i32, i32
  }
  func.func @transform_6(%arg0: i32) -> (i32, i32) {
    %c0_i32 = arith.constant 0 : i32
    %c0_i32_0 = arith.constant 0 : i32
    %c0_i32_1 = arith.constant 0 : i32
    return %c0_i32, %c0_i32_0 : i32, i32
  }
  func.func @transform_7(%arg0: i32) -> (i32, i32, i32) {
    %c0_i32 = arith.constant 0 : i32
    %c0_i32_0 = arith.constant 0 : i32
    %c0_i32_1 = arith.constant 0 : i32
    %c0_i32_2 = arith.constant 0 : i32
    return %c0_i32, %c0_i32_0, %c0_i32_1 : i32, i32, i32
  }
  func.func @transform_8(%arg0: i32) -> (i32, i32) {
    %c0_i32 = arith.constant 0 : i32
    %c0_i32_0 = arith.constant 0 : i32
    %c0_i32_1 = arith.constant 0 : i32
    return %c0_i32, %c0_i32_0 : i32, i32
  }
  func.func @transform_9(%arg0: i32) -> (i32, i32, i32) {
    %c0_i32 = arith.constant 0 : i32
    %c0_i32_0 = arith.constant 0 : i32
    %c0_i32_1 = arith.constant 0 : i32
    %c0_i32_2 = arith.constant 0 : i32
    return %c0_i32, %c0_i32_0, %c0_i32_1 : i32, i32, i32
  }
  func.func @transform_10(%arg0: i32) -> (i32, i32) {
    %c0_i32 = arith.constant 0 : i32
    %c0_i32_0 = arith.constant 0 : i32
    %c0_i32_1 = arith.constant 0 : i32
    return %c0_i32, %c0_i32_0 : i32, i32
  }
  func.func @transform_11(%arg0: i32) -> (i32, i32, i32) {
    %c0_i32 = arith.constant 0 : i32
    %c0_i32_0 = arith.constant 0 : i32
    %c0_i32_1 = arith.constant 0 : i32
    %c0_i32_2 = arith.constant 0 : i32
    return %c0_i32, %c0_i32_0, %c0_i32_1 : i32, i32, i32
  }
  func.func @transform_12(%arg0: i32) -> (i32, i32) {
    %c0_i32 = arith.constant 0 : i32
    %c0_i32_0 = arith.constant 0 : i32
    %c0_i32_1 = arith.constant 0 : i32
    return %c0_i32, %c0_i32_0 : i32, i32
  }
  func.func @transform_13(%arg0: i32) -> (i32, i32, i32) {
    %c0_i32 = arith.constant 0 : i32
    %c0_i32_0 = arith.constant 0 : i32
    %c0_i32_1 = arith.constant 0 : i32
    %c0_i32_2 = arith.constant 0 : i32
    return %c0_i32, %c0_i32_0, %c0_i32_1 : i32, i32, i32
  }
  func.func @transform_14(%arg0: i32) -> (i32, i32) {
    %c0_i32 = arith.constant 0 : i32
    %c0_i32_0 = arith.constant 0 : i32
    %c0_i32_1 = arith.constant 0 : i32
    return %c0_i32, %c0_i32_0 : i32, i32
  }
  func.func @transform_15(%arg0: i32) -> (i32, i32) {
    %c0_i32 = arith.constant 0 : i32
    %c0_i32_0 = arith.constant 0 : i32
    %c0_i32_1 = arith.constant 0 : i32
    return %c0_i32, %c0_i32_0 : i32, i32
  }
  func.func @transform_16(%arg0: i32) -> (i32, i32) {
    %c0_i32 = arith.constant 0 : i32
    %c0_i32_0 = arith.constant 0 : i32
    %c0_i32_1 = arith.constant 0 : i32
    return %c0_i32, %c0_i32_0 : i32, i32
  }
  func.func @transform_17(%arg0: i32) -> (i32, i32) {
    %c0_i32 = arith.constant 0 : i32
    %c0_i32_0 = arith.constant 0 : i32
    %c0_i32_1 = arith.constant 0 : i32
    return %c0_i32, %c0_i32_0 : i32, i32
  }
  func.func @transform_18(%arg0: i32) -> (i32, i32) {
    %c0_i32 = arith.constant 0 : i32
    %c0_i32_0 = arith.constant 0 : i32
    %c0_i32_1 = arith.constant 0 : i32
    return %c0_i32, %c0_i32_0 : i32, i32
  }
  func.func @transform_19(%arg0: i32) -> (i32, i32) {
    %c0_i32 = arith.constant 0 : i32
    %c0_i32_0 = arith.constant 0 : i32
    %c0_i32_1 = arith.constant 0 : i32
    return %c0_i32, %c0_i32_0 : i32, i32
  }
  func.func @transform_20(%arg0: i32) -> (i32, i32) {
    %c0_i32 = arith.constant 0 : i32
    %c0_i32_0 = arith.constant 0 : i32
    %c0_i32_1 = arith.constant 0 : i32
    return %c0_i32, %c0_i32_0 : i32, i32
  }
  func.func @transform_21(%arg0: i32) -> (i32, i32, i32) {
    %c0_i32 = arith.constant 0 : i32
    %c0_i32_0 = arith.constant 0 : i32
    %c0_i32_1 = arith.constant 0 : i32
    %c0_i32_2 = arith.constant 0 : i32
    return %c0_i32, %c0_i32_0, %c0_i32_1 : i32, i32, i32
  }
  func.func @transform_22(%arg0: i32) -> (i32, i32) {
    %c0_i32 = arith.constant 0 : i32
    %c0_i32_0 = arith.constant 0 : i32
    %c0_i32_1 = arith.constant 0 : i32
    return %c0_i32, %c0_i32_0 : i32, i32
  }
  func.func @transform_23(%arg0: i32) -> (i32, i32, i32) {
    %c0_i32 = arith.constant 0 : i32
    %c0_i32_0 = arith.constant 0 : i32
    %c0_i32_1 = arith.constant 0 : i32
    %c0_i32_2 = arith.constant 0 : i32
    return %c0_i32, %c0_i32_0, %c0_i32_1 : i32, i32, i32
  }
  func.func @transform_24(%arg0: i32) -> (i32, i32) {
    %c0_i32 = arith.constant 0 : i32
    %c0_i32_0 = arith.constant 0 : i32
    %c0_i32_1 = arith.constant 0 : i32
    return %c0_i32, %c0_i32_0 : i32, i32
  }
  func.func @transform_25(%arg0: i32) -> (i32, i32, i32) {
    %c0_i32 = arith.constant 0 : i32
    %c0_i32_0 = arith.constant 0 : i32
    %c0_i32_1 = arith.constant 0 : i32
    %c0_i32_2 = arith.constant 0 : i32
    return %c0_i32, %c0_i32_0, %c0_i32_1 : i32, i32, i32
  }
  func.func @transform_26(%arg0: i32) -> (i32, i32) {
    %c0_i32 = arith.constant 0 : i32
    %c0_i32_0 = arith.constant 0 : i32
    %c0_i32_1 = arith.constant 0 : i32
    return %c0_i32, %c0_i32_0 : i32, i32
  }
  func.func @transform_27(%arg0: i32) -> (i32, i32, i32) {
    %c0_i32 = arith.constant 0 : i32
    %c0_i32_0 = arith.constant 0 : i32
    %c0_i32_1 = arith.constant 0 : i32
    %c0_i32_2 = arith.constant 0 : i32
    return %c0_i32, %c0_i32_0, %c0_i32_1 : i32, i32, i32
  }
  func.func @transform_28(%arg0: i32) -> (i32, i32) {
    %c0_i32 = arith.constant 0 : i32
    %c0_i32_0 = arith.constant 0 : i32
    %c0_i32_1 = arith.constant 0 : i32
    return %c0_i32, %c0_i32_0 : i32, i32
  }
  func.func @transform_29(%arg0: i32) -> (i32, i32, i32) {
    %c0_i32 = arith.constant 0 : i32
    %c0_i32_0 = arith.constant 0 : i32
    %c0_i32_1 = arith.constant 0 : i32
    %c0_i32_2 = arith.constant 0 : i32
    return %c0_i32, %c0_i32_0, %c0_i32_1 : i32, i32, i32
  }
  func.func @transform_30(%arg0: i32) -> (i32, i32) {
    %c0_i32 = arith.constant 0 : i32
    %c0_i32_0 = arith.constant 0 : i32
    %c0_i32_1 = arith.constant 0 : i32
    return %c0_i32, %c0_i32_0 : i32, i32
  }
  func.func @transform_31(%arg0: i32) -> (i32, i32) {
    %c0_i32 = arith.constant 0 : i32
    %c0_i32_0 = arith.constant 0 : i32
    return %arg0, %c0_i32 : i32, i32
  }
}

</mosaic_0001>

<bundles_post_ra>
// kernel: tpu_custom_call.1
= control target key start
LH: loop header
LB: loop body
LE: loop exit
PB: predicated region body
PF: predicated region fallthrough
CT: control target
= control target key end

     0   :  { %s15205_s6 = smov 1   ;;  %s15206_s10 = smov 2   ;;  %s18109_s0 = inlined_call_operand.smem [shape: u32[32], index: -1, kind: input, shape index: {}] }
   0x1   :  { %s15254_s5 = sld [smem:[%s18109_s0]]   ;;  %s15207_s14 = smov 3  }
   0x2   :  { %s15259_s9 = sld [smem:[%s18109_s0 + %s15205_s6]]   ;;  %s15208_s18 = smov 4  }
   0x3   :  { %s15264_s13 = sld [smem:[%s18109_s0 + %s15206_s10]]   ;;  %s15209_s22 = smov 5  }
   0x4   :  { %s15269_s17 = sld [smem:[%s18109_s0 + %s15207_s14]]   ;;  %s15210_s26 = smov 6  }
   0x5   :  { %s15274_s21 = sld [smem:[%s18109_s0 + %s15208_s18]]   ;;  %s15211_s30 = smov 7  }
   0x6   :  { %s15279_s25 = sld [smem:[%s18109_s0 + %s15209_s22]]   ;;  %s15212_s4 = smov 8  }
   0x7   :  { %18180 = sst [smem:[#allocation7_spill]] %s15254_s5  ;;  %s15213_s10 = smov 9  }
   0x8   :  { %18181 = sst [smem:[#allocation8_spill]] %s15259_s9  ;;  %s15214_s15 = smov 10  }
   0x9   :  { %18182 = sst [smem:[#allocation9_spill]] %s15264_s13  ;;  %s15215_s20 = smov 11  }
   0xa   :  { %18183 = sst [smem:[#allocation10_spill]] %s15269_s17  ;;  %s15217_s1 = smov 13  }
   0xb   :  { %18184 = sst [smem:[#allocation11_spill]] %s15274_s21  ;;  %s15218_s7 = smov 14  }
   0xc   :  { %18185 = sst [smem:[#allocation12_spill]] %s15279_s25  ;;  %s15220_s22 = smov 16  }
   0xd   :  { %s15284_s29 = sld [smem:[%s18109_s0 + %s15210_s26]]   ;;  %s15216_s26 = smov 12  }
   0xe   :  { %s15289_s3 = sld [smem:[%s18109_s0 + %s15211_s30]]   ;;  %s15221_s28 = smov 17  }
   0xf   :  { %s15294_s8 = sld [smem:[%s18109_s0 + %s15212_s4]]   ;;  %s15235_s16 = smov 31  }
  0x10   :  { %s15299_s14 = sld [smem:[%s18109_s0 + %s15213_s10]]  }
  0x11   :  { %s15304_s19 = sld [smem:[%s18109_s0 + %s15214_s15]]   ;;  %s15219_s15 = smov 15  }
  0x12   :  { %s15309_s24 = sld [smem:[%s18109_s0 + %s15215_s20]]  }
  0x13   :  { %18186 = sst [smem:[#allocation13_spill]] %s15284_s29 }
  0x14   :  { %18187 = sst [smem:[#allocation14_spill]] %s15289_s3 }
  0x15   :  { %18188 = sst [smem:[#allocation15_spill]] %s15294_s8 }
  0x16   :  { %s15314_s30 = sld [smem:[%s18109_s0 + %s15216_s26]]  }
  0x17   :  { %s15319_s6 = sld [smem:[%s18109_s0 + %s15217_s1]]  }
  0x18   :  { %s15324_s12 = sld [smem:[%s18109_s0 + %s15218_s7]]   ;;  %s15222_s7 = smov 18  }
  0x19   :  { %s15329_s20 = sld [smem:[%s18109_s0 + %s15219_s15]]   ;;  %s15223_s15 = smov 19  }
  0x1a   :  { %s15334_s27 = sld [smem:[%s18109_s0 + %s15220_s22]]   ;;  %s15224_s22 = smov 20  }
  0x1b   :  { %s15339_s4 = sld [smem:[%s18109_s0 + %s15221_s28]]   ;;  %s15225_s28 = smov 21  }
  0x1c   :  { %s15344_s9 = sld [smem:[%s18109_s0 + %s15222_s7]]   ;;  %s15226_s7 = smov 22  }
  0x1d   :  { %18189 = sst [smem:[#allocation16_spill]] %s15319_s6 }
  0x1e   :  { %s15349_s13 = sld [smem:[%s18109_s0 + %s15223_s15]]   ;;  %s15227_s15 = smov 23  }
  0x1f   :  { %s15354_s29 = sld [smem:[%s18109_s0 + %s15224_s22]]   ;;  %s15228_s22 = smov 24  }
  0x20   :  { %s15359_s25 = sld [smem:[%s18109_s0 + %s15225_s28]]   ;;  %s15229_s28 = smov 25  }
  0x21   :  { %18190 = sst [smem:[#allocation17_spill]] %s15339_s4 }
  0x22   :  { %18191 = sst [smem:[#allocation18_spill]] %s15344_s9 }
  0x23   :  { %s15364_s21 = sld [smem:[%s18109_s0 + %s15226_s7]]   ;;  %s15230_s7 = smov 26  }
  0x24   :  { %s15369_s17 = sld [smem:[%s18109_s0 + %s15227_s15]]   ;;  %s15231_s15 = smov 27  }
  0x25   :  { %18192 = sst [smem:[#allocation19_spill]] %s15354_s29 }
  0x26   :  { %18193 = sst [smem:[#allocation20_spill]] %s15359_s25 }
  0x27   :  { %s15374_s29 = sld [smem:[%s18109_s0 + %s15228_s22]]   ;;  %s15232_s22 = smov 28  }
  0x28   :  { %s15379_s25 = sld [smem:[%s18109_s0 + %s15229_s28]]   ;;  %s15233_s28 = smov 29  }
  0x29   :  { %18194 = sst [smem:[#allocation21_spill]] %s15364_s21 }
  0x2a   :  { %18195 = sst [smem:[#allocation22_spill]] %s15369_s17 }
  0x2b   :  { %s15384_s21 = sld [smem:[%s18109_s0 + %s15230_s7]]   ;;  %s15234_s7 = smov 30  }
  0x2c   :  { %s15389_s17 = sld [smem:[%s18109_s0 + %s15231_s15]]  }
  0x2d   :  { %18196 = sst [smem:[#allocation23_spill]] %s15374_s29 }
  0x2e   :  { %18197 = sst [smem:[#allocation24_spill]] %s15379_s25 }
  0x2f   :  { %s15394_s29 = sld [smem:[%s18109_s0 + %s15232_s22]]  }
  0x30   :  { %s15399_s25 = sld [smem:[%s18109_s0 + %s15233_s28]]  }
  0x31   :  { %18198 = sst [smem:[#allocation25_spill]] %s15384_s21 }
  0x32   :  { %18199 = sst [smem:[#allocation26_spill]] %s15389_s17 }
  0x33   :  { %s11619_s21 = sld [smem:[%s18109_s0 + %s15234_s7]]  }
  0x34   :  { %s15407_s17 = sld [smem:[%s18109_s0 + %s15235_s16]]  }
  0x39   :  { %v68_v0 = vstv %s11619_s21 }
  0x3a   :  { %69 = vst [vmem:[#allocation2] sm:$0x1] %v68_v0 }
  0x3b   :  { %70 = vsyncpa [#allocation5], 0 }
  0x3c   :  { %72 = vsyncpa [#allocation5 + $0x1], 0  ;;  %s15409_s22 = smov 0   ;;  %s15411_s23 = smov 0  }
  0x3d   :  { %s15413_s26 = smov 0   ;;  %s15415_s28 = smov 0  }
  0x3e LB: > { %s18200_s8 = sld [smem:[#allocation15_spill]]  ;;  %s18201_s6 = sld [smem:[#allocation16_spill]]  ;;  %s15203_s28 = sphi %s15415_s28, %s18373_s28   ;;  %s15199_s26 = sphi %s15413_s26, %s18372_s26   ;;  %s15195_s23 = sphi %s15411_s23, %s18371_s23   ;;  %s15191_s22 = sphi %s15409_s22, %s18370_s22  }
  0x3f   : > { %s18202_s4 = sld [smem:[#allocation17_spill]]  ;;  %s18203_s3 = sld [smem:[#allocation14_spill]] }
  0x40   : > { %s15430_s0 = sadd.s32 4294967295, %s15203_s28   ;;  %s11622_s21 = sadd.s32 4294967294, %s15203_s28  }
  0x41   : > { %s15434_s1 = sadd.s32 1, %s15203_s28   ;;  %s85_s2 = sadd.s32 1, %s15199_s26 }
  0x42   : > { %s82_s7 = ssub.s32 %s15203_s28, %s15434_s1  ;;  %p92_p0 = scmp.ne.s32.totalorder %s15199_s26, %s15195_s23 }
  0x43   : > { %p83_p1 = scmp.eq.s32.totalorder %s82_s7, 0  ;;  %p93_p2 = scmp.eq.s32.totalorder %s15203_s28, 0 }
  0x44   : > { %p757_p3 = scmp.eq.s32.totalorder %s15430_s0, 1  ;;  %p762_p4 = scmp.ne.s32.totalorder %s15195_s23, %s15191_s22 }
  0x45   : > { %s15446_s10 = scalar_select %p83_p1, %s15199_s26, %s85_s2  }
  0x46   : > { %p94_p5 = por %p93_p2, %p92_p0  ;;  %p15448_p6 = por %p757_p3, %p92_p0 }
  0x47   : > { %p763_p7 = scmp.eq.s32.totalorder %s11622_s21, 1  ;;  %p18179_p9 = scmp.ge.s32.totalorder %s15203_s28, 2 }
  0x49   : > { %p15452_p8 = por %p763_p7, %p762_p4  ;;  %866 = sbr.rel (%p18179_p9) target bundleno = 258 (0x102), region = 132 }
  0x50   : > { %869 = sbr.rel (!%p94_p5) target bundleno = 258 (0x102), region = 136  ;;  %s18206_s5 = sld [smem:[#allocation7_spill]] (%p94_p5) }
  0x51   : > { %s871_s15 = sand.u32 (%p94_p5), 1, %s15199_s26   ;;  %s12248_s18 = sshll.u32 (%p94_p5), %s15203_s28, 6 }
  0x52   : > { %s11625_s2 = sshll.u32 (%p94_p5), %s871_s15, 10 }
  0x53   : > { %s15466_s21 = scalar_lea.vmem (%p94_p5), [#allocation3], %s11625_s2 }
  0x56   : > { %s15462_s7 = scalar_lea.vmem (%p94_p5), %s18206_s5, %s12248_s18 }
  0x57   : > { %v892_v1 = vld [vmem:[%s15462_s7] sm:$0xf]  ;;  %v894_v2 = vld [vmem:[%s15462_s7 + $0x4] sm:$0xf]  ;;  %v896_v3 = vld [vmem:[%s15462_s7 + $0x8] sm:$0xf] }
  0x58   : > { %893 = vst [vmem:[%s15466_s21] sm:$0xf] %v892_v1  ;;  %895 = vst [vmem:[%s15466_s21 + $0x4] sm:$0xf] %v894_v2  ;;  %v898_v4 = vld [vmem:[%s15462_s7 + $0xc] sm:$0xf] }
  0x59   : > { %v900_v5 = vld [vmem:[%s15462_s7 + $0x10] sm:$0xf]  ;;  %897 = vst [vmem:[%s15466_s21 + $0x8] sm:$0xf] %v896_v3  ;;  %899 = vst [vmem:[%s15466_s21 + $0xc] sm:$0xf] %v898_v4 }
  0x5a   : > { %901 = vst [vmem:[%s15466_s21 + $0x10] sm:$0xf] %v900_v5  ;;  %v902_v6 = vld [vmem:[%s15462_s7 + $0x14] sm:$0xf]  ;;  %v904_v7 = vld [vmem:[%s15462_s7 + $0x18] sm:$0xf] }
  0x5b   : > { %v906_v8 = vld [vmem:[%s15462_s7 + $0x1c] sm:$0xf]  ;;  %903 = vst [vmem:[%s15466_s21 + $0x14] sm:$0xf] %v902_v6  ;;  %905 = vst [vmem:[%s15466_s21 + $0x18] sm:$0xf] %v904_v7 }
  0x5c   : > { %907 = vst [vmem:[%s15466_s21 + $0x1c] sm:$0xf] %v906_v8  ;;  %v908_v9 = vld [vmem:[%s15462_s7 + $0x20] sm:$0xf]  ;;  %v910_v10 = vld [vmem:[%s15462_s7 + $0x24] sm:$0xf] }
  0x5d   : > { %v912_v11 = vld [vmem:[%s15462_s7 + $0x28] sm:$0xf]  ;;  %909 = vst [vmem:[%s15466_s21 + $0x20] sm:$0xf] %v908_v9  ;;  %911 = vst [vmem:[%s15466_s21 + $0x24] sm:$0xf] %v910_v10 }
  0x5e   : > { %913 = vst [vmem:[%s15466_s21 + $0x28] sm:$0xf] %v912_v11  ;;  %v914_v12 = vld [vmem:[%s15462_s7 + $0x2c] sm:$0xf]  ;;  %v916_v13 = vld [vmem:[%s15462_s7 + $0x30] sm:$0xf] }
  0x5f   : > { %v918_v14 = vld [vmem:[%s15462_s7 + $0x34] sm:$0xf]  ;;  %915 = vst [vmem:[%s15466_s21 + $0x2c] sm:$0xf] %v914_v12  ;;  %917 = vst [vmem:[%s15466_s21 + $0x30] sm:$0xf] %v916_v13 }
  0x60   : > { %919 = vst [vmem:[%s15466_s21 + $0x34] sm:$0xf] %v918_v14  ;;  %v920_v15 = vld [vmem:[%s15462_s7 + $0x38] sm:$0xf]  ;;  %v922_v16 = vld [vmem:[%s15462_s7 + $0x3c] sm:$0xf] }
  0x61   : > { %v924_v17 = vld [vmem:[%s15462_s7 + $0x80] sm:$0xf]  ;;  %921 = vst [vmem:[%s15466_s21 + $0x38] sm:$0xf] %v920_v15  ;;  %923 = vst [vmem:[%s15466_s21 + $0x3c] sm:$0xf] %v922_v16 }
  0x62   : > { %925 = vst [vmem:[%s15466_s21 + $0x40] sm:$0xf] %v924_v17  ;;  %v926_v18 = vld [vmem:[%s15462_s7 + $0x84] sm:$0xf]  ;;  %v928_v19 = vld [vmem:[%s15462_s7 + $0x88] sm:$0xf] }
  0x63   : > { %v930_v20 = vld [vmem:[%s15462_s7 + $0x8c] sm:$0xf]  ;;  %927 = vst [vmem:[%s15466_s21 + $0x44] sm:$0xf] %v926_v18  ;;  %929 = vst [vmem:[%s15466_s21 + $0x48] sm:$0xf] %v928_v19 }
  0x64   : > { %931 = vst [vmem:[%s15466_s21 + $0x4c] sm:$0xf] %v930_v20  ;;  %v932_v21 = vld [vmem:[%s15462_s7 + $0x90] sm:$0xf]  ;;  %v934_v22 = vld [vmem:[%s15462_s7 + $0x94] sm:$0xf] }
  0x65   : > { %v936_v23 = vld [vmem:[%s15462_s7 + $0x98] sm:$0xf]  ;;  %933 = vst [vmem:[%s15466_s21 + $0x50] sm:$0xf] %v932_v21  ;;  %935 = vst [vmem:[%s15466_s21 + $0x54] sm:$0xf] %v934_v22 }
  0x66   : > { %937 = vst [vmem:[%s15466_s21 + $0x58] sm:$0xf] %v936_v23  ;;  %v938_v24 = vld [vmem:[%s15462_s7 + $0x9c] sm:$0xf]  ;;  %v940_v25 = vld [vmem:[%s15462_s7 + $0xa0] sm:$0xf] }
  0x67   : > { %v942_v26 = vld [vmem:[%s15462_s7 + $0xa4] sm:$0xf]  ;;  %939 = vst [vmem:[%s15466_s21 + $0x5c] sm:$0xf] %v938_v24  ;;  %941 = vst [vmem:[%s15466_s21 + $0x60] sm:$0xf] %v940_v25 }
  0x68   : > { %943 = vst [vmem:[%s15466_s21 + $0x64] sm:$0xf] %v942_v26  ;;  %v944_v27 = vld [vmem:[%s15462_s7 + $0xa8] sm:$0xf]  ;;  %v946_v28 = vld [vmem:[%s15462_s7 + $0xac] sm:$0xf] }
  0x69   : > { %v948_v29 = vld [vmem:[%s15462_s7 + $0xb0] sm:$0xf]  ;;  %945 = vst [vmem:[%s15466_s21 + $0x68] sm:$0xf] %v944_v27  ;;  %947 = vst [vmem:[%s15466_s21 + $0x6c] sm:$0xf] %v946_v28 }
  0x6a   : > { %949 = vst [vmem:[%s15466_s21 + $0x70] sm:$0xf] %v948_v29  ;;  %v950_v30 = vld [vmem:[%s15462_s7 + $0xb4] sm:$0xf]  ;;  %v952_v31 = vld [vmem:[%s15462_s7 + $0xb8] sm:$0xf] }
  0x6b   : > { %v954_v32 = vld [vmem:[%s15462_s7 + $0xbc] sm:$0xf]  ;;  %951 = vst [vmem:[%s15466_s21 + $0x74] sm:$0xf] %v950_v30  ;;  %953 = vst [vmem:[%s15466_s21 + $0x78] sm:$0xf] %v952_v31 }
  0x6c   : > { %955 = vst [vmem:[%s15466_s21 + $0x7c] sm:$0xf] %v954_v32  ;;  %v956_v33 = vld [vmem:[%s15462_s7 + $0x100] sm:$0xf]  ;;  %v958_v34 = vld [vmem:[%s15462_s7 + $0x104] sm:$0xf] }
  0x6d   : > { %v960_v35 = vld [vmem:[%s15462_s7 + $0x108] sm:$0xf]  ;;  %957 = vst [vmem:[%s15466_s21 + $0x80] sm:$0xf] %v956_v33  ;;  %959 = vst [vmem:[%s15466_s21 + $0x84] sm:$0xf] %v958_v34 }
  0x6e   : > { %961 = vst [vmem:[%s15466_s21 + $0x88] sm:$0xf] %v960_v35  ;;  %v962_v36 = vld [vmem:[%s15462_s7 + $0x10c] sm:$0xf]  ;;  %v964_v37 = vld [vmem:[%s15462_s7 + $0x110] sm:$0xf] }
  0x6f   : > { %v966_v38 = vld [vmem:[%s15462_s7 + $0x114] sm:$0xf]  ;;  %963 = vst [vmem:[%s15466_s21 + $0x8c] sm:$0xf] %v962_v36  ;;  %965 = vst [vmem:[%s15466_s21 + $0x90] sm:$0xf] %v964_v37 }
  0x70   : > { %967 = vst [vmem:[%s15466_s21 + $0x94] sm:$0xf] %v966_v38  ;;  %v968_v39 = vld [vmem:[%s15462_s7 + $0x118] sm:$0xf]  ;;  %v970_v40 = vld [vmem:[%s15462_s7 + $0x11c] sm:$0xf] }
  0x71   : > { %v972_v41 = vld [vmem:[%s15462_s7 + $0x120] sm:$0xf]  ;;  %969 = vst [vmem:[%s15466_s21 + $0x98] sm:$0xf] %v968_v39  ;;  %971 = vst [vmem:[%s15466_s21 + $0x9c] sm:$0xf] %v970_v40 }
  0x72   : > { %973 = vst [vmem:[%s15466_s21 + $0xa0] sm:$0xf] %v972_v41  ;;  %v974_v42 = vld [vmem:[%s15462_s7 + $0x124] sm:$0xf]  ;;  %v976_v43 = vld [vmem:[%s15462_s7 + $0x128] sm:$0xf] }
  0x73   : > { %v978_v44 = vld [vmem:[%s15462_s7 + $0x12c] sm:$0xf]  ;;  %975 = vst [vmem:[%s15466_s21 + $0xa4] sm:$0xf] %v974_v42  ;;  %977 = vst [vmem:[%s15466_s21 + $0xa8] sm:$0xf] %v976_v43 }
  0x74   : > { %979 = vst [vmem:[%s15466_s21 + $0xac] sm:$0xf] %v978_v44  ;;  %v980_v45 = vld [vmem:[%s15462_s7 + $0x130] sm:$0xf]  ;;  %v982_v46 = vld [vmem:[%s15462_s7 + $0x134] sm:$0xf] }
  0x75   : > { %v984_v47 = vld [vmem:[%s15462_s7 + $0x138] sm:$0xf]  ;;  %981 = vst [vmem:[%s15466_s21 + $0xb0] sm:$0xf] %v980_v45  ;;  %983 = vst [vmem:[%s15466_s21 + $0xb4] sm:$0xf] %v982_v46 }
  0x76   : > { %985 = vst [vmem:[%s15466_s21 + $0xb8] sm:$0xf] %v984_v47  ;;  %v986_v48 = vld [vmem:[%s15462_s7 + $0x13c] sm:$0xf]  ;;  %v988_v49 = vld [vmem:[%s15462_s7 + $0x180] sm:$0xf] }
  0x77   : > { %v990_v50 = vld [vmem:[%s15462_s7 + $0x184] sm:$0xf]  ;;  %987 = vst [vmem:[%s15466_s21 + $0xbc] sm:$0xf] %v986_v48  ;;  %989 = vst [vmem:[%s15466_s21 + $0xc0] sm:$0xf] %v988_v49 }
  0x78   : > { %991 = vst [vmem:[%s15466_s21 + $0xc4] sm:$0xf] %v990_v50  ;;  %v992_v51 = vld [vmem:[%s15462_s7 + $0x188] sm:$0xf]  ;;  %v994_v52 = vld [vmem:[%s15462_s7 + $0x18c] sm:$0xf] }
  0x79   : > { %v996_v53 = vld [vmem:[%s15462_s7 + $0x190] sm:$0xf]  ;;  %993 = vst [vmem:[%s15466_s21 + $0xc8] sm:$0xf] %v992_v51  ;;  %995 = vst [vmem:[%s15466_s21 + $0xcc] sm:$0xf] %v994_v52 }
  0x7a   : > { %997 = vst [vmem:[%s15466_s21 + $0xd0] sm:$0xf] %v996_v53  ;;  %v998_v54 = vld [vmem:[%s15462_s7 + $0x194] sm:$0xf]  ;;  %v1000_v55 = vld [vmem:[%s15462_s7 + $0x198] sm:$0xf] }
  0x7b   : > { %v1002_v56 = vld [vmem:[%s15462_s7 + $0x19c] sm:$0xf]  ;;  %999 = vst [vmem:[%s15466_s21 + $0xd4] sm:$0xf] %v998_v54  ;;  %1001 = vst [vmem:[%s15466_s21 + $0xd8] sm:$0xf] %v1000_v55 }
  0x7c   : > { %1003 = vst [vmem:[%s15466_s21 + $0xdc] sm:$0xf] %v1002_v56  ;;  %v1004_v57 = vld [vmem:[%s15462_s7 + $0x1a0] sm:$0xf]  ;;  %v1006_v58 = vld [vmem:[%s15462_s7 + $0x1a4] sm:$0xf] }
  0x7d   : > { %v1008_v59 = vld [vmem:[%s15462_s7 + $0x1a8] sm:$0xf]  ;;  %1005 = vst [vmem:[%s15466_s21 + $0xe0] sm:$0xf] %v1004_v57  ;;  %1007 = vst [vmem:[%s15466_s21 + $0xe4] sm:$0xf] %v1006_v58 }
  0x7e   : > { %1009 = vst [vmem:[%s15466_s21 + $0xe8] sm:$0xf] %v1008_v59  ;;  %v1010_v60 = vld [vmem:[%s15462_s7 + $0x1ac] sm:$0xf]  ;;  %v1012_v61 = vld [vmem:[%s15462_s7 + $0x1b0] sm:$0xf] }
  0x7f   : > { %v1014_v62 = vld [vmem:[%s15462_s7 + $0x1b4] sm:$0xf]  ;;  %1011 = vst [vmem:[%s15466_s21 + $0xec] sm:$0xf] %v1010_v60  ;;  %1013 = vst [vmem:[%s15466_s21 + $0xf0] sm:$0xf] %v1012_v61 }
  0x80   : > { %1015 = vst [vmem:[%s15466_s21 + $0xf4] sm:$0xf] %v1014_v62  ;;  %v1016_v63 = vld [vmem:[%s15462_s7 + $0x1b8] sm:$0xf]  ;;  %v1018_v0 = vld [vmem:[%s15462_s7 + $0x1bc] sm:$0xf] }
  0x81   : > { %v1020_v1 = vld [vmem:[%s15462_s7 + $0x200] sm:$0xf]  ;;  %1017 = vst [vmem:[%s15466_s21 + $0xf8] sm:$0xf] %v1016_v63  ;;  %1019 = vst [vmem:[%s15466_s21 + $0xfc] sm:$0xf] %v1018_v0 }
  0x82   : > { %1021 = vst [vmem:[%s15466_s21 + $0x100] sm:$0xf] %v1020_v1  ;;  %v1022_v2 = vld [vmem:[%s15462_s7 + $0x204] sm:$0xf]  ;;  %v1024_v3 = vld [vmem:[%s15462_s7 + $0x208] sm:$0xf] }
  0x83   : > { %v1026_v4 = vld [vmem:[%s15462_s7 + $0x20c] sm:$0xf]  ;;  %1023 = vst [vmem:[%s15466_s21 + $0x104] sm:$0xf] %v1022_v2  ;;  %1025 = vst [vmem:[%s15466_s21 + $0x108] sm:$0xf] %v1024_v3 }
  0x84   : > { %1027 = vst [vmem:[%s15466_s21 + $0x10c] sm:$0xf] %v1026_v4  ;;  %v1028_v5 = vld [vmem:[%s15462_s7 + $0x210] sm:$0xf]  ;;  %v1030_v6 = vld [vmem:[%s15462_s7 + $0x214] sm:$0xf] }
  0x85   : > { %v1032_v7 = vld [vmem:[%s15462_s7 + $0x218] sm:$0xf]  ;;  %1029 = vst [vmem:[%s15466_s21 + $0x110] sm:$0xf] %v1028_v5  ;;  %1031 = vst [vmem:[%s15466_s21 + $0x114] sm:$0xf] %v1030_v6 }
  0x86   : > { %1033 = vst [vmem:[%s15466_s21 + $0x118] sm:$0xf] %v1032_v7  ;;  %v1034_v8 = vld [vmem:[%s15462_s7 + $0x21c] sm:$0xf]  ;;  %v1036_v9 = vld [vmem:[%s15462_s7 + $0x220] sm:$0xf] }
  0x87   : > { %v1038_v10 = vld [vmem:[%s15462_s7 + $0x224] sm:$0xf]  ;;  %1035 = vst [vmem:[%s15466_s21 + $0x11c] sm:$0xf] %v1034_v8  ;;  %1037 = vst [vmem:[%s15466_s21 + $0x120] sm:$0xf] %v1036_v9 }
  0x88   : > { %1039 = vst [vmem:[%s15466_s21 + $0x124] sm:$0xf] %v1038_v10  ;;  %v1040_v11 = vld [vmem:[%s15462_s7 + $0x228] sm:$0xf]  ;;  %v1042_v12 = vld [vmem:[%s15462_s7 + $0x22c] sm:$0xf] }
  0x89   : > { %v1044_v13 = vld [vmem:[%s15462_s7 + $0x230] sm:$0xf]  ;;  %1041 = vst [vmem:[%s15466_s21 + $0x128] sm:$0xf] %v1040_v11  ;;  %1043 = vst [vmem:[%s15466_s21 + $0x12c] sm:$0xf] %v1042_v12 }
  0x8a   : > { %1045 = vst [vmem:[%s15466_s21 + $0x130] sm:$0xf] %v1044_v13  ;;  %v1046_v14 = vld [vmem:[%s15462_s7 + $0x234] sm:$0xf]  ;;  %v1048_v15 = vld [vmem:[%s15462_s7 + $0x238] sm:$0xf] }
  0x8b   : > { %v1050_v16 = vld [vmem:[%s15462_s7 + $0x23c] sm:$0xf]  ;;  %1047 = vst [vmem:[%s15466_s21 + $0x134] sm:$0xf] %v1046_v14  ;;  %1049 = vst [vmem:[%s15466_s21 + $0x138] sm:$0xf] %v1048_v15 }
  0x8c   : > { %1051 = vst [vmem:[%s15466_s21 + $0x13c] sm:$0xf] %v1050_v16  ;;  %v1052_v17 = vld [vmem:[%s15462_s7 + $0x280] sm:$0xf]  ;;  %v1054_v18 = vld [vmem:[%s15462_s7 + $0x284] sm:$0xf] }
  0x8d   : > { %v1056_v19 = vld [vmem:[%s15462_s7 + $0x288] sm:$0xf]  ;;  %1053 = vst [vmem:[%s15466_s21 + $0x140] sm:$0xf] %v1052_v17  ;;  %1055 = vst [vmem:[%s15466_s21 + $0x144] sm:$0xf] %v1054_v18 }
  0x8e   : > { %1057 = vst [vmem:[%s15466_s21 + $0x148] sm:$0xf] %v1056_v19  ;;  %v1058_v20 = vld [vmem:[%s15462_s7 + $0x28c] sm:$0xf]  ;;  %v1060_v21 = vld [vmem:[%s15462_s7 + $0x290] sm:$0xf] }
  0x8f   : > { %v1062_v22 = vld [vmem:[%s15462_s7 + $0x294] sm:$0xf]  ;;  %1059 = vst [vmem:[%s15466_s21 + $0x14c] sm:$0xf] %v1058_v20  ;;  %1061 = vst [vmem:[%s15466_s21 + $0x150] sm:$0xf] %v1060_v21 }
  0x90   : > { %1063 = vst [vmem:[%s15466_s21 + $0x154] sm:$0xf] %v1062_v22  ;;  %v1064_v23 = vld [vmem:[%s15462_s7 + $0x298] sm:$0xf]  ;;  %v1066_v24 = vld [vmem:[%s15462_s7 + $0x29c] sm:$0xf] }
  0x91   : > { %v1068_v25 = vld [vmem:[%s15462_s7 + $0x2a0] sm:$0xf]  ;;  %1065 = vst [vmem:[%s15466_s21 + $0x158] sm:$0xf] %v1064_v23  ;;  %1067 = vst [vmem:[%s15466_s21 + $0x15c] sm:$0xf] %v1066_v24 }
  0x92   : > { %1069 = vst [vmem:[%s15466_s21 + $0x160] sm:$0xf] %v1068_v25  ;;  %v1070_v26 = vld [vmem:[%s15462_s7 + $0x2a4] sm:$0xf]  ;;  %v1072_v27 = vld [vmem:[%s15462_s7 + $0x2a8] sm:$0xf] }
  0x93   : > { %v1074_v28 = vld [vmem:[%s15462_s7 + $0x2ac] sm:$0xf]  ;;  %1071 = vst [vmem:[%s15466_s21 + $0x164] sm:$0xf] %v1070_v26  ;;  %1073 = vst [vmem:[%s15466_s21 + $0x168] sm:$0xf] %v1072_v27 }
  0x94   : > { %1075 = vst [vmem:[%s15466_s21 + $0x16c] sm:$0xf] %v1074_v28  ;;  %v1076_v29 = vld [vmem:[%s15462_s7 + $0x2b0] sm:$0xf]  ;;  %v1078_v30 = vld [vmem:[%s15462_s7 + $0x2b4] sm:$0xf] }
  0x95   : > { %v1080_v31 = vld [vmem:[%s15462_s7 + $0x2b8] sm:$0xf]  ;;  %1077 = vst [vmem:[%s15466_s21 + $0x170] sm:$0xf] %v1076_v29  ;;  %1079 = vst [vmem:[%s15466_s21 + $0x174] sm:$0xf] %v1078_v30 }
  0x96   : > { %1081 = vst [vmem:[%s15466_s21 + $0x178] sm:$0xf] %v1080_v31  ;;  %v1082_v32 = vld [vmem:[%s15462_s7 + $0x2bc] sm:$0xf]  ;;  %v1084_v33 = vld [vmem:[%s15462_s7 + $0x300] sm:$0xf] }
  0x97   : > { %v1086_v34 = vld [vmem:[%s15462_s7 + $0x304] sm:$0xf]  ;;  %1083 = vst [vmem:[%s15466_s21 + $0x17c] sm:$0xf] %v1082_v32  ;;  %1085 = vst [vmem:[%s15466_s21 + $0x180] sm:$0xf] %v1084_v33 }
  0x98   : > { %1087 = vst [vmem:[%s15466_s21 + $0x184] sm:$0xf] %v1086_v34  ;;  %v1088_v35 = vld [vmem:[%s15462_s7 + $0x308] sm:$0xf]  ;;  %v1090_v36 = vld [vmem:[%s15462_s7 + $0x30c] sm:$0xf] }
  0x99   : > { %v1092_v37 = vld [vmem:[%s15462_s7 + $0x310] sm:$0xf]  ;;  %1089 = vst [vmem:[%s15466_s21 + $0x188] sm:$0xf] %v1088_v35  ;;  %1091 = vst [vmem:[%s15466_s21 + $0x18c] sm:$0xf] %v1090_v36 }
  0x9a   : > { %1093 = vst [vmem:[%s15466_s21 + $0x190] sm:$0xf] %v1092_v37  ;;  %v1094_v38 = vld [vmem:[%s15462_s7 + $0x314] sm:$0xf]  ;;  %v1096_v39 = vld [vmem:[%s15462_s7 + $0x318] sm:$0xf] }
  0x9b   : > { %v1098_v40 = vld [vmem:[%s15462_s7 + $0x31c] sm:$0xf]  ;;  %1095 = vst [vmem:[%s15466_s21 + $0x194] sm:$0xf] %v1094_v38  ;;  %1097 = vst [vmem:[%s15466_s21 + $0x198] sm:$0xf] %v1096_v39 }
  0x9c   : > { %1099 = vst [vmem:[%s15466_s21 + $0x19c] sm:$0xf] %v1098_v40  ;;  %v1100_v41 = vld [vmem:[%s15462_s7 + $0x320] sm:$0xf]  ;;  %v1102_v42 = vld [vmem:[%s15462_s7 + $0x324] sm:$0xf] }
  0x9d   : > { %v1104_v43 = vld [vmem:[%s15462_s7 + $0x328] sm:$0xf]  ;;  %1101 = vst [vmem:[%s15466_s21 + $0x1a0] sm:$0xf] %v1100_v41  ;;  %1103 = vst [vmem:[%s15466_s21 + $0x1a4] sm:$0xf] %v1102_v42 }
  0x9e   : > { %1105 = vst [vmem:[%s15466_s21 + $0x1a8] sm:$0xf] %v1104_v43  ;;  %v1106_v44 = vld [vmem:[%s15462_s7 + $0x32c] sm:$0xf]  ;;  %v1108_v45 = vld [vmem:[%s15462_s7 + $0x330] sm:$0xf] }
  0x9f   : > { %v1110_v46 = vld [vmem:[%s15462_s7 + $0x334] sm:$0xf]  ;;  %1107 = vst [vmem:[%s15466_s21 + $0x1ac] sm:$0xf] %v1106_v44  ;;  %1109 = vst [vmem:[%s15466_s21 + $0x1b0] sm:$0xf] %v1108_v45 }
  0xa0   : > { %1111 = vst [vmem:[%s15466_s21 + $0x1b4] sm:$0xf] %v1110_v46  ;;  %v1112_v47 = vld [vmem:[%s15462_s7 + $0x338] sm:$0xf]  ;;  %v1114_v48 = vld [vmem:[%s15462_s7 + $0x33c] sm:$0xf] }
  0xa1   : > { %v1116_v49 = vld [vmem:[%s15462_s7 + $0x380] sm:$0xf]  ;;  %1113 = vst [vmem:[%s15466_s21 + $0x1b8] sm:$0xf] %v1112_v47  ;;  %1115 = vst [vmem:[%s15466_s21 + $0x1bc] sm:$0xf] %v1114_v48 }
  0xa2   : > { %1117 = vst [vmem:[%s15466_s21 + $0x1c0] sm:$0xf] %v1116_v49  ;;  %v1118_v50 = vld [vmem:[%s15462_s7 + $0x384] sm:$0xf]  ;;  %v1120_v51 = vld [vmem:[%s15462_s7 + $0x388] sm:$0xf] }
  0xa3   : > { %v1122_v52 = vld [vmem:[%s15462_s7 + $0x38c] sm:$0xf]  ;;  %1119 = vst [vmem:[%s15466_s21 + $0x1c4] sm:$0xf] %v1118_v50  ;;  %1121 = vst [vmem:[%s15466_s21 + $0x1c8] sm:$0xf] %v1120_v51 }
  0xa4   : > { %1123 = vst [vmem:[%s15466_s21 + $0x1cc] sm:$0xf] %v1122_v52  ;;  %v1124_v53 = vld [vmem:[%s15462_s7 + $0x390] sm:$0xf]  ;;  %v1126_v54 = vld [vmem:[%s15462_s7 + $0x394] sm:$0xf] }
  0xa5   : > { %v1128_v55 = vld [vmem:[%s15462_s7 + $0x398] sm:$0xf]  ;;  %1125 = vst [vmem:[%s15466_s21 + $0x1d0] sm:$0xf] %v1124_v53  ;;  %1127 = vst [vmem:[%s15466_s21 + $0x1d4] sm:$0xf] %v1126_v54 }
  0xa6   : > { %1129 = vst [vmem:[%s15466_s21 + $0x1d8] sm:$0xf] %v1128_v55  ;;  %v1130_v56 = vld [vmem:[%s15462_s7 + $0x39c] sm:$0xf]  ;;  %v1132_v57 = vld [vmem:[%s15462_s7 + $0x3a0] sm:$0xf] }
  0xa7   : > { %v1134_v58 = vld [vmem:[%s15462_s7 + $0x3a4] sm:$0xf]  ;;  %1131 = vst [vmem:[%s15466_s21 + $0x1dc] sm:$0xf] %v1130_v56  ;;  %1133 = vst [vmem:[%s15466_s21 + $0x1e0] sm:$0xf] %v1132_v57 }
  0xa8   : > { %1135 = vst [vmem:[%s15466_s21 + $0x1e4] sm:$0xf] %v1134_v58  ;;  %v1136_v59 = vld [vmem:[%s15462_s7 + $0x3a8] sm:$0xf]  ;;  %v1138_v60 = vld [vmem:[%s15462_s7 + $0x3ac] sm:$0xf] }
  0xa9   : > { %v1140_v61 = vld [vmem:[%s15462_s7 + $0x3b0] sm:$0xf]  ;;  %1137 = vst [vmem:[%s15466_s21 + $0x1e8] sm:$0xf] %v1136_v59  ;;  %1139 = vst [vmem:[%s15466_s21 + $0x1ec] sm:$0xf] %v1138_v60 }
  0xaa   : > { %1141 = vst [vmem:[%s15466_s21 + $0x1f0] sm:$0xf] %v1140_v61  ;;  %v1142_v62 = vld [vmem:[%s15462_s7 + $0x3b4] sm:$0xf]  ;;  %v1144_v63 = vld [vmem:[%s15462_s7 + $0x3b8] sm:$0xf] }
  0xab   : > { %v1146_v0 = vld [vmem:[%s15462_s7 + $0x3bc] sm:$0xf]  ;;  %1143 = vst [vmem:[%s15466_s21 + $0x1f4] sm:$0xf] %v1142_v62  ;;  %1145 = vst [vmem:[%s15466_s21 + $0x1f8] sm:$0xf] %v1144_v63 }
  0xac   : > { %1147 = vst [vmem:[%s15466_s21 + $0x1fc] sm:$0xf] %v1146_v0  ;;  %v1148_v1 = vld [vmem:[%s15462_s7 + $0x400] sm:$0xf]  ;;  %v1150_v2 = vld [vmem:[%s15462_s7 + $0x404] sm:$0xf] }
  0xad   : > { %v1152_v3 = vld [vmem:[%s15462_s7 + $0x408] sm:$0xf]  ;;  %1149 = vst [vmem:[%s15466_s21 + $0x200] sm:$0xf] %v1148_v1  ;;  %1151 = vst [vmem:[%s15466_s21 + $0x204] sm:$0xf] %v1150_v2 }
  0xae   : > { %1153 = vst [vmem:[%s15466_s21 + $0x208] sm:$0xf] %v1152_v3  ;;  %v1154_v4 = vld [vmem:[%s15462_s7 + $0x40c] sm:$0xf]  ;;  %v1156_v5 = vld [vmem:[%s15462_s7 + $0x410] sm:$0xf] }
  0xaf   : > { %v1158_v6 = vld [vmem:[%s15462_s7 + $0x414] sm:$0xf]  ;;  %1155 = vst [vmem:[%s15466_s21 + $0x20c] sm:$0xf] %v1154_v4  ;;  %1157 = vst [vmem:[%s15466_s21 + $0x210] sm:$0xf] %v1156_v5 }
  0xb0   : > { %1159 = vst [vmem:[%s15466_s21 + $0x214] sm:$0xf] %v1158_v6  ;;  %v1160_v7 = vld [vmem:[%s15462_s7 + $0x418] sm:$0xf]  ;;  %v1162_v8 = vld [vmem:[%s15462_s7 + $0x41c] sm:$0xf] }
  0xb1   : > { %v1164_v9 = vld [vmem:[%s15462_s7 + $0x420] sm:$0xf]  ;;  %1161 = vst [vmem:[%s15466_s21 + $0x218] sm:$0xf] %v1160_v7  ;;  %1163 = vst [vmem:[%s15466_s21 + $0x21c] sm:$0xf] %v1162_v8 }
  0xb2   : > { %1165 = vst [vmem:[%s15466_s21 + $0x220] sm:$0xf] %v1164_v9  ;;  %v1166_v10 = vld [vmem:[%s15462_s7 + $0x424] sm:$0xf]  ;;  %v1168_v11 = vld [vmem:[%s15462_s7 + $0x428] sm:$0xf] }
  0xb3   : > { %v1170_v12 = vld [vmem:[%s15462_s7 + $0x42c] sm:$0xf]  ;;  %1167 = vst [vmem:[%s15466_s21 + $0x224] sm:$0xf] %v1166_v10  ;;  %1169 = vst [vmem:[%s15466_s21 + $0x228] sm:$0xf] %v1168_v11 }
  0xb4   : > { %1171 = vst [vmem:[%s15466_s21 + $0x22c] sm:$0xf] %v1170_v12  ;;  %v1172_v13 = vld [vmem:[%s15462_s7 + $0x430] sm:$0xf]  ;;  %v1174_v14 = vld [vmem:[%s15462_s7 + $0x434] sm:$0xf] }
  0xb5   : > { %v1176_v15 = vld [vmem:[%s15462_s7 + $0x438] sm:$0xf]  ;;  %1173 = vst [vmem:[%s15466_s21 + $0x230] sm:$0xf] %v1172_v13  ;;  %1175 = vst [vmem:[%s15466_s21 + $0x234] sm:$0xf] %v1174_v14 }
  0xb6   : > { %1177 = vst [vmem:[%s15466_s21 + $0x238] sm:$0xf] %v1176_v15  ;;  %v1178_v16 = vld [vmem:[%s15462_s7 + $0x43c] sm:$0xf]  ;;  %v1180_v17 = vld [vmem:[%s15462_s7 + $0x480] sm:$0xf] }
  0xb7   : > { %v1182_v18 = vld [vmem:[%s15462_s7 + $0x484] sm:$0xf]  ;;  %1179 = vst [vmem:[%s15466_s21 + $0x23c] sm:$0xf] %v1178_v16  ;;  %1181 = vst [vmem:[%s15466_s21 + $0x240] sm:$0xf] %v1180_v17 }
  0xb8   : > { %1183 = vst [vmem:[%s15466_s21 + $0x244] sm:$0xf] %v1182_v18  ;;  %v1184_v19 = vld [vmem:[%s15462_s7 + $0x488] sm:$0xf]  ;;  %v1186_v20 = vld [vmem:[%s15462_s7 + $0x48c] sm:$0xf] }
  0xb9   : > { %v1188_v21 = vld [vmem:[%s15462_s7 + $0x490] sm:$0xf]  ;;  %1185 = vst [vmem:[%s15466_s21 + $0x248] sm:$0xf] %v1184_v19  ;;  %1187 = vst [vmem:[%s15466_s21 + $0x24c] sm:$0xf] %v1186_v20 }
  0xba   : > { %1189 = vst [vmem:[%s15466_s21 + $0x250] sm:$0xf] %v1188_v21  ;;  %v1190_v22 = vld [vmem:[%s15462_s7 + $0x494] sm:$0xf]  ;;  %v1192_v23 = vld [vmem:[%s15462_s7 + $0x498] sm:$0xf] }
  0xbb   : > { %v1194_v24 = vld [vmem:[%s15462_s7 + $0x49c] sm:$0xf]  ;;  %1191 = vst [vmem:[%s15466_s21 + $0x254] sm:$0xf] %v1190_v22  ;;  %1193 = vst [vmem:[%s15466_s21 + $0x258] sm:$0xf] %v1192_v23 }
  0xbc   : > { %1195 = vst [vmem:[%s15466_s21 + $0x25c] sm:$0xf] %v1194_v24  ;;  %v1196_v25 = vld [vmem:[%s15462_s7 + $0x4a0] sm:$0xf]  ;;  %v1198_v26 = vld [vmem:[%s15462_s7 + $0x4a4] sm:$0xf] }
  0xbd   : > { %v1200_v27 = vld [vmem:[%s15462_s7 + $0x4a8] sm:$0xf]  ;;  %1197 = vst [vmem:[%s15466_s21 + $0x260] sm:$0xf] %v1196_v25  ;;  %1199 = vst [vmem:[%s15466_s21 + $0x264] sm:$0xf] %v1198_v26 }
  0xbe   : > { %1201 = vst [vmem:[%s15466_s21 + $0x268] sm:$0xf] %v1200_v27  ;;  %v1202_v28 = vld [vmem:[%s15462_s7 + $0x4ac] sm:$0xf]  ;;  %v1204_v29 = vld [vmem:[%s15462_s7 + $0x4b0] sm:$0xf] }
  0xbf   : > { %v1206_v30 = vld [vmem:[%s15462_s7 + $0x4b4] sm:$0xf]  ;;  %1203 = vst [vmem:[%s15466_s21 + $0x26c] sm:$0xf] %v1202_v28  ;;  %1205 = vst [vmem:[%s15466_s21 + $0x270] sm:$0xf] %v1204_v29 }
  0xc0   : > { %1207 = vst [vmem:[%s15466_s21 + $0x274] sm:$0xf] %v1206_v30  ;;  %v1208_v31 = vld [vmem:[%s15462_s7 + $0x4b8] sm:$0xf]  ;;  %v1210_v32 = vld [vmem:[%s15462_s7 + $0x4bc] sm:$0xf] }
  0xc1   : > { %v1212_v33 = vld [vmem:[%s15462_s7 + $0x500] sm:$0xf]  ;;  %1209 = vst [vmem:[%s15466_s21 + $0x278] sm:$0xf] %v1208_v31  ;;  %1211 = vst [vmem:[%s15466_s21 + $0x27c] sm:$0xf] %v1210_v32 }
  0xc2   : > { %1213 = vst [vmem:[%s15466_s21 + $0x280] sm:$0xf] %v1212_v33  ;;  %v1214_v34 = vld [vmem:[%s15462_s7 + $0x504] sm:$0xf]  ;;  %v1216_v35 = vld [vmem:[%s15462_s7 + $0x508] sm:$0xf] }
  0xc3   : > { %v1218_v36 = vld [vmem:[%s15462_s7 + $0x50c] sm:$0xf]  ;;  %1215 = vst [vmem:[%s15466_s21 + $0x284] sm:$0xf] %v1214_v34  ;;  %1217 = vst [vmem:[%s15466_s21 + $0x288] sm:$0xf] %v1216_v35 }
  0xc4   : > { %1219 = vst [vmem:[%s15466_s21 + $0x28c] sm:$0xf] %v1218_v36  ;;  %v1220_v37 = vld [vmem:[%s15462_s7 + $0x510] sm:$0xf]  ;;  %v1222_v38 = vld [vmem:[%s15462_s7 + $0x514] sm:$0xf] }
  0xc5   : > { %v1224_v39 = vld [vmem:[%s15462_s7 + $0x518] sm:$0xf]  ;;  %1221 = vst [vmem:[%s15466_s21 + $0x290] sm:$0xf] %v1220_v37  ;;  %1223 = vst [vmem:[%s15466_s21 + $0x294] sm:$0xf] %v1222_v38 }
  0xc6   : > { %1225 = vst [vmem:[%s15466_s21 + $0x298] sm:$0xf] %v1224_v39  ;;  %v1226_v40 = vld [vmem:[%s15462_s7 + $0x51c] sm:$0xf]  ;;  %v1228_v41 = vld [vmem:[%s15462_s7 + $0x520] sm:$0xf] }
  0xc7   : > { %v1230_v42 = vld [vmem:[%s15462_s7 + $0x524] sm:$0xf]  ;;  %1227 = vst [vmem:[%s15466_s21 + $0x29c] sm:$0xf] %v1226_v40  ;;  %1229 = vst [vmem:[%s15466_s21 + $0x2a0] sm:$0xf] %v1228_v41 }
  0xc8   : > { %1231 = vst [vmem:[%s15466_s21 + $0x2a4] sm:$0xf] %v1230_v42  ;;  %v1232_v43 = vld [vmem:[%s15462_s7 + $0x528] sm:$0xf]  ;;  %v1234_v44 = vld [vmem:[%s15462_s7 + $0x52c] sm:$0xf] }
  0xc9   : > { %v1236_v45 = vld [vmem:[%s15462_s7 + $0x530] sm:$0xf]  ;;  %1233 = vst [vmem:[%s15466_s21 + $0x2a8] sm:$0xf] %v1232_v43  ;;  %1235 = vst [vmem:[%s15466_s21 + $0x2ac] sm:$0xf] %v1234_v44 }
  0xca   : > { %1237 = vst [vmem:[%s15466_s21 + $0x2b0] sm:$0xf] %v1236_v45  ;;  %v1238_v46 = vld [vmem:[%s15462_s7 + $0x534] sm:$0xf]  ;;  %v1240_v47 = vld [vmem:[%s15462_s7 + $0x538] sm:$0xf] }
  0xcb   : > { %v1242_v48 = vld [vmem:[%s15462_s7 + $0x53c] sm:$0xf]  ;;  %1239 = vst [vmem:[%s15466_s21 + $0x2b4] sm:$0xf] %v1238_v46  ;;  %1241 = vst [vmem:[%s15466_s21 + $0x2b8] sm:$0xf] %v1240_v47 }
  0xcc   : > { %1243 = vst [vmem:[%s15466_s21 + $0x2bc] sm:$0xf] %v1242_v48  ;;  %v1244_v49 = vld [vmem:[%s15462_s7 + $0x580] sm:$0xf]  ;;  %v1246_v50 = vld [vmem:[%s15462_s7 + $0x584] sm:$0xf] }
  0xcd   : > { %v1248_v51 = vld [vmem:[%s15462_s7 + $0x588] sm:$0xf]  ;;  %1245 = vst [vmem:[%s15466_s21 + $0x2c0] sm:$0xf] %v1244_v49  ;;  %1247 = vst [vmem:[%s15466_s21 + $0x2c4] sm:$0xf] %v1246_v50 }
  0xce   : > { %1249 = vst [vmem:[%s15466_s21 + $0x2c8] sm:$0xf] %v1248_v51  ;;  %v1250_v52 = vld [vmem:[%s15462_s7 + $0x58c] sm:$0xf]  ;;  %v1252_v53 = vld [vmem:[%s15462_s7 + $0x590] sm:$0xf] }
  0xcf   : > { %v1254_v54 = vld [vmem:[%s15462_s7 + $0x594] sm:$0xf]  ;;  %1251 = vst [vmem:[%s15466_s21 + $0x2cc] sm:$0xf] %v1250_v52  ;;  %1253 = vst [vmem:[%s15466_s21 + $0x2d0] sm:$0xf] %v1252_v53 }
  0xd0   : > { %1255 = vst [vmem:[%s15466_s21 + $0x2d4] sm:$0xf] %v1254_v54  ;;  %v1256_v55 = vld [vmem:[%s15462_s7 + $0x598] sm:$0xf]  ;;  %v1258_v56 = vld [vmem:[%s15462_s7 + $0x59c] sm:$0xf] }
  0xd1   : > { %v1260_v57 = vld [vmem:[%s15462_s7 + $0x5a0] sm:$0xf]  ;;  %1257 = vst [vmem:[%s15466_s21 + $0x2d8] sm:$0xf] %v1256_v55  ;;  %1259 = vst [vmem:[%s15466_s21 + $0x2dc] sm:$0xf] %v1258_v56 }
  0xd2   : > { %1261 = vst [vmem:[%s15466_s21 + $0x2e0] sm:$0xf] %v1260_v57  ;;  %v1262_v58 = vld [vmem:[%s15462_s7 + $0x5a4] sm:$0xf]  ;;  %v1264_v59 = vld [vmem:[%s15462_s7 + $0x5a8] sm:$0xf] }
  0xd3   : > { %v1266_v60 = vld [vmem:[%s15462_s7 + $0x5ac] sm:$0xf]  ;;  %1263 = vst [vmem:[%s15466_s21 + $0x2e4] sm:$0xf] %v1262_v58  ;;  %1265 = vst [vmem:[%s15466_s21 + $0x2e8] sm:$0xf] %v1264_v59 }
  0xd4   : > { %1267 = vst [vmem:[%s15466_s21 + $0x2ec] sm:$0xf] %v1266_v60  ;;  %v1268_v61 = vld [vmem:[%s15462_s7 + $0x5b0] sm:$0xf]  ;;  %v1270_v62 = vld [vmem:[%s15462_s7 + $0x5b4] sm:$0xf] }
  0xd5   : > { %v1272_v63 = vld [vmem:[%s15462_s7 + $0x5b8] sm:$0xf]  ;;  %1269 = vst [vmem:[%s15466_s21 + $0x2f0] sm:$0xf] %v1268_v61  ;;  %1271 = vst [vmem:[%s15466_s21 + $0x2f4] sm:$0xf] %v1270_v62 }
  0xd6   : > { %1273 = vst [vmem:[%s15466_s21 + $0x2f8] sm:$0xf] %v1272_v63  ;;  %v1274_v0 = vld [vmem:[%s15462_s7 + $0x5bc] sm:$0xf]  ;;  %v1276_v1 = vld [vmem:[%s15462_s7 + $0x600] sm:$0xf] }
  0xd7   : > { %v1278_v2 = vld [vmem:[%s15462_s7 + $0x604] sm:$0xf]  ;;  %1275 = vst [vmem:[%s15466_s21 + $0x2fc] sm:$0xf] %v1274_v0  ;;  %1277 = vst [vmem:[%s15466_s21 + $0x300] sm:$0xf] %v1276_v1 }
  0xd8   : > { %1279 = vst [vmem:[%s15466_s21 + $0x304] sm:$0xf] %v1278_v2  ;;  %v1280_v3 = vld [vmem:[%s15462_s7 + $0x608] sm:$0xf]  ;;  %v1282_v4 = vld [vmem:[%s15462_s7 + $0x60c] sm:$0xf] }
  0xd9   : > { %v1284_v5 = vld [vmem:[%s15462_s7 + $0x610] sm:$0xf]  ;;  %1281 = vst [vmem:[%s15466_s21 + $0x308] sm:$0xf] %v1280_v3  ;;  %1283 = vst [vmem:[%s15466_s21 + $0x30c] sm:$0xf] %v1282_v4 }
  0xda   : > { %1285 = vst [vmem:[%s15466_s21 + $0x310] sm:$0xf] %v1284_v5  ;;  %v1286_v6 = vld [vmem:[%s15462_s7 + $0x614] sm:$0xf]  ;;  %v1288_v7 = vld [vmem:[%s15462_s7 + $0x618] sm:$0xf] }
  0xdb   : > { %v1290_v8 = vld [vmem:[%s15462_s7 + $0x61c] sm:$0xf]  ;;  %1287 = vst [vmem:[%s15466_s21 + $0x314] sm:$0xf] %v1286_v6  ;;  %1289 = vst [vmem:[%s15466_s21 + $0x318] sm:$0xf] %v1288_v7 }
  0xdc   : > { %1291 = vst [vmem:[%s15466_s21 + $0x31c] sm:$0xf] %v1290_v8  ;;  %v1292_v9 = vld [vmem:[%s15462_s7 + $0x620] sm:$0xf]  ;;  %v1294_v10 = vld [vmem:[%s15462_s7 + $0x624] sm:$0xf] }
  0xdd   : > { %v1296_v11 = vld [vmem:[%s15462_s7 + $0x628] sm:$0xf]  ;;  %1293 = vst [vmem:[%s15466_s21 + $0x320] sm:$0xf] %v1292_v9  ;;  %1295 = vst [vmem:[%s15466_s21 + $0x324] sm:$0xf] %v1294_v10 }
  0xde   : > { %1297 = vst [vmem:[%s15466_s21 + $0x328] sm:$0xf] %v1296_v11  ;;  %v1298_v12 = vld [vmem:[%s15462_s7 + $0x62c] sm:$0xf]  ;;  %v1300_v13 = vld [vmem:[%s15462_s7 + $0x630] sm:$0xf] }
  0xdf   : > { %v1302_v14 = vld [vmem:[%s15462_s7 + $0x634] sm:$0xf]  ;;  %1299 = vst [vmem:[%s15466_s21 + $0x32c] sm:$0xf] %v1298_v12  ;;  %1301 = vst [vmem:[%s15466_s21 + $0x330] sm:$0xf] %v1300_v13 }
  0xe0   : > { %1303 = vst [vmem:[%s15466_s21 + $0x334] sm:$0xf] %v1302_v14  ;;  %v1304_v15 = vld [vmem:[%s15462_s7 + $0x638] sm:$0xf]  ;;  %v1306_v16 = vld [vmem:[%s15462_s7 + $0x63c] sm:$0xf] }
  0xe1   : > { %v1308_v17 = vld [vmem:[%s15462_s7 + $0x680] sm:$0xf]  ;;  %1305 = vst [vmem:[%s15466_s21 + $0x338] sm:$0xf] %v1304_v15  ;;  %1307 = vst [vmem:[%s15466_s21 + $0x33c] sm:$0xf] %v1306_v16 }
  0xe2   : > { %1309 = vst [vmem:[%s15466_s21 + $0x340] sm:$0xf] %v1308_v17  ;;  %v1310_v18 = vld [vmem:[%s15462_s7 + $0x684] sm:$0xf]  ;;  %v1312_v19 = vld [vmem:[%s15462_s7 + $0x688] sm:$0xf] }
  0xe3   : > { %v1314_v20 = vld [vmem:[%s15462_s7 + $0x68c] sm:$0xf]  ;;  %1311 = vst [vmem:[%s15466_s21 + $0x344] sm:$0xf] %v1310_v18  ;;  %1313 = vst [vmem:[%s15466_s21 + $0x348] sm:$0xf] %v1312_v19 }
  0xe4   : > { %1315 = vst [vmem:[%s15466_s21 + $0x34c] sm:$0xf] %v1314_v20  ;;  %v1316_v21 = vld [vmem:[%s15462_s7 + $0x690] sm:$0xf]  ;;  %v1318_v22 = vld [vmem:[%s15462_s7 + $0x694] sm:$0xf] }
  0xe5   : > { %v1320_v23 = vld [vmem:[%s15462_s7 + $0x698] sm:$0xf]  ;;  %1317 = vst [vmem:[%s15466_s21 + $0x350] sm:$0xf] %v1316_v21  ;;  %1319 = vst [vmem:[%s15466_s21 + $0x354] sm:$0xf] %v1318_v22 }
  0xe6   : > { %1321 = vst [vmem:[%s15466_s21 + $0x358] sm:$0xf] %v1320_v23  ;;  %v1322_v24 = vld [vmem:[%s15462_s7 + $0x69c] sm:$0xf]  ;;  %v1324_v25 = vld [vmem:[%s15462_s7 + $0x6a0] sm:$0xf] }
  0xe7   : > { %v1326_v26 = vld [vmem:[%s15462_s7 + $0x6a4] sm:$0xf]  ;;  %1323 = vst [vmem:[%s15466_s21 + $0x35c] sm:$0xf] %v1322_v24  ;;  %1325 = vst [vmem:[%s15466_s21 + $0x360] sm:$0xf] %v1324_v25 }
  0xe8   : > { %1327 = vst [vmem:[%s15466_s21 + $0x364] sm:$0xf] %v1326_v26  ;;  %v1328_v27 = vld [vmem:[%s15462_s7 + $0x6a8] sm:$0xf]  ;;  %v1330_v28 = vld [vmem:[%s15462_s7 + $0x6ac] sm:$0xf] }
  0xe9   : > { %v1332_v29 = vld [vmem:[%s15462_s7 + $0x6b0] sm:$0xf]  ;;  %1329 = vst [vmem:[%s15466_s21 + $0x368] sm:$0xf] %v1328_v27  ;;  %1331 = vst [vmem:[%s15466_s21 + $0x36c] sm:$0xf] %v1330_v28 }
  0xea   : > { %1333 = vst [vmem:[%s15466_s21 + $0x370] sm:$0xf] %v1332_v29  ;;  %v1334_v30 = vld [vmem:[%s15462_s7 + $0x6b4] sm:$0xf]  ;;  %v1336_v31 = vld [vmem:[%s15462_s7 + $0x6b8] sm:$0xf] }
  0xeb   : > { %v1338_v32 = vld [vmem:[%s15462_s7 + $0x6bc] sm:$0xf]  ;;  %1335 = vst [vmem:[%s15466_s21 + $0x374] sm:$0xf] %v1334_v30  ;;  %1337 = vst [vmem:[%s15466_s21 + $0x378] sm:$0xf] %v1336_v31 }
  0xec   : > { %1339 = vst [vmem:[%s15466_s21 + $0x37c] sm:$0xf] %v1338_v32  ;;  %v1340_v33 = vld [vmem:[%s15462_s7 + $0x700] sm:$0xf]  ;;  %v1342_v34 = vld [vmem:[%s15462_s7 + $0x704] sm:$0xf] }
  0xed   : > { %v1344_v35 = vld [vmem:[%s15462_s7 + $0x708] sm:$0xf]  ;;  %1341 = vst [vmem:[%s15466_s21 + $0x380] sm:$0xf] %v1340_v33  ;;  %1343 = vst [vmem:[%s15466_s21 + $0x384] sm:$0xf] %v1342_v34 }
  0xee   : > { %1345 = vst [vmem:[%s15466_s21 + $0x388] sm:$0xf] %v1344_v35  ;;  %v1346_v36 = vld [vmem:[%s15462_s7 + $0x70c] sm:$0xf]  ;;  %v1348_v37 = vld [vmem:[%s15462_s7 + $0x710] sm:$0xf] }
  0xef   : > { %v1350_v38 = vld [vmem:[%s15462_s7 + $0x714] sm:$0xf]  ;;  %1347 = vst [vmem:[%s15466_s21 + $0x38c] sm:$0xf] %v1346_v36  ;;  %1349 = vst [vmem:[%s15466_s21 + $0x390] sm:$0xf] %v1348_v37 }
  0xf0   : > { %1351 = vst [vmem:[%s15466_s21 + $0x394] sm:$0xf] %v1350_v38  ;;  %v1352_v39 = vld [vmem:[%s15462_s7 + $0x718] sm:$0xf]  ;;  %v1354_v40 = vld [vmem:[%s15462_s7 + $0x71c] sm:$0xf] }
  0xf1   : > { %v1356_v41 = vld [vmem:[%s15462_s7 + $0x720] sm:$0xf]  ;;  %1353 = vst [vmem:[%s15466_s21 + $0x398] sm:$0xf] %v1352_v39  ;;  %1355 = vst [vmem:[%s15466_s21 + $0x39c] sm:$0xf] %v1354_v40 }
  0xf2   : > { %1357 = vst [vmem:[%s15466_s21 + $0x3a0] sm:$0xf] %v1356_v41  ;;  %v1358_v42 = vld [vmem:[%s15462_s7 + $0x724] sm:$0xf]  ;;  %v1360_v43 = vld [vmem:[%s15462_s7 + $0x728] sm:$0xf] }
  0xf3   : > { %v1362_v44 = vld [vmem:[%s15462_s7 + $0x72c] sm:$0xf]  ;;  %1359 = vst [vmem:[%s15466_s21 + $0x3a4] sm:$0xf] %v1358_v42  ;;  %1361 = vst [vmem:[%s15466_s21 + $0x3a8] sm:$0xf] %v1360_v43 }
  0xf4   : > { %1363 = vst [vmem:[%s15466_s21 + $0x3ac] sm:$0xf] %v1362_v44  ;;  %v1364_v45 = vld [vmem:[%s15462_s7 + $0x730] sm:$0xf]  ;;  %v1366_v46 = vld [vmem:[%s15462_s7 + $0x734] sm:$0xf] }
  0xf5   : > { %v1368_v47 = vld [vmem:[%s15462_s7 + $0x738] sm:$0xf]  ;;  %1365 = vst [vmem:[%s15466_s21 + $0x3b0] sm:$0xf] %v1364_v45  ;;  %1367 = vst [vmem:[%s15466_s21 + $0x3b4] sm:$0xf] %v1366_v46 }
  0xf6   : > { %1369 = vst [vmem:[%s15466_s21 + $0x3b8] sm:$0xf] %v1368_v47  ;;  %v1370_v48 = vld [vmem:[%s15462_s7 + $0x73c] sm:$0xf]  ;;  %v1372_v49 = vld [vmem:[%s15462_s7 + $0x780] sm:$0xf] }
  0xf7   : > { %v1374_v50 = vld [vmem:[%s15462_s7 + $0x784] sm:$0xf]  ;;  %1371 = vst [vmem:[%s15466_s21 + $0x3bc] sm:$0xf] %v1370_v48  ;;  %1373 = vst [vmem:[%s15466_s21 + $0x3c0] sm:$0xf] %v1372_v49 }
  0xf8   : > { %1375 = vst [vmem:[%s15466_s21 + $0x3c4] sm:$0xf] %v1374_v50  ;;  %v1376_v51 = vld [vmem:[%s15462_s7 + $0x788] sm:$0xf]  ;;  %v1378_v52 = vld [vmem:[%s15462_s7 + $0x78c] sm:$0xf] }
  0xf9   : > { %v1380_v53 = vld [vmem:[%s15462_s7 + $0x790] sm:$0xf]  ;;  %1377 = vst [vmem:[%s15466_s21 + $0x3c8] sm:$0xf] %v1376_v51  ;;  %1379 = vst [vmem:[%s15466_s21 + $0x3cc] sm:$0xf] %v1378_v52 }
  0xfa   : > { %1381 = vst [vmem:[%s15466_s21 + $0x3d0] sm:$0xf] %v1380_v53  ;;  %v1382_v54 = vld [vmem:[%s15462_s7 + $0x794] sm:$0xf]  ;;  %v1384_v55 = vld [vmem:[%s15462_s7 + $0x798] sm:$0xf] }
  0xfb   : > { %v1386_v56 = vld [vmem:[%s15462_s7 + $0x79c] sm:$0xf]  ;;  %1383 = vst [vmem:[%s15466_s21 + $0x3d4] sm:$0xf] %v1382_v54  ;;  %1385 = vst [vmem:[%s15466_s21 + $0x3d8] sm:$0xf] %v1384_v55 }
  0xfc   : > { %1387 = vst [vmem:[%s15466_s21 + $0x3dc] sm:$0xf] %v1386_v56  ;;  %v1388_v57 = vld [vmem:[%s15462_s7 + $0x7a0] sm:$0xf]  ;;  %v1390_v58 = vld [vmem:[%s15462_s7 + $0x7a4] sm:$0xf] }
  0xfd   : > { %v1392_v59 = vld [vmem:[%s15462_s7 + $0x7a8] sm:$0xf]  ;;  %1389 = vst [vmem:[%s15466_s21 + $0x3e0] sm:$0xf] %v1388_v57  ;;  %1391 = vst [vmem:[%s15466_s21 + $0x3e4] sm:$0xf] %v1390_v58 }
  0xfe   : > { %1393 = vst [vmem:[%s15466_s21 + $0x3e8] sm:$0xf] %v1392_v59  ;;  %v1394_v60 = vld [vmem:[%s15462_s7 + $0x7ac] sm:$0xf]  ;;  %v1396_v61 = vld [vmem:[%s15462_s7 + $0x7b0] sm:$0xf] }
  0xff   : > { %v1398_v62 = vld [vmem:[%s15462_s7 + $0x7b4] sm:$0xf]  ;;  %1395 = vst [vmem:[%s15466_s21 + $0x3ec] sm:$0xf] %v1394_v60  ;;  %1397 = vst [vmem:[%s15466_s21 + $0x3f0] sm:$0xf] %v1396_v61 }
 0x100   : > { %1399 = vst [vmem:[%s15466_s21 + $0x3f4] sm:$0xf] %v1398_v62  ;;  %v1400_v63 = vld [vmem:[%s15462_s7 + $0x7b8] sm:$0xf]  ;;  %v1402_v0 = vld [vmem:[%s15462_s7 + $0x7bc] sm:$0xf] }
 0x101   : > { %1401 = vst [vmem:[%s15466_s21 + $0x3f8] sm:$0xf] %v1400_v63  ;;  %1403 = vst [vmem:[%s15466_s21 + $0x3fc] sm:$0xf] %v1402_v0 }
 0x102 PF: > { %p11628_p10 = scmp.ge.s32.totalorder %s15203_s28, 1  ;;  %p1947_p11 = scmp.lt.s32.totalorder %s15203_s28, 3 }
 0x104   : > { %p1948_p12 = pnand %p11628_p10, %p1947_p11 }
 0x106   : > { %1951 = sbr.rel (%p1948_p12) target bundleno = 5768 (0x1688), region = 181 }
 0x10d   : > { %v14916_v1 = vld [vmem:[%s18203_s3 + $0x20] sm:$0xff]   ;;  %s15982_s15 = sand.u32 1, %s15195_s23   ;;  %v14917_v2 = vld [vmem:[%s18203_s3 + $0x28] sm:$0xff]   ;;  %vm2647_vm0 = vcmask 261120   ;;  %v14982_v36 = vld [vmem:[%s18203_s3 + $0x10] sm:$0xff]   ;;  %s18352_s9 = sld [smem:[#allocation18_spill]] }
 0x10e   : > { %s11629_s18 = sshll.u32 %s15982_s15, 10  ;;  %12817 = vmatprep.subr.bf16.mxu0 %v14916_v1  ;;  %v14983_v37 = vld [vmem:[%s18203_s3 + $0x18] sm:$0xff]   ;;  %s18353_s7 = sld [smem:[#allocation19_spill]] }
 0x10f   : > { %12818 = vmatpush3.bf16.msra.mxu0 %v14916_v1  ;;  %s15986_s2 = scalar_lea.vmem [#allocation3], %s11629_s18  ;;  %s18354_s21 = sld [smem:[#allocation20_spill]] }
 0x110   : > { %v14918_v3 = vld [vmem:[%s15986_s2 + $0x40] sm:$0xff]   ;;  %12819 = vmatprep.subr.bf16.mxu0 %v14917_v2  ;;  %v14919_v4 = vld [vmem:[%s15986_s2 + $0x48] sm:$0xff]   ;;  %v14920_v5 = vld [vmem:[%s15986_s2 + $0x50] sm:$0xff]   ;;  %s18169_s18 = smov 1  }
 0x111   : > { %12821 = vmatprep.mubr.msk.bf16.mxu0 %vm2647_vm0, %v14918_v3  ;;  %v14921_v6 = vld [vmem:[%s15986_s2 + $0x58] sm:$0xff]   ;;  %v14922_v7 = vld [vmem:[%s15986_s2 + $0x60] sm:$0xff]   ;;  %v14923_v8 = vld [vmem:[%s15986_s2 + $0x68] sm:$0xff]  }
 0x112   : > { %v14924_v9 = vld [vmem:[%s15986_s2 + $0x70] sm:$0xff]   ;;  %v14925_v10 = vld [vmem:[%s15986_s2 + $0x78] sm:$0xff]   ;;  %v14926_v11 = vld [vmem:[%s15986_s2 + $0xc0] sm:$0xff]  }
 0x113   : > { %12820 = vmatpush3.bf16.msra.mxu0 %v14917_v2  ;;  %v14927_v12 = vld [vmem:[%s15986_s2 + $0xc8] sm:$0xff]   ;;  %v14928_v13 = vld [vmem:[%s15986_s2 + $0xd0] sm:$0xff]   ;;  %v14929_v14 = vld [vmem:[%s15986_s2 + $0xd8] sm:$0xff]  }
 0x114   : > { %v14930_v15 = vld [vmem:[%s15986_s2 + $0xe0] sm:$0xff]   ;;  %v16015_v16 = vld [vmem:[%s15986_s2 + $0xe8] sm:$0xff]   ;;  %v16018_v17 = vld [vmem:[%s15986_s2 + $0xf0] sm:$0xff]   ;;  %12949 = vmatprep.subr.bf16.mxu0 %v14982_v36 }
 0x115   : > { %v16025_v18 = vld [vmem:[%s15986_s2 + $0xf8] sm:$0xff]   ;;  %v16028_v19 = vld [vmem:[%s15986_s2 + $0x140] sm:$0xff]   ;;  %v16035_v20 = vld [vmem:[%s15986_s2 + $0x148] sm:$0xff]  }
 0x116   : > { %12822 = vmatmul.mubr.msk.bf16.vlgmr.msra.gmra.mrb[0].mxu0 %vm2647_vm0, %v14919_v4  ;;  %v16038_v21 = vld [vmem:[%s15986_s2 + $0x150] sm:$0xff]   ;;  %v16045_v22 = vld [vmem:[%s15986_s2 + $0x158] sm:$0xff]   ;;  %v16048_v23 = vld [vmem:[%s15986_s2 + $0x160] sm:$0xff]  }
 0x117   : > { %12825 = vmatprep.mubr.msk.bf16.mxu0 %vm2647_vm0, %v14920_v5  ;;  %v16055_v24 = vld [vmem:[%s15986_s2 + $0x168] sm:$0xff]   ;;  %v16058_v25 = vld [vmem:[%s15986_s2 + $0x170] sm:$0xff]   ;;  %v16065_v26 = vld [vmem:[%s15986_s2 + $0x178] sm:$0xff]   ;;  %12950 = vmatpush3.bf16.msra.mxu0 %v14982_v36 }
 0x118   : > { %v16068_v27 = vld [vmem:[%s15986_s2 + $0x1c0] sm:$0xff]   ;;  %v16075_v28 = vld [vmem:[%s15986_s2 + $0x1c8] sm:$0xff]   ;;  %v16078_v29 = vld [vmem:[%s15986_s2 + $0x1d0] sm:$0xff]   ;;  %12951 = vmatprep.subr.bf16.mxu0 %v14983_v37 }
 0x119   : > { %v16085_v30 = vld [vmem:[%s15986_s2 + $0x1d8] sm:$0xff]   ;;  %v16088_v31 = vld [vmem:[%s15986_s2 + $0x1e0] sm:$0xff]   ;;  %v16095_v32 = vld [vmem:[%s15986_s2 + $0x1e8] sm:$0xff]  }
 0x11a   : > { %v16098_v33 = vld [vmem:[%s15986_s2 + $0x1f0] sm:$0xff]   ;;  %v16105_v34 = vld [vmem:[%s15986_s2 + $0x1f8] sm:$0xff]   ;;  %v16108_v35 = vld [vmem:[%s15986_s2 + $0x240] sm:$0xff]  }
 0x11b   : > { %v16117_v38 = vld [vmem:[%s15986_s2 + $0x248] sm:$0xff]   ;;  %v16120_v39 = vld [vmem:[%s15986_s2 + $0x250] sm:$0xff]   ;;  %12952 = vmatpush3.bf16.msra.mxu0 %v14983_v37  ;;  %v16127_v40 = vld [vmem:[%s15986_s2 + $0x258] sm:$0xff]  }
 0x11c   : > { %v16130_v41 = vld [vmem:[%s15986_s2 + $0x260] sm:$0xff]   ;;  %v16137_v42 = vld [vmem:[%s15986_s2 + $0x268] sm:$0xff]   ;;  %v16140_v43 = vld [vmem:[%s15986_s2 + $0x270] sm:$0xff]  }
 0x11d   : > { %v16147_v44 = vld [vmem:[%s15986_s2 + $0x278] sm:$0xff]   ;;  %v16150_v45 = vld [vmem:[%s15986_s2 + $0x2c0] sm:$0xff]   ;;  %v16157_v46 = vld [vmem:[%s15986_s2 + $0x2c8] sm:$0xff]  }
 0x11e   : > { %12826 = vmatmul.mubr.msk.bf16.gmra.mrb[4].mxu0 %vm2647_vm0, %v14921_v6  ;;  %v16160_v47 = vld [vmem:[%s15986_s2 + $0x2d0] sm:$0xff]   ;;  %v16167_v48 = vld [vmem:[%s15986_s2 + $0x2d8] sm:$0xff]   ;;  %v16170_v49 = vld [vmem:[%s15986_s2 + $0x2e0] sm:$0xff]  }
 0x11f   : > { %12829 = vmatprep.mubr.msk.bf16.mxu0 %vm2647_vm0, %v14922_v7  ;;  %v16177_v50 = vld [vmem:[%s15986_s2 + $0x2e8] sm:$0xff]   ;;  %v16180_v51 = vld [vmem:[%s15986_s2 + $0x2f0] sm:$0xff]   ;;  %v16187_v52 = vld [vmem:[%s15986_s2 + $0x2f8] sm:$0xff]  }
 0x120   : > { %v16190_v53 = vld [vmem:[%s15986_s2 + $0x340] sm:$0xff]   ;;  %v16197_v54 = vld [vmem:[%s15986_s2 + $0x348] sm:$0xff]   ;;  %v16200_v55 = vld [vmem:[%s15986_s2 + $0x350] sm:$0xff]  }
 0x121   : > { %v16207_v56 = vld [vmem:[%s15986_s2 + $0x358] sm:$0xff]   ;;  %v16210_v57 = vld [vmem:[%s15986_s2 + $0x360] sm:$0xff]   ;;  %v16217_v58 = vld [vmem:[%s15986_s2 + $0x368] sm:$0xff]  }
 0x122   : > { %v16220_v59 = vld [vmem:[%s15986_s2 + $0x370] sm:$0xff]   ;;  %v16227_v60 = vld [vmem:[%s15986_s2 + $0x378] sm:$0xff]   ;;  %v14974_v61 = vld [vmem:[%s15986_s2 + $0x3c0] sm:$0xff]  }
 0x123   : > { %v14975_v62 = vld [vmem:[%s15986_s2 + $0x3c8] sm:$0xff]   ;;  %v14976_v63 = vld [vmem:[%s15986_s2 + $0x3d0] sm:$0xff]   ;;  %v14977_v0 = vld [vmem:[%s15986_s2 + $0x3d8] sm:$0xff]  }
 0x124   : > { %v14978_v1 = vld [vmem:[%s15986_s2 + $0x3e0] sm:$0xff]   ;;  %v14979_v2 = vld [vmem:[%s15986_s2 + $0x3e8] sm:$0xff]   ;;  %v14980_v3 = vld [vmem:[%s15986_s2 + $0x3f0] sm:$0xff]  }
 0x125   : > { %v14981_v4 = vld [vmem:[%s15986_s2 + $0x3f8] sm:$0xff]   ;;  %v14984_v5 = vld [vmem:[%s15986_s2] sm:$0xff]   ;;  %v14985_v6 = vld [vmem:[%s15986_s2 + $0x8] sm:$0xff]  }
 0x126   : > { %12830 = vmatmul.mubr.msk.bf16.gmra.mrb[8].mxu0 %vm2647_vm0, %v14923_v8  ;;  %v14986_v7 = vld [vmem:[%s15986_s2 + $0x10] sm:$0xff]   ;;  %v14987_v8 = vld [vmem:[%s15986_s2 + $0x18] sm:$0xff]   ;;  %v14996_v37 = vld [vmem:[%s15986_s2 + $0xa0] sm:$0xff]  }
 0x127   : > { %12833 = vmatprep.mubr.msk.bf16.mxu0 %vm2647_vm0, %v14924_v9  ;;  %v14988_v9 = vld [vmem:[%s15986_s2 + $0x20] sm:$0xff]   ;;  %v14995_v36 = vld [vmem:[%s15986_s2 + $0x98] sm:$0xff]  }
 0x12e   : > { %12834 = vmatmul.mubr.msk.bf16.gmra.mrb[12].mxu0 %vm2647_vm0, %v14925_v10  ;;  %v14989_v10 = vld [vmem:[%s15986_s2 + $0x28] sm:$0xff]  }
 0x12f   : > { %12837 = vmatprep.mubr.msk.bf16.mxu0 %vm2647_vm0, %v14926_v11  ;;  %v14990_v11 = vld [vmem:[%s15986_s2 + $0x30] sm:$0xff]  }
 0x136   : > { %12838 = vmatmul.mubr.msk.bf16.gmra.mrb[16].mxu0 %vm2647_vm0, %v14927_v12  ;;  %v14991_v12 = vld [vmem:[%s15986_s2 + $0x38] sm:$0xff]  }
 0x137   : > { %12841 = vmatprep.mubr.msk.bf16.mxu0 %vm2647_vm0, %v14928_v13  ;;  %v14992_v13 = vld [vmem:[%s15986_s2 + $0x80] sm:$0xff]  }
 0x13e   : > { %12842 = vmatmul.mubr.msk.bf16.gmra.mrb[20].mxu0 %vm2647_vm0, %v14929_v14  ;;  %v14993_v14 = vld [vmem:[%s15986_s2 + $0x88] sm:$0xff]  }
 0x13f   : > { %12845 = vmatprep.mubr.msk.bf16.mxu0 %vm2647_vm0, %v14930_v15  ;;  %v14994_v15 = vld [vmem:[%s15986_s2 + $0x90] sm:$0xff]  }
 0x146   : > { %12846 = vmatmul.mubr.msk.bf16.gmra.mrb[24].mxu0 %vm2647_vm0, %v16015_v16 }
 0x147   : > { %12849 = vmatprep.mubr.msk.bf16.mxu0 %vm2647_vm0, %v16018_v17 }
 0x14e   : > { %12850 = vmatmul.mubr.msk.bf16.gmra.mrb[28].mxu0 %vm2647_vm0, %v16025_v18 }
 0x14f   : > { %12853 = vmatprep.mubr.msk.bf16.mxu0 %vm2647_vm0, %v16028_v19 }
 0x156   : > { %12854 = vmatmul.mubr.msk.bf16.gmra.mrb[32].mxu0 %vm2647_vm0, %v16035_v20 }
 0x157   : > { %12857 = vmatprep.mubr.msk.bf16.mxu0 %vm2647_vm0, %v16038_v21 }
 0x15e   : > { %12858 = vmatmul.mubr.msk.bf16.gmra.mrb[36].mxu0 %vm2647_vm0, %v16045_v22 }
 0x15f   : > { %12861 = vmatprep.mubr.msk.bf16.mxu0 %vm2647_vm0, %v16048_v23 }
 0x166   : > { %12862 = vmatmul.mubr.msk.bf16.gmra.mrb[40].mxu0 %vm2647_vm0, %v16055_v24 }
 0x167   : > { %12865 = vmatprep.mubr.msk.bf16.mxu0 %vm2647_vm0, %v16058_v25 }
 0x16e   : > { %12866 = vmatmul.mubr.msk.bf16.gmra.mrb[44].mxu0 %vm2647_vm0, %v16065_v26 }
 0x16f   : > { %12869 = vmatprep.mubr.msk.bf16.mxu0 %vm2647_vm0, %v16068_v27 }
 0x176   : > { %12870 = vmatmul.mubr.msk.bf16.gmra.mrb[48].mxu0 %vm2647_vm0, %v16075_v28 }
 0x177   : > { %12873 = vmatprep.mubr.msk.bf16.mxu0 %vm2647_vm0, %v16078_v29 }
 0x17e   : > { %12874 = vmatmul.mubr.msk.bf16.gmra.mrb[52].mxu0 %vm2647_vm0, %v16085_v30 }
 0x17f   : > { %12877 = vmatprep.mubr.msk.bf16.mxu0 %vm2647_vm0, %v16088_v31 }
 0x186   : > { %12878 = vmatmul.mubr.msk.bf16.gmra.mrb[56].mxu0 %vm2647_vm0, %v16095_v32 }
 0x187   : > { %12881 = vmatprep.mubr.msk.bf16.mxu0 %vm2647_vm0, %v16098_v33 }
 0x18e   : > { %12882 = vmatmul.mubr.msk.bf16.gmra.mrb[60].mxu0 %vm2647_vm0, %v16105_v34 }
 0x18f   : > { %12885 = vmatprep.mubr.msk.bf16.mxu0 %vm2647_vm0, %v16108_v35 }
 0x196   : > { %12886 = vmatmul.mubr.msk.bf16.gmra.mrb[64].mxu0 %vm2647_vm0, %v16117_v38 }
 0x197   : > { %12889 = vmatprep.mubr.msk.bf16.mxu0 %vm2647_vm0, %v16120_v39 }
 0x19e   : > { %12890 = vmatmul.mubr.msk.bf16.gmra.mrb[68].mxu0 %vm2647_vm0, %v16127_v40 }
 0x19f   : > { %12893 = vmatprep.mubr.msk.bf16.mxu0 %vm2647_vm0, %v16130_v41 }
 0x1a6   : > { %12894 = vmatmul.mubr.msk.bf16.gmra.mrb[72].mxu0 %vm2647_vm0, %v16137_v42 }
 0x1a7   : > { %12897 = vmatprep.mubr.msk.bf16.mxu0 %vm2647_vm0, %v16140_v43 }
 0x1ae   : > { %12898 = vmatmul.mubr.msk.bf16.gmra.mrb[76].mxu0 %vm2647_vm0, %v16147_v44 }
 0x1af   : > { %12901 = vmatprep.mubr.msk.bf16.mxu0 %vm2647_vm0, %v16150_v45 }
 0x1b6   : > { %12902 = vmatmul.mubr.msk.bf16.gmra.mrb[80].mxu0 %vm2647_vm0, %v16157_v46 }
 0x1b7   : > { %12905 = vmatprep.mubr.msk.bf16.mxu0 %vm2647_vm0, %v16160_v47 }
 0x1be   : > { %12906 = vmatmul.mubr.msk.bf16.gmra.mrb[84].mxu0 %vm2647_vm0, %v16167_v48 }
 0x1bf   : > { %12909 = vmatprep.mubr.msk.bf16.mxu0 %vm2647_vm0, %v16170_v49 }
 0x1c6   : > { %12910 = vmatmul.mubr.msk.bf16.gmra.mrb[88].mxu0 %vm2647_vm0, %v16177_v50 }
 0x1c7   : > { %12913 = vmatprep.mubr.msk.bf16.mxu0 %vm2647_vm0, %v16180_v51 }
 0x1ce   : > { %12914 = vmatmul.mubr.msk.bf16.gmra.mrb[92].mxu0 %vm2647_vm0, %v16187_v52 }
 0x1cf   : > { %12917 = vmatprep.mubr.msk.bf16.mxu0 %vm2647_vm0, %v16190_v53 }
 0x1d6   : > { %12918 = vmatmul.mubr.msk.bf16.gmra.mrb[96].mxu0 %vm2647_vm0, %v16197_v54 }
 0x1d7   : > { %12921 = vmatprep.mubr.msk.bf16.mxu0 %vm2647_vm0, %v16200_v55 }
 0x1de   : > { %12922 = vmatmul.mubr.msk.bf16.gmra.mrb[100].mxu0 %vm2647_vm0, %v16207_v56 }
 0x1df   : > { %12925 = vmatprep.mubr.msk.bf16.mxu0 %vm2647_vm0, %v16210_v57 }
 0x1e6   : > { %12926 = vmatmul.mubr.msk.bf16.gmra.mrb[104].mxu0 %vm2647_vm0, %v16217_v58 }
 0x1e7   : > { %12929 = vmatprep.mubr.msk.bf16.mxu0 %vm2647_vm0, %v16220_v59 }
 0x1ee   : > { %12930 = vmatmul.mubr.msk.bf16.gmra.mrb[108].mxu0 %vm2647_vm0, %v16227_v60 }
 0x1ef   : > { %12933 = vmatprep.mubr.msk.bf16.mxu0 %vm2647_vm0, %v14974_v61  ;;  %v14997_v61 = vld [vmem:[%s15986_s2 + $0xa8] sm:$0xff]  }
 0x1f6   : > { %12934 = vmatmul.mubr.msk.bf16.gmra.mrb[112].mxu0 %vm2647_vm0, %v14975_v62  ;;  %v14998_v62 = vld [vmem:[%s15986_s2 + $0xb0] sm:$0xff]  }
 0x1f7   : > { %12937 = vmatprep.mubr.msk.bf16.mxu0 %vm2647_vm0, %v14976_v63  ;;  %v14999_v63 = vld [vmem:[%s15986_s2 + $0xb8] sm:$0xff]  }
 0x1fe   : > { %12938 = vmatmul.mubr.msk.bf16.gmra.mrb[116].mxu0 %vm2647_vm0, %v14977_v0  ;;  %v15000_v0 = vld [vmem:[%s15986_s2 + $0x100] sm:$0xff]  }
 0x1ff   : > { %12941 = vmatprep.mubr.msk.bf16.mxu0 %vm2647_vm0, %v14978_v1  ;;  %v15001_v1 = vld [vmem:[%s15986_s2 + $0x108] sm:$0xff]  }
 0x206   : > { %12942 = vmatmul.mubr.msk.bf16.gmra.mrb[120].mxu0 %vm2647_vm0, %v14979_v2  ;;  %v15002_v2 = vld [vmem:[%s15986_s2 + $0x110] sm:$0xff]  }
 0x207   : > { %12945 = vmatprep.mubr.msk.bf16.mxu0 %vm2647_vm0, %v14980_v3  ;;  %v15003_v3 = vld [vmem:[%s15986_s2 + $0x118] sm:$0xff]  }
 0x20e   : > { %12946 = vmatmul.mubr.msk.bf16.gmra.mrb[124].mxu0 %vm2647_vm0, %v14981_v4  ;;  %v15004_v4 = vld [vmem:[%s15986_s2 + $0x120] sm:$0xff]  }
 0x20f   : > { %12953 = vmatprep.mubr.msk.bf16.mxu0 %vm2647_vm0, %v14984_v5  ;;  %v15005_v5 = vld [vmem:[%s15986_s2 + $0x128] sm:$0xff]  }
 0x216   : > { %12954 = vmatmul.mubr.msk.bf16.vlgmr.msra.gmra.mrb[0].mxu0 %vm2647_vm0, %v14985_v6  ;;  %v15006_v6 = vld [vmem:[%s15986_s2 + $0x130] sm:$0xff]  }
 0x217   : > { %12957 = vmatprep.mubr.msk.bf16.mxu0 %vm2647_vm0, %v14986_v7  ;;  %v15007_v7 = vld [vmem:[%s15986_s2 + $0x138] sm:$0xff]  }
 0x21e   : > { %12958 = vmatmul.mubr.msk.bf16.gmra.mrb[4].mxu0 %vm2647_vm0, %v14987_v8  ;;  %v15008_v8 = vld [vmem:[%s15986_s2 + $0x180] sm:$0xff]  }
 0x21f   : > { %12961 = vmatprep.mubr.msk.bf16.mxu0 %vm2647_vm0, %v14988_v9  ;;  %v15009_v9 = vld [vmem:[%s15986_s2 + $0x188] sm:$0xff]  }
 0x226   : > { %12962 = vmatmul.mubr.msk.bf16.gmra.mrb[8].mxu0 %vm2647_vm0, %v14989_v10  ;;  %v15010_v10 = vld [vmem:[%s15986_s2 + $0x190] sm:$0xff]  }
 0x227   : > { %12965 = vmatprep.mubr.msk.bf16.mxu0 %vm2647_vm0, %v14990_v11  ;;  %v15011_v11 = vld [vmem:[%s15986_s2 + $0x198] sm:$0xff]  }
 0x22e   : > { %12966 = vmatmul.mubr.msk.bf16.gmra.mrb[12].mxu0 %vm2647_vm0, %v14991_v12  ;;  %v15012_v12 = vld [vmem:[%s15986_s2 + $0x1a0] sm:$0xff]  }
 0x22f   : > { %12969 = vmatprep.mubr.msk.bf16.mxu0 %vm2647_vm0, %v14992_v13  ;;  %v15013_v13 = vld [vmem:[%s15986_s2 + $0x1a8] sm:$0xff]  }
 0x236   : > { %12970 = vmatmul.mubr.msk.bf16.gmra.mrb[16].mxu0 %vm2647_vm0, %v14993_v14  ;;  %v15014_v14 = vld [vmem:[%s15986_s2 + $0x1b0] sm:$0xff]  }
 0x237   : > { %12973 = vmatprep.mubr.msk.bf16.mxu0 %vm2647_vm0, %v14994_v15  ;;  %v15015_v15 = vld [vmem:[%s15986_s2 + $0x1b8] sm:$0xff]  }
 0x23e   : > { %12974 = vmatmul.mubr.msk.bf16.gmra.mrb[20].mxu0 %vm2647_vm0, %v14995_v36  ;;  %v15016_v36 = vld [vmem:[%s15986_s2 + $0x200] sm:$0xff]  }
 0x23f   : > { %12977 = vmatprep.mubr.msk.bf16.mxu0 %vm2647_vm0, %v14996_v37  ;;  %v15048_v37 = vld [vmem:[%s18203_s3] sm:$0xff]  }
 0x240   : > { %13081 = vmatprep.subr.bf16.mxu0 %v15048_v37 }
 0x241   : > { %13082 = vmatpush3.bf16.msra.mxu0 %v15048_v37  ;;  %v15035_v37 = vld [vmem:[%s15986_s2 + $0x318] sm:$0xff]  }
 0x246   : > { %12978 = vmatmul.mubr.msk.bf16.gmra.mrb[24].mxu0 %vm2647_vm0, %v14997_v61  ;;  %v15049_v61 = vld [vmem:[%s18203_s3 + $0x8] sm:$0xff]   ;;  %s18356_s3 = sld [smem:[#allocation10_spill]] }
 0x247   : > { %12981 = vmatprep.mubr.msk.bf16.mxu0 %vm2647_vm0, %v14998_v62  ;;  %13083 = vmatprep.subr.bf16.mxu0 %v15049_v61  ;;  %v18117_v62 = vmov 0  }
 0x248   : > { %14914 = vset.pattern.permute.xlu1 %v18117_v62  ;;  %13084 = vmatpush3.bf16.msra.mxu0 %v15049_v61  ;;  %v15036_v61 = vld [vmem:[%s15986_s2 + $0x320] sm:$0xff]  }
 0x24e   : > { %12982 = vmatmul.mubr.msk.bf16.gmra.mrb[28].mxu0 %vm2647_vm0, %v14999_v63  ;;  %v15017_v63 = vld [vmem:[%s15986_s2 + $0x208] sm:$0xff]  }
 0x24f   : > { %12985 = vmatprep.mubr.msk.bf16.mxu0 %vm2647_vm0, %v15000_v0  ;;  %v15018_v0 = vld [vmem:[%s15986_s2 + $0x210] sm:$0xff]  }
 0x256   : > { %12986 = vmatmul.mubr.msk.bf16.gmra.mrb[32].mxu0 %vm2647_vm0, %v15001_v1  ;;  %v15019_v1 = vld [vmem:[%s15986_s2 + $0x218] sm:$0xff]  }
 0x257   : > { %12989 = vmatprep.mubr.msk.bf16.mxu0 %vm2647_vm0, %v15002_v2  ;;  %v15020_v2 = vld [vmem:[%s15986_s2 + $0x220] sm:$0xff]  }
 0x25e   : > { %12990 = vmatmul.mubr.msk.bf16.gmra.mrb[36].mxu0 %vm2647_vm0, %v15003_v3  ;;  %v15021_v3 = vld [vmem:[%s15986_s2 + $0x228] sm:$0xff]  }
 0x25f   : > { %12993 = vmatprep.mubr.msk.bf16.mxu0 %vm2647_vm0, %v15004_v4  ;;  %v15022_v4 = vld [vmem:[%s15986_s2 + $0x230] sm:$0xff]  }
 0x266   : > { %12994 = vmatmul.mubr.msk.bf16.gmra.mrb[40].mxu0 %vm2647_vm0, %v15005_v5  ;;  %v15023_v5 = vld [vmem:[%s15986_s2 + $0x238] sm:$0xff]  }
 0x267   : > { %12997 = vmatprep.mubr.msk.bf16.mxu0 %vm2647_vm0, %v15006_v6  ;;  %v15024_v6 = vld [vmem:[%s15986_s2 + $0x280] sm:$0xff]  }
 0x26e   : > { %12998 = vmatmul.mubr.msk.bf16.gmra.mrb[44].mxu0 %vm2647_vm0, %v15007_v7  ;;  %v15025_v7 = vld [vmem:[%s15986_s2 + $0x288] sm:$0xff]  }
 0x26f   : > { %13001 = vmatprep.mubr.msk.bf16.mxu0 %vm2647_vm0, %v15008_v8  ;;  %v15026_v8 = vld [vmem:[%s15986_s2 + $0x290] sm:$0xff]  }
 0x276   : > { %13002 = vmatmul.mubr.msk.bf16.gmra.mrb[48].mxu0 %vm2647_vm0, %v15009_v9  ;;  %v15027_v9 = vld [vmem:[%s15986_s2 + $0x298] sm:$0xff]  }
 0x277   : > { %13005 = vmatprep.mubr.msk.bf16.mxu0 %vm2647_vm0, %v15010_v10  ;;  %v15028_v10 = vld [vmem:[%s15986_s2 + $0x2a0] sm:$0xff]  }
 0x27e   : > { %13006 = vmatmul.mubr.msk.bf16.gmra.mrb[52].mxu0 %vm2647_vm0, %v15011_v11  ;;  %v15029_v11 = vld [vmem:[%s15986_s2 + $0x2a8] sm:$0xff]  }
 0x27f   : > { %13009 = vmatprep.mubr.msk.bf16.mxu0 %vm2647_vm0, %v15012_v12  ;;  %v15030_v12 = vld [vmem:[%s15986_s2 + $0x2b0] sm:$0xff]  }
 0x286   : > { %13010 = vmatmul.mubr.msk.bf16.gmra.mrb[56].mxu0 %vm2647_vm0, %v15013_v13  ;;  %v15031_v13 = vld [vmem:[%s15986_s2 + $0x2b8] sm:$0xff]  }
 0x287   : > { %13013 = vmatprep.mubr.msk.bf16.mxu0 %vm2647_vm0, %v15014_v14  ;;  %v15032_v14 = vld [vmem:[%s15986_s2 + $0x300] sm:$0xff]  }
 0x28e   : > { %13014 = vmatmul.mubr.msk.bf16.gmra.mrb[60].mxu0 %vm2647_vm0, %v15015_v15  ;;  %v15033_v15 = vld [vmem:[%s15986_s2 + $0x308] sm:$0xff]  }
 0x28f   : > { %13017 = vmatprep.mubr.msk.bf16.mxu0 %vm2647_vm0, %v15016_v36  ;;  %v15034_v36 = vld [vmem:[%s15986_s2 + $0x310] sm:$0xff]  }
 0x296   : > { %13018 = vmatmul.mubr.msk.bf16.gmra.mrb[64].mxu0 %vm2647_vm0, %v15017_v63  ;;  %v15037_v63 = vld [vmem:[%s15986_s2 + $0x328] sm:$0xff]  }
 0x297   : > { %13021 = vmatprep.mubr.msk.bf16.mxu0 %vm2647_vm0, %v15018_v0  ;;  %v15038_v0 = vld [vmem:[%s15986_s2 + $0x330] sm:$0xff]  }
 0x29e   : > { %13022 = vmatmul.mubr.msk.bf16.gmra.mrb[68].mxu0 %vm2647_vm0, %v15019_v1  ;;  %v15039_v1 = vld [vmem:[%s15986_s2 + $0x338] sm:$0xff]  }
 0x29f   : > { %13025 = vmatprep.mubr.msk.bf16.mxu0 %vm2647_vm0, %v15020_v2  ;;  %v15040_v2 = vld [vmem:[%s15986_s2 + $0x380] sm:$0xff]  }
 0x2a6   : > { %13026 = vmatmul.mubr.msk.bf16.gmra.mrb[72].mxu0 %vm2647_vm0, %v15021_v3  ;;  %v15041_v3 = vld [vmem:[%s15986_s2 + $0x388] sm:$0xff]  }
 0x2a7   : > { %13029 = vmatprep.mubr.msk.bf16.mxu0 %vm2647_vm0, %v15022_v4  ;;  %v15042_v4 = vld [vmem:[%s15986_s2 + $0x390] sm:$0xff]  }
 0x2ae   : > { %13030 = vmatmul.mubr.msk.bf16.gmra.mrb[76].mxu0 %vm2647_vm0, %v15023_v5  ;;  %v15043_v5 = vld [vmem:[%s15986_s2 + $0x398] sm:$0xff]  }
 0x2af   : > { %13033 = vmatprep.mubr.msk.bf16.mxu0 %vm2647_vm0, %v15024_v6  ;;  %v15044_v6 = vld [vmem:[%s15986_s2 + $0x3a0] sm:$0xff]  }
 0x2b6   : > { %13034 = vmatmul.mubr.msk.bf16.gmra.mrb[80].mxu0 %vm2647_vm0, %v15025_v7  ;;  %v15045_v7 = vld [vmem:[%s15986_s2 + $0x3a8] sm:$0xff]  }
 0x2b7   : > { %13037 = vmatprep.mubr.msk.bf16.mxu0 %vm2647_vm0, %v15026_v8  ;;  %v15046_v8 = vld [vmem:[%s15986_s2 + $0x3b0] sm:$0xff]  }
 0x2be   : > { %13038 = vmatmul.mubr.msk.bf16.gmra.mrb[84].mxu0 %vm2647_vm0, %v15027_v9  ;;  %v15047_v9 = vld [vmem:[%s15986_s2 + $0x3b8] sm:$0xff]  }
 0x2bf   : > { %13041 = vmatprep.mubr.msk.bf16.mxu0 %vm2647_vm0, %v15028_v10  ;;  %v15127_v10 = vld [vmem:[%s15986_s2 + $0x40] sm:$0xff]  }
 0x2c6   : > { %13042 = vmatmul.mubr.msk.bf16.gmra.mrb[88].mxu0 %vm2647_vm0, %v15029_v11  ;;  %v15128_v11 = vld [vmem:[%s15986_s2 + $0x48] sm:$0xff]  }
 0x2c7   : > { %13045 = vmatprep.mubr.msk.bf16.mxu0 %vm2647_vm0, %v15030_v12  ;;  %v15129_v12 = vld [vmem:[%s15986_s2 + $0x50] sm:$0xff]  }
 0x2ce   : > { %13046 = vmatmul.mubr.msk.bf16.gmra.mrb[92].mxu0 %vm2647_vm0, %v15031_v13  ;;  %v15130_v13 = vld [vmem:[%s15986_s2 + $0x58] sm:$0xff]  }
 0x2cf   : > { %13049 = vmatprep.mubr.msk.bf16.mxu0 %vm2647_vm0, %v15032_v14  ;;  %v15131_v14 = vld [vmem:[%s15986_s2 + $0x60] sm:$0xff]  }
 0x2d6   : > { %13050 = vmatmul.mubr.msk.bf16.gmra.mrb[96].mxu0 %vm2647_vm0, %v15033_v15  ;;  %v15132_v15 = vld [vmem:[%s15986_s2 + $0x68] sm:$0xff]  }
 0x2d7   : > { %13053 = vmatprep.mubr.msk.bf16.mxu0 %vm2647_vm0, %v15034_v36  ;;  %v15133_v36 = vld [vmem:[%s15986_s2 + $0x70] sm:$0xff]  }
 0x2de   : > { %13054 = vmatmul.mubr.msk.bf16.gmra.mrb[100].mxu0 %vm2647_vm0, %v15035_v37  ;;  %v15134_v37 = vld [vmem:[%s15986_s2 + $0x78] sm:$0xff]  }
 0x2df   : > { %13057 = vmatprep.mubr.msk.bf16.mxu0 %vm2647_vm0, %v15036_v61  ;;  %v15135_v61 = vld [vmem:[%s15986_s2 + $0xc0] sm:$0xff]  }
 0x2e6   : > { %13058 = vmatmul.mubr.msk.bf16.gmra.mrb[104].mxu0 %vm2647_vm0, %v15037_v63  ;;  %v15136_v63 = vld [vmem:[%s15986_s2 + $0xc8] sm:$0xff]  }
 0x2e7   : > { %13061 = vmatprep.mubr.msk.bf16.mxu0 %vm2647_vm0, %v15038_v0  ;;  %v15137_v0 = vld [vmem:[%s15986_s2 + $0xd0] sm:$0xff]  }
 0x2ee   : > { %13062 = vmatmul.mubr.msk.bf16.gmra.mrb[108].mxu0 %vm2647_vm0, %v15039_v1  ;;  %v15138_v1 = vld [vmem:[%s15986_s2 + $0xd8] sm:$0xff]  }
 0x2ef   : > { %13065 = vmatprep.mubr.msk.bf16.mxu0 %vm2647_vm0, %v15040_v2  ;;  %v15139_v2 = vld [vmem:[%s15986_s2 + $0xe0] sm:$0xff]   ;;  %s18172_s2 = smov 127  }
 0x2f6   : > { %13066 = vmatmul.mubr.msk.bf16.gmra.mrb[112].mxu0 %vm2647_vm0, %v15041_v3 }
 0x2f7   : > { %13069 = vmatprep.mubr.msk.bf16.mxu0 %vm2647_vm0, %v15042_v4 }
 0x2fe   : > { %13070 = vmatmul.mubr.msk.bf16.gmra.mrb[116].mxu0 %vm2647_vm0, %v15043_v5 }
 0x2ff   : > { %13073 = vmatprep.mubr.msk.bf16.mxu0 %vm2647_vm0, %v15044_v6 }
 0x306   : > { %13074 = vmatmul.mubr.msk.bf16.gmra.mrb[120].mxu0 %vm2647_vm0, %v15045_v7 }
 0x307   : > { %13077 = vmatprep.mubr.msk.bf16.mxu0 %vm2647_vm0, %v15046_v8 }
 0x30e   : > { %13078 = vmatmul.mubr.msk.bf16.gmra.mrb[124].mxu0 %vm2647_vm0, %v15047_v9 }
 0x30f   : > { %13085 = vmatprep.mubr.bf16.mxu0 %v18117_v62 }
 0x316   : > { %13086 = vmatmul.mubr.bf16.vlgmr.msra.gmra.mrb[0].mxu0 %v18117_v62 }
 0x317   : > { %13089 = vmatprep.mubr.bf16.mxu0 %v18117_v62 }
 0x31e   : > { %13090 = vmatmul.mubr.bf16.gmra.mrb[4].mxu0 %v18117_v62 }
 0x31f   : > { %13093 = vmatprep.mubr.bf16.mxu0 %v18117_v62 }
 0x326   : > { %13094 = vmatmul.mubr.bf16.gmra.mrb[8].mxu0 %v18117_v62 }
 0x327   : > { %13097 = vmatprep.mubr.bf16.mxu0 %v18117_v62 }
 0x32e   : > { %13098 = vmatmul.mubr.bf16.gmra.mrb[12].mxu0 %v18117_v62 }
 0x32f   : > { %13101 = vmatprep.mubr.msk.bf16.mxu0 %vm2647_vm0, %v15127_v10 }
 0x336   : > { %13102 = vmatmul.mubr.msk.bf16.gmra.mrb[16].mxu0 %vm2647_vm0, %v15128_v11 }
 0x337   : > { %13105 = vmatprep.mubr.msk.bf16.mxu0 %vm2647_vm0, %v15129_v12 }
 0x33e   : > { %13106 = vmatmul.mubr.msk.bf16.gmra.mrb[20].mxu0 %vm2647_vm0, %v15130_v13 }
 0x33f   : > { %13109 = vmatprep.mubr.msk.bf16.mxu0 %vm2647_vm0, %v15131_v14 }
 0x346   : > { %13110 = vmatmul.mubr.msk.bf16.gmra.mrb[24].mxu0 %vm2647_vm0, %v15132_v15 }
 0x347   : > { %13113 = vmatprep.mubr.msk.bf16.mxu0 %vm2647_vm0, %v15133_v36 }
 0x34e   : > { %13114 = vmatmul.mubr.msk.bf16.gmra.mrb[28].mxu0 %vm2647_vm0, %v15134_v37 }
 0x34f   : > { %13117 = vmatprep.mubr.msk.bf16.mxu0 %vm2647_vm0, %v15135_v61 }
 0x356   : > { %13118 = vmatmul.mubr.msk.bf16.gmra.mrb[32].mxu0 %vm2647_vm0, %v15136_v63 }
 0x357   : > { %13121 = vmatprep.mubr.msk.bf16.mxu0 %vm2647_vm0, %v15137_v0 }
 0x35e   : > { %13122 = vmatmul.mubr.msk.bf16.gmra.mrb[36].mxu0 %vm2647_vm0, %v15138_v1 }
 0x35f   : > { %13125 = vmatprep.mubr.msk.bf16.mxu0 %vm2647_vm0, %v15139_v2 }
 0x366   : > { %13126 = vmatmul.mubr.msk.bf16.gmra.mrb[40].mxu0 %vm2647_vm0, %v16015_v16  ;;  %v15050_v16 = vld [vmem:[%s15299_s14 + $0x20] sm:$0xff]  }
 0x367   : > { %13129 = vmatprep.mubr.msk.bf16.mxu0 %vm2647_vm0, %v16018_v17  ;;  %13213 = vmatprep.subr.bf16.mxu1 %v15050_v16  ;;  %v15051_v17 = vld [vmem:[%s15299_s14 + $0x28] sm:$0xff]  }
 0x368   : > { %13214 = vmatpush3.bf16.msra.mxu1 %v15050_v16 }
 0x369   : > { %13215 = vmatprep.subr.bf16.mxu1 %v15051_v17 }
 0x36c   : > { %13216 = vmatpush3.bf16.msra.mxu1 %v15051_v17 }
 0x36e   : > { %13130 = vmatmul.mubr.msk.bf16.gmra.mrb[44].mxu0 %vm2647_vm0, %v16025_v18  ;;  %v16481_v18 = vld [vmem:[%s18200_s8] ss:$0 sm:$0xff] }
 0x36f   : > { %13133 = vmatprep.mubr.msk.bf16.mxu0 %vm2647_vm0, %v16028_v19 }
 0x376   : > { %13134 = vmatmul.mubr.msk.bf16.gmra.mrb[48].mxu0 %vm2647_vm0, %v16035_v20 }
 0x377   : > { %13137 = vmatprep.mubr.msk.bf16.mxu0 %vm2647_vm0, %v16038_v21 }
 0x37e   : > { %13138 = vmatmul.mubr.msk.bf16.gmra.mrb[52].mxu0 %vm2647_vm0, %v16045_v22 }
 0x37f   : > { %13141 = vmatprep.mubr.msk.bf16.mxu0 %vm2647_vm0, %v16048_v23 }
 0x386   : > { %13142 = vmatmul.mubr.msk.bf16.gmra.mrb[56].mxu0 %vm2647_vm0, %v16055_v24 }
 0x387   : > { %13145 = vmatprep.mubr.msk.bf16.mxu0 %vm2647_vm0, %v16058_v25 }
 0x38e   : > { %13146 = vmatmul.mubr.msk.bf16.gmra.mrb[60].mxu0 %vm2647_vm0, %v16065_v26 }
 0x38f   : > { %13149 = vmatprep.mubr.msk.bf16.mxu0 %vm2647_vm0, %v16068_v27 }
 0x396   : > { %13150 = vmatmul.mubr.msk.bf16.gmra.mrb[64].mxu0 %vm2647_vm0, %v16075_v28 }
 0x397   : > { %13153 = vmatprep.mubr.msk.bf16.mxu0 %vm2647_vm0, %v16078_v29 }
 0x39e   : > { %13154 = vmatmul.mubr.msk.bf16.gmra.mrb[68].mxu0 %vm2647_vm0, %v16085_v30 }
 0x39f   : > { %13157 = vmatprep.mubr.msk.bf16.mxu0 %vm2647_vm0, %v16088_v31 }
 0x3a6   : > { %13158 = vmatmul.mubr.msk.bf16.gmra.mrb[72].mxu0 %vm2647_vm0, %v16095_v32 }
 0x3a7   : > { %13161 = vmatprep.mubr.msk.bf16.mxu0 %vm2647_vm0, %v16098_v33 }
 0x3ae   : > { %13162 = vmatmul.mubr.msk.bf16.gmra.mrb[76].mxu0 %vm2647_vm0, %v16105_v34 }
 0x3af   : > { %13165 = vmatprep.mubr.msk.bf16.mxu0 %vm2647_vm0, %v16108_v35 }
 0x3b6   : > { %13166 = vmatmul.mubr.msk.bf16.gmra.mrb[80].mxu0 %vm2647_vm0, %v16117_v38 }
 0x3b7   : > { %13169 = vmatprep.mubr.msk.bf16.mxu0 %vm2647_vm0, %v16120_v39 }
 0x3be   : > { %13170 = vmatmul.mubr.msk.bf16.gmra.mrb[84].mxu0 %vm2647_vm0, %v16127_v40 }
 0x3bf   : > { %13173 = vmatprep.mubr.msk.bf16.mxu0 %vm2647_vm0, %v16130_v41 }
 0x3c6   : > { %13174 = vmatmul.mubr.msk.bf16.gmra.mrb[88].mxu0 %vm2647_vm0, %v16137_v42 }
 0x3c7   : > { %13177 = vmatprep.mubr.msk.bf16.mxu0 %vm2647_vm0, %v16140_v43 }
 0x3ce   : > { %13178 = vmatmul.mubr.msk.bf16.gmra.mrb[92].mxu0 %vm2647_vm0, %v16147_v44 }
 0x3cf   : > { %13181 = vmatprep.mubr.msk.bf16.mxu0 %vm2647_vm0, %v16150_v45 }
 0x3d6   : > { %13182 = vmatmul.mubr.msk.bf16.gmra.mrb[96].mxu0 %vm2647_vm0, %v16157_v46 }
 0x3d7   : > { %13185 = vmatprep.mubr.msk.bf16.mxu0 %vm2647_vm0, %v16160_v47 }
 0x3de   : > { %13186 = vmatmul.mubr.msk.bf16.gmra.mrb[100].mxu0 %vm2647_vm0, %v16167_v48 }
 0x3df   : > { %13189 = vmatprep.mubr.msk.bf16.mxu0 %vm2647_vm0, %v16170_v49 }
 0x3e6   : > { %13190 = vmatmul.mubr.msk.bf16.gmra.mrb[104].mxu0 %vm2647_vm0, %v16177_v50 }
 0x3e7   : > { %13193 = vmatprep.mubr.msk.bf16.mxu0 %vm2647_vm0, %v16180_v51 }
 0x3e9   : > { %v13087_v19 = vpop.f32.mrb[0].mxu0 }
 0x3ea   : > { %v14147_v20 = vadd.f32 %v13087_v19, %v16481_v18  ;;  %v4642_v21 = vpop.f32.mrb[1].mxu0 }
 0x3eb   : > { %v14148_v22 = vadd.f32 %v16481_v18, %v4642_v21  ;;  %v13088_v23 = vpop.f32.mrb[2].mxu0 }
 0x3ec   : > { %v5411_v24 = vmul.f32 0.02, %v14147_v20  ;;  %v14149_v25 = vadd.f32 %v13088_v23, %v16481_v18  ;;  %v4645_v26 = vpop.f32.mrb[3].mxu0  ;;  %vm5283_vm1 = vcmp.ge.f32.partialorder %v14147_v20, 0.0 }
 0x3ed   : > { %v5409_v27 = vmul.f32 0.02, %v14148_v22  ;;  %v14150_v28 = vadd.f32 %v16481_v18, %v4645_v26  ;;  %vm5281_vm2 = vcmp.ge.f32.partialorder %v14148_v22, 0.0 }
 0x3ee   : > { %vm5284_vm3 = vcmp.ge.f32.partialorder %v14149_v25, 0.0  ;;  %v5412_v29 = vmul.f32 0.02, %v14149_v25  ;;  %13194 = vmatmul.mubr.msk.bf16.gmra.mrb[108].mxu0 %vm2647_vm0, %v16187_v52  ;;  %v16493_v31 = vsel %vm5283_vm1, %v14147_v20, %v5411_v24 }
 0x3ef   : > { %vm5282_vm4 = vcmp.ge.f32.partialorder %v14150_v28, 0.0  ;;  %v5410_v30 = vmul.f32 0.02, %v14150_v28  ;;  %13197 = vmatprep.mubr.msk.bf16.mxu0 %vm2647_vm0, %v16190_v53  ;;  %v16497_v33 = vsel %vm5281_vm2, %v14148_v22, %v5409_v27 }
 0x3f0   : > { %v16495_v32 = vsel %vm5284_vm3, %v14149_v25, %v5412_v29 }
 0x3f1   : > { %v16501_v35 = vsel %vm5282_vm4, %v14150_v28, %v5410_v30  ;;  %v13091_v38 = vpop.f32.mrb[4].mxu0 }
 0x3f2   : > { %v14151_v40 = vadd.f32 %v13091_v38, %v16481_v18  ;;  %v4658_v41 = vpop.f32.mrb[5].mxu0 }
 0x3f3   : > { %v14152_v42 = vadd.f32 %v16481_v18, %v4658_v41  ;;  %v13092_v43 = vpop.f32.mrb[6].mxu0 }
 0x3f4   : > { %v5415_v44 = vmul.f32 0.02, %v14151_v40  ;;  %v14153_v45 = vadd.f32 %v13092_v43, %v16481_v18  ;;  %v4661_v46 = vpop.f32.mrb[7].mxu0  ;;  %vm5287_vm5 = vcmp.ge.f32.partialorder %v14151_v40, 0.0 }
 0x3f5   : > { %v5413_v47 = vmul.f32 0.02, %v14152_v42  ;;  %v14154_v48 = vadd.f32 %v16481_v18, %v4661_v46  ;;  %vm5285_vm6 = vcmp.ge.f32.partialorder %v14152_v42, 0.0 }
 0x3f6   : > { %vm5288_vm7 = vcmp.ge.f32.partialorder %v14153_v45, 0.0  ;;  %v5416_v49 = vmul.f32 0.02, %v14153_v45  ;;  %13198 = vmatmul.mubr.msk.bf16.gmra.mrb[112].mxu0 %vm2647_vm0, %v16197_v54  ;;  %v16513_v51 = vsel %vm5287_vm5, %v14151_v40, %v5415_v44 }
 0x3f7   : > { %vm5286_vm8 = vcmp.ge.f32.partialorder %v14154_v48, 0.0  ;;  %v5414_v50 = vmul.f32 0.02, %v14154_v48  ;;  %13201 = vmatprep.mubr.msk.bf16.mxu0 %vm2647_vm0, %v16200_v55  ;;  %v16517_v53 = vsel %vm5285_vm6, %v14152_v42, %v5413_v47 }
 0x3f8   : > { %v16515_v52 = vsel %vm5288_vm7, %v14153_v45, %v5416_v49 }
 0x3f9   : > { %v16521_v4 = vsel %vm5286_vm8, %v14154_v48, %v5414_v50  ;;  %v13095_v5 = vpop.f32.mrb[8].mxu0 }
 0x3fa   : > { %v14155_v6 = vadd.f32 %v13095_v5, %v16481_v18  ;;  %v4674_v7 = vpop.f32.mrb[9].mxu0 }
 0x3fb   : > { %v14156_v55 = vadd.f32 %v16481_v18, %v4674_v7  ;;  %v13096_v8 = vpop.f32.mrb[10].mxu0 }
 0x3fc   : > { %v5419_v9 = vmul.f32 0.02, %v14155_v6  ;;  %v14157_v10 = vadd.f32 %v13096_v8, %v16481_v18  ;;  %v4677_v11 = vpop.f32.mrb[11].mxu0  ;;  %vm5291_vm9 = vcmp.ge.f32.partialorder %v14155_v6, 0.0 }
 0x3fd   : > { %v5417_v12 = vmul.f32 0.02, %v14156_v55  ;;  %v14158_v13 = vadd.f32 %v16481_v18, %v4677_v11  ;;  %vm5289_vm10 = vcmp.ge.f32.partialorder %v14156_v55, 0.0 }
 0x3fe   : > { %vm5292_vm11 = vcmp.ge.f32.partialorder %v14157_v10, 0.0  ;;  %v5420_v14 = vmul.f32 0.02, %v14157_v10  ;;  %13202 = vmatmul.mubr.msk.bf16.gmra.mrb[116].mxu0 %vm2647_vm0, %v16207_v56  ;;  %v16533_v36 = vsel %vm5291_vm9, %v14155_v6, %v5419_v9 }
 0x3ff   : > { %vm5290_vm12 = vcmp.ge.f32.partialorder %v14158_v13, 0.0  ;;  %v5418_v15 = vmul.f32 0.02, %v14158_v13  ;;  %13205 = vmatprep.mubr.msk.bf16.mxu0 %vm2647_vm0, %v16210_v57  ;;  %v16537_v61 = vsel %vm5289_vm10, %v14156_v55, %v5417_v12 }
 0x400   : > { %v16535_v37 = vsel %vm5292_vm11, %v14157_v10, %v5420_v14 }
 0x401   : > { %v16541_v0 = vsel %vm5290_vm12, %v14158_v13, %v5418_v15  ;;  %v13099_v1 = vpop.f32.mrb[12].mxu0 }
 0x402   : > { %v14159_v2 = vadd.f32 %v13099_v1, %v16481_v18  ;;  %v4690_v16 = vpop.f32.mrb[13].mxu0 }
 0x403   : > { %v14160_v57 = vadd.f32 %v16481_v18, %v4690_v16  ;;  %v13100_v17 = vpop.f32.mrb[14].mxu0 }
 0x404   : > { %v5423_v19 = vmul.f32 0.02, %v14159_v2  ;;  %v14161_v20 = vadd.f32 %v13100_v17, %v16481_v18  ;;  %v4693_v21 = vpop.f32.mrb[15].mxu0  ;;  %vm5295_vm13 = vcmp.ge.f32.partialorder %v14159_v2, 0.0 }
 0x405   : > { %v5421_v22 = vmul.f32 0.02, %v14160_v57  ;;  %v14162_v23 = vadd.f32 %v16481_v18, %v4693_v21  ;;  %vm5293_vm14 = vcmp.ge.f32.partialorder %v14160_v57, 0.0 }
 0x406   : > { %vm5296_vm15 = vcmp.ge.f32.partialorder %v14161_v20, 0.0  ;;  %v5424_v24 = vmul.f32 0.02, %v14161_v20  ;;  %13206 = vmatmul.mubr.msk.bf16.gmra.mrb[120].mxu0 %vm2647_vm0, %v16217_v58  ;;  %v16553_v26 = vsel %vm5295_vm13, %v14159_v2, %v5423_v19 }
 0x407   : > { %vm5294_vm1 = vcmp.ge.f32.partialorder %v14162_v23, 0.0  ;;  %v5422_v25 = vmul.f32 0.02, %v14162_v23  ;;  %13209 = vmatprep.mubr.msk.bf16.mxu0 %vm2647_vm0, %v16220_v59  ;;  %v16557_v28 = vsel %vm5293_vm14, %v14160_v57, %v5421_v22 }
 0x408   : > { %v16555_v27 = vsel %vm5296_vm15, %v14161_v20, %v5424_v24 }
 0x409   : > { %v16561_v30 = vsel %vm5294_vm1, %v14162_v23, %v5422_v25  ;;  %v13103_v38 = vpop.f32.mrb[16].mxu0 }
 0x40a   : > { %v14163_v40 = vadd.f32 %v13103_v38, %v16481_v18  ;;  %v4706_v41 = vpop.f32.mrb[17].mxu0 }
 0x40b   : > { %v14164_v59 = vadd.f32 %v16481_v18, %v4706_v41  ;;  %v13104_v42 = vpop.f32.mrb[18].mxu0 }
 0x40c   : > { %v5427_v43 = vmul.f32 0.02, %v14163_v40  ;;  %v14165_v44 = vadd.f32 %v13104_v42, %v16481_v18  ;;  %v4709_v45 = vpop.f32.mrb[19].mxu0  ;;  %vm5299_vm2 = vcmp.ge.f32.partialorder %v14163_v40, 0.0 }
 0x40d   : > { %v5425_v46 = vmul.f32 0.02, %v14164_v59  ;;  %v14166_v47 = vadd.f32 %v16481_v18, %v4709_v45  ;;  %vm5297_vm4 = vcmp.ge.f32.partialorder %v14164_v59, 0.0 }
 0x40e   : > { %vm5300_vm3 = vcmp.ge.f32.partialorder %v14165_v44, 0.0  ;;  %v5428_v48 = vmul.f32 0.02, %v14165_v44  ;;  %13210 = vmatmul.mubr.msk.bf16.gmra.mrb[124].mxu0 %vm2647_vm0, %v16227_v60  ;;  %v5555_v50 = vsel %vm5299_vm2, %v14163_v40, %v5427_v43 }
 0x40f   : > { %v5426_v49 = vmul.f32 0.02, %v14166_v47  ;;  %vm5298_vm5 = vcmp.ge.f32.partialorder %v14166_v47, 0.0  ;;  %v5553_v55 = vsel %vm5297_vm4, %v14164_v59, %v5425_v46 }
 0x410   : > { %v5556_v5 = vsel %vm5300_vm3, %v14165_v44, %v5428_v48 }
 0x411   : > { %v16571_v6 = vpack.c.bf16 %v5556_v5, %v5555_v50  ;;  %v13107_v7 = vpop.f32.mrb[20].mxu0  ;;  %v5554_v8 = vsel %vm5298_vm5, %v14166_v47, %v5426_v49 }
 0x412   : > { %v14167_v9 = vadd.f32 %v13107_v7, %v16481_v18  ;;  %v4722_v10 = vpop.f32.mrb[21].mxu0  ;;  %v16574_v11 = vpack.c.bf16 %v5554_v8, %v5553_v55 }
 0x413   : > { %18207 = vst [vmem:[#allocation27_spill] sm:$0xff] %v16571_v6  ;;  %v14168_v12 = vadd.f32 %v16481_v18, %v4722_v10  ;;  %v13108_v13 = vpop.f32.mrb[22].mxu0 }
 0x414   : > { %18208 = vst [vmem:[#allocation28_spill] sm:$0xff] %v16574_v11  ;;  %v5431_v14 = vmul.f32 0.02, %v14167_v9  ;;  %v14169_v60 = vadd.f32 %v13108_v13, %v16481_v18  ;;  %v4725_v15 = vpop.f32.mrb[23].mxu0  ;;  %13217 = vmatprep.mubr.msk.bf16.mxu1 %vm2647_vm0, %v16574_v11  ;;  %vm5303_vm6 = vcmp.ge.f32.partialorder %v14167_v9, 0.0 }
 0x415   : > { %v5429_v1 = vmul.f32 0.02, %v14168_v12  ;;  %v14170_v2 = vadd.f32 %v16481_v18, %v4725_v15  ;;  %13218 = vmatmul.mubr.msk.bf16.vlgmr.msra.gmra.mrb[0].mxu1 %vm2647_vm0, %v16571_v6  ;;  %vm5301_vm7 = vcmp.ge.f32.partialorder %v14168_v12, 0.0 }
 0x416   : > { %vm5304_vm8 = vcmp.ge.f32.partialorder %v14169_v60, 0.0  ;;  %v5432_v16 = vmul.f32 0.02, %v14169_v60  ;;  %v5559_v17 = vsel %vm5303_vm6, %v14167_v9, %v5431_v14 }
 0x417   : > { %vm5302_vm9 = vcmp.ge.f32.partialorder %v14170_v2, 0.0  ;;  %v5430_v57 = vmul.f32 0.02, %v14170_v2  ;;  %v5557_v20 = vsel %vm5301_vm7, %v14168_v12, %v5429_v1 }
 0x418   : > { %v5560_v19 = vsel %vm5304_vm8, %v14169_v60, %v5432_v16 }
 0x419   : > { %v16583_v21 = vpack.c.bf16 %v5560_v19, %v5559_v17  ;;  %v5558_v22 = vsel %vm5302_vm9, %v14170_v2, %v5430_v57  ;;  %v13111_v23 = vpop.f32.mrb[24].mxu0 }
 0x41a   : > { %v16585_v24 = vpack.c.bf16 %v5558_v22, %v5557_v20  ;;  %v14171_v25 = vadd.f32 %v13111_v23, %v16481_v18  ;;  %v4738_v38 = vpop.f32.mrb[25].mxu0 }
 0x41b   : > { %18209 = vst [vmem:[#allocation29_spill] sm:$0xff] %v16583_v21  ;;  %v14172_v40 = vadd.f32 %v16481_v18, %v4738_v38  ;;  %v13112_v41 = vpop.f32.mrb[26].mxu0 }
 0x41c   : > { %18210 = vst [vmem:[#allocation30_spill] sm:$0xff] %v16585_v24  ;;  %v5435_v59 = vmul.f32 0.02, %v14171_v25  ;;  %v14173_v42 = vadd.f32 %v13112_v41, %v16481_v18  ;;  %v4741_v43 = vpop.f32.mrb[27].mxu0  ;;  %13221 = vmatprep.mubr.msk.bf16.mxu1 %vm2647_vm0, %v16585_v24  ;;  %vm5307_vm10 = vcmp.ge.f32.partialorder %v14171_v25, 0.0 }
 0x41d   : > { %v5433_v44 = vmul.f32 0.02, %v14172_v40  ;;  %v14174_v45 = vadd.f32 %v16481_v18, %v4741_v43  ;;  %13222 = vmatmul.mubr.msk.bf16.gmra.mrb[4].mxu1 %vm2647_vm0, %v16583_v21  ;;  %vm5305_vm11 = vcmp.ge.f32.partialorder %v14172_v40, 0.0 }
 0x41e   : > { %vm5308_vm12 = vcmp.ge.f32.partialorder %v14173_v42, 0.0  ;;  %v5436_v46 = vmul.f32 0.02, %v14173_v42  ;;  %v5563_v48 = vsel %vm5307_vm10, %v14171_v25, %v5435_v59 }
 0x41f   : > { %vm5306_vm13 = vcmp.ge.f32.partialorder %v14174_v45, 0.0  ;;  %v5434_v47 = vmul.f32 0.02, %v14174_v45  ;;  %v5561_v50 = vsel %vm5305_vm11, %v14172_v40, %v5433_v44 }
 0x420   : > { %v5564_v49 = vsel %vm5308_vm12, %v14173_v42, %v5436_v46 }
 0x421   : > { %v16595_v5 = vpack.c.bf16 %v5564_v49, %v5563_v48  ;;  %v5562_v7 = vsel %vm5306_vm13, %v14174_v45, %v5434_v47  ;;  %v13115_v55 = vpop.f32.mrb[28].mxu0 }
 0x422   : > { %v16597_v8 = vpack.c.bf16 %v5562_v7, %v5561_v50  ;;  %v14175_v9 = vadd.f32 %v13115_v55, %v16481_v18  ;;  %v4754_v10 = vpop.f32.mrb[29].mxu0 }
 0x423   : > { %18211 = vst [vmem:[#allocation31_spill] sm:$0xff] %v16595_v5  ;;  %v14176_v12 = vadd.f32 %v16481_v18, %v4754_v10  ;;  %v13116_v13 = vpop.f32.mrb[30].mxu0 }
 0x424   : > { %18212 = vst [vmem:[#allocation32_spill] sm:$0xff] %v16597_v8  ;;  %v5439_v14 = vmul.f32 0.02, %v14175_v9  ;;  %v14177_v60 = vadd.f32 %v13116_v13, %v16481_v18  ;;  %v4757_v15 = vpop.f32.mrb[31].mxu0  ;;  %13225 = vmatprep.mubr.msk.bf16.mxu1 %vm2647_vm0, %v16597_v8  ;;  %vm5311_vm14 = vcmp.ge.f32.partialorder %v14175_v9, 0.0 }
 0x425   : > { %v5437_v1 = vmul.f32 0.02, %v14176_v12  ;;  %v14178_v2 = vadd.f32 %v16481_v18, %v4757_v15  ;;  %13226 = vmatmul.mubr.msk.bf16.gmra.mrb[8].mxu1 %vm2647_vm0, %v16595_v5  ;;  %vm5309_vm15 = vcmp.ge.f32.partialorder %v14176_v12, 0.0 }
 0x426   : > { %vm5312_vm1 = vcmp.ge.f32.partialorder %v14177_v60, 0.0  ;;  %v5440_v16 = vmul.f32 0.02, %v14177_v60  ;;  %v5567_v17 = vsel %vm5311_vm14, %v14175_v9, %v5439_v14 }
 0x427   : > { %vm5310_vm2 = vcmp.ge.f32.partialorder %v14178_v2, 0.0  ;;  %v5438_v57 = vmul.f32 0.02, %v14178_v2  ;;  %v5565_v20 = vsel %vm5309_vm15, %v14176_v12, %v5437_v1 }
 0x428   : > { %v5568_v19 = vsel %vm5312_vm1, %v14177_v60, %v5440_v16 }
 0x429   : > { %v16607_v22 = vpack.c.bf16 %v5568_v19, %v5567_v17  ;;  %v5566_v23 = vsel %vm5310_vm2, %v14178_v2, %v5438_v57  ;;  %v13119_v25 = vpop.f32.mrb[32].mxu0 }
 0x42a   : > { %v16609_v38 = vpack.c.bf16 %v5566_v23, %v5565_v20  ;;  %v14179_v40 = vadd.f32 %v13119_v25, %v16481_v18  ;;  %v4770_v41 = vpop.f32.mrb[33].mxu0 }
 0x42b   : > { %18213 = vst [vmem:[#allocation33_spill] sm:$0xff] %v16607_v22  ;;  %v14180_v59 = vadd.f32 %v16481_v18, %v4770_v41  ;;  %v13120_v42 = vpop.f32.mrb[34].mxu0 }
 0x42c   : > { %18214 = vst [vmem:[#allocation34_spill] sm:$0xff] %v16609_v38  ;;  %v5443_v43 = vmul.f32 0.02, %v14179_v40  ;;  %v14181_v44 = vadd.f32 %v13120_v42, %v16481_v18  ;;  %v4773_v45 = vpop.f32.mrb[35].mxu0  ;;  %13229 = vmatprep.mubr.msk.bf16.mxu1 %vm2647_vm0, %v16609_v38  ;;  %vm5315_vm3 = vcmp.ge.f32.partialorder %v14179_v40, 0.0 }
 0x42d   : > { %v5441_v46 = vmul.f32 0.02, %v14180_v59  ;;  %v14182_v47 = vadd.f32 %v16481_v18, %v4773_v45  ;;  %13230 = vmatmul.mubr.msk.bf16.gmra.mrb[12].mxu1 %vm2647_vm0, %v16607_v22  ;;  %vm5313_vm4 = vcmp.ge.f32.partialorder %v14180_v59, 0.0 }
 0x42e   : > { %vm5316_vm5 = vcmp.ge.f32.partialorder %v14181_v44, 0.0  ;;  %v5444_v48 = vmul.f32 0.02, %v14181_v44  ;;  %v16619_v50 = vsel %vm5315_vm3, %v14179_v40, %v5443_v43 }
 0x42f   : > { %vm5314_vm6 = vcmp.ge.f32.partialorder %v14182_v47, 0.0  ;;  %v5442_v49 = vmul.f32 0.02, %v14182_v47  ;;  %v16623_v55 = vsel %vm5313_vm4, %v14180_v59, %v5441_v46 }
 0x430   : > { %v16621_v7 = vsel %vm5316_vm5, %v14181_v44, %v5444_v48 }
 0x431   : > { %v16627_v10 = vsel %vm5314_vm6, %v14182_v47, %v5442_v49  ;;  %v13123_v12 = vpop.f32.mrb[36].mxu0 }
 0x432   : > { %v14183_v14 = vadd.f32 %v13123_v12, %v16481_v18  ;;  %v4786_v60 = vpop.f32.mrb[37].mxu0 }
 0x433   : > { %v14184_v15 = vadd.f32 %v16481_v18, %v4786_v60  ;;  %v13124_v1 = vpop.f32.mrb[38].mxu0 }
 0x434   : > { %v5447_v2 = vmul.f32 0.02, %v14183_v14  ;;  %v14185_v16 = vadd.f32 %v13124_v1, %v16481_v18  ;;  %v4789_v57 = vpop.f32.mrb[39].mxu0  ;;  %vm5319_vm7 = vcmp.ge.f32.partialorder %v14183_v14, 0.0 }
 0x435   : > { %v5445_v17 = vmul.f32 0.02, %v14184_v15  ;;  %v14186_v19 = vadd.f32 %v16481_v18, %v4789_v57  ;;  %vm5317_vm8 = vcmp.ge.f32.partialorder %v14184_v15, 0.0 }
 0x436   : > { %vm5320_vm9 = vcmp.ge.f32.partialorder %v14185_v16, 0.0  ;;  %v5448_v20 = vmul.f32 0.02, %v14185_v16  ;;  %v16635_v25 = vsel %vm5319_vm7, %v14183_v14, %v5447_v2 }
 0x437   : > { %vm5318_vm10 = vcmp.ge.f32.partialorder %v14186_v19, 0.0  ;;  %v5446_v23 = vmul.f32 0.02, %v14186_v19  ;;  %v16639_v41 = vsel %vm5317_vm8, %v14184_v15, %v5445_v17 }
 0x438   : > { %v16637_v40 = vsel %vm5320_vm9, %v14185_v16, %v5448_v20 }
 0x439   : > { %v16643_v42 = vsel %vm5318_vm10, %v14186_v19, %v5446_v23  ;;  %v13127_v43 = vpop.f32.mrb[40].mxu0 }
 0x43a   : > { %v14187_v45 = vadd.f32 %v13127_v43, %v16481_v18  ;;  %v4802_v46 = vpop.f32.mrb[41].mxu0 }
 0x43b   : > { %v14188_v47 = vadd.f32 %v16481_v18, %v4802_v46  ;;  %v13128_v48 = vpop.f32.mrb[42].mxu0 }
 0x43c   : > { %v5451_v49 = vmul.f32 0.02, %v14187_v45  ;;  %v14189_v12 = vadd.f32 %v13128_v48, %v16481_v18  ;;  %v4805_v14 = vpop.f32.mrb[43].mxu0  ;;  %vm5323_vm11 = vcmp.ge.f32.partialorder %v14187_v45, 0.0 }
 0x43d   : > { %v5449_v60 = vmul.f32 0.02, %v14188_v47  ;;  %v14190_v15 = vadd.f32 %v16481_v18, %v4805_v14  ;;  %vm5321_vm12 = vcmp.ge.f32.partialorder %v14188_v47, 0.0 }
 0x43e   : > { %vm5324_vm13 = vcmp.ge.f32.partialorder %v14189_v12, 0.0  ;;  %v5452_v1 = vmul.f32 0.02, %v14189_v12  ;;  %v16651_v16 = vsel %vm5323_vm11, %v14187_v45, %v5451_v49 }
 0x43f   : > { %vm5322_vm14 = vcmp.ge.f32.partialorder %v14190_v15, 0.0  ;;  %v5450_v2 = vmul.f32 0.02, %v14190_v15  ;;  %v16655_v17 = vsel %vm5321_vm12, %v14188_v47, %v5449_v60 }
 0x440   : > { %v16653_v57 = vsel %vm5324_vm13, %v14189_v12, %v5452_v1 }
 0x441   : > { %v16659_v20 = vsel %vm5322_vm14, %v14190_v15, %v5450_v2  ;;  %v13131_v23 = vpop.f32.mrb[44].mxu0 }
 0x442   : > { %v14191_v46 = vadd.f32 %v13131_v23, %v16481_v18  ;;  %v4818_v48 = vpop.f32.mrb[45].mxu0 }
 0x443   : > { %v14192_v14 = vadd.f32 %v16481_v18, %v4818_v48  ;;  %v13132_v45 = vpop.f32.mrb[46].mxu0 }
 0x444   : > { %v5455_v49 = vmul.f32 0.02, %v14191_v46  ;;  %v14193_v12 = vadd.f32 %v13132_v45, %v16481_v18  ;;  %v4821_v47 = vpop.f32.mrb[47].mxu0  ;;  %vm5327_vm15 = vcmp.ge.f32.partialorder %v14191_v46, 0.0 }
 0x445   : > { %v5453_v60 = vmul.f32 0.02, %v14192_v14  ;;  %v14194_v1 = vadd.f32 %v16481_v18, %v4821_v47  ;;  %vm5325_vm1 = vcmp.ge.f32.partialorder %v14192_v14, 0.0 }
 0x446   : > { %vm5328_vm2 = vcmp.ge.f32.partialorder %v14193_v12, 0.0  ;;  %v5456_v15 = vmul.f32 0.02, %v14193_v12  ;;  %v16667_v62 = vsel %vm5327_vm15, %v14191_v46, %v5455_v49 }
 0x447   : > { %vm5326_vm3 = vcmp.ge.f32.partialorder %v14194_v1, 0.0  ;;  %v5454_v2 = vmul.f32 0.02, %v14194_v1  ;;  %v16671_v19 = vsel %vm5325_vm1, %v14192_v14, %v5453_v60 }
 0x448   : > { %v16669_v23 = vsel %vm5328_vm2, %v14193_v12, %v5456_v15 }
 0x449   : > { %v16675_v45 = vsel %vm5326_vm3, %v14194_v1, %v5454_v2  ;;  %v13135_v43 = vpop.f32.mrb[48].mxu0 }
 0x44a   : > { %v14195_v59 = vadd.f32 %v13135_v43, %v16481_v18  ;;  %v4834_v44 = vpop.f32.mrb[49].mxu0 }
 0x44b   : > { %v14196_v9 = vadd.f32 %v16481_v18, %v4834_v44  ;;  %v13136_v46 = vpop.f32.mrb[50].mxu0 }
 0x44c   : > { %v5459_v49 = vmul.f32 0.02, %v14195_v59  ;;  %v14197_v12 = vadd.f32 %v13136_v46, %v16481_v18  ;;  %v4837_v14 = vpop.f32.mrb[51].mxu0  ;;  %vm5331_vm4 = vcmp.ge.f32.partialorder %v14195_v59, 0.0 }
 0x44d   : > { %v5457_v60 = vmul.f32 0.02, %v14196_v9  ;;  %v14198_v15 = vadd.f32 %v16481_v18, %v4837_v14  ;;  %vm5329_vm5 = vcmp.ge.f32.partialorder %v14196_v9, 0.0 }
 0x44e   : > { %vm5332_vm6 = vcmp.ge.f32.partialorder %v14197_v12, 0.0  ;;  %v5460_v1 = vmul.f32 0.02, %v14197_v12  ;;  %v5587_v48 = vsel %vm5331_vm4, %v14195_v59, %v5459_v49 }
 0x44f   : > { %vm5330_vm7 = vcmp.ge.f32.partialorder %v14198_v15, 0.0  ;;  %v5458_v2 = vmul.f32 0.02, %v14198_v15  ;;  %v5585_v43 = vsel %vm5329_vm5, %v14196_v9, %v5457_v60 }
 0x450   : > { %v5588_v47 = vsel %vm5332_vm6, %v14197_v12, %v5460_v1 }
 0x451   : > { %v16683_v13 = vpack.c.bf16 %v5588_v47, %v5587_v48  ;;  %v5586_v44 = vsel %vm5330_vm7, %v14198_v15, %v5458_v2  ;;  %v13139_v29 = vpop.f32.mrb[52].mxu0 }
 0x452   : > { %v16685_v58 = vpack.c.bf16 %v5586_v44, %v5585_v43  ;;  %v14199_v46 = vadd.f32 %v13139_v29, %v16481_v18  ;;  %v4850_v63 = vpop.f32.mrb[53].mxu0 }
 0x453   : > { %18215 = vst [vmem:[#allocation35_spill] sm:$0xff] %v16683_v13  ;;  %v14200_v56 = vadd.f32 %v16481_v18, %v4850_v63  ;;  %v13140_v14 = vpop.f32.mrb[54].mxu0 }
 0x454   : > { %18216 = vst [vmem:[#allocation36_spill] sm:$0xff] %v16685_v58  ;;  %v5463_v3 = vmul.f32 0.02, %v14199_v46  ;;  %v14201_v54 = vadd.f32 %v13140_v14, %v16481_v18  ;;  %v4853_v34 = vpop.f32.mrb[55].mxu0  ;;  %13233 = vmatprep.mubr.msk.bf16.mxu1 %vm2647_vm0, %v16685_v58  ;;  %vm5335_vm8 = vcmp.ge.f32.partialorder %v14199_v46, 0.0 }
 0x455   : > { %v5461_v9 = vmul.f32 0.02, %v14200_v56  ;;  %v14202_v59 = vadd.f32 %v16481_v18, %v4853_v34  ;;  %13234 = vmatmul.mubr.msk.bf16.gmra.mrb[16].mxu1 %vm2647_vm0, %v16683_v13  ;;  %vm5333_vm9 = vcmp.ge.f32.partialorder %v14200_v56, 0.0 }
 0x456   : > { %vm5336_vm10 = vcmp.ge.f32.partialorder %v14201_v54, 0.0  ;;  %v5464_v29 = vmul.f32 0.02, %v14201_v54  ;;  %v5591_v48 = vsel %vm5335_vm8, %v14199_v46, %v5463_v3 }
 0x457   : > { %vm5334_vm11 = vcmp.ge.f32.partialorder %v14202_v59, 0.0  ;;  %v5462_v63 = vmul.f32 0.02, %v14202_v59  ;;  %v5589_v49 = vsel %vm5333_vm9, %v14200_v56, %v5461_v9 }
 0x458   : > { %v5592_v47 = vsel %vm5336_vm10, %v14201_v54, %v5464_v29 }
 0x459   : > { %v16695_v12 = vpack.c.bf16 %v5592_v47, %v5591_v48  ;;  %v5590_v60 = vsel %vm5334_vm11, %v14202_v59, %v5462_v63  ;;  %v13143_v15 = vpop.f32.mrb[56].mxu0 }
 0x45a   : > { %v16697_v1 = vpack.c.bf16 %v5590_v60, %v5589_v49  ;;  %v14203_v2 = vadd.f32 %v13143_v15, %v16481_v18  ;;  %v4866_v34 = vpop.f32.mrb[57].mxu0 }
 0x45b   : > { %18217 = vst [vmem:[#allocation37_spill] sm:$0xff] %v16695_v12  ;;  %v14204_v43 = vadd.f32 %v16481_v18, %v4866_v34  ;;  %v13144_v44 = vpop.f32.mrb[58].mxu0 }
 0x45c   : > { %18218 = vst [vmem:[#allocation38_spill] sm:$0xff] %v16697_v1  ;;  %v5467_v14 = vmul.f32 0.02, %v14203_v2  ;;  %v14205_v39 = vadd.f32 %v13144_v44, %v16481_v18  ;;  %v4869_v13 = vpop.f32.mrb[59].mxu0  ;;  %13237 = vmatprep.mubr.msk.bf16.mxu1 %vm2647_vm0, %v16697_v1  ;;  %vm5339_vm12 = vcmp.ge.f32.partialorder %v14203_v2, 0.0 }
 0x45d   : > { %v5465_v3 = vmul.f32 0.02, %v14204_v43  ;;  %v14206_v54 = vadd.f32 %v16481_v18, %v4869_v13  ;;  %13238 = vmatmul.mubr.msk.bf16.gmra.mrb[20].mxu1 %vm2647_vm0, %v16695_v12  ;;  %vm5337_vm13 = vcmp.ge.f32.partialorder %v14204_v43, 0.0 }
 0x45e   : > { %vm5340_vm14 = vcmp.ge.f32.partialorder %v14205_v39, 0.0  ;;  %v5468_v56 = vmul.f32 0.02, %v14205_v39  ;;  %v5595_v9 = vsel %vm5339_vm12, %v14203_v2, %v5467_v14 }
 0x45f   : > { %vm5338_vm15 = vcmp.ge.f32.partialorder %v14206_v54, 0.0  ;;  %v5466_v46 = vmul.f32 0.02, %v14206_v54  ;;  %v5593_v29 = vsel %vm5337_vm13, %v14204_v43, %v5465_v3 }
 0x460   : > { %v5596_v59 = vsel %vm5340_vm14, %v14205_v39, %v5468_v56 }
 0x461   : > { %v16707_v63 = vpack.c.bf16 %v5596_v59, %v5595_v9  ;;  %v5594_v48 = vsel %vm5338_vm15, %v14206_v54, %v5466_v46  ;;  %v13147_v47 = vpop.f32.mrb[60].mxu0 }
 0x462   : > { %v16709_v49 = vpack.c.bf16 %v5594_v48, %v5593_v29  ;;  %v14207_v60 = vadd.f32 %v13147_v47, %v16481_v18  ;;  %v4882_v13 = vpop.f32.mrb[61].mxu0 }
 0x463   : > { %18219 = vst [vmem:[#allocation39_spill] sm:$0xff] %v16707_v63  ;;  %v14208_v15 = vadd.f32 %v16481_v18, %v4882_v13  ;;  %v13148_v34 = vpop.f32.mrb[62].mxu0 }
 0x464   : > { %18220 = vst [vmem:[#allocation40_spill] sm:$0xff] %v16709_v49  ;;  %v5471_v44 = vmul.f32 0.02, %v14207_v60  ;;  %v14209_v12 = vadd.f32 %v13148_v34, %v16481_v18  ;;  %v4885_v1 = vpop.f32.mrb[63].mxu0  ;;  %13241 = vmatprep.mubr.msk.bf16.mxu1 %vm2647_vm0, %v16709_v49  ;;  %vm5343_vm1 = vcmp.ge.f32.partialorder %v14207_v60, 0.0  ;;  %v15052_v34 = vld [vmem:[%s15299_s14 + $0x10] sm:$0xff]  }
 0x465   : > { %v5469_v39 = vmul.f32 0.02, %v14208_v15  ;;  %v14210_v2 = vadd.f32 %v16481_v18, %v4885_v1  ;;  %13242 = vmatmul.mubr.msk.bf16.gmra.mrb[24].mxu1 %vm2647_vm0, %v16707_v63  ;;  %vm5341_vm2 = vcmp.ge.f32.partialorder %v14208_v15, 0.0  ;;  %13281 = vmatprep.subr.bf16.mxu1 %v15052_v34 }
 0x466   : > { %vm5344_vm3 = vcmp.ge.f32.partialorder %v14209_v12, 0.0  ;;  %v5472_v43 = vmul.f32 0.02, %v14209_v12  ;;  %v5599_v3 = vsel %vm5343_vm1, %v14207_v60, %v5471_v44  ;;  %13282 = vmatpush3.bf16.msra.mxu1 %v15052_v34 }
 0x467   : > { %vm5342_vm4 = vcmp.ge.f32.partialorder %v14210_v2, 0.0  ;;  %v5470_v14 = vmul.f32 0.02, %v14210_v2  ;;  %v5597_v56 = vsel %vm5341_vm2, %v14208_v15, %v5469_v39  ;;  %v15053_v39 = vld [vmem:[%s15299_s14 + $0x18] sm:$0xff]  }
 0x468   : > { %v5600_v54 = vsel %vm5344_vm3, %v14209_v12, %v5472_v43  ;;  %13283 = vmatprep.subr.bf16.mxu1 %v15053_v39 }
 0x469   : > { %v16719_v46 = vpack.c.bf16 %v5600_v54, %v5599_v3  ;;  %v5598_v9 = vsel %vm5342_vm4, %v14210_v2, %v5470_v14  ;;  %v13151_v59 = vpop.f32.mrb[64].mxu0 }
 0x46a   : > { %v16721_v29 = vpack.c.bf16 %v5598_v9, %v5597_v56  ;;  %v14211_v1 = vadd.f32 %v13151_v59, %v16481_v18  ;;  %v4898_v48 = vpop.f32.mrb[65].mxu0  ;;  %13284 = vmatpush3.bf16.msra.mxu1 %v15053_v39 }
 0x46b   : > { %18221 = vst [vmem:[#allocation41_spill] sm:$0xff] %v16719_v46  ;;  %v14212_v47 = vadd.f32 %v16481_v18, %v4898_v48  ;;  %v13152_v13 = vpop.f32.mrb[66].mxu0 }
 0x46c   : > { %18222 = vst [vmem:[#allocation42_spill] sm:$0xff] %v16721_v29  ;;  %v5475_v63 = vmul.f32 0.02, %v14211_v1  ;;  %v14213_v49 = vadd.f32 %v13152_v13, %v16481_v18  ;;  %v4901_v60 = vpop.f32.mrb[67].mxu0  ;;  %13245 = vmatprep.mubr.msk.bf16.mxu1 %vm2647_vm0, %v16721_v29  ;;  %vm5347_vm5 = vcmp.ge.f32.partialorder %v14211_v1, 0.0 }
 0x46d   : > { %v5473_v12 = vmul.f32 0.02, %v14212_v47  ;;  %v14214_v15 = vadd.f32 %v16481_v18, %v4901_v60  ;;  %13246 = vmatmul.mubr.msk.bf16.gmra.mrb[28].mxu1 %vm2647_vm0, %v16719_v46  ;;  %vm5345_vm6 = vcmp.ge.f32.partialorder %v14212_v47, 0.0 }
 0x46e   : > { %vm5348_vm7 = vcmp.ge.f32.partialorder %v14213_v49, 0.0  ;;  %v5476_v44 = vmul.f32 0.02, %v14213_v49  ;;  %v16733_v43 = vsel %vm5347_vm5, %v14211_v1, %v5475_v63 }
 0x46f   : > { %vm5346_vm8 = vcmp.ge.f32.partialorder %v14214_v15, 0.0  ;;  %v5474_v2 = vmul.f32 0.02, %v14214_v15  ;;  %v16737_v3 = vsel %vm5345_vm6, %v14212_v47, %v5473_v12 }
 0x470   : > { %v16735_v14 = vsel %vm5348_vm7, %v14213_v49, %v5476_v44 }
 0x471   : > { %v16741_v56 = vsel %vm5346_vm8, %v14214_v15, %v5474_v2  ;;  %v13155_v9 = vpop.f32.mrb[68].mxu0 }
 0x472   : > { %v14215_v48 = vadd.f32 %v13155_v9, %v16481_v18  ;;  %v4914_v13 = vpop.f32.mrb[69].mxu0 }
 0x473   : > { %v14216_v63 = vadd.f32 %v16481_v18, %v4914_v13  ;;  %v13156_v49 = vpop.f32.mrb[70].mxu0 }
 0x474   : > { %v5479_v1 = vmul.f32 0.02, %v14215_v48  ;;  %v14217_v47 = vadd.f32 %v13156_v49, %v16481_v18  ;;  %v4917_v34 = vpop.f32.mrb[71].mxu0  ;;  %vm5351_vm9 = vcmp.ge.f32.partialorder %v14215_v48, 0.0 }
 0x475   : > { %v5477_v60 = vmul.f32 0.02, %v14216_v63  ;;  %v14218_v12 = vadd.f32 %v16481_v18, %v4917_v34  ;;  %vm5349_vm10 = vcmp.ge.f32.partialorder %v14216_v63, 0.0 }
 0x476   : > { %vm5352_vm11 = vcmp.ge.f32.partialorder %v14217_v47, 0.0  ;;  %v5480_v15 = vmul.f32 0.02, %v14217_v47  ;;  %v16749_v2 = vsel %vm5351_vm9, %v14215_v48, %v5479_v1 }
 0x477   : > { %vm5350_vm12 = vcmp.ge.f32.partialorder %v14218_v12, 0.0  ;;  %v5478_v44 = vmul.f32 0.02, %v14218_v12  ;;  %v16753_v39 = vsel %vm5349_vm10, %v14216_v63, %v5477_v60 }
 0x478   : > { %v16751_v9 = vsel %vm5352_vm11, %v14217_v47, %v5480_v15 }
 0x479   : > { %v16757_v49 = vsel %vm5350_vm12, %v14218_v12, %v5478_v44  ;;  %v13159_v54 = vpop.f32.mrb[72].mxu0 }
 0x47a   : > { %v14219_v59 = vadd.f32 %v13159_v54, %v16481_v18  ;;  %v4930_v46 = vpop.f32.mrb[73].mxu0 }
 0x47b   : > { %v14220_v29 = vadd.f32 %v16481_v18, %v4930_v46  ;;  %v13160_v48 = vpop.f32.mrb[74].mxu0 }
 0x47c   : > { %v5483_v1 = vmul.f32 0.02, %v14219_v59  ;;  %v14221_v47 = vadd.f32 %v13160_v48, %v16481_v18  ;;  %v4933_v63 = vpop.f32.mrb[75].mxu0  ;;  %vm5355_vm13 = vcmp.ge.f32.partialorder %v14219_v59, 0.0 }
 0x47d   : > { %v5481_v60 = vmul.f32 0.02, %v14220_v29  ;;  %v14222_v15 = vadd.f32 %v16481_v18, %v4933_v63  ;;  %vm5353_vm14 = vcmp.ge.f32.partialorder %v14220_v29, 0.0 }
 0x47e   : > { %vm5356_vm15 = vcmp.ge.f32.partialorder %v14221_v47, 0.0  ;;  %v5484_v12 = vmul.f32 0.02, %v14221_v47  ;;  %v16765_v13 = vsel %vm5355_vm13, %v14219_v59, %v5483_v1 }
 0x47f   : > { %vm5354_vm1 = vcmp.ge.f32.partialorder %v14222_v15, 0.0  ;;  %v5482_v44 = vmul.f32 0.02, %v14222_v15  ;;  %18223 = vst [vmem:[#allocation43_spill] sm:$0xff] %v16765_v13  ;;  %v16769_v34 = vsel %vm5353_vm14, %v14220_v29, %v5481_v60 }
 0x480   : > { %v16767_v54 = vsel %vm5356_vm15, %v14221_v47, %v5484_v12  ;;  %18225 = vst [vmem:[#allocation45_spill] sm:$0xff] %v16769_v34 }
 0x481   : > { %18224 = vst [vmem:[#allocation44_spill] sm:$0xff] %v16767_v54  ;;  %v16773_v48 = vsel %vm5354_vm1, %v14222_v15, %v5482_v44  ;;  %v13163_v58 = vpop.f32.mrb[76].mxu0 }
 0x482   : > { %v14223_v22 = vadd.f32 %v13163_v58, %v16481_v18  ;;  %v4946_v38 = vpop.f32.mrb[77].mxu0 }
 0x483   : > { %v14224_v5 = vadd.f32 %v16481_v18, %v4946_v38  ;;  %v13164_v59 = vpop.f32.mrb[78].mxu0 }
 0x484   : > { %v5487_v1 = vmul.f32 0.02, %v14223_v22  ;;  %v14225_v47 = vadd.f32 %v13164_v59, %v16481_v18  ;;  %v4949_v29 = vpop.f32.mrb[79].mxu0  ;;  %vm5359_vm2 = vcmp.ge.f32.partialorder %v14223_v22, 0.0 }
 0x485   : > { %v5485_v60 = vmul.f32 0.02, %v14224_v5  ;;  %v14226_v12 = vadd.f32 %v16481_v18, %v4949_v29  ;;  %vm5357_vm3 = vcmp.ge.f32.partialorder %v14224_v5, 0.0 }
 0x486   : > { %vm5360_vm4 = vcmp.ge.f32.partialorder %v14225_v47, 0.0  ;;  %v5488_v15 = vmul.f32 0.02, %v14225_v47  ;;  %v16781_v46 = vsel %vm5359_vm2, %v14223_v22, %v5487_v1 }
 0x487   : > { %vm5358_vm5 = vcmp.ge.f32.partialorder %v14226_v12, 0.0  ;;  %v5486_v44 = vmul.f32 0.02, %v14226_v12  ;;  %18226 = vst [vmem:[#allocation46_spill] sm:$0xff] %v16781_v46  ;;  %v16785_v63 = vsel %vm5357_vm3, %v14224_v5, %v5485_v60 }
 0x488   : > { %v16783_v58 = vsel %vm5360_vm4, %v14225_v47, %v5488_v15  ;;  %18228 = vst [vmem:[#allocation48_spill] sm:$0xff] %v16785_v63 }
 0x489   : > { %18227 = vst [vmem:[#allocation47_spill] sm:$0xff] %v16783_v58  ;;  %v16789_v59 = vsel %vm5358_vm5, %v14226_v12, %v5486_v44  ;;  %v13167_v8 = vpop.f32.mrb[80].mxu0 }
 0x48a   : > { %18229 = vst [vmem:[#allocation49_spill] sm:$0xff] %v16789_v59  ;;  %v14227_v21 = vadd.f32 %v13167_v8, %v16481_v18  ;;  %v4962_v24 = vpop.f32.mrb[81].mxu0 }
 0x48b   : > { %v14228_v6 = vadd.f32 %v16481_v18, %v4962_v24  ;;  %v13168_v22 = vpop.f32.mrb[82].mxu0 }
 0x48c   : > { %v5491_v1 = vmul.f32 0.02, %v14227_v21  ;;  %v14229_v47 = vadd.f32 %v13168_v22, %v16481_v18  ;;  %v4965_v5 = vpop.f32.mrb[83].mxu0  ;;  %vm5363_vm6 = vcmp.ge.f32.partialorder %v14227_v21, 0.0 }
 0x48d   : > { %v5489_v60 = vmul.f32 0.02, %v14228_v6  ;;  %v14230_v15 = vadd.f32 %v16481_v18, %v4965_v5  ;;  %vm5361_vm7 = vcmp.ge.f32.partialorder %v14228_v6, 0.0 }
 0x48e   : > { %vm5364_vm8 = vcmp.ge.f32.partialorder %v14229_v47, 0.0  ;;  %v5492_v12 = vmul.f32 0.02, %v14229_v47  ;;  %v5619_v38 = vsel %vm5363_vm6, %v14227_v21, %v5491_v1 }
 0x48f   : > { %vm5362_vm9 = vcmp.ge.f32.partialorder %v14230_v15, 0.0  ;;  %v5490_v44 = vmul.f32 0.02, %v14230_v15  ;;  %v5617_v8 = vsel %vm5361_vm7, %v14228_v6, %v5489_v60 }
 0x490   : > { %v5620_v29 = vsel %vm5364_vm8, %v14229_v47, %v5492_v12 }
 0x491   : > { %v16797_v11 = vpack.c.bf16 %v5620_v29, %v5619_v38  ;;  %v5618_v24 = vsel %vm5362_vm9, %v14230_v15, %v5490_v44  ;;  %v13171_v46 = vpop.f32.mrb[84].mxu0  ;;  %v16814_v44 = vld [vmem:[%s18200_s8] ss:$0 sm:$0xff] }
 0x492   : > { %v16799_v58 = vpack.c.bf16 %v5618_v24, %v5617_v8  ;;  %v14231_v22 = vadd.f32 %v13171_v46, %v16481_v18  ;;  %v4978_v63 = vpop.f32.mrb[85].mxu0 }
 0x493   : > { %18230 = vst [vmem:[#allocation50_spill] sm:$0xff] %v16797_v11  ;;  %v14232_v59 = vadd.f32 %v16481_v18, %v4978_v63  ;;  %v13172_v5 = vpop.f32.mrb[86].mxu0 }
 0x494   : > { %18231 = vst [vmem:[#allocation51_spill] sm:$0xff] %v16799_v58  ;;  %v5495_v13 = vmul.f32 0.02, %v14231_v22  ;;  %v14233_v54 = vadd.f32 %v13172_v5, %v16481_v18  ;;  %v4981_v34 = vpop.f32.mrb[87].mxu0  ;;  %13249 = vmatprep.mubr.msk.bf16.mxu1 %vm2647_vm0, %v16799_v58  ;;  %vm5367_vm10 = vcmp.ge.f32.partialorder %v14231_v22, 0.0 }
 0x495   : > { %v5493_v6 = vmul.f32 0.02, %v14232_v59  ;;  %v14234_v21 = vadd.f32 %v16481_v18, %v4981_v34  ;;  %13250 = vmatmul.mubr.msk.bf16.gmra.mrb[32].mxu1 %vm2647_vm0, %v16797_v11  ;;  %vm5365_vm11 = vcmp.ge.f32.partialorder %v14232_v59, 0.0 }
 0x496   : > { %vm5368_vm12 = vcmp.ge.f32.partialorder %v14233_v54, 0.0  ;;  %v5496_v46 = vmul.f32 0.02, %v14233_v54  ;;  %v5623_v38 = vsel %vm5367_vm10, %v14231_v22, %v5495_v13 }
 0x497   : > { %vm5366_vm13 = vcmp.ge.f32.partialorder %v14234_v21, 0.0  ;;  %v5494_v63 = vmul.f32 0.02, %v14234_v21  ;;  %v5621_v1 = vsel %vm5365_vm11, %v14232_v59, %v5493_v6 }
 0x498   : > { %v5624_v29 = vsel %vm5368_vm12, %v14233_v54, %v5496_v46 }
 0x499   : > { %v16809_v47 = vpack.c.bf16 %v5624_v29, %v5623_v38  ;;  %v5622_v60 = vsel %vm5366_vm13, %v14234_v21, %v5494_v63  ;;  %v13175_v15 = vpop.f32.mrb[88].mxu0 }
 0x49a   : > { %v16811_v12 = vpack.c.bf16 %v5622_v60, %v5621_v1  ;;  %v14235_v18 = vadd.f32 %v16814_v44, %v13175_v15  ;;  %v4994_v34 = vpop.f32.mrb[89].mxu0 }
 0x49b   : > { %18232 = vst [vmem:[#allocation52_spill] sm:$0xff] %v16809_v47  ;;  %v14236_v8 = vadd.f32 %v16814_v44, %v4994_v34  ;;  %v13176_v24 = vpop.f32.mrb[90].mxu0 }
 0x49c   : > { %18233 = vst [vmem:[#allocation53_spill] sm:$0xff] %v16811_v12  ;;  %v5499_v5 = vmul.f32 0.02, %v14235_v18  ;;  %v14237_v11 = vadd.f32 %v16814_v44, %v13176_v24  ;;  %v4997_v13 = vpop.f32.mrb[91].mxu0  ;;  %13253 = vmatprep.mubr.msk.bf16.mxu1 %vm2647_vm0, %v16811_v12  ;;  %vm5371_vm14 = vcmp.ge.f32.partialorder %v14235_v18, 0.0 }
 0x49d   : > { %v5497_v54 = vmul.f32 0.02, %v14236_v8  ;;  %v14238_v59 = vadd.f32 %v16814_v44, %v4997_v13  ;;  %13254 = vmatmul.mubr.msk.bf16.gmra.mrb[36].mxu1 %vm2647_vm0, %v16809_v47  ;;  %vm5369_vm15 = vcmp.ge.f32.partialorder %v14236_v8, 0.0 }
 0x49e   : > { %vm5372_vm1 = vcmp.ge.f32.partialorder %v14237_v11, 0.0  ;;  %v5500_v22 = vmul.f32 0.02, %v14237_v11  ;;  %v5627_v21 = vsel %vm5371_vm14, %v14235_v18, %v5499_v5 }
 0x49f   : > { %vm5370_vm2 = vcmp.ge.f32.partialorder %v14238_v59, 0.0  ;;  %v5498_v6 = vmul.f32 0.02, %v14238_v59  ;;  %v5625_v63 = vsel %vm5369_vm15, %v14236_v8, %v5497_v54 }
 0x4a0   : > { %v5628_v46 = vsel %vm5372_vm1, %v14237_v11, %v5500_v22 }
 0x4a1   : > { %v16824_v38 = vpack.c.bf16 %v5628_v46, %v5627_v21  ;;  %v5626_v29 = vsel %vm5370_vm2, %v14238_v59, %v5498_v6  ;;  %v13179_v1 = vpop.f32.mrb[92].mxu0 }
 0x4a2   : > { %v16826_v60 = vpack.c.bf16 %v5626_v29, %v5625_v63  ;;  %v14239_v15 = vadd.f32 %v16814_v44, %v13179_v1  ;;  %v5010_v34 = vpop.f32.mrb[93].mxu0 }
 0x4a3   : > { %18234 = vst [vmem:[#allocation54_spill] sm:$0xff] %v16824_v38  ;;  %v14240_v24 = vadd.f32 %v16814_v44, %v5010_v34  ;;  %v13180_v13 = vpop.f32.mrb[94].mxu0 }
 0x4a4   : > { %18235 = vst [vmem:[#allocation55_spill] sm:$0xff] %v16826_v60  ;;  %v5503_v47 = vmul.f32 0.02, %v14239_v15  ;;  %v14241_v12 = vadd.f32 %v16814_v44, %v13180_v13  ;;  %v5013_v58 = vpop.f32.mrb[95].mxu0  ;;  %13257 = vmatprep.mubr.msk.bf16.mxu1 %vm2647_vm0, %v16826_v60  ;;  %vm5375_vm3 = vcmp.ge.f32.partialorder %v14239_v15, 0.0 }
 0x4a5   : > { %v5501_v11 = vmul.f32 0.02, %v14240_v24  ;;  %v14242_v18 = vadd.f32 %v16814_v44, %v5013_v58  ;;  %13258 = vmatmul.mubr.msk.bf16.gmra.mrb[40].mxu1 %vm2647_vm0, %v16824_v38  ;;  %vm5373_vm4 = vcmp.ge.f32.partialorder %v14240_v24, 0.0 }
 0x4a6   : > { %vm5376_vm5 = vcmp.ge.f32.partialorder %v14241_v12, 0.0  ;;  %v5504_v8 = vmul.f32 0.02, %v14241_v12  ;;  %v5631_v54 = vsel %vm5375_vm3, %v14239_v15, %v5503_v47 }
 0x4a7   : > { %vm5374_vm6 = vcmp.ge.f32.partialorder %v14242_v18, 0.0  ;;  %v5502_v5 = vmul.f32 0.02, %v14242_v18  ;;  %v5629_v22 = vsel %vm5373_vm4, %v14240_v24, %v5501_v11 }
 0x4a8   : > { %v5632_v59 = vsel %vm5376_vm5, %v14241_v12, %v5504_v8 }
 0x4a9   : > { %v16836_v6 = vpack.c.bf16 %v5632_v59, %v5631_v54  ;;  %v5630_v21 = vsel %vm5374_vm6, %v14242_v18, %v5502_v5  ;;  %v13183_v46 = vpop.f32.mrb[96].mxu0 }
 0x4aa   : > { %v16838_v63 = vpack.c.bf16 %v5630_v21, %v5629_v22  ;;  %v14243_v29 = vadd.f32 %v16814_v44, %v13183_v46  ;;  %v5026_v58 = vpop.f32.mrb[97].mxu0 }
 0x4ab   : > { %18236 = vst [vmem:[#allocation56_spill] sm:$0xff] %v16836_v6  ;;  %v14244_v1 = vadd.f32 %v16814_v44, %v5026_v58  ;;  %v13184_v34 = vpop.f32.mrb[98].mxu0 }
 0x4ac   : > { %18237 = vst [vmem:[#allocation57_spill] sm:$0xff] %v16838_v63  ;;  %v5507_v13 = vmul.f32 0.02, %v14243_v29  ;;  %v14245_v38 = vadd.f32 %v16814_v44, %v13184_v34  ;;  %v5029_v60 = vpop.f32.mrb[99].mxu0  ;;  %13261 = vmatprep.mubr.msk.bf16.mxu1 %vm2647_vm0, %v16838_v63  ;;  %vm5379_vm7 = vcmp.ge.f32.partialorder %v14243_v29, 0.0 }
 0x4ad   : > { %v5505_v47 = vmul.f32 0.02, %v14244_v1  ;;  %v14246_v12 = vadd.f32 %v16814_v44, %v5029_v60  ;;  %13262 = vmatmul.mubr.msk.bf16.gmra.mrb[44].mxu1 %vm2647_vm0, %v16836_v6  ;;  %vm5377_vm8 = vcmp.ge.f32.partialorder %v14244_v1, 0.0 }
 0x4ae   : > { %vm5380_vm9 = vcmp.ge.f32.partialorder %v14245_v38, 0.0  ;;  %v5508_v15 = vmul.f32 0.02, %v14245_v38  ;;  %v16848_v11 = vsel %vm5379_vm7, %v14243_v29, %v5507_v13 }
 0x4af   : > { %vm5378_vm10 = vcmp.ge.f32.partialorder %v14246_v12, 0.0  ;;  %v5506_v24 = vmul.f32 0.02, %v14246_v12  ;;  %18238 = vst [vmem:[#allocation58_spill] sm:$0xff] %v16848_v11  ;;  %v16852_v8 = vsel %vm5377_vm8, %v14244_v1, %v5505_v47 }
 0x4b0   : > { %v16850_v18 = vsel %vm5380_vm9, %v14245_v38, %v5508_v15  ;;  %18240 = vst [vmem:[#allocation60_spill] sm:$0xff] %v16852_v8 }
 0x4b1   : > { %18239 = vst [vmem:[#allocation59_spill] sm:$0xff] %v16850_v18  ;;  %v16856_v54 = vsel %vm5378_vm10, %v14246_v12, %v5506_v24  ;;  %v13187_v60 = vpop.f32.mrb[100].mxu0 }
 0x4b2   : > { %18241 = vst [vmem:[#allocation61_spill] sm:$0xff] %v16856_v54  ;;  %v14247_v22 = vadd.f32 %v16814_v44, %v13187_v60  ;;  %v5042_v21 = vpop.f32.mrb[101].mxu0 }
 0x4b3   : > { %v14248_v46 = vadd.f32 %v16814_v44, %v5042_v21  ;;  %v13188_v29 = vpop.f32.mrb[102].mxu0 }
 0x4b4   : > { %v5511_v58 = vmul.f32 0.02, %v14247_v22  ;;  %v14249_v38 = vadd.f32 %v16814_v44, %v13188_v29  ;;  %v5045_v1 = vpop.f32.mrb[103].mxu0  ;;  %vm5383_vm11 = vcmp.ge.f32.partialorder %v14247_v22, 0.0 }
 0x4b5   : > { %v5509_v34 = vmul.f32 0.02, %v14248_v46  ;;  %v14250_v13 = vadd.f32 %v16814_v44, %v5045_v1  ;;  %vm5381_vm12 = vcmp.ge.f32.partialorder %v14248_v46, 0.0 }
 0x4b6   : > { %vm5384_vm13 = vcmp.ge.f32.partialorder %v14249_v38, 0.0  ;;  %v5512_v47 = vmul.f32 0.02, %v14249_v38  ;;  %v16864_v15 = vsel %vm5383_vm11, %v14247_v22, %v5511_v58 }
 0x4b7   : > { %vm5382_vm14 = vcmp.ge.f32.partialorder %v14250_v13, 0.0  ;;  %v5510_v12 = vmul.f32 0.02, %v14250_v13  ;;  %18242 = vst [vmem:[#allocation62_spill] sm:$0xff] %v16864_v15  ;;  %v16868_v60 = vsel %vm5381_vm12, %v14248_v46, %v5509_v34 }
 0x4b8   : > { %v16866_v24 = vsel %vm5384_vm13, %v14249_v38, %v5512_v47  ;;  %18244 = vst [vmem:[#allocation64_spill] sm:$0xff] %v16868_v60 }
 0x4b9   : > { %18243 = vst [vmem:[#allocation63_spill] sm:$0xff] %v16866_v24  ;;  %v16872_v29 = vsel %vm5382_vm14, %v14250_v13, %v5510_v12  ;;  %v13191_v5 = vpop.f32.mrb[104].mxu0 }
 0x4ba   : > { %18245 = vst [vmem:[#allocation65_spill] sm:$0xff] %v16872_v29  ;;  %v14251_v59 = vadd.f32 %v16814_v44, %v13191_v5  ;;  %v5058_v6 = vpop.f32.mrb[105].mxu0 }
 0x4bb   : > { %v14252_v63 = vadd.f32 %v16814_v44, %v5058_v6  ;;  %v13192_v22 = vpop.f32.mrb[106].mxu0 }
 0x4bc   : > { %v5515_v58 = vmul.f32 0.02, %v14251_v59  ;;  %v14253_v38 = vadd.f32 %v16814_v44, %v13192_v22  ;;  %v5061_v46 = vpop.f32.mrb[107].mxu0  ;;  %vm5387_vm15 = vcmp.ge.f32.partialorder %v14251_v59, 0.0 }
 0x4bd   : > { %v5513_v34 = vmul.f32 0.02, %v14252_v63  ;;  %v14254_v47 = vadd.f32 %v16814_v44, %v5061_v46  ;;  %vm5385_vm1 = vcmp.ge.f32.partialorder %v14252_v63, 0.0 }
 0x4be   : > { %vm5388_vm2 = vcmp.ge.f32.partialorder %v14253_v38, 0.0  ;;  %v5516_v13 = vmul.f32 0.02, %v14253_v38  ;;  %v16880_v21 = vsel %vm5387_vm15, %v14251_v59, %v5515_v58 }
 0x4bf   : > { %vm5386_vm3 = vcmp.ge.f32.partialorder %v14254_v47, 0.0  ;;  %v5514_v12 = vmul.f32 0.02, %v14254_v47  ;;  %18246 = vst [vmem:[#allocation66_spill] sm:$0xff] %v16880_v21  ;;  %v16884_v1 = vsel %vm5385_vm1, %v14252_v63, %v5513_v34 }
 0x4c0   : > { %v16882_v5 = vsel %vm5388_vm2, %v14253_v38, %v5516_v13  ;;  %18248 = vst [vmem:[#allocation68_spill] sm:$0xff] %v16884_v1 }
 0x4c1   : > { %18247 = vst [vmem:[#allocation67_spill] sm:$0xff] %v16882_v5  ;;  %v16888_v22 = vsel %vm5386_vm3, %v14254_v47, %v5514_v12  ;;  %v13195_v15 = vpop.f32.mrb[108].mxu0 }
 0x4c2   : > { %18249 = vst [vmem:[#allocation69_spill] sm:$0xff] %v16888_v22  ;;  %v14255_v24 = vadd.f32 %v16814_v44, %v13195_v15  ;;  %v5074_v60 = vpop.f32.mrb[109].mxu0 }
 0x4c3   : > { %v14256_v29 = vadd.f32 %v16814_v44, %v5074_v60  ;;  %v13196_v59 = vpop.f32.mrb[110].mxu0 }
 0x4c4   : > { %v5519_v58 = vmul.f32 0.02, %v14255_v24  ;;  %v14257_v38 = vadd.f32 %v16814_v44, %v13196_v59  ;;  %v5077_v63 = vpop.f32.mrb[111].mxu0  ;;  %vm5391_vm4 = vcmp.ge.f32.partialorder %v14255_v24, 0.0 }
 0x4c5   : > { %v5517_v34 = vmul.f32 0.02, %v14256_v29  ;;  %v14258_v13 = vadd.f32 %v16814_v44, %v5077_v63  ;;  %vm5389_vm5 = vcmp.ge.f32.partialorder %v14256_v29, 0.0 }
 0x4c6   : > { %vm5392_vm6 = vcmp.ge.f32.partialorder %v14257_v38, 0.0  ;;  %v5520_v47 = vmul.f32 0.02, %v14257_v38  ;;  %v16896_v6 = vsel %vm5391_vm4, %v14255_v24, %v5519_v58 }
 0x4c7   : > { %vm5390_vm7 = vcmp.ge.f32.partialorder %v14258_v13, 0.0  ;;  %v5518_v12 = vmul.f32 0.02, %v14258_v13  ;;  %18250 = vst [vmem:[#allocation70_spill] sm:$0xff] %v16896_v6  ;;  %v16900_v46 = vsel %vm5389_vm5, %v14256_v29, %v5517_v34 }
 0x4c8   : > { %v16898_v15 = vsel %vm5392_vm6, %v14257_v38, %v5520_v47  ;;  %18252 = vst [vmem:[#allocation72_spill] sm:$0xff] %v16900_v46 }
 0x4c9   : > { %18251 = vst [vmem:[#allocation71_spill] sm:$0xff] %v16898_v15  ;;  %v16904_v59 = vsel %vm5390_vm7, %v14258_v13, %v5518_v12  ;;  %v13199_v21 = vpop.f32.mrb[112].mxu0 }
 0x4ca   : > { %18253 = vst [vmem:[#allocation73_spill] sm:$0xff] %v16904_v59  ;;  %v14259_v5 = vadd.f32 %v16814_v44, %v13199_v21  ;;  %v5090_v1 = vpop.f32.mrb[113].mxu0 }
 0x4cb   : > { %v14260_v22 = vadd.f32 %v16814_v44, %v5090_v1  ;;  %v13200_v24 = vpop.f32.mrb[114].mxu0 }
 0x4cc   : > { %v5523_v58 = vmul.f32 0.02, %v14259_v5  ;;  %v14261_v38 = vadd.f32 %v16814_v44, %v13200_v24  ;;  %v5093_v29 = vpop.f32.mrb[115].mxu0  ;;  %vm5395_vm8 = vcmp.ge.f32.partialorder %v14259_v5, 0.0 }
 0x4cd   : > { %v5521_v34 = vmul.f32 0.02, %v14260_v22  ;;  %v14262_v47 = vadd.f32 %v16814_v44, %v5093_v29  ;;  %vm5393_vm9 = vcmp.ge.f32.partialorder %v14260_v22, 0.0 }
 0x4ce   : > { %vm5396_vm10 = vcmp.ge.f32.partialorder %v14261_v38, 0.0  ;;  %v5524_v13 = vmul.f32 0.02, %v14261_v38  ;;  %v5651_v60 = vsel %vm5395_vm8, %v14259_v5, %v5523_v58 }
 0x4cf   : > { %vm5394_vm11 = vcmp.ge.f32.partialorder %v14262_v47, 0.0  ;;  %v5522_v12 = vmul.f32 0.02, %v14262_v47  ;;  %v5649_v21 = vsel %vm5393_vm9, %v14260_v22, %v5521_v34 }
 0x4d0   : > { %v5652_v63 = vsel %vm5396_vm10, %v14261_v38, %v5524_v13 }
 0x4d1   : > { %v5722_v6 = vpack.c.bf16 %v5652_v63, %v5651_v60  ;;  %v5650_v15 = vsel %vm5394_vm11, %v14262_v47, %v5522_v12  ;;  %v13203_v1 = vpop.f32.mrb[116].mxu0 }
 0x4d2   : > { %v5721_v46 = vpack.c.bf16 %v5650_v15, %v5649_v21  ;;  %v14263_v59 = vadd.f32 %v16814_v44, %v13203_v1  ;;  %v5106_v24 = vpop.f32.mrb[117].mxu0 }
 0x4d3   : > { %v14264_v11 = vadd.f32 %v16814_v44, %v5106_v24  ;;  %v13204_v18 = vpop.f32.mrb[118].mxu0 }
 0x4d4   : > { %v5527_v8 = vmul.f32 0.02, %v14263_v59  ;;  %v14265_v29 = vadd.f32 %v16814_v44, %v13204_v18  ;;  %v5109_v54 = vpop.f32.mrb[119].mxu0  ;;  %13265 = vmatprep.mubr.msk.bf16.mxu1 %vm2647_vm0, %v5721_v46  ;;  %vm5399_vm12 = vcmp.ge.f32.partialorder %v14263_v59, 0.0 }
 0x4d5   : > { %v5525_v5 = vmul.f32 0.02, %v14264_v11  ;;  %v14266_v22 = vadd.f32 %v16814_v44, %v5109_v54  ;;  %13266 = vmatmul.mubr.msk.bf16.gmra.mrb[48].mxu1 %vm2647_vm0, %v5722_v6  ;;  %vm5397_vm13 = vcmp.ge.f32.partialorder %v14264_v11, 0.0 }
 0x4d6   : > { %vm5400_vm14 = vcmp.ge.f32.partialorder %v14265_v29, 0.0  ;;  %v5528_v15 = vmul.f32 0.02, %v14265_v29  ;;  %v5655_v63 = vsel %vm5399_vm12, %v14263_v59, %v5527_v8 }
 0x4d7   : > { %vm5398_vm15 = vcmp.ge.f32.partialorder %v14266_v22, 0.0  ;;  %v5526_v60 = vmul.f32 0.02, %v14266_v22  ;;  %v5653_v38 = vsel %vm5397_vm13, %v14264_v11, %v5525_v5 }
 0x4d8   : > { %v5656_v58 = vsel %vm5400_vm14, %v14265_v29, %v5528_v15 }
 0x4d9   : > { %v5724_v34 = vpack.c.bf16 %v5656_v58, %v5655_v63  ;;  %v5654_v47 = vsel %vm5398_vm15, %v14266_v22, %v5526_v60  ;;  %v13207_v18 = vpop.f32.mrb[120].mxu0 }
 0x4da   : > { %v5723_v13 = vpack.c.bf16 %v5654_v47, %v5653_v38  ;;  %v14267_v46 = vadd.f32 %v16814_v44, %v13207_v18  ;;  %v5122_v12 = vpop.f32.mrb[121].mxu0 }
 0x4db   : > { %v14268_v21 = vadd.f32 %v16814_v44, %v5122_v12  ;;  %v13208_v54 = vpop.f32.mrb[122].mxu0 }
 0x4dc   : > { %v5531_v1 = vmul.f32 0.02, %v14267_v46  ;;  %v14269_v6 = vadd.f32 %v16814_v44, %v13208_v54  ;;  %v5125_v24 = vpop.f32.mrb[123].mxu0  ;;  %13269 = vmatprep.mubr.msk.bf16.mxu1 %vm2647_vm0, %v5723_v13  ;;  %vm5403_vm1 = vcmp.ge.f32.partialorder %v14267_v46, 0.0 }
 0x4dd   : > { %v5529_v8 = vmul.f32 0.02, %v14268_v21  ;;  %v14270_v11 = vadd.f32 %v16814_v44, %v5125_v24  ;;  %13270 = vmatmul.mubr.msk.bf16.gmra.mrb[52].mxu1 %vm2647_vm0, %v5724_v34  ;;  %vm5401_vm2 = vcmp.ge.f32.partialorder %v14268_v21, 0.0 }
 0x4de   : > { %vm5404_vm3 = vcmp.ge.f32.partialorder %v14269_v6, 0.0  ;;  %v5532_v59 = vmul.f32 0.02, %v14269_v6  ;;  %v5659_v5 = vsel %vm5403_vm1, %v14267_v46, %v5531_v1 }
 0x4df   : > { %vm5402_vm4 = vcmp.ge.f32.partialorder %v14270_v11, 0.0  ;;  %v5530_v29 = vmul.f32 0.02, %v14270_v11  ;;  %v5657_v15 = vsel %vm5401_vm2, %v14268_v21, %v5529_v8 }
 0x4e0   : > { %v5660_v22 = vsel %vm5404_vm3, %v14269_v6, %v5532_v59 }
 0x4e1   : > { %v5726_v60 = vpack.c.bf16 %v5660_v22, %v5659_v5  ;;  %v5658_v63 = vsel %vm5402_vm4, %v14270_v11, %v5530_v29  ;;  %v13211_v58 = vpop.f32.mrb[124].mxu0 }
 0x4e2   : > { %v5725_v38 = vpack.c.bf16 %v5658_v63, %v5657_v15  ;;  %v14271_v47 = vadd.f32 %v16814_v44, %v13211_v58  ;;  %v5138_v18 = vpop.f32.mrb[125].mxu0  ;;  %v15054_v15 = vld [vmem:[%s15299_s14] sm:$0xff]   ;;  %v18255_v63 = vpack.c.bf16 %v16495_v32, %v16493_v31  ;;  %v18256_v58 = vpack.c.bf16 %v16521_v4, %v16517_v53 }
 0x4e3   : > { %v14272_v13 = vadd.f32 %v16814_v44, %v5138_v18  ;;  %v13212_v12 = vpop.f32.mrb[126].mxu0  ;;  %13349 = vmatprep.subr.bf16.mxu1 %v15054_v15  ;;  %v18259_v31 = vpack.c.bf16 %v16535_v37, %v16533_v36  ;;  %v18260_v32 = vpack.c.bf16 %v16561_v30, %v16557_v28  ;;  %v18264_v53 = vpack.c.bf16 %v16643_v42, %v16639_v41  ;;  %v18274_v30 = vld [vmem:[#allocation45_spill] sm:$0xff]  ;;  %v18282_v42 = vld [vmem:[#allocation47_spill] sm:$0xff] }
 0x4e4   : > { %v5535_v54 = vmul.f32 0.02, %v14271_v47  ;;  %v14273_v34 = vadd.f32 %v16814_v44, %v13212_v12  ;;  %v5141_v24 = vpop.f32.mrb[127].mxu0  ;;  %13273 = vmatprep.mubr.msk.bf16.mxu1 %vm2647_vm0, %v5725_v38  ;;  %vm5407_vm5 = vcmp.ge.f32.partialorder %v14271_v47, 0.0  ;;  %v18257_v38 = vpack.c.bf16 %v16515_v52, %v16513_v51  ;;  %v18300_v18 = vld [vmem:[#allocation67_spill] sm:$0xff] }
 0x4e5   : > { %v5533_v46 = vmul.f32 0.02, %v14272_v13  ;;  %v14274_v21 = vadd.f32 %v16814_v44, %v5141_v24  ;;  %13274 = vmatmul.mubr.msk.bf16.gmra.mrb[56].mxu1 %vm2647_vm0, %v5726_v60  ;;  %vm5405_vm6 = vcmp.ge.f32.partialorder %v14272_v13, 0.0  ;;  %v18254_v44 = vpack.c.bf16 %v16501_v35, %v16497_v33  ;;  %v15055_v60 = vld [vmem:[%s15299_s14 + $0x8] sm:$0xff]  }
 0x4e6   : > { %vm5408_vm7 = vcmp.ge.f32.partialorder %v14273_v34, 0.0  ;;  %v5536_v1 = vmul.f32 0.02, %v14273_v34  ;;  %v5663_v8 = vsel %vm5407_vm5, %v14271_v47, %v5535_v54  ;;  %v18258_v33 = vpack.c.bf16 %v16541_v0, %v16537_v61  ;;  %v18303_v54 = vld [vmem:[#allocation73_spill] sm:$0xff] }
 0x4e7   : > { %vm5406_vm8 = vcmp.ge.f32.partialorder %v14274_v21, 0.0  ;;  %v5534_v6 = vmul.f32 0.02, %v14274_v21  ;;  %v5661_v59 = vsel %vm5405_vm6, %v14272_v13, %v5533_v46  ;;  %v18261_v35 = vpack.c.bf16 %v16555_v27, %v16553_v26  ;;  %v18301_v13 = vld [vmem:[#allocation66_spill] sm:$0xff]  ;;  %v18306_v46 = vld [vmem:[#allocation71_spill] sm:$0xff] }
 0x4e8   : > { %v5664_v11 = vsel %vm5408_vm7, %v14273_v34, %v5536_v1  ;;  %v18262_v51 = vpack.c.bf16 %v16627_v10, %v16623_v55  ;;  %v18263_v52 = vpack.c.bf16 %v16621_v7, %v16619_v50  ;;  %v18265_v4 = vpack.c.bf16 %v16637_v40, %v16635_v25  ;;  %v18276_v7 = vld [vmem:[#allocation44_spill] sm:$0xff]  ;;  %v18277_v55 = vld [vmem:[#allocation43_spill] sm:$0xff]  ;;  %v18279_v25 = vld [vmem:[#allocation49_spill] sm:$0xff] }
 0x4e9   : > { %v5728_v29 = vpack.c.bf16 %v5664_v11, %v5663_v8  ;;  %v5662_v5 = vsel %vm5406_vm8, %v14274_v21, %v5534_v6  ;;  %v18266_v36 = vpack.c.bf16 %v16659_v20, %v16655_v17  ;;  %v18267_v37 = vpack.c.bf16 %v16653_v57, %v16651_v16  ;;  %v18280_v40 = vld [vmem:[#allocation48_spill] sm:$0xff]  ;;  %v18283_v16 = vld [vmem:[#allocation46_spill] sm:$0xff]  ;;  %v18285_v17 = vld [vmem:[#allocation61_spill] sm:$0xff] }
 0x4ea   : > { %v5727_v22 = vpack.c.bf16 %v5662_v5, %v5661_v59  ;;  %v18268_v61 = vpack.c.bf16 %v16675_v45, %v16671_v19  ;;  %v18269_v0 = vpack.c.bf16 %v16669_v23, %v16667_v62  ;;  %v18270_v26 = vpack.c.bf16 %v16741_v56, %v16737_v3  ;;  %v18286_v19 = vld [vmem:[#allocation60_spill] sm:$0xff]  ;;  %v18288_v23 = vld [vmem:[#allocation59_spill] sm:$0xff]  ;;  %v18289_v45 = vld [vmem:[#allocation58_spill] sm:$0xff] }
 0x4eb   : > { %v18271_v27 = vpack.c.bf16 %v16735_v14, %v16733_v43  ;;  %v18272_v28 = vpack.c.bf16 %v16757_v49, %v16753_v39  ;;  %v18273_v62 = vpack.c.bf16 %v16751_v9, %v16749_v2  ;;  %v18275_v50 = vpack.c.bf16 %v16773_v48, %v18274_v30  ;;  %v18291_v14 = vld [vmem:[#allocation65_spill] sm:$0xff]  ;;  %v18292_v3 = vld [vmem:[#allocation64_spill] sm:$0xff]  ;;  %v18294_v2 = vld [vmem:[#allocation63_spill] sm:$0xff] }
 0x4ec   : > { %13277 = vmatprep.mubr.msk.bf16.mxu1 %vm2647_vm0, %v5727_v22  ;;  %v18278_v10 = vpack.c.bf16 %v18276_v7, %v18277_v55  ;;  %v18281_v41 = vpack.c.bf16 %v18279_v25, %v18280_v40  ;;  %v18284_v57 = vpack.c.bf16 %v18282_v42, %v18283_v16  ;;  %v18287_v20 = vpack.c.bf16 %v18285_v17, %v18286_v19  ;;  %v18295_v9 = vld [vmem:[#allocation62_spill] sm:$0xff]  ;;  %v18297_v49 = vld [vmem:[#allocation69_spill] sm:$0xff]  ;;  %v18298_v48 = vld [vmem:[#allocation68_spill] sm:$0xff] }
 0x4ed   : > { %13278 = vmatmul.mubr.msk.bf16.gmra.mrb[60].mxu1 %vm2647_vm0, %v5728_v29  ;;  %v18290_v43 = vpack.c.bf16 %v18288_v23, %v18289_v45  ;;  %v18293_v56 = vpack.c.bf16 %v18291_v14, %v18292_v3  ;;  %v18296_v39 = vpack.c.bf16 %v18294_v2, %v18295_v9  ;;  %v18299_v47 = vpack.c.bf16 %v18297_v49, %v18298_v48  ;;  %v18304_v34 = vld [vmem:[#allocation72_spill] sm:$0xff]  ;;  %v18307_v21 = vld [vmem:[#allocation70_spill] sm:$0xff]  ;;  %v18311_v11 = vld [vmem:[#allocation27_spill] sm:$0xff] }
 0x4ee   : > { %13285 = vmatprep.mubr.msk.bf16.mxu1 %vm2647_vm0, %v18254_v44  ;;  %v18302_v12 = vpack.c.bf16 %v18300_v18, %v18301_v13  ;;  %v18305_v24 = vpack.c.bf16 %v18303_v54, %v18304_v34  ;;  %v18308_v1 = vpack.c.bf16 %v18306_v46, %v18307_v21  ;;  %v18309_v6 = vmov 0   ;;  %v18310_v8 = vld [vmem:[#allocation28_spill] sm:$0xff]  ;;  %v18312_v59 = vld [vmem:[#allocation30_spill] sm:$0xff]  ;;  %v18313_v29 = vld [vmem:[#allocation29_spill] sm:$0xff] }
 0x4ef   : > { %v18314_v5 = vld [vmem:[#allocation32_spill] sm:$0xff]  ;;  %v18315_v22 = vld [vmem:[#allocation31_spill] sm:$0xff]  ;;  %v18317_v44 = vld [vmem:[#allocation33_spill] sm:$0xff] }
 0x4f5   : > { %13286 = vmatmul.mubr.msk.bf16.vlgmr.msra.gmra.mrb[0].mxu1 %vm2647_vm0, %v18255_v63  ;;  %v18319_v63 = vld [vmem:[#allocation35_spill] sm:$0xff] }
 0x4f6   : > { %13289 = vmatprep.mubr.msk.bf16.mxu1 %vm2647_vm0, %v18256_v58  ;;  %13350 = vmatpush3.bf16.msra.mxu1 %v15054_v15  ;;  %v18316_v15 = vld [vmem:[#allocation34_spill] sm:$0xff] }
 0x4f7   : > { %13351 = vmatprep.subr.bf16.mxu1 %v15055_v60  ;;  %v18320_v58 = vld [vmem:[#allocation38_spill] sm:$0xff] }
 0x4fa   : > { %13352 = vmatpush3.bf16.msra.mxu1 %v15055_v60  ;;  %v18318_v60 = vld [vmem:[#allocation36_spill] sm:$0xff] }
 0x4fd   : > { %13290 = vmatmul.mubr.msk.bf16.gmra.mrb[4].mxu1 %vm2647_vm0, %v18257_v38  ;;  %v18321_v38 = vld [vmem:[#allocation37_spill] sm:$0xff] }
 0x4fe   : > { %13293 = vmatprep.mubr.msk.bf16.mxu1 %vm2647_vm0, %v18258_v33  ;;  %v18322_v33 = vld [vmem:[#allocation40_spill] sm:$0xff] }
 0x505   : > { %13294 = vmatmul.mubr.msk.bf16.gmra.mrb[8].mxu1 %vm2647_vm0, %v18259_v31  ;;  %v18323_v31 = vld [vmem:[#allocation39_spill] sm:$0xff] }
 0x506   : > { %13297 = vmatprep.mubr.msk.bf16.mxu1 %vm2647_vm0, %v18260_v32  ;;  %v18324_v32 = vld [vmem:[#allocation42_spill] sm:$0xff] }
 0x50d   : > { %13298 = vmatmul.mubr.msk.bf16.gmra.mrb[12].mxu1 %vm2647_vm0, %v18261_v35  ;;  %v18325_v35 = vld [vmem:[#allocation41_spill] sm:$0xff] }
 0x50e   : > { %13301 = vmatprep.mubr.msk.bf16.mxu1 %vm2647_vm0, %v18262_v51  ;;  %v18326_v51 = vld [vmem:[#allocation51_spill] sm:$0xff] }
 0x515   : > { %13302 = vmatmul.mubr.msk.bf16.gmra.mrb[16].mxu1 %vm2647_vm0, %v18263_v52  ;;  %v18327_v52 = vld [vmem:[#allocation50_spill] sm:$0xff] }
 0x516   : > { %13305 = vmatprep.mubr.msk.bf16.mxu1 %vm2647_vm0, %v18264_v53  ;;  %v18328_v53 = vld [vmem:[#allocation53_spill] sm:$0xff] }
 0x51d   : > { %13306 = vmatmul.mubr.msk.bf16.gmra.mrb[20].mxu1 %vm2647_vm0, %v18265_v4  ;;  %v18329_v4 = vld [vmem:[#allocation52_spill] sm:$0xff] }
 0x51e   : > { %13309 = vmatprep.mubr.msk.bf16.mxu1 %vm2647_vm0, %v18266_v36  ;;  %v18330_v36 = vld [vmem:[#allocation55_spill] sm:$0xff] }
 0x525   : > { %13310 = vmatmul.mubr.msk.bf16.gmra.mrb[24].mxu1 %vm2647_vm0, %v18267_v37  ;;  %v18331_v37 = vld [vmem:[#allocation54_spill] sm:$0xff] }
 0x526   : > { %13313 = vmatprep.mubr.msk.bf16.mxu1 %vm2647_vm0, %v18268_v61  ;;  %v18332_v61 = vld [vmem:[#allocation57_spill] sm:$0xff] }
 0x52d   : > { %13314 = vmatmul.mubr.msk.bf16.gmra.mrb[28].mxu1 %vm2647_vm0, %v18269_v0  ;;  %v15056_v0 = vld [vmem:[%s15309_s24 + $0x20] sm:$0xff]  }
 0x52e   : > { %13317 = vmatprep.mubr.msk.bf16.mxu1 %vm2647_vm0, %v18270_v26  ;;  %13417 = vmatprep.subr.bf16.mxu1 %v15056_v0  ;;  %v18333_v26 = vld [vmem:[#allocation56_spill] sm:$0xff] }
 0x535   : > { %13318 = vmatmul.mubr.msk.bf16.gmra.mrb[32].mxu1 %vm2647_vm0, %v18271_v27  ;;  %v15057_v27 = vld [vmem:[%s15309_s24 + $0x28] sm:$0xff]  }
 0x536   : > { %13321 = vmatprep.mubr.msk.bf16.mxu1 %vm2647_vm0, %v18272_v28  ;;  %v17121_v28 = vld [vmem:[%s15304_s19] ss:$0 sm:$0xff] }
 0x53d   : > { %13322 = vmatmul.mubr.msk.bf16.gmra.mrb[36].mxu1 %vm2647_vm0, %v18273_v62 }
 0x53e   : > { %13325 = vmatprep.mubr.msk.bf16.mxu1 %vm2647_vm0, %v18275_v50 }
 0x545   : > { %13326 = vmatmul.mubr.msk.bf16.gmra.mrb[40].mxu1 %vm2647_vm0, %v18278_v10  ;;  %v17126_v10 = vld [vmem:[%s15309_s24 + $0x10] sm:$0xff]  }
 0x546   : > { %13329 = vmatprep.mubr.msk.bf16.mxu1 %vm2647_vm0, %v18281_v41 }
 0x54d   : > { %13330 = vmatmul.mubr.msk.bf16.gmra.mrb[44].mxu1 %vm2647_vm0, %v18284_v57 }
 0x54e   : > { %13333 = vmatprep.mubr.msk.bf16.mxu1 %vm2647_vm0, %v18287_v20 }
 0x555   : > { %13334 = vmatmul.mubr.msk.bf16.gmra.mrb[48].mxu1 %vm2647_vm0, %v18290_v43 }
 0x556   : > { %13337 = vmatprep.mubr.msk.bf16.mxu1 %vm2647_vm0, %v18293_v56 }
 0x55d   : > { %13338 = vmatmul.mubr.msk.bf16.gmra.mrb[52].mxu1 %vm2647_vm0, %v18296_v39 }
 0x55e   : > { %13341 = vmatprep.mubr.msk.bf16.mxu1 %vm2647_vm0, %v18299_v47 }
 0x565   : > { %13342 = vmatmul.mubr.msk.bf16.gmra.mrb[56].mxu1 %vm2647_vm0, %v18302_v12 }
 0x566   : > { %13345 = vmatprep.mubr.msk.bf16.mxu1 %vm2647_vm0, %v18305_v24 }
 0x56d   : > { %13346 = vmatmul.mubr.msk.bf16.gmra.mrb[60].mxu1 %vm2647_vm0, %v18308_v1 }
 0x56e   : > { %13353 = vmatprep.mubr.bf16.mxu1 %v18309_v6 }
 0x575   : > { %13354 = vmatmul.mubr.bf16.vlgmr.msra.gmra.mrb[0].mxu1 %v18309_v6 }
 0x576   : > { %13357 = vmatprep.mubr.bf16.mxu1 %v18309_v6  ;;  %13418 = vmatpush3.bf16.msra.mxu1 %v15056_v0 }
 0x577   : > { %13419 = vmatprep.subr.bf16.mxu1 %v15057_v27 }
 0x57a   : > { %13420 = vmatpush3.bf16.msra.mxu1 %v15057_v27 }
 0x57b   : > { %13453 = vmatprep.subr.bf16.mxu1 %v17126_v10 }
 0x57d   : > { %13358 = vmatmul.mubr.bf16.gmra.mrb[4].mxu1 %v18309_v6 }
 0x57e   : > { %13361 = vmatprep.mubr.bf16.mxu1 %v18309_v6 }
 0x585   : > { %13362 = vmatmul.mubr.bf16.gmra.mrb[8].mxu1 %v18309_v6 }
 0x586   : > { %13365 = vmatprep.mubr.bf16.mxu1 %v18309_v6 }
 0x58d   : > { %13366 = vmatmul.mubr.bf16.gmra.mrb[12].mxu1 %v18309_v6 }
 0x58e   : > { %13369 = vmatprep.mubr.msk.bf16.mxu1 %vm2647_vm0, %v18310_v8 }
 0x595   : > { %13370 = vmatmul.mubr.msk.bf16.gmra.mrb[16].mxu1 %vm2647_vm0, %v18311_v11 }
 0x596   : > { %13373 = vmatprep.mubr.msk.bf16.mxu1 %vm2647_vm0, %v18312_v59 }
 0x59d   : > { %13374 = vmatmul.mubr.msk.bf16.gmra.mrb[20].mxu1 %vm2647_vm0, %v18313_v29 }
 0x59e   : > { %13377 = vmatprep.mubr.msk.bf16.mxu1 %vm2647_vm0, %v18314_v5 }
 0x5a5   : > { %13378 = vmatmul.mubr.msk.bf16.gmra.mrb[24].mxu1 %vm2647_vm0, %v18315_v22 }
 0x5a6   : > { %13381 = vmatprep.mubr.msk.bf16.mxu1 %vm2647_vm0, %v18316_v15 }
 0x5ad   : > { %13382 = vmatmul.mubr.msk.bf16.gmra.mrb[28].mxu1 %vm2647_vm0, %v18317_v44 }
 0x5ae   : > { %13385 = vmatprep.mubr.msk.bf16.mxu1 %vm2647_vm0, %v18318_v60 }
 0x5b5   : > { %13386 = vmatmul.mubr.msk.bf16.gmra.mrb[32].mxu1 %vm2647_vm0, %v18319_v63 }
 0x5b6   : > { %13389 = vmatprep.mubr.msk.bf16.mxu1 %vm2647_vm0, %v18320_v58 }
 0x5bd   : > { %13390 = vmatmul.mubr.msk.bf16.gmra.mrb[36].mxu1 %vm2647_vm0, %v18321_v38 }
 0x5be   : > { %13393 = vmatprep.mubr.msk.bf16.mxu1 %vm2647_vm0, %v18322_v33 }
 0x5c5   : > { %13394 = vmatmul.mubr.msk.bf16.gmra.mrb[40].mxu1 %vm2647_vm0, %v18323_v31 }
 0x5c6   : > { %13397 = vmatprep.mubr.msk.bf16.mxu1 %vm2647_vm0, %v18324_v32 }
 0x5cd   : > { %13398 = vmatmul.mubr.msk.bf16.gmra.mrb[44].mxu1 %vm2647_vm0, %v18325_v35 }
 0x5ce   : > { %13401 = vmatprep.mubr.msk.bf16.mxu1 %vm2647_vm0, %v18326_v51 }
 0x5d5   : > { %13402 = vmatmul.mubr.msk.bf16.gmra.mrb[48].mxu1 %vm2647_vm0, %v18327_v52 }
 0x5d6   : > { %13405 = vmatprep.mubr.msk.bf16.mxu1 %vm2647_vm0, %v18328_v53 }
 0x5dd   : > { %13406 = vmatmul.mubr.msk.bf16.gmra.mrb[52].mxu1 %vm2647_vm0, %v18329_v4 }
 0x5de   : > { %13409 = vmatprep.mubr.msk.bf16.mxu1 %vm2647_vm0, %v18330_v36 }
 0x5e5   : > { %13410 = vmatmul.mubr.msk.bf16.gmra.mrb[56].mxu1 %vm2647_vm0, %v18331_v37 }
 0x5e6   : > { %13413 = vmatprep.mubr.msk.bf16.mxu1 %vm2647_vm0, %v18332_v61 }
 0x5ed   : > { %13414 = vmatmul.mubr.msk.bf16.gmra.mrb[60].mxu1 %vm2647_vm0, %v18333_v26 }
 0x648   : > { %v13355_v62 = vpop.f32.mrb[0].mxu1 }
 0x649   : > { %v14275_v30 = vadd.f32 %v13355_v62, %v17121_v28  ;;  %v6654_v50 = vpop.f32.mrb[1].mxu1 }
 0x64a   : > { %v14276_v7 = vadd.f32 %v17121_v28, %v6654_v50  ;;  %v13356_v55 = vpop.f32.mrb[2].mxu1 }
 0x64b   : > { %v7039_v25 = vmul.f32 0.02, %v14275_v30  ;;  %v14277_v40 = vadd.f32 %v13356_v55, %v17121_v28  ;;  %v6657_v41 = vpop.f32.mrb[3].mxu1  ;;  %vm6975_vm9 = vcmp.ge.f32.partialorder %v14275_v30, 0.0 }
 0x64c   : > { %v7037_v42 = vmul.f32 0.02, %v14276_v7  ;;  %v14278_v16 = vadd.f32 %v17121_v28, %v6657_v41  ;;  %vm6973_vm10 = vcmp.ge.f32.partialorder %v14276_v7, 0.0 }
 0x64d   : > { %vm6976_vm11 = vcmp.ge.f32.partialorder %v14277_v40, 0.0  ;;  %v7040_v57 = vmul.f32 0.02, %v14277_v40  ;;  %v17131_v19 = vsel %vm6975_vm9, %v14275_v30, %v7039_v25 }
 0x64e   : > { %vm6974_vm12 = vcmp.ge.f32.partialorder %v14278_v16, 0.0  ;;  %v7038_v17 = vmul.f32 0.02, %v14278_v16  ;;  %v17135_v23 = vsel %vm6973_vm10, %v14276_v7, %v7037_v42 }
 0x64f   : > { %v17133_v20 = vsel %vm6976_vm11, %v14277_v40, %v7040_v57 }
 0x650   : > { %v17139_v43 = vsel %vm6974_vm12, %v14278_v16, %v7038_v17  ;;  %v13359_v14 = vpop.f32.mrb[4].mxu1 }
 0x651   : > { %v14279_v56 = vadd.f32 %v13359_v14, %v17121_v28  ;;  %v6670_v2 = vpop.f32.mrb[5].mxu1 }
 0x652   : > { %v14280_v9 = vadd.f32 %v17121_v28, %v6670_v2  ;;  %v13360_v39 = vpop.f32.mrb[6].mxu1 }
 0x653   : > { %v7043_v49 = vmul.f32 0.02, %v14279_v56  ;;  %v14281_v48 = vadd.f32 %v13360_v39, %v17121_v28  ;;  %v6673_v47 = vpop.f32.mrb[7].mxu1  ;;  %vm6979_vm13 = vcmp.ge.f32.partialorder %v14279_v56, 0.0 }
 0x654   : > { %v7041_v18 = vmul.f32 0.02, %v14280_v9  ;;  %v14282_v13 = vadd.f32 %v17121_v28, %v6673_v47  ;;  %vm6977_vm14 = vcmp.ge.f32.partialorder %v14280_v9, 0.0 }
 0x655   : > { %vm6980_vm15 = vcmp.ge.f32.partialorder %v14281_v48, 0.0  ;;  %v7044_v12 = vmul.f32 0.02, %v14281_v48  ;;  %v17147_v34 = vsel %vm6979_vm13, %v14279_v56, %v7043_v49 }
 0x656   : > { %vm6978_vm1 = vcmp.ge.f32.partialorder %v14282_v13, 0.0  ;;  %v7042_v54 = vmul.f32 0.02, %v14282_v13  ;;  %v17151_v46 = vsel %vm6977_vm14, %v14280_v9, %v7041_v18 }
 0x657   : > { %v17149_v24 = vsel %vm6980_vm15, %v14281_v48, %v7044_v12 }
 0x658   : > { %v17155_v1 = vsel %vm6978_vm1, %v14282_v13, %v7042_v54  ;;  %v13363_v8 = vpop.f32.mrb[8].mxu1 }
 0x659   : > { %v14283_v59 = vadd.f32 %v13363_v8, %v17121_v28  ;;  %v6686_v29 = vpop.f32.mrb[9].mxu1 }
 0x65a   : > { %v14284_v5 = vadd.f32 %v17121_v28, %v6686_v29  ;;  %v13364_v22 = vpop.f32.mrb[10].mxu1 }
 0x65b   : > { %v7047_v15 = vmul.f32 0.02, %v14283_v59  ;;  %v14285_v44 = vadd.f32 %v13364_v22, %v17121_v28  ;;  %v6689_v60 = vpop.f32.mrb[11].mxu1  ;;  %vm6983_vm2 = vcmp.ge.f32.partialorder %v14283_v59, 0.0 }
 0x65c   : > { %v7045_v63 = vmul.f32 0.02, %v14284_v5  ;;  %v14286_v58 = vadd.f32 %v17121_v28, %v6689_v60  ;;  %vm6981_vm3 = vcmp.ge.f32.partialorder %v14284_v5, 0.0 }
 0x65d   : > { %vm6984_vm4 = vcmp.ge.f32.partialorder %v14285_v44, 0.0  ;;  %v7048_v38 = vmul.f32 0.02, %v14285_v44  ;;  %v17163_v31 = vsel %vm6983_vm2, %v14283_v59, %v7047_v15 }
 0x65e   : > { %vm6982_vm5 = vcmp.ge.f32.partialorder %v14286_v58, 0.0  ;;  %v7046_v33 = vmul.f32 0.02, %v14286_v58  ;;  %v17167_v35 = vsel %vm6981_vm3, %v14284_v5, %v7045_v63 }
 0x65f   : > { %v17165_v32 = vsel %vm6984_vm4, %v14285_v44, %v7048_v38  ;;  %v15059_v38 = vld [vmem:[%s15309_s24 + $0x18] sm:$0xff]  }
 0x660   : > { %v17171_v52 = vsel %vm6982_vm5, %v14286_v58, %v7046_v33  ;;  %v13367_v53 = vpop.f32.mrb[12].mxu1 }
 0x661   : > { %v14287_v36 = vadd.f32 %v13367_v53, %v17121_v28  ;;  %v6702_v37 = vpop.f32.mrb[13].mxu1 }
 0x662   : > { %v14288_v61 = vadd.f32 %v17121_v28, %v6702_v37  ;;  %v13368_v0 = vpop.f32.mrb[14].mxu1 }
 0x663   : > { %v7051_v26 = vmul.f32 0.02, %v14287_v36  ;;  %v14289_v27 = vadd.f32 %v13368_v0, %v17121_v28  ;;  %v6705_v62 = vpop.f32.mrb[15].mxu1  ;;  %vm6987_vm6 = vcmp.ge.f32.partialorder %v14287_v36, 0.0 }
 0x664   : > { %v7049_v30 = vmul.f32 0.02, %v14288_v61  ;;  %v14290_v50 = vadd.f32 %v17121_v28, %v6705_v62  ;;  %vm6985_vm7 = vcmp.ge.f32.partialorder %v14288_v61, 0.0 }
 0x665   : > { %vm6988_vm8 = vcmp.ge.f32.partialorder %v14289_v27, 0.0  ;;  %v7052_v7 = vmul.f32 0.02, %v14289_v27  ;;  %v17179_v25 = vsel %vm6987_vm6, %v14287_v36, %v7051_v26 }
 0x666   : > { %vm6986_vm9 = vcmp.ge.f32.partialorder %v14290_v50, 0.0  ;;  %v7050_v55 = vmul.f32 0.02, %v14290_v50  ;;  %v17183_v41 = vsel %vm6985_vm7, %v14288_v61, %v7049_v30 }
 0x667   : > { %v17181_v40 = vsel %vm6988_vm8, %v14289_v27, %v7052_v7 }
 0x668   : > { %v17187_v16 = vsel %vm6986_vm9, %v14290_v50, %v7050_v55  ;;  %v13371_v57 = vpop.f32.mrb[16].mxu1 }
 0x669   : > { %v14291_v14 = vadd.f32 %v13371_v57, %v17121_v28  ;;  %v6718_v56 = vpop.f32.mrb[17].mxu1 }
 0x66a   : > { %v14292_v2 = vadd.f32 %v17121_v28, %v6718_v56  ;;  %v13372_v9 = vpop.f32.mrb[18].mxu1 }
 0x66b   : > { %v7055_v39 = vmul.f32 0.02, %v14291_v14  ;;  %v14293_v49 = vadd.f32 %v13372_v9, %v17121_v28  ;;  %v6721_v48 = vpop.f32.mrb[19].mxu1  ;;  %vm6991_vm10 = vcmp.ge.f32.partialorder %v14291_v14, 0.0 }
 0x66c   : > { %v7053_v47 = vmul.f32 0.02, %v14292_v2  ;;  %v14294_v18 = vadd.f32 %v17121_v28, %v6721_v48  ;;  %vm6989_vm11 = vcmp.ge.f32.partialorder %v14292_v2, 0.0 }
 0x66d   : > { %vm6992_vm12 = vcmp.ge.f32.partialorder %v14293_v49, 0.0  ;;  %v7056_v13 = vmul.f32 0.02, %v14293_v49  ;;  %v7119_v54 = vsel %vm6991_vm10, %v14291_v14, %v7055_v39 }
 0x66e   : > { %vm6990_vm13 = vcmp.ge.f32.partialorder %v14294_v18, 0.0  ;;  %v7054_v12 = vmul.f32 0.02, %v14294_v18  ;;  %v7117_v59 = vsel %vm6989_vm11, %v14292_v2, %v7053_v47 }
 0x66f   : > { %v7120_v8 = vsel %vm6992_vm12, %v14293_v49, %v7056_v13 }
 0x670   : > { %v17195_v29 = vpack.c.bf16 %v7120_v8, %v7119_v54  ;;  %v7118_v5 = vsel %vm6990_vm13, %v14294_v18, %v7054_v12  ;;  %v13375_v22 = vpop.f32.mrb[20].mxu1 }
 0x671   : > { %v17197_v15 = vpack.c.bf16 %v7118_v5, %v7117_v59  ;;  %v14295_v44 = vadd.f32 %v13375_v22, %v17121_v28  ;;  %v6734_v60 = vpop.f32.mrb[21].mxu1 }
 0x672   : > { %v14296_v63 = vadd.f32 %v17121_v28, %v6734_v60  ;;  %v13376_v58 = vpop.f32.mrb[22].mxu1 }
 0x673   : > { %v7059_v33 = vmul.f32 0.02, %v14295_v44  ;;  %v14297_v53 = vadd.f32 %v13376_v58, %v17121_v28  ;;  %v6737_v36 = vpop.f32.mrb[23].mxu1  ;;  %13421 = vmatprep.mubr.msk.bf16.mxu1 %vm2647_vm0, %v17197_v15  ;;  %vm6995_vm14 = vcmp.ge.f32.partialorder %v14295_v44, 0.0 }
 0x674   : > { %v7057_v37 = vmul.f32 0.02, %v14296_v63  ;;  %v14298_v61 = vadd.f32 %v17121_v28, %v6737_v36  ;;  %13422 = vmatmul.mubr.msk.bf16.vlgmr.msra.gmra.mrb[64].mxu1 %vm2647_vm0, %v17195_v29  ;;  %vm6993_vm15 = vcmp.ge.f32.partialorder %v14296_v63, 0.0 }
 0x675   : > { %vm6996_vm1 = vcmp.ge.f32.partialorder %v14297_v53, 0.0  ;;  %v7060_v0 = vmul.f32 0.02, %v14297_v53  ;;  %13454 = vmatpush3.bf16.msra.mxu1 %v17126_v10  ;;  %v7123_v27 = vsel %vm6995_vm14, %v14295_v44, %v7059_v33 }
 0x676   : > { %vm6994_vm2 = vcmp.ge.f32.partialorder %v14298_v61, 0.0  ;;  %v7058_v26 = vmul.f32 0.02, %v14298_v61  ;;  %13455 = vmatprep.subr.bf16.mxu1 %v15059_v38  ;;  %v7121_v30 = vsel %vm6993_vm15, %v14296_v63, %v7057_v37 }
 0x677   : > { %v7124_v62 = vsel %vm6996_vm1, %v14297_v53, %v7060_v0 }
 0x678   : > { %v17209_v50 = vpack.c.bf16 %v7124_v62, %v7123_v27  ;;  %v7122_v7 = vsel %vm6994_vm2, %v14298_v61, %v7058_v26  ;;  %v13379_v55 = vpop.f32.mrb[24].mxu1 }
 0x679   : > { %v17211_v57 = vpack.c.bf16 %v7122_v7, %v7121_v30  ;;  %v14299_v14 = vadd.f32 %v13379_v55, %v17121_v28  ;;  %v6750_v56 = vpop.f32.mrb[25].mxu1  ;;  %13456 = vmatpush3.bf16.msra.mxu1 %v15059_v38 }
 0x67a   : > { %v14300_v2 = vadd.f32 %v17121_v28, %v6750_v56  ;;  %v13380_v9 = vpop.f32.mrb[26].mxu1 }
 0x67b   : > { %v7063_v10 = vmul.f32 0.02, %v14299_v14  ;;  %v14301_v39 = vadd.f32 %v13380_v9, %v17121_v28  ;;  %v6753_v49 = vpop.f32.mrb[27].mxu1  ;;  %13425 = vmatprep.mubr.msk.bf16.mxu1 %vm2647_vm0, %v17211_v57  ;;  %vm6999_vm3 = vcmp.ge.f32.partialorder %v14299_v14, 0.0 }
 0x67c   : > { %v7061_v48 = vmul.f32 0.02, %v14300_v2  ;;  %v14302_v47 = vadd.f32 %v17121_v28, %v6753_v49  ;;  %13426 = vmatmul.mubr.msk.bf16.gmra.mrb[68].mxu1 %vm2647_vm0, %v17209_v50  ;;  %vm6997_vm4 = vcmp.ge.f32.partialorder %v14300_v2, 0.0  ;;  %v17240_v49 = vld [vmem:[%s15309_s24] sm:$0xff]  }
 0x67d   : > { %vm7000_vm5 = vcmp.ge.f32.partialorder %v14301_v39, 0.0  ;;  %v7064_v18 = vmul.f32 0.02, %v14301_v39  ;;  %v7127_v12 = vsel %vm6999_vm3, %v14299_v14, %v7063_v10  ;;  %13489 = vmatprep.subr.bf16.mxu1 %v17240_v49 }
 0x67e   : > { %vm6998_vm6 = vcmp.ge.f32.partialorder %v14302_v47, 0.0  ;;  %v7062_v13 = vmul.f32 0.02, %v14302_v47  ;;  %v7125_v8 = vsel %vm6997_vm4, %v14300_v2, %v7061_v48 }
 0x67f   : > { %v7128_v54 = vsel %vm7000_vm5, %v14301_v39, %v7064_v18 }
 0x680   : > { %v17221_v59 = vpack.c.bf16 %v7128_v54, %v7127_v12  ;;  %v7126_v5 = vsel %vm6998_vm6, %v14302_v47, %v7062_v13  ;;  %v13383_v22 = vpop.f32.mrb[28].mxu1 }
 0x681   : > { %v17223_v44 = vpack.c.bf16 %v7126_v5, %v7125_v8  ;;  %v14303_v60 = vadd.f32 %v13383_v22, %v17121_v28  ;;  %v6766_v63 = vpop.f32.mrb[29].mxu1 }
 0x682   : > { %v14304_v58 = vadd.f32 %v17121_v28, %v6766_v63  ;;  %v13384_v38 = vpop.f32.mrb[30].mxu1 }
 0x683   : > { %v7067_v33 = vmul.f32 0.02, %v14303_v60  ;;  %v14305_v53 = vadd.f32 %v13384_v38, %v17121_v28  ;;  %v6769_v36 = vpop.f32.mrb[31].mxu1  ;;  %13429 = vmatprep.mubr.msk.bf16.mxu1 %vm2647_vm0, %v17223_v44  ;;  %vm7003_vm7 = vcmp.ge.f32.partialorder %v14303_v60, 0.0 }
 0x684   : > { %v7065_v37 = vmul.f32 0.02, %v14304_v58  ;;  %v14306_v61 = vadd.f32 %v17121_v28, %v6769_v36  ;;  %13430 = vmatmul.mubr.msk.bf16.gmra.mrb[72].mxu1 %vm2647_vm0, %v17221_v59  ;;  %vm7001_vm8 = vcmp.ge.f32.partialorder %v14304_v58, 0.0 }
 0x685   : > { %vm7004_vm9 = vcmp.ge.f32.partialorder %v14305_v53, 0.0  ;;  %v7068_v0 = vmul.f32 0.02, %v14305_v53  ;;  %v7131_v27 = vsel %vm7003_vm7, %v14303_v60, %v7067_v33 }
 0x686   : > { %vm7002_vm10 = vcmp.ge.f32.partialorder %v14306_v61, 0.0  ;;  %v7066_v26 = vmul.f32 0.02, %v14306_v61  ;;  %v7129_v30 = vsel %vm7001_vm8, %v14304_v58, %v7065_v37 }
 0x687   : > { %v7132_v62 = vsel %vm7004_vm9, %v14305_v53, %v7068_v0 }
 0x688   : > { %v17233_v7 = vpack.c.bf16 %v7132_v62, %v7131_v27  ;;  %v7130_v55 = vsel %vm7002_vm10, %v14306_v61, %v7066_v26  ;;  %v13387_v14 = vpop.f32.mrb[32].mxu1 }
 0x689   : > { %v17235_v56 = vpack.c.bf16 %v7130_v55, %v7129_v30  ;;  %v14307_v2 = vadd.f32 %v13387_v14, %v17121_v28  ;;  %v6782_v9 = vpop.f32.mrb[33].mxu1 }
 0x68a   : > { %18334 = vst [vmem:[#allocation45_spill] sm:$0xff] %v17233_v7  ;;  %v14308_v10 = vadd.f32 %v17121_v28, %v6782_v9  ;;  %v13388_v39 = vpop.f32.mrb[34].mxu1 }
 0x68b   : > { %v7071_v48 = vmul.f32 0.02, %v14307_v2  ;;  %v14309_v47 = vadd.f32 %v13388_v39, %v17121_v28  ;;  %v6785_v18 = vpop.f32.mrb[35].mxu1  ;;  %13433 = vmatprep.mubr.msk.bf16.mxu1 %vm2647_vm0, %v17235_v56  ;;  %vm7007_vm11 = vcmp.ge.f32.partialorder %v14307_v2, 0.0 }
 0x68c   : > { %v7069_v13 = vmul.f32 0.02, %v14308_v10  ;;  %v14310_v12 = vadd.f32 %v17121_v28, %v6785_v18  ;;  %13434 = vmatmul.mubr.msk.bf16.gmra.mrb[76].mxu1 %vm2647_vm0, %v17233_v7  ;;  %vm7005_vm12 = vcmp.ge.f32.partialorder %v14308_v10, 0.0 }
 0x68d   : > { %vm7008_vm13 = vcmp.ge.f32.partialorder %v14309_v47, 0.0  ;;  %v7072_v54 = vmul.f32 0.02, %v14309_v47  ;;  %v17249_v5 = vsel %vm7007_vm11, %v14307_v2, %v7071_v48 }
 0x68e   : > { %vm7006_vm14 = vcmp.ge.f32.partialorder %v14310_v12, 0.0  ;;  %v7070_v8 = vmul.f32 0.02, %v14310_v12  ;;  %v17253_v60 = vsel %vm7005_vm12, %v14308_v10, %v7069_v13 }
 0x68f   : > { %v17251_v22 = vsel %vm7008_vm13, %v14309_v47, %v7072_v54 }
 0x690   : > { %v17257_v58 = vsel %vm7006_vm14, %v14310_v12, %v7070_v8  ;;  %v13391_v38 = vpop.f32.mrb[36].mxu1 }
 0x691   : > { %v14311_v53 = vadd.f32 %v13391_v38, %v17121_v28  ;;  %v6798_v36 = vpop.f32.mrb[37].mxu1 }
 0x692   : > { %v14312_v37 = vadd.f32 %v17121_v28, %v6798_v36  ;;  %v13392_v61 = vpop.f32.mrb[38].mxu1 }
 0x693   : > { %v7075_v0 = vmul.f32 0.02, %v14311_v53  ;;  %v14313_v26 = vadd.f32 %v13392_v61, %v17121_v28  ;;  %v6801_v27 = vpop.f32.mrb[39].mxu1  ;;  %vm7011_vm15 = vcmp.ge.f32.partialorder %v14311_v53, 0.0 }
 0x694   : > { %v7073_v62 = vmul.f32 0.02, %v14312_v37  ;;  %v14314_v30 = vadd.f32 %v17121_v28, %v6801_v27  ;;  %vm7009_vm1 = vcmp.ge.f32.partialorder %v14312_v37, 0.0 }
 0x695   : > { %vm7012_vm2 = vcmp.ge.f32.partialorder %v14313_v26, 0.0  ;;  %v7076_v55 = vmul.f32 0.02, %v14313_v26  ;;  %v17265_v2 = vsel %vm7011_vm15, %v14311_v53, %v7075_v0 }
 0x696   : > { %vm7010_vm3 = vcmp.ge.f32.partialorder %v14314_v30, 0.0  ;;  %v7074_v14 = vmul.f32 0.02, %v14314_v30  ;;  %v17269_v10 = vsel %vm7009_vm1, %v14312_v37, %v7073_v62 }
 0x697   : > { %v17267_v9 = vsel %vm7012_vm2, %v14313_v26, %v7076_v55 }
 0x698   : > { %v17273_v48 = vsel %vm7010_vm3, %v14314_v30, %v7074_v14  ;;  %v13395_v47 = vpop.f32.mrb[40].mxu1 }
 0x699   : > { %v14315_v13 = vadd.f32 %v13395_v47, %v17121_v28  ;;  %v6814_v12 = vpop.f32.mrb[41].mxu1 }
 0x69a   : > { %v14316_v54 = vadd.f32 %v17121_v28, %v6814_v12  ;;  %v13396_v8 = vpop.f32.mrb[42].mxu1 }
 0x69b   : > { %v7079_v38 = vmul.f32 0.02, %v14315_v13  ;;  %v14317_v53 = vadd.f32 %v13396_v8, %v17121_v28  ;;  %v6817_v36 = vpop.f32.mrb[43].mxu1  ;;  %vm7015_vm4 = vcmp.ge.f32.partialorder %v14315_v13, 0.0 }
 0x69c   : > { %v7077_v37 = vmul.f32 0.02, %v14316_v54  ;;  %v14318_v61 = vadd.f32 %v17121_v28, %v6817_v36  ;;  %vm7013_vm5 = vcmp.ge.f32.partialorder %v14316_v54, 0.0 }
 0x69d   : > { %vm7016_vm6 = vcmp.ge.f32.partialorder %v14317_v53, 0.0  ;;  %v7080_v0 = vmul.f32 0.02, %v14317_v53  ;;  %v17281_v27 = vsel %vm7015_vm4, %v14315_v13, %v7079_v38 }
 0x69e   : > { %vm7014_vm7 = vcmp.ge.f32.partialorder %v14318_v61, 0.0  ;;  %v7078_v26 = vmul.f32 0.02, %v14318_v61  ;;  %v17285_v30 = vsel %vm7013_vm5, %v14316_v54, %v7077_v37 }
 0x69f   : > { %v17283_v62 = vsel %vm7016_vm6, %v14317_v53, %v7080_v0 }
 0x6a0   : > { %v17289_v14 = vsel %vm7014_vm7, %v14318_v61, %v7078_v26  ;;  %v13399_v47 = vpop.f32.mrb[44].mxu1 }
 0x6a1   : > { %v14319_v8 = vadd.f32 %v13399_v47, %v17121_v28  ;;  %v6830_v36 = vpop.f32.mrb[45].mxu1 }
 0x6a2   : > { %v14320_v39 = vadd.f32 %v17121_v28, %v6830_v36  ;;  %v13400_v13 = vpop.f32.mrb[46].mxu1 }
 0x6a3   : > { %v7083_v38 = vmul.f32 0.02, %v14319_v8  ;;  %v14321_v53 = vadd.f32 %v13400_v13, %v17121_v28  ;;  %v6833_v54 = vpop.f32.mrb[47].mxu1  ;;  %vm7019_vm8 = vcmp.ge.f32.partialorder %v14319_v8, 0.0 }
 0x6a4   : > { %v7081_v37 = vmul.f32 0.02, %v14320_v39  ;;  %v14322_v0 = vadd.f32 %v17121_v28, %v6833_v54  ;;  %vm7017_vm9 = vcmp.ge.f32.partialorder %v14320_v39, 0.0 }
 0x6a5   : > { %vm7020_vm10 = vcmp.ge.f32.partialorder %v14321_v53, 0.0  ;;  %v7084_v61 = vmul.f32 0.02, %v14321_v53  ;;  %v17297_v55 = vsel %vm7019_vm8, %v14319_v8, %v7083_v38 }
 0x6a6   : > { %vm7018_vm11 = vcmp.ge.f32.partialorder %v14322_v0, 0.0  ;;  %v7082_v26 = vmul.f32 0.02, %v14322_v0  ;;  %v17301_v12 = vsel %vm7017_vm9, %v14320_v39, %v7081_v37 }
 0x6a7   : > { %v17299_v47 = vsel %vm7020_vm10, %v14321_v53, %v7084_v61 }
 0x6a8   : > { %v17305_v13 = vsel %vm7018_vm11, %v14322_v0, %v7082_v26  ;;  %v13403_v18 = vpop.f32.mrb[48].mxu1 }
 0x6a9   : > { %v14323_v63 = vadd.f32 %v13403_v18, %v17121_v28  ;;  %v6846_v33 = vpop.f32.mrb[49].mxu1 }
 0x6aa   : > { %v14324_v42 = vadd.f32 %v17121_v28, %v6846_v33  ;;  %v13404_v8 = vpop.f32.mrb[50].mxu1 }
 0x6ab   : > { %v7087_v38 = vmul.f32 0.02, %v14323_v63  ;;  %v14325_v53 = vadd.f32 %v13404_v8, %v17121_v28  ;;  %v6849_v39 = vpop.f32.mrb[51].mxu1  ;;  %vm7023_vm12 = vcmp.ge.f32.partialorder %v14323_v63, 0.0 }
 0x6ac   : > { %v7085_v37 = vmul.f32 0.02, %v14324_v42  ;;  %v14326_v61 = vadd.f32 %v17121_v28, %v6849_v39  ;;  %vm7021_vm13 = vcmp.ge.f32.partialorder %v14324_v42, 0.0 }
 0x6ad   : > { %vm7024_vm14 = vcmp.ge.f32.partialorder %v14325_v53, 0.0  ;;  %v7088_v0 = vmul.f32 0.02, %v14325_v53  ;;  %v7151_v36 = vsel %vm7023_vm12, %v14323_v63, %v7087_v38 }
 0x6ae   : > { %vm7022_vm15 = vcmp.ge.f32.partialorder %v14326_v61, 0.0  ;;  %v7086_v26 = vmul.f32 0.02, %v14326_v61  ;;  %v7149_v18 = vsel %vm7021_vm13, %v14324_v42, %v7085_v37 }
 0x6af   : > { %v7152_v54 = vsel %vm7024_vm14, %v14325_v53, %v7088_v0 }
 0x6b0   : > { %v7190_v17 = vpack.c.bf16 %v7152_v54, %v7151_v36  ;;  %v7150_v51 = vsel %vm7022_vm15, %v14326_v61, %v7086_v26  ;;  %v13407_v33 = vpop.f32.mrb[52].mxu1 }
 0x6b1   : > { %v7189_v4 = vpack.c.bf16 %v7150_v51, %v7149_v18  ;;  %v14327_v21 = vadd.f32 %v13407_v33, %v17121_v28  ;;  %v6862_v8 = vpop.f32.mrb[53].mxu1 }
 0x6b2   : > { %v14328_v11 = vadd.f32 %v17121_v28, %v6862_v8  ;;  %v13408_v45 = vpop.f32.mrb[54].mxu1 }
 0x6b3   : > { %v7091_v3 = vmul.f32 0.02, %v14327_v21  ;;  %v14329_v39 = vadd.f32 %v13408_v45, %v17121_v28  ;;  %v6865_v7 = vpop.f32.mrb[55].mxu1  ;;  %13437 = vmatprep.mubr.msk.bf16.mxu1 %vm2647_vm0, %v7189_v4  ;;  %vm7027_vm1 = vcmp.ge.f32.partialorder %v14327_v21, 0.0 }
 0x6b4   : > { %v7089_v63 = vmul.f32 0.02, %v14328_v11  ;;  %v14330_v42 = vadd.f32 %v17121_v28, %v6865_v7  ;;  %13438 = vmatmul.mubr.msk.bf16.gmra.mrb[80].mxu1 %vm2647_vm0, %v7190_v17  ;;  %vm7025_vm2 = vcmp.ge.f32.partialorder %v14328_v11, 0.0 }
 0x6b5   : > { %vm7028_vm3 = vcmp.ge.f32.partialorder %v14329_v39, 0.0  ;;  %v7092_v51 = vmul.f32 0.02, %v14329_v39  ;;  %v7155_v54 = vsel %vm7027_vm1, %v14327_v21, %v7091_v3 }
 0x6b6   : > { %vm7026_vm4 = vcmp.ge.f32.partialorder %v14330_v42, 0.0  ;;  %v7090_v36 = vmul.f32 0.02, %v14330_v42  ;;  %v7153_v53 = vsel %vm7025_vm2, %v14328_v11, %v7089_v63 }
 0x6b7   : > { %v7156_v38 = vsel %vm7028_vm3, %v14329_v39, %v7092_v51 }
 0x6b8   : > { %v7192_v37 = vpack.c.bf16 %v7156_v38, %v7155_v54  ;;  %v7154_v61 = vsel %vm7026_vm4, %v14330_v42, %v7090_v36  ;;  %v13411_v45 = vpop.f32.mrb[56].mxu1 }
 0x6b9   : > { %v7191_v0 = vpack.c.bf16 %v7154_v61, %v7153_v53  ;;  %v14331_v4 = vadd.f32 %v13411_v45, %v17121_v28  ;;  %v6878_v26 = vpop.f32.mrb[57].mxu1 }
 0x6ba   : > { %v14332_v18 = vadd.f32 %v17121_v28, %v6878_v26  ;;  %v13412_v7 = vpop.f32.mrb[58].mxu1 }
 0x6bb   : > { %v7095_v33 = vmul.f32 0.02, %v14331_v4  ;;  %v14333_v17 = vadd.f32 %v13412_v7, %v17121_v28  ;;  %v6881_v8 = vpop.f32.mrb[59].mxu1  ;;  %13441 = vmatprep.mubr.msk.bf16.mxu1 %vm2647_vm0, %v7191_v0  ;;  %vm7031_vm5 = vcmp.ge.f32.partialorder %v14331_v4, 0.0 }
 0x6bc   : > { %v7093_v3 = vmul.f32 0.02, %v14332_v18  ;;  %v14334_v21 = vadd.f32 %v17121_v28, %v6881_v8  ;;  %13442 = vmatmul.mubr.msk.bf16.gmra.mrb[84].mxu1 %vm2647_vm0, %v7192_v37  ;;  %vm7029_vm6 = vcmp.ge.f32.partialorder %v14332_v18, 0.0 }
 0x6bd   : > { %vm7032_vm7 = vcmp.ge.f32.partialorder %v14333_v17, 0.0  ;;  %v7096_v11 = vmul.f32 0.02, %v14333_v17  ;;  %v7159_v63 = vsel %vm7031_vm5, %v14331_v4, %v7095_v33 }
 0x6be   : > { %vm7030_vm8 = vcmp.ge.f32.partialorder %v14334_v21, 0.0  ;;  %v7094_v39 = vmul.f32 0.02, %v14334_v21  ;;  %v7157_v51 = vsel %vm7029_vm6, %v14332_v18, %v7093_v3 }
 0x6bf   : > { %v7160_v42 = vsel %vm7032_vm7, %v14333_v17, %v7096_v11 }
 0x6c0   : > { %v7194_v36 = vpack.c.bf16 %v7160_v42, %v7159_v63  ;;  %v7158_v54 = vsel %vm7030_vm8, %v14334_v21, %v7094_v39  ;;  %v13415_v38 = vpop.f32.mrb[60].mxu1 }
 0x6c1   : > { %v7193_v53 = vpack.c.bf16 %v7158_v54, %v7157_v51  ;;  %v14335_v61 = vadd.f32 %v13415_v38, %v17121_v28  ;;  %v6894_v45 = vpop.f32.mrb[61].mxu1  ;;  %v15061_v51 = vld [vmem:[%s15309_s24 + $0x8] sm:$0xff]   ;;  %v18337_v54 = vpack.c.bf16 %v17155_v1, %v17151_v46  ;;  %v18344_v46 = vpack.c.bf16 %v17251_v22, %v17249_v5 }
 0x6c2   : > { %v14336_v0 = vadd.f32 %v17121_v28, %v6894_v45  ;;  %v13416_v26 = vpop.f32.mrb[62].mxu1  ;;  %v18345_v1 = vpack.c.bf16 %v17273_v48, %v17269_v10 }
 0x6c3   : > { %v7099_v7 = vmul.f32 0.02, %v14335_v61  ;;  %v14337_v37 = vadd.f32 %v13416_v26, %v17121_v28  ;;  %v6897_v8 = vpop.f32.mrb[63].mxu1  ;;  %13445 = vmatprep.mubr.msk.bf16.mxu1 %vm2647_vm0, %v7193_v53  ;;  %vm7035_vm9 = vcmp.ge.f32.partialorder %v14335_v61, 0.0 }
 0x6c4   : > { %v7097_v4 = vmul.f32 0.02, %v14336_v0  ;;  %v14338_v18 = vadd.f32 %v17121_v28, %v6897_v8  ;;  %13446 = vmatmul.mubr.msk.bf16.gmra.mrb[88].mxu1 %vm2647_vm0, %v7194_v36  ;;  %vm7033_vm10 = vcmp.ge.f32.partialorder %v14336_v0, 0.0  ;;  %v18335_v28 = vpack.c.bf16 %v17139_v43, %v17135_v23 }
 0x6c5   : > { %vm7036_vm11 = vcmp.ge.f32.partialorder %v14337_v37, 0.0  ;;  %v7100_v33 = vmul.f32 0.02, %v14337_v37  ;;  %v7163_v3 = vsel %vm7035_vm9, %v14335_v61, %v7099_v7  ;;  %v18336_v36 = vpack.c.bf16 %v17133_v20, %v17131_v19 }
 0x6c6   : > { %vm7034_vm12 = vcmp.ge.f32.partialorder %v14338_v18, 0.0  ;;  %v7098_v17 = vmul.f32 0.02, %v14338_v18  ;;  %v7161_v11 = vsel %vm7033_vm10, %v14336_v0, %v7097_v4  ;;  %v18338_v23 = vpack.c.bf16 %v17149_v24, %v17147_v34 }
 0x6c7   : > { %v7164_v21 = vsel %vm7036_vm11, %v14337_v37, %v7100_v33  ;;  %v18339_v43 = vpack.c.bf16 %v17171_v52, %v17167_v35  ;;  %v18340_v19 = vpack.c.bf16 %v17165_v32, %v17163_v31  ;;  %v18341_v20 = vpack.c.bf16 %v17187_v16, %v17183_v41  ;;  %v15062_v41 = vld [vmem:[%s18201_s6 + $0x40] sm:$0xff]   ;;  %v15063_v16 = vld [vmem:[%s18201_s6 + $0x48] sm:$0xff]  }
 0x6c8   : > { %v7196_v39 = vpack.c.bf16 %v7164_v21, %v7163_v3  ;;  %v7162_v63 = vsel %vm7034_vm12, %v14338_v18, %v7098_v17  ;;  %v18342_v34 = vpack.c.bf16 %v17181_v40, %v17179_v25  ;;  %v18343_v24 = vpack.c.bf16 %v17257_v58, %v17253_v60  ;;  %v18351_v40 = vld [vmem:[#allocation45_spill] sm:$0xff] }
 0x6c9   : > { %v7195_v42 = vpack.c.bf16 %v7162_v63, %v7161_v11  ;;  %v18346_v31 = vpack.c.bf16 %v17267_v9, %v17265_v2  ;;  %v18347_v32 = vpack.c.bf16 %v17289_v14, %v17285_v30  ;;  %v18348_v35 = vpack.c.bf16 %v17283_v62, %v17281_v27 }
 0x6ca   : > { %v18349_v52 = vpack.c.bf16 %v17305_v13, %v17301_v12  ;;  %v18350_v25 = vpack.c.bf16 %v17299_v47, %v17297_v55 }
 0x6cb   : > { %13449 = vmatprep.mubr.msk.bf16.mxu1 %vm2647_vm0, %v7195_v42 }
 0x6cc   : > { %13450 = vmatmul.mubr.msk.bf16.gmra.mrb[92].mxu1 %vm2647_vm0, %v7196_v39 }
 0x6cd   : > { %13457 = vmatprep.mubr.msk.bf16.mxu1 %vm2647_vm0, %v18335_v28 }
 0x6d4   : > { %13458 = vmatmul.mubr.msk.bf16.vlgmr.msra.gmra.mrb[64].mxu1 %vm2647_vm0, %v18336_v36 }
 0x6d5   : > { %13461 = vmatprep.mubr.msk.bf16.mxu1 %vm2647_vm0, %v18337_v54  ;;  %13490 = vmatpush3.bf16.msra.mxu1 %v17240_v49 }
 0x6d6   : > { %13491 = vmatprep.subr.bf16.mxu1 %v15061_v51 }
 0x6d9   : > { %13492 = vmatpush3.bf16.msra.mxu1 %v15061_v51 }
 0x6da   : > { %13525 = vmatprep.subr.bf16.mxu1 %v15062_v41 }
 0x6dc   : > { %13462 = vmatmul.mubr.msk.bf16.gmra.mrb[68].mxu1 %vm2647_vm0, %v18338_v23 }
 0x6dd   : > { %13465 = vmatprep.mubr.msk.bf16.mxu1 %vm2647_vm0, %v18339_v43 }
 0x6e4   : > { %13466 = vmatmul.mubr.msk.bf16.gmra.mrb[72].mxu1 %vm2647_vm0, %v18340_v19 }
 0x6e5   : > { %13469 = vmatprep.mubr.msk.bf16.mxu1 %vm2647_vm0, %v18341_v20 }
 0x6ec   : > { %13470 = vmatmul.mubr.msk.bf16.gmra.mrb[76].mxu1 %vm2647_vm0, %v18342_v34 }
 0x6ed   : > { %13473 = vmatprep.mubr.msk.bf16.mxu1 %vm2647_vm0, %v18343_v24 }
 0x6f4   : > { %13474 = vmatmul.mubr.msk.bf16.gmra.mrb[80].mxu1 %vm2647_vm0, %v18344_v46 }
 0x6f5   : > { %13477 = vmatprep.mubr.msk.bf16.mxu1 %vm2647_vm0, %v18345_v1 }
 0x6fc   : > { %13478 = vmatmul.mubr.msk.bf16.gmra.mrb[84].mxu1 %vm2647_vm0, %v18346_v31 }
 0x6fd   : > { %13481 = vmatprep.mubr.msk.bf16.mxu1 %vm2647_vm0, %v18347_v32 }
 0x704   : > { %13482 = vmatmul.mubr.msk.bf16.gmra.mrb[88].mxu1 %vm2647_vm0, %v18348_v35 }
 0x705   : > { %13485 = vmatprep.mubr.msk.bf16.mxu1 %vm2647_vm0, %v18349_v52 }
 0x70c   : > { %13486 = vmatmul.mubr.msk.bf16.gmra.mrb[92].mxu1 %vm2647_vm0, %v18350_v25 }
 0x70d   : > { %13493 = vmatprep.mubr.bf16.mxu1 %v18309_v6 }
 0x714   : > { %13494 = vmatmul.mubr.bf16.vlgmr.msra.gmra.mrb[64].mxu1 %v18309_v6 }
 0x715   : > { %13497 = vmatprep.mubr.bf16.mxu1 %v18309_v6  ;;  %13526 = vmatpush3.bf16.msra.mxu1 %v15062_v41 }
 0x716   : > { %13527 = vmatprep.subr.bf16.mxu1 %v15063_v16 }
 0x719   : > { %13528 = vmatpush3.bf16.msra.mxu1 %v15063_v16 }
 0x71c   : > { %13498 = vmatmul.mubr.bf16.gmra.mrb[68].mxu1 %v18309_v6 }
 0x71d   : > { %13501 = vmatprep.mubr.bf16.mxu1 %v18309_v6 }
 0x724   : > { %13502 = vmatmul.mubr.bf16.gmra.mrb[72].mxu1 %v18309_v6 }
 0x725   : > { %13505 = vmatprep.mubr.bf16.mxu1 %v18309_v6 }
 0x72c   : > { %13506 = vmatmul.mubr.bf16.gmra.mrb[76].mxu1 %v18309_v6 }
 0x72d   : > { %13509 = vmatprep.mubr.msk.bf16.mxu1 %vm2647_vm0, %v17197_v15  ;;  %v15065_v15 = vld [vmem:[%s18201_s6 + $0x58] sm:$0xff]  }
 0x734   : > { %13510 = vmatmul.mubr.msk.bf16.gmra.mrb[80].mxu1 %vm2647_vm0, %v17195_v29  ;;  %v15064_v29 = vld [vmem:[%s18201_s6 + $0x50] sm:$0xff]  }
 0x735   : > { %13513 = vmatprep.mubr.msk.bf16.mxu1 %vm2647_vm0, %v17211_v57  ;;  %13529 = vmatprep.subr.bf16.mxu1 %v15064_v29  ;;  %v17432_v57 = vld [vmem:[%s15314_s30] ss:$0 sm:$0xff] }
 0x736   : > { %13530 = vmatpush3.bf16.msra.mxu1 %v15064_v29 }
 0x737   : > { %13531 = vmatprep.subr.bf16.mxu1 %v15065_v15 }
 0x73a   : > { %13532 = vmatpush3.bf16.msra.mxu1 %v15065_v15 }
 0x73c   : > { %13514 = vmatmul.mubr.msk.bf16.gmra.mrb[84].mxu1 %vm2647_vm0, %v17209_v50  ;;  %v17428_v50 = vld [vmem:[%s18201_s6 + $0x20] sm:$0xff]  }
 0x73d   : > { %13517 = vmatprep.mubr.msk.bf16.mxu1 %vm2647_vm0, %v17223_v44  ;;  %13549 = vmatprep.subr.bf16.mxu1 %v17428_v50 }
 0x744   : > { %13518 = vmatmul.mubr.msk.bf16.gmra.mrb[88].mxu1 %vm2647_vm0, %v17221_v59 }
 0x745   : > { %13521 = vmatprep.mubr.msk.bf16.mxu1 %vm2647_vm0, %v17235_v56 }
 0x74c   : > { %13522 = vmatmul.mubr.msk.bf16.gmra.mrb[92].mxu1 %vm2647_vm0, %v18351_v40 }
 0x7e7   : > { %v13495_v59 = vpop.f32.mrb[64].mxu1 }
 0x7e8   : > { %v14339_v44 = vadd.f32 %v13495_v59, %v17432_v57  ;;  %v7738_v56 = vpop.f32.mrb[65].mxu1 }
 0x7e9   : > { %v14340_v49 = vadd.f32 %v17432_v57, %v7738_v56  ;;  %v13496_v5 = vpop.f32.mrb[66].mxu1 }
 0x7ea   : > { %v7931_v22 = vmul.f32 0.2, %v14339_v44  ;;  %v14341_v60 = vadd.f32 %v13496_v5, %v17432_v57  ;;  %v7741_v58 = vpop.f32.mrb[67].mxu1  ;;  %vm7899_vm13 = vcmp.ge.f32.partialorder %v14339_v44, 0.0 }
 0x7eb   : > { %v7929_v2 = vmul.f32 0.2, %v14340_v49  ;;  %v14342_v9 = vadd.f32 %v17432_v57, %v7741_v58  ;;  %vm7897_vm14 = vcmp.ge.f32.partialorder %v14340_v49, 0.0 }
 0x7ec   : > { %vm7900_vm15 = vcmp.ge.f32.partialorder %v14341_v60, 0.0  ;;  %v7932_v10 = vmul.f32 0.2, %v14341_v60  ;;  %v17438_v27 = vsel %vm7899_vm13, %v14339_v44, %v7931_v22 }
 0x7ed   : > { %vm7898_vm1 = vcmp.ge.f32.partialorder %v14342_v9, 0.0  ;;  %v7930_v48 = vmul.f32 0.2, %v14342_v9  ;;  %v17442_v30 = vsel %vm7897_vm14, %v14340_v49, %v7929_v2 }
 0x7ee   : > { %v17440_v62 = vsel %vm7900_vm15, %v14341_v60, %v7932_v10 }
 0x7ef   : > { %v7994_v55 = vpack.c.bf16 %v17440_v62, %v17438_v27  ;;  %v17446_v14 = vsel %vm7898_vm1, %v14342_v9, %v7930_v48  ;;  %v13499_v12 = vpop.f32.mrb[68].mxu1  ;;  %v15072_v27 = vld [vmem:[%s15329_s20 + $0x10] sm:$0xff]   ;;  %v15073_v62 = vld [vmem:[%s15329_s20 + $0x18] sm:$0xff]  }
 0x7f0   : > { %v7993_v47 = vpack.c.bf16 %v17446_v14, %v17442_v30  ;;  %v14343_v13 = vadd.f32 %v13499_v12, %v17432_v57  ;;  %v7754_v38 = vpop.f32.mrb[69].mxu1  ;;  %v15074_v30 = vld [vmem:[%s18202_s4] sm:$0xff]  }
 0x7f1   : > { %v14344_v53 = vadd.f32 %v17432_v57, %v7754_v38  ;;  %v13500_v61 = vpop.f32.mrb[70].mxu1 }
 0x7f2   : > { %v7935_v45 = vmul.f32 0.2, %v14343_v13  ;;  %v14345_v0 = vadd.f32 %v13500_v61, %v17432_v57  ;;  %v7757_v26 = vpop.f32.mrb[71].mxu1  ;;  %vm7903_vm2 = vcmp.ge.f32.partialorder %v14343_v13, 0.0 }
 0x7f3   : > { %v7933_v7 = vmul.f32 0.2, %v14344_v53  ;;  %v14346_v37 = vadd.f32 %v17432_v57, %v7757_v26  ;;  %vm7901_vm3 = vcmp.ge.f32.partialorder %v14344_v53, 0.0 }
 0x7f4   : > { %vm7904_vm4 = vcmp.ge.f32.partialorder %v14345_v0, 0.0  ;;  %v7936_v8 = vmul.f32 0.2, %v14345_v0  ;;  %v17454_v18 = vsel %vm7903_vm2, %v14343_v13, %v7935_v45 }
 0x7f5   : > { %vm7902_vm5 = vcmp.ge.f32.partialorder %v14346_v37, 0.0  ;;  %v7934_v4 = vmul.f32 0.2, %v14346_v37  ;;  %v17458_v17 = vsel %vm7901_vm3, %v14344_v53, %v7933_v7  ;;  %vm8051_vm3 = vcmask 523264  }
 0x7f6   : > { %v17456_v33 = vsel %vm7904_vm4, %v14345_v0, %v7936_v8 }
 0x7f7   : > { %v7996_v3 = vpack.c.bf16 %v17456_v33, %v17454_v18  ;;  %v17462_v21 = vsel %vm7902_vm5, %v14346_v37, %v7934_v4  ;;  %v13503_v11 = vpop.f32.mrb[72].mxu1 }
 0x7f8   : > { %v7995_v39 = vpack.c.bf16 %v17462_v21, %v17458_v17  ;;  %v14347_v63 = vadd.f32 %v13503_v11, %v17432_v57  ;;  %v7770_v42 = vpop.f32.mrb[73].mxu1 }
 0x7f9   : > { %v14348_v28 = vadd.f32 %v17432_v57, %v7770_v42  ;;  %v13504_v51 = vpop.f32.mrb[74].mxu1 }
 0x7fa   : > { %v7939_v36 = vmul.f32 0.2, %v14347_v63  ;;  %v14349_v54 = vadd.f32 %v13504_v51, %v17432_v57  ;;  %v7773_v23 = vpop.f32.mrb[75].mxu1  ;;  %vm7907_vm6 = vcmp.ge.f32.partialorder %v14347_v63, 0.0 }
 0x7fb   : > { %v7937_v43 = vmul.f32 0.2, %v14348_v28  ;;  %v14350_v19 = vadd.f32 %v17432_v57, %v7773_v23  ;;  %vm7905_vm7 = vcmp.ge.f32.partialorder %v14348_v28, 0.0 }
 0x7fc   : > { %vm7908_vm8 = vcmp.ge.f32.partialorder %v14349_v54, 0.0  ;;  %v7940_v20 = vmul.f32 0.2, %v14349_v54  ;;  %v17470_v24 = vsel %vm7907_vm6, %v14347_v63, %v7939_v36 }
 0x7fd   : > { %vm7906_vm9 = vcmp.ge.f32.partialorder %v14350_v19, 0.0  ;;  %v7938_v34 = vmul.f32 0.2, %v14350_v19  ;;  %v17474_v1 = vsel %vm7905_vm7, %v14348_v28, %v7937_v43 }
 0x7fe   : > { %v17472_v46 = vsel %vm7908_vm8, %v14349_v54, %v7940_v20  ;;  %v15067_v20 = vld [vmem:[%s18201_s6 + $0x28] sm:$0xff]  }
 0x7ff   : > { %v7998_v31 = vpack.c.bf16 %v17472_v46, %v17470_v24  ;;  %v17478_v32 = vsel %vm7906_vm9, %v14350_v19, %v7938_v34  ;;  %v13507_v35 = vpop.f32.mrb[76].mxu1 }
 0x800   : > { %v7997_v52 = vpack.c.bf16 %v17478_v32, %v17474_v1  ;;  %v14351_v25 = vadd.f32 %v13507_v35, %v17432_v57  ;;  %v7786_v40 = vpop.f32.mrb[77].mxu1 }
 0x801   : > { %v14352_v41 = vadd.f32 %v17432_v57, %v7786_v40  ;;  %v13508_v16 = vpop.f32.mrb[78].mxu1 }
 0x802   : > { %v7943_v29 = vmul.f32 0.2, %v14351_v25  ;;  %v14353_v15 = vadd.f32 %v13508_v16, %v17432_v57  ;;  %v7789_v59 = vpop.f32.mrb[79].mxu1  ;;  %vm7911_vm10 = vcmp.ge.f32.partialorder %v14351_v25, 0.0 }
 0x803   : > { %v7941_v44 = vmul.f32 0.2, %v14352_v41  ;;  %v14354_v56 = vadd.f32 %v17432_v57, %v7789_v59  ;;  %vm7909_vm11 = vcmp.ge.f32.partialorder %v14352_v41, 0.0 }
 0x804   : > { %vm7912_vm12 = vcmp.ge.f32.partialorder %v14353_v15, 0.0  ;;  %v7944_v49 = vmul.f32 0.2, %v14353_v15  ;;  %v17486_v22 = vsel %vm7911_vm10, %v14351_v25, %v7943_v29 }
 0x805   : > { %vm7910_vm13 = vcmp.ge.f32.partialorder %v14354_v56, 0.0  ;;  %v7942_v5 = vmul.f32 0.2, %v14354_v56  ;;  %v17490_v58 = vsel %vm7909_vm11, %v14352_v41, %v7941_v44 }
 0x806   : > { %v17488_v60 = vsel %vm7912_vm12, %v14353_v15, %v7944_v49  ;;  %v15068_v15 = vld [vmem:[%s18201_s6 + $0x30] sm:$0xff]  }
 0x807   : > { %v8000_v2 = vpack.c.bf16 %v17488_v60, %v17486_v22  ;;  %v17494_v9 = vsel %vm7910_vm13, %v14354_v56, %v7942_v5  ;;  %v13511_v10 = vpop.f32.mrb[80].mxu1 }
 0x808   : > { %v7999_v48 = vpack.c.bf16 %v17494_v9, %v17490_v58  ;;  %v14355_v12 = vadd.f32 %v13511_v10, %v17432_v57  ;;  %v7802_v13 = vpop.f32.mrb[81].mxu1 }
 0x809   : > { %v14356_v38 = vadd.f32 %v17432_v57, %v7802_v13  ;;  %v13512_v53 = vpop.f32.mrb[82].mxu1 }
 0x80a   : > { %v7947_v61 = vmul.f32 0.2, %v14355_v12  ;;  %v14357_v45 = vadd.f32 %v13512_v53, %v17432_v57  ;;  %v7805_v0 = vpop.f32.mrb[83].mxu1  ;;  %vm7915_vm14 = vcmp.ge.f32.partialorder %v14355_v12, 0.0 }
 0x80b   : > { %v7945_v26 = vmul.f32 0.2, %v14356_v38  ;;  %v14358_v7 = vadd.f32 %v17432_v57, %v7805_v0  ;;  %vm7913_vm15 = vcmp.ge.f32.partialorder %v14356_v38, 0.0 }
 0x80c   : > { %vm7916_vm1 = vcmp.ge.f32.partialorder %v14357_v45, 0.0  ;;  %v7948_v37 = vmul.f32 0.2, %v14357_v45  ;;  %v7979_v4 = vsel %vm7915_vm14, %v14355_v12, %v7947_v61 }
 0x80d   : > { %vm7914_vm2 = vcmp.ge.f32.partialorder %v14358_v7, 0.0  ;;  %v7946_v8 = vmul.f32 0.2, %v14358_v7  ;;  %v7977_v63 = vsel %vm7913_vm15, %v14356_v38, %v7945_v26 }
 0x80e   : > { %v7980_v11 = vsel %vm7916_vm1, %v14357_v45, %v7948_v37 }
 0x80f   : > { %v8002_v42 = vpack.c.bf16 %v7980_v11, %v7979_v4  ;;  %v7978_v28 = vsel %vm7914_vm2, %v14358_v7, %v7946_v8  ;;  %v13515_v51 = vpop.f32.mrb[84].mxu1  ;;  %v15070_v11 = vld [vmem:[%s15329_s20] sm:$0xff]  }
 0x810   : > { %v8001_v36 = vpack.c.bf16 %v7978_v28, %v7977_v63  ;;  %v14359_v54 = vadd.f32 %v13515_v51, %v17432_v57  ;;  %v7818_v23 = vpop.f32.mrb[85].mxu1 }
 0x811   : > { %v14360_v43 = vadd.f32 %v17432_v57, %v7818_v23  ;;  %v13516_v19 = vpop.f32.mrb[86].mxu1 }
 0x812   : > { %v7951_v34 = vmul.f32 0.2, %v14359_v54  ;;  %v14361_v35 = vadd.f32 %v13516_v19, %v17432_v57  ;;  %v7821_v25 = vpop.f32.mrb[87].mxu1  ;;  %13533 = vmatprep.mubr.msk.bf16.mxu1 %vm8051_vm3, %v8001_v36  ;;  %vm7919_vm4 = vcmp.ge.f32.partialorder %v14359_v54, 0.0 }
 0x813   : > { %v7949_v40 = vmul.f32 0.2, %v14360_v43  ;;  %v14362_v41 = vadd.f32 %v17432_v57, %v7821_v25  ;;  %13534 = vmatmul.mubr.msk.bf16.vlgmr.msra.gmra.mrb[96].mxu1 %vm8051_vm3, %v8002_v42  ;;  %vm7917_vm5 = vcmp.ge.f32.partialorder %v14360_v43, 0.0 }
 0x814   : > { %vm7920_vm6 = vcmp.ge.f32.partialorder %v14361_v35, 0.0  ;;  %v7952_v16 = vmul.f32 0.2, %v14361_v35  ;;  %13550 = vmatpush3.bf16.msra.mxu1 %v17428_v50  ;;  %v7983_v59 = vsel %vm7919_vm4, %v14359_v54, %v7951_v34  ;;  %v15069_v50 = vld [vmem:[%s18201_s6 + $0x38] sm:$0xff]  }
 0x815   : > { %vm7918_vm7 = vcmp.ge.f32.partialorder %v14362_v41, 0.0  ;;  %v7950_v29 = vmul.f32 0.2, %v14362_v41  ;;  %13551 = vmatprep.subr.bf16.mxu1 %v15067_v20  ;;  %v7981_v56 = vsel %vm7917_vm5, %v14360_v43, %v7949_v40 }
 0x816   : > { %v7984_v44 = vsel %vm7920_vm6, %v14361_v35, %v7952_v16 }
 0x817   : > { %v8004_v49 = vpack.c.bf16 %v7984_v44, %v7983_v59  ;;  %v7982_v5 = vsel %vm7918_vm7, %v14362_v41, %v7950_v29  ;;  %v13519_v10 = vpop.f32.mrb[88].mxu1 }
 0x818   : > { %v8003_v12 = vpack.c.bf16 %v7982_v5, %v7981_v56  ;;  %v14363_v13 = vadd.f32 %v13519_v10, %v17432_v57  ;;  %v7834_v38 = vpop.f32.mrb[89].mxu1  ;;  %13552 = vmatpush3.bf16.msra.mxu1 %v15067_v20 }
 0x819   : > { %v14364_v53 = vadd.f32 %v17432_v57, %v7834_v38  ;;  %v13520_v61 = vpop.f32.mrb[90].mxu1  ;;  %13553 = vmatprep.subr.bf16.mxu1 %v15068_v15 }
 0x81a   : > { %v7955_v45 = vmul.f32 0.2, %v14363_v13  ;;  %v14365_v0 = vadd.f32 %v13520_v61, %v17432_v57  ;;  %v7837_v26 = vpop.f32.mrb[91].mxu1  ;;  %13537 = vmatprep.mubr.msk.bf16.mxu1 %vm8051_vm3, %v8003_v12  ;;  %vm7923_vm8 = vcmp.ge.f32.partialorder %v14363_v13, 0.0 }
 0x81b   : > { %v7953_v7 = vmul.f32 0.2, %v14364_v53  ;;  %v14366_v37 = vadd.f32 %v17432_v57, %v7837_v26  ;;  %13538 = vmatmul.mubr.msk.bf16.gmra.mrb[100].mxu1 %vm8051_vm3, %v8004_v49  ;;  %vm7921_vm9 = vcmp.ge.f32.partialorder %v14364_v53, 0.0 }
 0x81c   : > { %vm7924_vm10 = vcmp.ge.f32.partialorder %v14365_v0, 0.0  ;;  %v7956_v8 = vmul.f32 0.2, %v14365_v0  ;;  %13554 = vmatpush3.bf16.msra.mxu1 %v15068_v15  ;;  %v7987_v63 = vsel %vm7923_vm8, %v14363_v13, %v7955_v45 }
 0x81d   : > { %vm7922_vm11 = vcmp.ge.f32.partialorder %v14366_v37, 0.0  ;;  %v7954_v4 = vmul.f32 0.2, %v14366_v37  ;;  %13555 = vmatprep.subr.bf16.mxu1 %v15069_v50  ;;  %v7985_v28 = vsel %vm7921_vm9, %v14364_v53, %v7953_v7  ;;  %v15075_v53 = vld [vmem:[%s18202_s4 + $0x8] sm:$0xff]  }
 0x81e   : > { %v7988_v42 = vsel %vm7924_vm10, %v14365_v0, %v7956_v8  ;;  %v15076_v8 = vld [vmem:[%s18202_s4 + $0x10] sm:$0xff]  }
 0x81f   : > { %v8006_v51 = vpack.c.bf16 %v7988_v42, %v7987_v63  ;;  %v7986_v36 = vsel %vm7922_vm11, %v14366_v37, %v7954_v4  ;;  %v13523_v54 = vpop.f32.mrb[92].mxu1 }
 0x820   : > { %v8005_v23 = vpack.c.bf16 %v7986_v36, %v7985_v28  ;;  %v14367_v43 = vadd.f32 %v13523_v54, %v17432_v57  ;;  %v7850_v19 = vpop.f32.mrb[93].mxu1  ;;  %13556 = vmatpush3.bf16.msra.mxu1 %v15069_v50 }
 0x821   : > { %v14368_v20 = vadd.f32 %v17432_v57, %v7850_v19  ;;  %v13524_v34 = vpop.f32.mrb[94].mxu1  ;;  %13573 = vmatprep.subr.bf16.mxu1 %v15070_v11 }
 0x822   : > { %v7959_v35 = vmul.f32 0.2, %v14367_v43  ;;  %v14369_v25 = vadd.f32 %v13524_v34, %v17432_v57  ;;  %v7853_v40 = vpop.f32.mrb[95].mxu1  ;;  %13541 = vmatprep.mubr.msk.bf16.mxu1 %vm8051_vm3, %v8005_v23  ;;  %vm7927_vm12 = vcmp.ge.f32.partialorder %v14367_v43, 0.0 }
 0x823   : > { %v7957_v41 = vmul.f32 0.2, %v14368_v20  ;;  %v14370_v16 = vadd.f32 %v17432_v57, %v7853_v40  ;;  %13542 = vmatmul.mubr.msk.bf16.gmra.mrb[104].mxu1 %vm8051_vm3, %v8006_v51  ;;  %vm7925_vm13 = vcmp.ge.f32.partialorder %v14368_v20, 0.0  ;;  %v15071_v57 = vld [vmem:[%s15329_s20 + $0x8] sm:$0xff]  }
 0x824   : > { %vm7928_vm14 = vcmp.ge.f32.partialorder %v14369_v25, 0.0  ;;  %v7960_v29 = vmul.f32 0.2, %v14369_v25  ;;  %v7991_v59 = vsel %vm7927_vm12, %v14367_v43, %v7959_v35 }
 0x825   : > { %vm7926_vm15 = vcmp.ge.f32.partialorder %v14370_v16, 0.0  ;;  %v7958_v15 = vmul.f32 0.2, %v14370_v16  ;;  %v7989_v56 = vsel %vm7925_vm13, %v14368_v20, %v7957_v41  ;;  %v15077_v20 = vld [vmem:[%s18202_s4 + $0x18] sm:$0xff]  }
 0x826   : > { %v7992_v44 = vsel %vm7928_vm14, %v14369_v25, %v7960_v29 }
 0x827   : > { %v8008_v49 = vpack.c.bf16 %v7992_v44, %v7991_v59  ;;  %v7990_v5 = vsel %vm7926_vm15, %v14370_v16, %v7958_v15  ;;  %v15078_v15 = vld [vmem:[%s18202_s4 + $0x20] sm:$0xff]  }
 0x828   : > { %v8007_v10 = vpack.c.bf16 %v7990_v5, %v7989_v56 }
 0x82a   : > { %13545 = vmatprep.mubr.msk.bf16.mxu1 %vm8051_vm3, %v8007_v10 }
 0x82b   : > { %13546 = vmatmul.mubr.msk.bf16.gmra.mrb[108].mxu1 %vm8051_vm3, %v8008_v49 }
 0x82c   : > { %13557 = vmatprep.mubr.msk.bf16.mxu1 %vm8051_vm3, %v7993_v47 }
 0x833   : > { %13558 = vmatmul.mubr.msk.bf16.vlgmr.msra.gmra.mrb[96].mxu1 %vm8051_vm3, %v7994_v55  ;;  %v17564_v55 = vld [vmem:[%s15324_s12] ss:$0 sm:$0xff] }
 0x834   : > { %13561 = vmatprep.mubr.msk.bf16.mxu1 %vm8051_vm3, %v7995_v39  ;;  %13574 = vmatpush3.bf16.msra.mxu1 %v15070_v11 }
 0x835   : > { %13575 = vmatprep.subr.bf16.mxu1 %v15071_v57 }
 0x838   : > { %13576 = vmatpush3.bf16.msra.mxu1 %v15071_v57 }
 0x839   : > { %13577 = vmatprep.subr.bf16.mxu1 %v15072_v27 }
 0x83b   : > { %13562 = vmatmul.mubr.msk.bf16.gmra.mrb[100].mxu1 %vm8051_vm3, %v7996_v3 }
 0x83c   : > { %13565 = vmatprep.mubr.msk.bf16.mxu1 %vm8051_vm3, %v7997_v52  ;;  %13578 = vmatpush3.bf16.msra.mxu1 %v15072_v27 }
 0x83d   : > { %13579 = vmatprep.subr.bf16.mxu1 %v15073_v62 }
 0x840   : > { %13580 = vmatpush3.bf16.msra.mxu1 %v15073_v62 }
 0x841   : > { %13597 = vmatprep.subr.bf16.mxu1 %v15074_v30 }
 0x843   : > { %13566 = vmatmul.mubr.msk.bf16.gmra.mrb[104].mxu1 %vm8051_vm3, %v7998_v31 }
 0x844   : > { %13569 = vmatprep.mubr.msk.bf16.mxu1 %vm8051_vm3, %v7999_v48 }
 0x84b   : > { %13570 = vmatmul.mubr.msk.bf16.gmra.mrb[108].mxu1 %vm8051_vm3, %v8000_v2 }
 0x906   : > { %v13559_v14 = vpop.f32.mrb[96].mxu1 }
 0x907   : > { %v8327_v47 = vadd.f32 %v13559_v14, %v17564_v55  ;;  %v8255_v18 = vpop.f32.mrb[97].mxu1 }
 0x908   : > { %v8325_v33 = vadd.f32 %v17564_v55, %v8255_v18  ;;  %v13560_v17 = vpop.f32.mrb[98].mxu1 }
 0x909   : > { %v8359_v3 = vmul.f32 0.2, %v8327_v47  ;;  %v8328_v21 = vadd.f32 %v13560_v17, %v17564_v55  ;;  %v8258_v39 = vpop.f32.mrb[99].mxu1  ;;  %vm8343_vm1 = vcmp.ge.f32.partialorder %v8327_v47, 0.0 }
 0x90a   : > { %v8357_v24 = vmul.f32 0.2, %v8325_v33  ;;  %v8326_v46 = vadd.f32 %v17564_v55, %v8258_v39  ;;  %vm8341_vm2 = vcmp.ge.f32.partialorder %v8325_v33, 0.0 }
 0x90b   : > { %vm8344_vm4 = vcmp.ge.f32.partialorder %v8328_v21, 0.0  ;;  %v8360_v1 = vmul.f32 0.2, %v8328_v21  ;;  %v8375_v32 = vsel %vm8343_vm1, %v8327_v47, %v8359_v3 }
 0x90c   : > { %vm8342_vm5 = vcmp.ge.f32.partialorder %v8326_v46, 0.0  ;;  %v8358_v31 = vmul.f32 0.2, %v8326_v46  ;;  %v8373_v22 = vsel %vm8341_vm2, %v8325_v33, %v8357_v24 }
 0x90d   : > { %v8376_v52 = vsel %vm8344_vm4, %v8328_v21, %v8360_v1 }
 0x90e   : > { %v8390_v60 = vpack.c.bf16 %v8376_v52, %v8375_v32  ;;  %v8374_v58 = vsel %vm8342_vm5, %v8326_v46, %v8358_v31  ;;  %v13563_v2 = vpop.f32.mrb[100].mxu1 }
 0x90f   : > { %v8389_v9 = vpack.c.bf16 %v8374_v58, %v8373_v22  ;;  %v8331_v48 = vadd.f32 %v13563_v2, %v17564_v55  ;;  %v8271_v12 = vpop.f32.mrb[101].mxu1  ;;  %v15080_v22 = vld [vmem:[%s18202_s4 + $0x30] sm:$0xff]   ;;  %v15082_v58 = vld [vmem:[%s15349_s13] sm:$0xff]  }
 0x910   : > { %v8329_v13 = vadd.f32 %v17564_v55, %v8271_v12  ;;  %v13564_v38 = vpop.f32.mrb[102].mxu1  ;;  %v17599_v2 = vld [vmem:[%s15334_s27] ss:$0 sm:$0xff] }
 0x911   : > { %v8363_v61 = vmul.f32 0.2, %v8331_v48  ;;  %v8332_v50 = vadd.f32 %v13564_v38, %v17564_v55  ;;  %v8274_v45 = vpop.f32.mrb[103].mxu1  ;;  %13581 = vmatprep.mubr.msk.bf16.mxu1 %vm8051_vm3, %v8389_v9  ;;  %vm8347_vm6 = vcmp.ge.f32.partialorder %v8331_v48, 0.0 }
 0x912   : > { %v8361_v0 = vmul.f32 0.2, %v8329_v13  ;;  %v8330_v26 = vadd.f32 %v17564_v55, %v8274_v45  ;;  %13582 = vmatmul.mubr.msk.bf16.vlgmr.msra.gmra.mrb[112].mxu1 %vm8051_vm3, %v8390_v60  ;;  %vm8345_vm7 = vcmp.ge.f32.partialorder %v8329_v13, 0.0  ;;  %v15081_v60 = vld [vmem:[%s18202_s4 + $0x38] sm:$0xff]  }
 0x913   : > { %vm8348_vm8 = vcmp.ge.f32.partialorder %v8332_v50, 0.0  ;;  %v8364_v7 = vmul.f32 0.2, %v8332_v50  ;;  %13598 = vmatpush3.bf16.msra.mxu1 %v15074_v30  ;;  %v8379_v4 = vsel %vm8347_vm6, %v8331_v48, %v8363_v61 }
 0x914   : > { %vm8346_vm9 = vcmp.ge.f32.partialorder %v8330_v26, 0.0  ;;  %v8362_v37 = vmul.f32 0.2, %v8330_v26  ;;  %13599 = vmatprep.subr.bf16.mxu1 %v15075_v53  ;;  %v8377_v63 = vsel %vm8345_vm7, %v8329_v13, %v8361_v0 }
 0x915   : > { %v8380_v11 = vsel %vm8348_vm8, %v8332_v50, %v8364_v7 }
 0x916   : > { %v8392_v42 = vpack.c.bf16 %v8380_v11, %v8379_v4  ;;  %v8378_v28 = vsel %vm8346_vm9, %v8330_v26, %v8362_v37  ;;  %v13567_v51 = vpop.f32.mrb[104].mxu1 }
 0x917   : > { %v8391_v36 = vpack.c.bf16 %v8378_v28, %v8377_v63  ;;  %v8335_v54 = vadd.f32 %v13567_v51, %v17564_v55  ;;  %v8287_v23 = vpop.f32.mrb[105].mxu1  ;;  %13600 = vmatpush3.bf16.msra.mxu1 %v15075_v53 }
 0x918   : > { %v8333_v43 = vadd.f32 %v17564_v55, %v8287_v23  ;;  %v13568_v19 = vpop.f32.mrb[106].mxu1  ;;  %13601 = vmatprep.subr.bf16.mxu1 %v15076_v8 }
 0x919   : > { %v8367_v34 = vmul.f32 0.2, %v8335_v54  ;;  %v8336_v35 = vadd.f32 %v13568_v19, %v17564_v55  ;;  %v8290_v25 = vpop.f32.mrb[107].mxu1  ;;  %13585 = vmatprep.mubr.msk.bf16.mxu1 %vm8051_vm3, %v8391_v36  ;;  %vm8351_vm10 = vcmp.ge.f32.partialorder %v8335_v54, 0.0 }
 0x91a   : > { %v8365_v40 = vmul.f32 0.2, %v8333_v43  ;;  %v8334_v41 = vadd.f32 %v17564_v55, %v8290_v25  ;;  %13586 = vmatmul.mubr.msk.bf16.gmra.mrb[116].mxu1 %vm8051_vm3, %v8392_v42  ;;  %vm8349_vm11 = vcmp.ge.f32.partialorder %v8333_v43, 0.0 }
 0x91b   : > { %vm8352_vm12 = vcmp.ge.f32.partialorder %v8336_v35, 0.0  ;;  %v8368_v16 = vmul.f32 0.2, %v8336_v35  ;;  %13602 = vmatpush3.bf16.msra.mxu1 %v15076_v8  ;;  %v8383_v59 = vsel %vm8351_vm10, %v8335_v54, %v8367_v34 }
 0x91c   : > { %vm8350_vm13 = vcmp.ge.f32.partialorder %v8334_v41, 0.0  ;;  %v8366_v29 = vmul.f32 0.2, %v8334_v41  ;;  %13603 = vmatprep.subr.bf16.mxu1 %v15077_v20  ;;  %v8381_v56 = vsel %vm8349_vm11, %v8333_v43, %v8365_v40 }
 0x91d   : > { %v8384_v44 = vsel %vm8352_vm12, %v8336_v35, %v8368_v16 }
 0x91e   : > { %v8394_v49 = vpack.c.bf16 %v8384_v44, %v8383_v59  ;;  %v8382_v5 = vsel %vm8350_vm13, %v8334_v41, %v8366_v29  ;;  %v13571_v10 = vpop.f32.mrb[108].mxu1 }
 0x91f   : > { %v8393_v57 = vpack.c.bf16 %v8382_v5, %v8381_v56  ;;  %v8339_v27 = vadd.f32 %v13571_v10, %v17564_v55  ;;  %v8303_v62 = vpop.f32.mrb[109].mxu1  ;;  %13604 = vmatpush3.bf16.msra.mxu1 %v15077_v20 }
 0x920   : > { %v8337_v30 = vadd.f32 %v17564_v55, %v8303_v62  ;;  %v13572_v14 = vpop.f32.mrb[110].mxu1  ;;  %13605 = vmatprep.subr.bf16.mxu1 %v15078_v15 }
 0x921   : > { %v8371_v47 = vmul.f32 0.2, %v8339_v27  ;;  %v8340_v18 = vadd.f32 %v13572_v14, %v17564_v55  ;;  %v8306_v33 = vpop.f32.mrb[111].mxu1  ;;  %13589 = vmatprep.mubr.msk.bf16.mxu1 %vm8051_vm3, %v8393_v57  ;;  %vm8355_vm14 = vcmp.ge.f32.partialorder %v8339_v27, 0.0 }
 0x922   : > { %v8369_v17 = vmul.f32 0.2, %v8337_v30  ;;  %v8338_v3 = vadd.f32 %v17564_v55, %v8306_v33  ;;  %13590 = vmatmul.mubr.msk.bf16.gmra.mrb[120].mxu1 %vm8051_vm3, %v8394_v49  ;;  %vm8353_vm15 = vcmp.ge.f32.partialorder %v8337_v30, 0.0  ;;  %v15079_v55 = vld [vmem:[%s18202_s4 + $0x28] sm:$0xff]   ;;  %s18357_s4 = sld [smem:[#allocation11_spill]] }
 0x923   : > { %vm8356_vm1 = vcmp.ge.f32.partialorder %v8340_v18, 0.0  ;;  %v8372_v21 = vmul.f32 0.2, %v8340_v18  ;;  %13606 = vmatpush3.bf16.msra.mxu1 %v15078_v15  ;;  %v8387_v24 = vsel %vm8355_vm14, %v8339_v27, %v8371_v47 }
 0x924   : > { %vm8354_vm2 = vcmp.ge.f32.partialorder %v8338_v3, 0.0  ;;  %v8370_v39 = vmul.f32 0.2, %v8338_v3  ;;  %v8385_v1 = vsel %vm8353_vm15, %v8337_v30, %v8369_v17  ;;  %13607 = vmatprep.subr.bf16.mxu1 %v15079_v55 }
 0x925   : > { %v8388_v46 = vsel %vm8356_vm1, %v8340_v18, %v8372_v21 }
 0x926   : > { %v8396_v31 = vpack.c.bf16 %v8388_v46, %v8387_v24  ;;  %v8386_v32 = vsel %vm8354_vm2, %v8338_v3, %v8370_v39 }
 0x927   : > { %v8395_v52 = vpack.c.bf16 %v8386_v32, %v8385_v1  ;;  %13608 = vmatpush3.bf16.msra.mxu1 %v15079_v55 }
 0x928   : > { %13609 = vmatprep.subr.bf16.mxu1 %v15080_v22 }
 0x929   : > { %13593 = vmatprep.mubr.msk.bf16.mxu1 %vm8051_vm3, %v8395_v52 }
 0x92a   : > { %13594 = vmatmul.mubr.msk.bf16.gmra.mrb[124].mxu1 %vm8051_vm3, %v8396_v31 }
 0x92b   : > { %13610 = vmatpush3.bf16.msra.mxu1 %v15080_v22 }
 0x92c   : > { %13611 = vmatprep.subr.bf16.mxu1 %v15081_v60 }
 0x92f   : > { %13612 = vmatpush3.bf16.msra.mxu1 %v15081_v60 }
 0x930   : > { %13629 = vmatprep.subr.bf16.mxu1 %v15082_v58 }
 0x9e5   : > { %v13583_v9 = vpop.f32.mrb[112].mxu1 }
 0x9e6   : > { %v8503_v48 = vadd.f32 %v13583_v9, %v17599_v2  ;;  %v8494_v12 = vpop.f32.mrb[113].mxu1 }
 0x9e7   : > { %v8495_v13 = vadd.f32 %v17599_v2, %v8494_v12  ;;  %v13584_v38 = vpop.f32.mrb[114].mxu1 }
 0x9e8   : > { %v8575_v53 = vmul.f32 0.02, %v8503_v48  ;;  %v8506_v61 = vadd.f32 %v13584_v38, %v17599_v2  ;;  %v8497_v50 = vpop.f32.mrb[115].mxu1  ;;  %vm8559_vm4 = vcmp.ge.f32.partialorder %v8503_v48, 0.0 }
 0x9e9   : > { %v8573_v45 = vmul.f32 0.02, %v8495_v13  ;;  %v8498_v0 = vadd.f32 %v17599_v2, %v8497_v50  ;;  %vm8557_vm5 = vcmp.ge.f32.partialorder %v8495_v13, 0.0 }
 0x9ea   : > { %vm8560_vm6 = vcmp.ge.f32.partialorder %v8506_v61, 0.0  ;;  %v8576_v26 = vmul.f32 0.02, %v8506_v61  ;;  %v8591_v37 = vsel %vm8559_vm4, %v8503_v48, %v8575_v53 }
 0x9eb   : > { %vm8558_vm7 = vcmp.ge.f32.partialorder %v8498_v0, 0.0  ;;  %v8574_v7 = vmul.f32 0.02, %v8498_v0  ;;  %v8589_v63 = vsel %vm8557_vm5, %v8495_v13, %v8573_v45 }
 0x9ec   : > { %v8592_v8 = vsel %vm8560_vm6, %v8506_v61, %v8576_v26  ;;  %v15083_v26 = vld [vmem:[%s15349_s13 + $0x8] sm:$0xff]  }
 0x9ed   : > { %v8606_v4 = vpack.c.bf16 %v8592_v8, %v8591_v37  ;;  %v13587_v11 = vpop.f32.mrb[116].mxu1  ;;  %v8590_v42 = vsel %vm8558_vm7, %v8498_v0, %v8574_v7  ;;  %v15085_v7 = vld [vmem:[%s15349_s13 + $0x18] sm:$0xff]   ;;  %v17621_v37 = vld [vmem:[%s18352_s9] ss:$0 sm:$0xff] }
 0x9ee   : > { %v8519_v28 = vadd.f32 %v13587_v11, %v17599_v2  ;;  %v8510_v51 = vpop.f32.mrb[117].mxu1  ;;  %v8605_v36 = vpack.c.bf16 %v8590_v42, %v8589_v63 }
 0x9ef   : > { %v8511_v54 = vadd.f32 %v17599_v2, %v8510_v51  ;;  %v13588_v23 = vpop.f32.mrb[118].mxu1 }
 0x9f0   : > { %v8579_v43 = vmul.f32 0.02, %v8519_v28  ;;  %v8522_v19 = vadd.f32 %v13588_v23, %v17599_v2  ;;  %v8513_v20 = vpop.f32.mrb[119].mxu1  ;;  %13613 = vmatprep.mubr.bf16.mxu1 %v8605_v36  ;;  %vm8563_vm8 = vcmp.ge.f32.partialorder %v8519_v28, 0.0 }
 0x9f1   : > { %v8577_v34 = vmul.f32 0.02, %v8511_v54  ;;  %v8514_v35 = vadd.f32 %v17599_v2, %v8513_v20  ;;  %13614 = vmatmul.mubr.bf16.vlgmr.msra.gmra.mrb[128].mxu1 %v8606_v4  ;;  %vm8561_vm9 = vcmp.ge.f32.partialorder %v8511_v54, 0.0 }
 0x9f2   : > { %vm8564_vm10 = vcmp.ge.f32.partialorder %v8522_v19, 0.0  ;;  %v8580_v25 = vmul.f32 0.02, %v8522_v19  ;;  %13630 = vmatpush3.bf16.msra.mxu1 %v15082_v58  ;;  %v8595_v41 = vsel %vm8563_vm8, %v8519_v28, %v8579_v43 }
 0x9f3   : > { %vm8562_vm11 = vcmp.ge.f32.partialorder %v8514_v35, 0.0  ;;  %v8578_v40 = vmul.f32 0.02, %v8514_v35  ;;  %v8593_v15 = vsel %vm8561_vm9, %v8511_v54, %v8577_v34  ;;  %13631 = vmatprep.subr.bf16.mxu1 %v15083_v26 }
 0x9f4   : > { %v8596_v16 = vsel %vm8564_vm10, %v8522_v19, %v8580_v25 }
 0x9f5   : > { %v13591_v29 = vpop.f32.mrb[120].mxu1  ;;  %v8594_v59 = vsel %vm8562_vm11, %v8514_v35, %v8578_v40  ;;  %v8608_v44 = vpack.c.bf16 %v8596_v16, %v8595_v41 }
 0x9f6   : > { %v8535_v56 = vadd.f32 %v13591_v29, %v17599_v2  ;;  %v8526_v49 = vpop.f32.mrb[121].mxu1  ;;  %v8607_v5 = vpack.c.bf16 %v8594_v59, %v8593_v15  ;;  %13632 = vmatpush3.bf16.msra.mxu1 %v15083_v26 }
 0x9f7   : > { %v8527_v10 = vadd.f32 %v17599_v2, %v8526_v49  ;;  %v13592_v57 = vpop.f32.mrb[122].mxu1 }
 0x9f8   : > { %v8583_v27 = vmul.f32 0.02, %v8535_v56  ;;  %v8538_v62 = vadd.f32 %v13592_v57, %v17599_v2  ;;  %v8529_v30 = vpop.f32.mrb[123].mxu1  ;;  %13617 = vmatprep.mubr.bf16.mxu1 %v8607_v5  ;;  %vm8567_vm12 = vcmp.ge.f32.partialorder %v8535_v56, 0.0 }
 0x9f9   : > { %v8581_v14 = vmul.f32 0.02, %v8527_v10  ;;  %v8530_v47 = vadd.f32 %v17599_v2, %v8529_v30  ;;  %13618 = vmatmul.mubr.bf16.gmra.mrb[132].mxu1 %v8608_v44  ;;  %vm8565_vm13 = vcmp.ge.f32.partialorder %v8527_v10, 0.0 }
 0x9fa   : > { %vm8568_vm14 = vcmp.ge.f32.partialorder %v8538_v62, 0.0  ;;  %v8584_v18 = vmul.f32 0.02, %v8538_v62  ;;  %v8599_v17 = vsel %vm8567_vm12, %v8535_v56, %v8583_v27 }
 0x9fb   : > { %vm8566_vm15 = vcmp.ge.f32.partialorder %v8530_v47, 0.0  ;;  %v8582_v33 = vmul.f32 0.02, %v8530_v47  ;;  %v8597_v39 = vsel %vm8565_vm13, %v8527_v10, %v8581_v14 }
 0x9fc   : > { %v8600_v3 = vsel %vm8568_vm14, %v8538_v62, %v8584_v18 }
 0x9fd   : > { %v13595_v21 = vpop.f32.mrb[124].mxu1  ;;  %v8598_v24 = vsel %vm8566_vm15, %v8530_v47, %v8582_v33  ;;  %v8610_v46 = vpack.c.bf16 %v8600_v3, %v8599_v17 }
 0x9fe   : > { %v8551_v1 = vadd.f32 %v13595_v21, %v17599_v2  ;;  %v8542_v31 = vpop.f32.mrb[125].mxu1  ;;  %v8609_v32 = vpack.c.bf16 %v8598_v24, %v8597_v39 }
 0x9ff   : > { %v8543_v52 = vadd.f32 %v17599_v2, %v8542_v31  ;;  %v13596_v55 = vpop.f32.mrb[126].mxu1 }
 0xa00   : > { %v8587_v22 = vmul.f32 0.02, %v8551_v1  ;;  %v8554_v60 = vadd.f32 %v13596_v55, %v17599_v2  ;;  %v8545_v58 = vpop.f32.mrb[127].mxu1  ;;  %13621 = vmatprep.mubr.bf16.mxu1 %v8609_v32  ;;  %vm8571_vm1 = vcmp.ge.f32.partialorder %v8551_v1, 0.0 }
 0xa01   : > { %v8585_v9 = vmul.f32 0.02, %v8543_v52  ;;  %v8546_v48 = vadd.f32 %v17599_v2, %v8545_v58  ;;  %13622 = vmatmul.mubr.bf16.gmra.mrb[136].mxu1 %v8610_v46  ;;  %vm8569_vm2 = vcmp.ge.f32.partialorder %v8543_v52, 0.0  ;;  %v15084_v2 = vld [vmem:[%s15349_s13 + $0x10] sm:$0xff]  }
 0xa02   : > { %vm8572_vm4 = vcmp.ge.f32.partialorder %v8554_v60, 0.0  ;;  %v8588_v12 = vmul.f32 0.02, %v8554_v60  ;;  %v8603_v38 = vsel %vm8571_vm1, %v8551_v1, %v8587_v22  ;;  %13633 = vmatprep.subr.bf16.mxu1 %v15084_v2 }
 0xa03   : > { %vm8570_vm5 = vcmp.ge.f32.partialorder %v8546_v48, 0.0  ;;  %v8586_v13 = vmul.f32 0.02, %v8546_v48  ;;  %v8601_v61 = vsel %vm8569_vm2, %v8543_v52, %v8585_v9  ;;  %13634 = vmatpush3.bf16.msra.mxu1 %v15084_v2 }
 0xa04   : > { %v8604_v53 = vsel %vm8572_vm4, %v8554_v60, %v8588_v12  ;;  %13635 = vmatprep.subr.bf16.mxu1 %v15085_v7 }
 0xa05   : > { %v8602_v50 = vsel %vm8570_vm5, %v8546_v48, %v8586_v13  ;;  %v8612_v45 = vpack.c.bf16 %v8604_v53, %v8603_v38 }
 0xa06   : > { %v8611_v0 = vpack.c.bf16 %v8602_v50, %v8601_v61 }
 0xa07   : > { %13636 = vmatpush3.bf16.msra.mxu1 %v15085_v7 }
 0xa08   : > { %13625 = vmatprep.mubr.bf16.mxu1 %v8611_v0 }
 0xa09   : > { %13626 = vmatmul.mubr.bf16.gmra.mrb[140].mxu1 %v8612_v45 }
 0xac4   : > { %v13615_v8 = vpop.f32.mrb[128].mxu1 }
 0xac5   : > { %v8727_v4 = vadd.f32 %v13615_v8, %v17621_v37  ;;  %v8718_v11 = vpop.f32.mrb[129].mxu1 }
 0xac6   : > { %v8719_v63 = vadd.f32 %v17621_v37, %v8718_v11  ;;  %v13616_v42 = vpop.f32.mrb[130].mxu1 }
 0xac7   : > { %v8799_v28 = vmul.f32 0.02, %v8727_v4  ;;  %v8730_v51 = vadd.f32 %v13616_v42, %v17621_v37  ;;  %v8721_v36 = vpop.f32.mrb[131].mxu1  ;;  %vm8783_vm6 = vcmp.ge.f32.partialorder %v8727_v4, 0.0 }
 0xac8   : > { %v8797_v54 = vmul.f32 0.02, %v8719_v63  ;;  %v8722_v23 = vadd.f32 %v17621_v37, %v8721_v36  ;;  %vm8781_vm7 = vcmp.ge.f32.partialorder %v8719_v63, 0.0 }
 0xac9   : > { %vm8784_vm8 = vcmp.ge.f32.partialorder %v8730_v51, 0.0  ;;  %v8800_v43 = vmul.f32 0.02, %v8730_v51  ;;  %v8815_v20 = vsel %vm8783_vm6, %v8727_v4, %v8799_v28 }
 0xaca   : > { %vm8782_vm9 = vcmp.ge.f32.partialorder %v8722_v23, 0.0  ;;  %v8798_v19 = vmul.f32 0.02, %v8722_v23  ;;  %v8813_v35 = vsel %vm8781_vm7, %v8719_v63, %v8797_v54 }
 0xacb   : > { %v8816_v34 = vsel %vm8784_vm8, %v8730_v51, %v8800_v43  ;;  %v17648_v43 = vld [vmem:[%s18353_s7] ss:$0 sm:$0xff]  ;;  %s18355_s7 = sld [smem:[#allocation21_spill]] }
 0xacc   : > { %v8830_v25 = vpack.c.bf16 %v8816_v34, %v8815_v20  ;;  %v8814_v40 = vsel %vm8782_vm9, %v8722_v23, %v8798_v19  ;;  %v13619_v41 = vpop.f32.mrb[132].mxu1 }
 0xacd   : > { %v8829_v16 = vpack.c.bf16 %v8814_v40, %v8813_v35  ;;  %v8743_v29 = vadd.f32 %v13619_v41, %v17621_v37  ;;  %v8734_v15 = vpop.f32.mrb[133].mxu1 }
 0xace   : > { %v8735_v59 = vadd.f32 %v17621_v37, %v8734_v15  ;;  %v13620_v44 = vpop.f32.mrb[134].mxu1 }
 0xacf   : > { %v8803_v56 = vmul.f32 0.02, %v8743_v29  ;;  %v8746_v49 = vadd.f32 %v13620_v44, %v17621_v37  ;;  %v8737_v5 = vpop.f32.mrb[135].mxu1  ;;  %13637 = vmatprep.mubr.msk.bf16.mxu1 %vm8051_vm3, %v8829_v16  ;;  %vm8787_vm10 = vcmp.ge.f32.partialorder %v8743_v29, 0.0 }
 0xad0   : > { %v8801_v10 = vmul.f32 0.02, %v8735_v59  ;;  %v8738_v57 = vadd.f32 %v17621_v37, %v8737_v5  ;;  %13638 = vmatmul.mubr.msk.bf16.vlgmr.msra.gmra.mrb[144].mxu1 %vm8051_vm3, %v8830_v25  ;;  %vm8785_vm11 = vcmp.ge.f32.partialorder %v8735_v59, 0.0 }
 0xad1   : > { %vm8788_vm12 = vcmp.ge.f32.partialorder %v8746_v49, 0.0  ;;  %v8804_v27 = vmul.f32 0.02, %v8746_v49  ;;  %v8819_v30 = vsel %vm8787_vm10, %v8743_v29, %v8803_v56  ;;  %vm9284_vm10 = vcmask 130048  }
 0xad2   : > { %vm8786_vm13 = vcmp.ge.f32.partialorder %v8738_v57, 0.0  ;;  %v8802_v62 = vmul.f32 0.02, %v8738_v57  ;;  %v8817_v47 = vsel %vm8785_vm11, %v8735_v59, %v8801_v10 }
 0xad3   : > { %v8820_v14 = vsel %vm8788_vm12, %v8746_v49, %v8804_v27  ;;  %vm9443_vm12 = vcmask 1043456  }
 0xad4   : > { %v8832_v18 = vpack.c.bf16 %v8820_v14, %v8819_v30  ;;  %v8818_v33 = vsel %vm8786_vm13, %v8738_v57, %v8802_v62  ;;  %v13623_v17 = vpop.f32.mrb[136].mxu1  ;;  %vm9439_vm13 = vcmask 64512  }
 0xad5   : > { %v8831_v3 = vpack.c.bf16 %v8818_v33, %v8817_v47  ;;  %v8759_v21 = vadd.f32 %v13623_v17, %v17621_v37  ;;  %v8750_v39 = vpop.f32.mrb[137].mxu1 }
 0xad6   : > { %v8751_v24 = vadd.f32 %v17621_v37, %v8750_v39  ;;  %v13624_v46 = vpop.f32.mrb[138].mxu1 }
 0xad7   : > { %v8807_v1 = vmul.f32 0.02, %v8759_v21  ;;  %v8762_v31 = vadd.f32 %v13624_v46, %v17621_v37  ;;  %v8753_v32 = vpop.f32.mrb[139].mxu1  ;;  %13641 = vmatprep.mubr.msk.bf16.mxu1 %vm8051_vm3, %v8831_v3  ;;  %vm8791_vm14 = vcmp.ge.f32.partialorder %v8759_v21, 0.0 }
 0xad8   : > { %v8805_v52 = vmul.f32 0.02, %v8751_v24  ;;  %v8754_v55 = vadd.f32 %v17621_v37, %v8753_v32  ;;  %13642 = vmatmul.mubr.msk.bf16.gmra.mrb[148].mxu1 %vm8051_vm3, %v8832_v18  ;;  %vm8789_vm15 = vcmp.ge.f32.partialorder %v8751_v24, 0.0 }
 0xad9   : > { %vm8792_vm1 = vcmp.ge.f32.partialorder %v8762_v31, 0.0  ;;  %v8808_v22 = vmul.f32 0.02, %v8762_v31  ;;  %v8823_v58 = vsel %vm8791_vm14, %v8759_v21, %v8807_v1  ;;  %v15237_v1 = vmov 0.0  }
 0xada   : > { %vm8790_vm2 = vcmp.ge.f32.partialorder %v8754_v55, 0.0  ;;  %v8806_v60 = vmul.f32 0.02, %v8754_v55  ;;  %v8821_v48 = vsel %vm8789_vm15, %v8751_v24, %v8805_v52  ;;  %13653 = vmatprep.subr.bf16.mxu1 %v15237_v1  ;;  %13683 = vmatprep.subr.bf16.mxu0 %v15237_v1  ;;  %vm9608_vm15 = vcmask 1041408  }
 0xadb   : > { %v8824_v9 = vsel %vm8792_vm1, %v8762_v31, %v8808_v22  ;;  %vm9604_vm1 = vcmask 31744  }
 0xadc   : > { %v8834_v12 = vpack.c.bf16 %v8824_v9, %v8823_v58  ;;  %v8822_v13 = vsel %vm8790_vm2, %v8754_v55, %v8806_v60  ;;  %v13627_v38 = vpop.f32.mrb[140].mxu1 }
 0xadd   : > { %v8833_v53 = vpack.c.bf16 %v8822_v13, %v8821_v48  ;;  %v8775_v61 = vadd.f32 %v13627_v38, %v17621_v37  ;;  %v8766_v50 = vpop.f32.mrb[141].mxu1 }
 0xade   : > { %v8767_v45 = vadd.f32 %v17621_v37, %v8766_v50  ;;  %v13628_v0 = vpop.f32.mrb[142].mxu1 }
 0xadf   : > { %v8811_v26 = vmul.f32 0.02, %v8775_v61  ;;  %v8778_v2 = vadd.f32 %v13628_v0, %v17621_v37  ;;  %v8769_v7 = vpop.f32.mrb[143].mxu1  ;;  %13645 = vmatprep.mubr.msk.bf16.mxu1 %vm8051_vm3, %v8833_v53  ;;  %vm8795_vm4 = vcmp.ge.f32.partialorder %v8775_v61, 0.0 }
 0xae0   : > { %v8809_v8 = vmul.f32 0.02, %v8767_v45  ;;  %v8770_v4 = vadd.f32 %v17621_v37, %v8769_v7  ;;  %13646 = vmatmul.mubr.msk.bf16.gmra.mrb[152].mxu1 %vm8051_vm3, %v8834_v12  ;;  %vm8793_vm5 = vcmp.ge.f32.partialorder %v8767_v45, 0.0 }
 0xae1   : > { %vm8796_vm6 = vcmp.ge.f32.partialorder %v8778_v2, 0.0  ;;  %v8812_v11 = vmul.f32 0.02, %v8778_v2  ;;  %v8827_v42 = vsel %vm8795_vm4, %v8775_v61, %v8811_v26  ;;  %vm9773_vm4 = vcmask 1040384  }
 0xae2   : > { %vm8794_vm7 = vcmp.ge.f32.partialorder %v8770_v4, 0.0  ;;  %v8810_v63 = vmul.f32 0.02, %v8770_v4  ;;  %v8825_v51 = vsel %vm8793_vm5, %v8767_v45, %v8809_v8  ;;  %vm9769_vm5 = vcmask 15360  }
 0xae3   : > { %v8828_v28 = vsel %vm8796_vm6, %v8778_v2, %v8812_v11 }
 0xae4   : > { %v8836_v36 = vpack.c.bf16 %v8828_v28, %v8827_v42  ;;  %v8826_v54 = vsel %vm8794_vm7, %v8770_v4, %v8810_v63  ;;  %vm11459_vm7 = vcmask 1041409  }
 0xae5   : > { %v8835_v23 = vpack.c.bf16 %v8826_v54, %v8825_v51 }
 0xae7   : > { %13649 = vmatprep.mubr.msk.bf16.mxu1 %vm8051_vm3, %v8835_v23 }
 0xae8   : > { %13650 = vmatmul.mubr.msk.bf16.gmra.mrb[156].mxu1 %vm8051_vm3, %v8836_v36  ;;  %vm15238_vm3 = vmmov 0  }
 0xae9   : > { %13657 = vmatprep.mubr.msk.bf16.mxu1 %vm15238_vm3, %v15237_v1  ;;  %13685 = vmatprep.mubr.msk.bf16.mxu0 %vm15238_vm3, %v15237_v1 }
 0xba3   : > { %v13639_v37 = vpop.f32.mrb[144].mxu1 }
 0xba4   : > { %v8943_v19 = vadd.f32 %v13639_v37, %v17648_v43  ;;  %v8934_v20 = vpop.f32.mrb[145].mxu1  ;;  %v9246_v37 = vld [vmem:[%s18355_s7] sm:$0xff] }
 0xba5   : > { %v8935_v34 = vadd.f32 %v17648_v43, %v8934_v20  ;;  %v13640_v35 = vpop.f32.mrb[146].mxu1 }
 0xba6   : > { %15089 = vtanh.f32 %v8943_v19  ;;  %v8946_v25 = vadd.f32 %v13640_v35, %v17648_v43  ;;  %v8937_v40 = vpop.f32.mrb[147].mxu1  ;;  %v9247_v19 = vld [vmem:[%s18355_s7 + $0x8] sm:$0xff]  ;;  %v17706_v35 = vld [vmem:[%s18356_s3] ss:$0 sm:$0xff]  ;;  %s18358_s3 = sld [smem:[#allocation22_spill]] }
 0xba7   : > { %15091 = vtanh.f32 %v8935_v34  ;;  %v8938_v41 = vadd.f32 %v17648_v43, %v8937_v40 }
 0xba8   : > { %15093 = vtanh.f32 %v8946_v25 }
 0xba9   : > { %15095 = vtanh.f32 %v8938_v41 }
 0xbab   : > { %v13643_v16 = vpop.f32.mrb[148].mxu1 }
 0xbac   : > { %v8959_v29 = vadd.f32 %v13643_v16, %v17648_v43  ;;  %v8950_v15 = vpop.f32.mrb[149].mxu1 }
 0xbad   : > { %v8951_v59 = vadd.f32 %v17648_v43, %v8950_v15  ;;  %v13644_v44 = vpop.f32.mrb[150].mxu1 }
 0xbae   : > { %15097 = vtanh.f32 %v8959_v29  ;;  %v8962_v56 = vadd.f32 %v13644_v44, %v17648_v43  ;;  %v8953_v49 = vpop.f32.mrb[151].mxu1 }
 0xbaf   : > { %15099 = vtanh.f32 %v8951_v59  ;;  %v8954_v5 = vadd.f32 %v17648_v43, %v8953_v49  ;;  %v17714_v49 = vld [vmem:[%s18357_s4] ss:$0 sm:$0xff]  ;;  %s18359_s4 = sld [smem:[#allocation23_spill]] }
 0xbb0   : > { %v15090_v10 = vpop.eup %15089  ;;  %15101 = vtanh.f32 %v8962_v56 }
 0xbb1   : > { %v15092_v57 = vpop.eup %15091  ;;  %15103 = vtanh.f32 %v8954_v5 }
 0xbb2   : > { %v15094_v27 = vpop.eup %15093  ;;  %9013 = vxpose.xlu0.b32.start [1/16] (narrow) %v15092_v57, 32 }
 0xbb3   : > { %v15096_v62 = vpop.eup %15095  ;;  %v13647_v30 = vpop.f32.mrb[152].mxu1  ;;  %v17658_v14 = vpack.c.bf16 %v15094_v27, %v15090_v10 }
 0xbb4   : > { %v8975_v47 = vadd.f32 %v13647_v30, %v17648_v43  ;;  %v8966_v18 = vpop.f32.mrb[153].mxu1  ;;  %v17661_v33 = vpack.c.bf16 %v15096_v62, %v15092_v57 }
 0xbb5   : > { %v8967_v17 = vadd.f32 %v17648_v43, %v8966_v18  ;;  %v13648_v3 = vpop.f32.mrb[154].mxu1 }
 0xbb6   : > { %15105 = vtanh.f32 %v8975_v47  ;;  %v8978_v21 = vadd.f32 %v13648_v3, %v17648_v43  ;;  %v8969_v39 = vpop.f32.mrb[155].mxu1  ;;  %9014 = vxpose.xlu0.b32.cont [2/16] (narrow) %v15096_v62, 32 }
 0xbb7   : > { %15107 = vtanh.f32 %v8967_v17  ;;  %v8970_v24 = vadd.f32 %v17648_v43, %v8969_v39 }
 0xbb8   : > { %v15098_v46 = vpop.eup %15097  ;;  %15109 = vtanh.f32 %v8978_v21  ;;  %v15088_v21 = vld [vmem:[%s18354_s21 + $0x10] sm:$0xff]  }
 0xbb9   : > { %v15100_v31 = vpop.eup %15099  ;;  %15111 = vtanh.f32 %v8970_v24 }
 0xbba   : > { %v15102_v32 = vpop.eup %15101  ;;  %9015 = vxpose.xlu0.b32.cont [3/16] (narrow) %v15090_v10, 32 }
 0xbbb   : > { %v15104_v52 = vpop.eup %15103  ;;  %v13651_v55 = vpop.f32.mrb[156].mxu1  ;;  %v17668_v22 = vpack.c.bf16 %v15102_v32, %v15098_v46 }
 0xbbc   : > { %v8991_v60 = vadd.f32 %v13651_v55, %v17648_v43  ;;  %v8982_v58 = vpop.f32.mrb[157].mxu1  ;;  %v17671_v9 = vpack.c.bf16 %v15104_v52, %v15100_v31 }
 0xbbd   : > { %v8983_v48 = vadd.f32 %v17648_v43, %v8982_v58  ;;  %v13652_v12 = vpop.f32.mrb[158].mxu1 }
 0xbbe   : > { %15113 = vtanh.f32 %v8991_v60  ;;  %v8994_v13 = vadd.f32 %v13652_v12, %v17648_v43  ;;  %9016 = vxpose.xlu0.b32.cont [4/16] (narrow) %v15094_v27, 32  ;;  %v8985_v38 = vpop.f32.mrb[159].mxu1  ;;  %v15087_v27 = vld [vmem:[%s18354_s21] sm:$0xff]  }
 0xbbf   : > { %15115 = vtanh.f32 %v8983_v48  ;;  %v8986_v53 = vadd.f32 %v17648_v43, %v8985_v38  ;;  %v15086_v43 = vld [vmem:[%s18354_s21 + $0x8] sm:$0xff]  }
 0xbc0   : > { %v15106_v61 = vpop.eup %15105  ;;  %15117 = vtanh.f32 %v8994_v13 }
 0xbc1   : > { %v15108_v50 = vpop.eup %15107  ;;  %15119 = vtanh.f32 %v8986_v53 }
 0xbc2   : > { %v15110_v45 = vpop.eup %15109  ;;  %9017 = vxpose.xlu0.b32.cont [5/16] (narrow) %v15100_v31, 32 }
 0xbc3   : > { %v15112_v0 = vpop.eup %15111  ;;  %v17676_v26 = vpack.c.bf16 %v15110_v45, %v15106_v61 }
 0xbc4   : > { %v17678_v2 = vpack.c.bf16 %v15112_v0, %v15108_v50 }
 0xbc6   : > { %9018 = vxpose.xlu0.b32.cont [6/16] (narrow) %v15104_v52, 32 }
 0xbc8   : > { %v15114_v7 = vpop.eup %15113 }
 0xbc9   : > { %v15116_v8 = vpop.eup %15115 }
 0xbca   : > { %v15118_v4 = vpop.eup %15117  ;;  %9019 = vxpose.xlu0.b32.cont [7/16] (narrow) %v15098_v46, 32 }
 0xbcb   : > { %v15120_v11 = vpop.eup %15119  ;;  %v17680_v63 = vpack.c.bf16 %v15118_v4, %v15114_v7 }
 0xbcc   : > { %v17682_v42 = vpack.c.bf16 %v15120_v11, %v15116_v8 }
 0xbce   : > { %9020 = vxpose.xlu0.b32.cont [8/16] (narrow) %v15102_v32, 32 }
 0xbd2   : > { %9021 = vxpose.xlu0.b32.cont [9/16] (narrow) %v15108_v50, 32 }
 0xbd6   : > { %9022 = vxpose.xlu0.b32.cont [10/16] (narrow) %v15112_v0, 32 }
 0xbda   : > { %9023 = vxpose.xlu0.b32.cont [11/16] (narrow) %v15106_v61, 32 }
 0xbde   : > { %9024 = vxpose.xlu0.b32.cont [12/16] (narrow) %v15110_v45, 32 }
 0xbe2   : > { %9025 = vxpose.xlu0.b32.cont [13/16] (narrow) %v15116_v8, 32 }
 0xbe6   : > { %9026 = vxpose.xlu0.b32.cont [14/16] (narrow) %v15120_v11, 32 }
 0xbea   : > { %9027 = vxpose.xlu0.b32.cont [15/16] (narrow) %v15114_v7, 32 }
 0xbee   : > { %9028 = vxpose.xlu0.b32.end [16/16] (narrow) %v15118_v4, 32 }
 0xc17   : > { %14915 = vset.pattern.permute.xlu0 %v18309_v6 }
 0xc32   : > { %v9029_v28 = vpop.trf.xlu0 }
 0xc33   : > { %9047 = vrot.lane.b32.xlu1 %v9029_v28, %s18169_s18 }
 0xc36   : > { %v9030_v51 = vpop.trf.xlu0 }
 0xc37   : > { %v9087_v36 = vpack.c.bf16 %v9030_v51, %v9029_v28  ;;  %9067 = vrot.lane.b32.xlu1 %v9029_v28, %s18172_s2 }
 0xc39   : > { %13654 = vmatpush3.bf16.msra.mxu1 %v9087_v36 }
 0xc3a   : > { %v9031_v6 = vpop.trf.xlu0  ;;  %13655 = vmatprep.subr.bf16.mxu1 %v15237_v1 }
 0xc3b   : > { %9049 = vrot.lane.b32.xlu1 %v9030_v51, %s18169_s18 }
 0xc3e   : > { %v9032_v54 = vpop.trf.xlu0 }
 0xc3f   : > { %9069 = vrot.lane.b32.xlu1 %v9030_v51, %s18172_s2  ;;  %v9088_v23 = vpack.c.bf16 %v9032_v54, %v9031_v6 }
 0xc41   : > { %13656 = vmatpush3.bf16.msra.mxu1 %v9088_v23 }
 0xc42   : > { %13661 = vmatprep.subr.bf16.mxu1 %v15237_v1 }
 0xc43   : > { %9051 = vrot.lane.b32.xlu1 %v9031_v6, %s18169_s18 }
 0xc44   : > { %13658 = vmatmul.mubr.msk.bf16.vlgmr.msra.gmra.mrb[160].mxu1 %vm2647_vm0, %v15086_v43 }
 0xc45   : > { %13665 = vmatprep.mubr.msk.bf16.mxu1 %vm15238_vm3, %v15237_v1 }
 0xc47   : > { %9053 = vrot.lane.b32.xlu1 %v9032_v54, %s18169_s18 }
 0xc4b   : > { %9071 = vrot.lane.b32.xlu1 %v9031_v6, %s18172_s2  ;;  %v12207_v6 = vld [vmem:[%s18358_s3 + $0x4] sm:$0xf] }
 0xc4f   : > { %9073 = vrot.lane.b32.xlu1 %v9032_v54, %s18172_s2  ;;  %v9417_v54 = vld [vmem:[%s18359_s4] sm:$0xff]  ;;  %s18360_s4 = sld [smem:[#allocation25_spill]] }
 0xc53   : > { %9250 = vperm.xlu1 %14914, %v9246_v37  }
 0xc57   : > { %9255 = vperm.xlu1 %14914, %v9247_v19  }
 0xca5   : > { %v9048_v20 = vpop.permute.xlu1 %9047 }
 0xca6   : > { %v9061_v40 = vmul.f32 %v17706_v35, %v9048_v20 }
 0xca9   : > { %v9068_v34 = vpop.permute.xlu1 %9067 }
 0xcaa   : > { %v9081_v62 = vmul.f32 %v17714_v49, %v9068_v34 }
 0xcad   : > { %v9050_v25 = vpop.permute.xlu1 %9049 }
 0xcae   : > { %v9062_v41 = vmul.f32 %v17706_v35, %v9050_v25 }
 0xcb0   : > { %v9065_v16 = vpack.c.bf16 %v9062_v41, %v9061_v40 }
 0xcb1   : > { %v9070_v29 = vpop.permute.xlu1 %9069 }
 0xcb2   : > { %13662 = vmatpush3.bf16.msra.mxu1 %v9065_v16  ;;  %v9082_v5 = vmul.f32 %v17714_v49, %v9070_v29  ;;  %v9281_v16 = vld [vmem:[%s18358_s3] sm:$0xf] }
 0xcb3   : > { %13663 = vmatprep.subr.bf16.mxu1 %v15237_v1 }
 0xcb4   : > { %v9085_v30 = vpack.c.bf16 %v9082_v5, %v9081_v62 }
 0xcb5   : > { %v9052_v15 = vpop.permute.xlu1 %9051 }
 0xcb6   : > { %v9063_v44 = vmul.f32 %v17706_v35, %v9052_v15  ;;  %v12210_v15 = vld [vmem:[%s18358_s3 + $0x8] sm:$0xf]  ;;  %s18362_s3 = smov 1  }
 0xcb9   : > { %v9054_v59 = vpop.permute.xlu1 %9053 }
 0xcba   : > { %v9064_v56 = vmul.f32 %v17706_v35, %v9054_v59 }
 0xcbc   : > { %v9066_v10 = vpack.c.bf16 %v9064_v56, %v9063_v44 }
 0xcbd   : > { %v9072_v57 = vpop.permute.xlu1 %9071 }
 0xcbe   : > { %13664 = vmatpush3.bf16.msra.mxu1 %v9066_v10  ;;  %v9083_v18 = vmul.f32 %v17714_v49, %v9072_v57 }
 0xcbf   : > { %13669 = vmatprep.subr.bf16.mxu1 %v15237_v1 }
 0xcc1   : > { %13666 = vmatmul.mubr.msk.bf16.vlgmr.msra.gmra.mrb[164].mxu1 %vm2647_vm0, %v15087_v27  ;;  %v9074_v47 = vpop.permute.xlu1 %9073 }
 0xcc2   : > { %v9084_v17 = vmul.f32 %v17714_v49, %v9074_v47  ;;  %13670 = vmatpush3.bf16.msra.mxu1 %v9085_v30  ;;  %13673 = vmatprep.mubr.msk.bf16.mxu1 %vm15238_vm3, %v15237_v1 }
 0xcc3   : > { %13671 = vmatprep.subr.bf16.mxu1 %v15237_v1 }
 0xcc4   : > { %v9086_v3 = vpack.c.bf16 %v9084_v17, %v9083_v18 }
 0xcc6   : > { %13672 = vmatpush3.bf16.msra.mxu1 %v9086_v3 }
 0xcc7   : > { %13677 = vmatprep.subr.bf16.mxu1 %v15237_v1 }
 0xcc9   : > { %13674 = vmatmul.mubr.msk.bf16.vlgmr.msra.gmra.mrb[168].mxu1 %vm2647_vm0, %v15088_v21 }
 0xcca   : > { %13679 = vmatprep.mubr.msk.bf16.mxu1 %vm15238_vm3, %v15237_v1 }
 0xcd2   : > { %v9251_v12 = vpop.permute.xlu1 %9250 }
 0xcd6   : > { %v9256_v7 = vpop.permute.xlu1 %9255 }
 0xd17   : > { %v9136_v39 = vpop.f32.mrb[160].mxu1 }
 0xd18   : > { %v13659_v24 = vpop.f32.mrb[161].mxu1 }
 0xd19   : > { %v9139_v46 = vpop.f32.mrb[162].mxu1 }
 0xd1a   : > { %v13660_v31 = vpop.f32.mrb[163].mxu1 }
 0xd94   : > { %v9185_v32 = vpop.f32.mrb[164].mxu1 }
 0xd95   : > { %v9186_v52 = vadd.f32 %v9185_v32, %v9136_v39  ;;  %v13667_v55 = vpop.f32.mrb[165].mxu1 }
 0xd96   : > { %v9188_v60 = vpop.f32.mrb[166].mxu1 }
 0xd97   : > { %v9189_v58 = vadd.f32 %v9188_v60, %v9139_v46  ;;  %v13668_v48 = vpop.f32.mrb[167].mxu1 }
 0xd9c   : > { %v9237_v13 = vpop.f32.mrb[168].mxu1 }
 0xd9d   : > { %v9244_v38 = vadd.f32 %v9237_v13, %v9186_v52  ;;  %v13675_v53 = vpop.f32.mrb[169].mxu1  ;;  %v9582_v52 = vld [vmem:[%s18360_s4] sm:$0xf]  ;;  %s18363_s4 = sld [smem:[#allocation26_spill]] }
 0xd9e   : > { %v9240_v61 = vpop.f32.mrb[170].mxu1 }
 0xd9f   : > { %v9258_v50 = vadd.f32 %v9251_v12, %v9244_v38  ;;  %v9245_v45 = vadd.f32 %v9240_v61, %v9189_v58  ;;  %v13676_v0 = vpop.f32.mrb[171].mxu1 }
 0xda1   : > { %v9259_v8 = vadd.f32 %v9256_v7, %v9245_v45  ;;  %vm9260_vm8 = vcmp.ge.f32.partialorder %v9258_v50, 0.0  ;;  %v9262_v4 = vmul.f32 0.02, %v9258_v50 }
 0xda3   : > { %vm9261_vm9 = vcmp.ge.f32.partialorder %v9259_v8, 0.0  ;;  %v9263_v11 = vmul.f32 0.02, %v9259_v8  ;;  %v9264_v28 = vsel %vm9260_vm8, %v9258_v50, %v9262_v4  ;;  %vm11465_vm8 = vcmask 1043459  }
 0xda4   : > { %9266 = vrot.lane.b32.xlu1 %v9264_v28, %s18169_s18 }
 0xda5   : > { %v9265_v51 = vsel %vm9261_vm9, %v9259_v8, %v9263_v11  ;;  %vm11471_vm9 = vcmask 1045509  }
 0xda6   : > { %v9280_v36 = vpack.c.bf16 %v9265_v51, %v9264_v28 }
 0xda8   : > { %9273 = vrot.lane.b32.xlu1 %v9264_v28, %s18172_s2  ;;  %13678 = vmatpush3.bf16.msra.mxu1 %v9280_v36 }
 0xda9   : > { %13689 = vmatprep.subr.bf16.mxu1 %v15237_v1 }
 0xdab   : > { %13680 = vmatmul.mubr.msk.bf16.vlgmr.msra.gmra.mrb[172].mxu1 %vm9284_vm10, %v12207_v6 }
 0xdac   : > { %9268 = vrot.lane.b32.xlu1 %v9265_v51, %s18169_s18  ;;  %13691 = vmatprep.mubr.msk.bf16.mxu1 %vm15238_vm3, %v15237_v1  ;;  %s18361_s18 = sld [smem:[#allocation24_spill]] }
 0xdb0   : > { %9275 = vrot.lane.b32.xlu1 %v9265_v51, %s18172_s2 }
 0xdb2   : > { %v12212_v60 = vld [vmem:[%s18361_s18 + $0x2] sm:$0x3]  ;;  %v9436_v45 = vld [vmem:[%s18361_s18] sm:$0x3]  ;;  %v12215_v0 = vld [vmem:[%s18361_s18 + $0x4] sm:$0x3] }
 0xdb4   : > { %9420 = vperm.xlu1 %14914, %v9417_v54  }
 0xe16   : > { %v9267_v23 = vpop.permute.xlu1 %9266 }
 0xe17   : > { %v9270_v19 = vmul.f32 %v17706_v35, %v9267_v23 }
 0xe1a   : > { %v9274_v43 = vpop.permute.xlu1 %9273 }
 0xe1b   : > { %v9277_v40 = vmul.f32 %v17714_v49, %v9274_v43 }
 0xe1e   : > { %v9269_v37 = vpop.permute.xlu1 %9268 }
 0xe1f   : > { %v9271_v20 = vmul.f32 %v17706_v35, %v9269_v37 }
 0xe21   : > { %v9272_v34 = vpack.c.bf16 %v9271_v20, %v9270_v19 }
 0xe22   : > { %v9276_v25 = vpop.permute.xlu1 %9275 }
 0xe23   : > { %v9278_v41 = vmul.f32 %v17714_v49, %v9276_v25  ;;  %13684 = vmatpush3.bf16.msra.mxu0 %v9272_v34 }
 0xe24   : > { %13695 = vmatprep.subr.bf16.mxu0 %v15237_v1 }
 0xe25   : > { %v9279_v29 = vpack.c.bf16 %v9278_v41, %v9277_v40 }
 0xe26   : > { %13686 = vmatmul.mubr.msk.bf16.vlgmr.msra.gmra.mrb[128].mxu0 %vm9284_vm10, %v9281_v16 }
 0xe27   : > { %13690 = vmatpush3.bf16.msra.mxu1 %v9279_v29  ;;  %13697 = vmatprep.mubr.msk.bf16.mxu0 %vm15238_vm3, %v15237_v1 }
 0xe28   : > { %13701 = vmatprep.subr.bf16.mxu1 %v15237_v1 }
 0xe2a   : > { %13692 = vmatmul.mubr.msk.bf16.vlgmr.msra.gmra.mrb[176].mxu1 %vm9284_vm10, %v12210_v15  ;;  %v12217_v15 = vld [vmem:[%s18363_s4 + $0x1] sm:$0x1]  ;;  %vm11474_vm10 = vcmask 1046534  }
 0xe2b   : > { %13703 = vmatprep.mubr.msk.bf16.mxu1 %vm15238_vm3, %v15237_v1 }
 0xe33   : > { %v9421_v3 = vpop.permute.xlu1 %9420 }
 0xe7e   : > { %v9322_v59 = vpop.f32.mrb[172].mxu1 }
 0xe7f   : > { %v13681_v44 = vpop.f32.mrb[173].mxu1 }
 0xe80   : > { %v9325_v56 = vpop.f32.mrb[174].mxu1 }
 0xe81   : > { %v13682_v5 = vpop.f32.mrb[175].mxu1 }
 0xef9   : > { %v9365_v10 = vpop.f32.mrb[128].mxu0 }
 0xefa   : > { %v9366_v57 = vadd.f32 %v9365_v10, %v9322_v59  ;;  %v13687_v27 = vpop.f32.mrb[129].mxu0  ;;  %v9747_v59 = vld [vmem:[%s15394_s29] sm:$0x3] }
 0xefb   : > { %v9368_v62 = vpop.f32.mrb[130].mxu0 }
 0xefc   : > { %v13688_v30 = vpop.f32.mrb[131].mxu0  ;;  %v9601_v62 = vld [vmem:[%s18363_s4] sm:$0x1] }
 0xefd   : > { %v9410_v47 = vpop.f32.mrb[176].mxu1 }
 0xefe   : > { %v9416_v18 = vadd.f32 %v9410_v47, %v9366_v57  ;;  %v13693_v17 = vpop.f32.mrb[177].mxu1 }
 0xeff   : > { %v9413_v21 = vpop.f32.mrb[178].mxu1 }
 0xf00   : > { %v9423_v39 = vadd.f32 %v9421_v3, %v9416_v18  ;;  %v13694_v24 = vpop.f32.mrb[179].mxu1  ;;  %v12220_v18 = vld [vmem:[%s18363_s4 + $0x2] sm:$0x1]  ;;  %s18365_s4 = smov 127  }
 0xf02   : > { %vm9424_vm11 = vcmp.ge.f32.partialorder %v9423_v39, 0.0  ;;  %v9425_v46 = vmul.f32 0.02, %v9423_v39 }
 0xf04   : > { %v9426_v31 = vsel %vm9424_vm11, %v9423_v39, %v9425_v46  ;;  %vm11477_vm11 = vcmask 1047559  }
 0xf05   : > { %9431 = vrot.lane.b32.xlu0 %v9426_v31, %s18172_s2  ;;  %v9435_v32 = vpack.c.bf16 %v9426_v31, %v9426_v31  ;;  %9427 = vrot.lane.b32.xlu1 %v9426_v31, %s18362_s3 }
 0xf07   : > { %v9445_v55 = vsel %vm9443_vm12, %v9435_v32, 0 }
 0xf08   : > { %13696 = vmatpush3.bf16.msra.mxu0 %v9445_v55 }
 0xf09   : > { %9585 = vperm.xlu1 %14914, %v9582_v52   ;;  %13707 = vmatprep.subr.bf16.mxu0 %v15237_v1 }
 0xf0b   : > { %13698 = vmatmul.mubr.msk.bf16.vlgmr.msra.gmra.mrb[132].mxu0 %vm9439_vm13, %v12212_v60 }
 0xf0c   : > { %13709 = vmatprep.mubr.msk.bf16.mxu0 %vm15238_vm3, %v15237_v1 }
 0xf77   : > { %v9432_v58 = vpop.permute.xlu0 %9431  ;;  %v9428_v48 = vpop.permute.xlu1 %9427 }
 0xf78   : > { %v9433_v12 = vmul.f32 %v17714_v49, %v9432_v58  ;;  %v9429_v13 = vmul.f32 %v17706_v35, %v9428_v48 }
 0xf7a   : > { %v9434_v38 = vpack.c.bf16 %v9433_v12, %v9433_v12  ;;  %v9430_v53 = vpack.c.bf16 %v9429_v13, %v9429_v13 }
 0xf7c   : > { %v9539_v61 = vsel %vm9443_vm12, %v9434_v38, 0  ;;  %v9491_v50 = vsel %vm9443_vm12, %v9430_v53, 0 }
 0xf7d   : > { %13702 = vmatpush3.bf16.msra.mxu1 %v9491_v50  ;;  %13708 = vmatpush3.bf16.msra.mxu0 %v9539_v61 }
 0xf7e   : > { %13713 = vmatprep.subr.bf16.mxu1 %v15237_v1  ;;  %13719 = vmatprep.subr.bf16.mxu0 %v15237_v1 }
 0xf80   : > { %13704 = vmatmul.mubr.msk.bf16.vlgmr.msra.gmra.mrb[180].mxu1 %vm9439_vm13, %v9436_v45  ;;  %13710 = vmatmul.mubr.msk.bf16.vlgmr.msra.gmra.mrb[136].mxu0 %vm9439_vm13, %v12215_v0  ;;  %v12222_v0 = vld [vmem:[%s15399_s25 + $0x1] sm:$0x1] }
 0xf81   : > { %13715 = vmatprep.mubr.msk.bf16.mxu1 %vm15238_vm3, %v15237_v1  ;;  %13721 = vmatprep.mubr.msk.bf16.mxu0 %vm15238_vm3, %v15237_v1 }
 0xf88   : > { %v9586_v34 = vpop.permute.xlu1 %9585 }
 0xfde   : > { %v9481_v7 = vpop.f32.mrb[132].mxu0 }
 0xfdf   : > { %v13699_v8 = vpop.f32.mrb[133].mxu0 }
 0xfe0   : > { %v9484_v4 = vpop.f32.mrb[134].mxu0 }
 0xfe1   : > { %v13700_v11 = vpop.f32.mrb[135].mxu0 }
0x1053   : > { %v9527_v28 = vpop.f32.mrb[180].mxu1  ;;  %v9575_v51 = vpop.f32.mrb[136].mxu0 }
0x1054   : > { %v9528_v36 = vadd.f32 %v9527_v28, %v9481_v7  ;;  %v13705_v6 = vpop.f32.mrb[181].mxu1  ;;  %v13711_v54 = vpop.f32.mrb[137].mxu0  ;;  %v9912_v7 = vld [vmem:[#allocation2] sm:$0x1] }
0x1055   : > { %v9530_v23 = vpop.f32.mrb[182].mxu1  ;;  %v9578_v43 = vpop.f32.mrb[138].mxu0 }
0x1056   : > { %v9581_v37 = vadd.f32 %v9575_v51, %v9528_v36  ;;  %v13706_v19 = vpop.f32.mrb[183].mxu1  ;;  %v13712_v20 = vpop.f32.mrb[139].mxu0  ;;  %v9766_v23 = vld [vmem:[%s15399_s25] sm:$0x1] }
0x1057   : > { %v15241_v19 = vmov 0.0|0.0  }
0x1058   : > { %v9588_v25 = vadd.f32 %v9586_v34, %v9581_v37 }
0x105a   : > { %vm9589_vm14 = vcmp.ge.f32.partialorder %v9588_v25, 0.0  ;;  %v9590_v40 = vmul.f32 0.02, %v9588_v25 }
0x105c   : > { %v9591_v41 = vsel %vm9589_vm14, %v9588_v25, %v9590_v40  ;;  %v12225_v25 = vld [vmem:[%s15399_s25 + $0x2] sm:$0x1] }
0x105d   : > { %9592 = vrot.lane.b32.xlu1 %v9591_v41, %s18362_s3  ;;  %v9600_v16 = vpack.c.bf16 %v9591_v41, %v9591_v41 }
0x105f   : > { %v9610_v29 = vsel %vm9608_vm15, %v9600_v16, 0 }
0x1060   : > { %13714 = vmatpush3.bf16.msra.mxu1 %v9610_v29 }
0x1061   : > { %9596 = vrot.lane.b32.xlu1 %v9591_v41, %s18172_s2  ;;  %13725 = vmatprep.subr.bf16.mxu1 %v15237_v1  ;;  %s18364_s2 = sld [smem:[#allocation12_spill]] }
0x1063   : > { %13716 = vmatmul.mubr.msk.bf16.vlgmr.msra.gmra.mrb[184].mxu1 %vm9604_vm1, %v12217_v15 }
0x1064   : > { %13727 = vmatprep.mubr.msk.bf16.mxu1 %vm15238_vm3, %v15237_v1 }
0x1065   : > { %9750 = vperm.xlu1 %14914, %v9747_v59  }
0x1067   : > { %v9926_v28 = vld [vmem:[%s18364_s2] sm:$0xff]  ;;  %v9927_v51 = vld [vmem:[%s18364_s2 + $0x8] sm:$0xff]  ;;  %v9928_v20 = vld [vmem:[%s18364_s2 + $0x10] sm:$0xff] }
0x1068   : > { %v13996_v43 = vpack.c.bf16 %v9927_v51, %v9926_v28  ;;  %v9930_v40 = vld [vmem:[%s18364_s2 + $0x20] sm:$0xff]  ;;  %v9931_v41 = vld [vmem:[%s18364_s2 + $0x28] sm:$0xff]  ;;  %v9932_v29 = vld [vmem:[%s18364_s2 + $0x30] sm:$0xff] }
0x1069   : > { %v14002_v16 = vpack.c.bf16 %v9931_v41, %v9930_v40  ;;  %v9933_v15 = vld [vmem:[%s18364_s2 + $0x38] sm:$0xff] }
0x106a   : > { %v14005_v59 = vpack.c.bf16 %v9933_v15, %v9932_v29 }
0x10cf   : > { %v9593_v44 = vpop.permute.xlu1 %9592 }
0x10d0   : > { %v9594_v56 = vmul.f32 %v17706_v35, %v9593_v44  ;;  %v9934_v44 = vld [vmem:[%s18364_s2 + $0x40] sm:$0xff] }
0x10d2   : > { %v9595_v5 = vpack.c.bf16 %v9594_v56, %v9594_v56 }
0x10d3   : > { %v9597_v10 = vpop.permute.xlu1 %9596 }
0x10d4   : > { %v9656_v57 = vsel %vm9608_vm15, %v9595_v5, 0  ;;  %v9598_v27 = vmul.f32 %v17714_v49, %v9597_v10  ;;  %v9936_v5 = vld [vmem:[%s18364_s2 + $0x50] sm:$0xff]  ;;  %v9937_v10 = vld [vmem:[%s18364_s2 + $0x58] sm:$0xff] }
0x10d5   : > { %13720 = vmatpush3.bf16.msra.mxu0 %v9656_v57  ;;  %v9940_v57 = vld [vmem:[%s18364_s2 + $0x70] sm:$0xff] }
0x10d6   : > { %v9599_v30 = vpack.c.bf16 %v9598_v27, %v9598_v27  ;;  %13731 = vmatprep.subr.bf16.mxu0 %v15237_v1  ;;  %v9941_v27 = vld [vmem:[%s18364_s2 + $0x78] sm:$0xff] }
0x10d8   : > { %v9704_v47 = vsel %vm9608_vm15, %v9599_v30, 0  ;;  %13722 = vmatmul.mubr.msk.bf16.vlgmr.msra.gmra.mrb[140].mxu0 %vm9604_vm1, %v9601_v62  ;;  %v14017_v62 = vpack.c.bf16 %v9941_v27, %v9940_v57 }
0x10d9   : > { %13726 = vmatpush3.bf16.msra.mxu1 %v9704_v47  ;;  %13733 = vmatprep.mubr.msk.bf16.mxu0 %vm15238_vm3, %v15237_v1 }
0x10da   : > { %13737 = vmatprep.subr.bf16.mxu1 %v15237_v1 }
0x10dc   : > { %13728 = vmatmul.mubr.msk.bf16.vlgmr.msra.gmra.mrb[188].mxu1 %vm9604_vm1, %v12220_v18  ;;  %v9918_v18 = vlaneseq }
0x10dd   : > { %13739 = vmatprep.mubr.msk.bf16.mxu1 %vm15238_vm3, %v15237_v1 }
0x10e4   : > { %v9751_v48 = vpop.permute.xlu1 %9750 }
0x1136   : > { %v9646_v17 = vpop.f32.mrb[184].mxu1 }
0x1137   : > { %v13717_v3 = vpop.f32.mrb[185].mxu1 }
0x1138   : > { %v9649_v21 = vpop.f32.mrb[186].mxu1 }
0x1139   : > { %v13718_v39 = vpop.f32.mrb[187].mxu1 }
0x11ab   : > { %v9692_v24 = vpop.f32.mrb[140].mxu0 }
0x11ac   : > { %v9693_v46 = vadd.f32 %v9692_v24, %v9646_v17  ;;  %v13723_v31 = vpop.f32.mrb[141].mxu0 }
0x11ad   : > { %v9695_v32 = vpop.f32.mrb[142].mxu0 }
0x11ae   : > { %v13724_v52 = vpop.f32.mrb[143].mxu0 }
0x11af   : > { %v9740_v55 = vpop.f32.mrb[188].mxu1 }
0x11b0   : > { %v9746_v60 = vadd.f32 %v9740_v55, %v9693_v46  ;;  %v13729_v58 = vpop.f32.mrb[189].mxu1 }
0x11b1   : > { %v9743_v12 = vpop.f32.mrb[190].mxu1 }
0x11b2   : > { %v9753_v13 = vadd.f32 %v9751_v48, %v9746_v60  ;;  %v13730_v38 = vpop.f32.mrb[191].mxu1 }
0x11b4   : > { %vm9754_vm2 = vcmp.ge.f32.partialorder %v9753_v13, 0.0  ;;  %v9755_v53 = vmul.f32 0.02, %v9753_v13 }
0x11b6   : > { %v9756_v61 = vsel %vm9754_vm2, %v9753_v13, %v9755_v53 }
0x11b7   : > { %9757 = vrot.lane.b32.xlu1 %v9756_v61, %s18362_s3  ;;  %v9765_v50 = vpack.c.bf16 %v9756_v61, %v9756_v61  ;;  %s18366_s3 = sld [smem:[#allocation13_spill]] }
0x11b9   : > { %v9775_v45 = vsel %vm9773_vm4, %v9765_v50, 0 }
0x11ba   : > { %13732 = vmatpush3.bf16.msra.mxu0 %v9775_v45 }
0x11bb   : > { %9761 = vrot.lane.b32.xlu1 %v9756_v61, %s18365_s4  ;;  %13743 = vmatprep.subr.bf16.mxu0 %v15237_v1  ;;  %s18367_s4 = sld [smem:[#allocation9_spill]] }
0x11bd   : > { %13734 = vmatmul.mubr.msk.bf16.vlgmr.msra.gmra.mrb[144].mxu0 %vm9769_vm5, %v12222_v0  ;;  %v9942_v53 = vld [vmem:[%s18366_s3] sm:$0x1]  ;;  %s11631_s3 = sshll.u32 %s15430_s0, 4 }
0x11be   : > { %13745 = vmatprep.mubr.msk.bf16.mxu0 %vm15238_vm3, %v15237_v1  ;;  %p2041_p13 = scmp.lt.s32.totalorder %s11631_s3, 31 }
0x11bf   : > { %9915 = vperm.xlu1 %14914, %v9912_v7  }
0x11c0   : > { %s18375_s3 = smov (!%p2041_p13, %s11631_s3), 31 }
0x11c1   : > { %v10020_v28 = vld [vmem:[%s18367_s4 + $0x8] sm:$0xff]  ;;  %v10019_v51 = vld [vmem:[%s18367_s4] sm:$0xff]  ;;  %s12249_s5 = sshll.u32 %s18375_s3, 5  ;;  %s12250_s3 = sshll.u32 %s15430_s0, 8 }
0x11c2   : > { %s11498_s4 = scalar_lea.sflag [#allocation5], %s15982_s15  ;;  %s15243_s0 = smov [#allocation4]  }
0x11c3   : > { %s15145_s8 = sshll.u32 %s15243_s0, 4  ;;  %s15146_s8 = int_to_ptr.vmem [resolvable:$false] %s15145_s8 }
0x11c4   : > { %s15147_s9 = scalar_lea.vmem %s15146_s8, 512 }
0x1229   : > { %v9758_v8 = vpop.permute.xlu1 %9757 }
0x122a   : > { %v9759_v4 = vmul.f32 %v17706_v35, %v9758_v8  ;;  %v9929_v35 = vld [vmem:[%s18364_s2 + $0x18] sm:$0xff] }
0x122c   : > { %v9760_v11 = vpack.c.bf16 %v9759_v4, %v9759_v4 }
0x122d   : > { %v9762_v36 = vpop.permute.xlu1 %9761 }
0x122e   : > { %v9821_v6 = vsel %vm9773_vm4, %v9760_v11, 0  ;;  %v9763_v54 = vmul.f32 %v17714_v49, %v9762_v36  ;;  %v13999_v49 = vpack.c.bf16 %v9929_v35, %v9928_v20 }
0x122f   : > { %13738 = vmatpush3.bf16.msra.mxu1 %v9821_v6 }
0x1230   : > { %v9764_v37 = vpack.c.bf16 %v9763_v54, %v9763_v54  ;;  %13995 = vmatprep.subr.bf16.mxu1 %v15241_v19 }
0x1232   : > { %v9869_v34 = vsel %vm9773_vm4, %v9764_v37, 0  ;;  %13740 = vmatmul.mubr.msk.bf16.vlgmr.msra.gmra.mrb[192].mxu1 %vm9769_vm5, %v9766_v23 }
0x1233   : > { %13744 = vmatpush3.bf16.msra.mxu0 %v9869_v34  ;;  %13997 = vmatpush3.bf16.msra.mxu1 %v13996_v43 }
0x1234   : > { %14020 = vmatprep.subr.bf16.mxu0 %v17661_v33  ;;  %13998 = vmatprep.subr.bf16.mxu1 %v15241_v19 }
0x1235   : > { %13781 = vmatprep.mubr.msk.f32.mxu1 %vm15238_vm3, %v15237_v1 }
0x1236   : > { %13746 = vmatmul.mubr.msk.bf16.vlgmr.msra.gmra.mrb[148].mxu0 %vm9769_vm5, %v12225_v25 }
0x1237   : > { %14022 = vmatpush3.bf16.msra.mxu0 %v17661_v33  ;;  %14000 = vmatpush3.bf16.msra.mxu1 %v13999_v49  ;;  %v9935_v33 = vld [vmem:[%s18364_s2 + $0x48] sm:$0xff] }
0x1238   : > { %14024 = vmatprep.subr.bf16.mxu0 %v17658_v14  ;;  %14001 = vmatprep.subr.bf16.mxu1 %v15241_v19  ;;  %v14008_v56 = vpack.c.bf16 %v9935_v33, %v9934_v44  ;;  %v15242_v44 = vmov 1966171168  }
0x1239   : > { %v10114_v33 = vunpack.c.l.s4 %v15242_v44 }
0x123b   : > { %14026 = vmatpush3.bf16.msra.mxu0 %v17658_v14  ;;  %14003 = vmatpush3.bf16.msra.mxu1 %v14002_v16  ;;  %v14011_v14 = vpack.c.bf16 %v9937_v10, %v9936_v5 }
0x123c   : > { %14028 = vmatprep.subr.bf16.mxu0 %v17671_v9  ;;  %14004 = vmatprep.subr.bf16.mxu1 %v15241_v19 }
0x123e   : > { %v9916_v24 = vpop.permute.xlu1 %9915 }
0x123f   : > { %14030 = vmatpush3.bf16.msra.mxu0 %v17671_v9  ;;  %14006 = vmatpush3.bf16.msra.mxu1 %v14005_v59  ;;  %v9939_v9 = vld [vmem:[%s18364_s2 + $0x68] sm:$0xff] }
0x1240   : > { %14032 = vmatprep.subr.bf16.mxu0 %v17668_v22  ;;  %14007 = vmatprep.subr.bf16.mxu1 %v15241_v19 }
0x1243   : > { %14034 = vmatpush3.bf16.msra.mxu0 %v17668_v22  ;;  %14009 = vmatpush3.bf16.msra.mxu1 %v14008_v56  ;;  %v9938_v22 = vld [vmem:[%s18364_s2 + $0x60] sm:$0xff]  ;;  %s18368_s2 = sld [smem:[#allocation8_spill]]  ;;  %v10115_v56 = vunpack.c.0.s8 %v10114_v33 }
0x1244   : > { %14036 = vmatprep.subr.bf16.mxu0 %v17678_v2  ;;  %14010 = vmatprep.subr.bf16.mxu1 %v15241_v19 }
0x1247   : > { %14038 = vmatpush3.bf16.msra.mxu0 %v17678_v2  ;;  %14012 = vmatpush3.bf16.msra.mxu1 %v14011_v14  ;;  %v14014_v2 = vpack.c.bf16 %v9939_v9, %v9938_v22 }
0x1248   : > { %14040 = vmatprep.subr.bf16.mxu0 %v17676_v26  ;;  %14013 = vmatprep.subr.bf16.mxu1 %v15241_v19 }
0x1249   : > { %s17874_s6 = scalar_lea.vmem %s18368_s2, %s12249_s5  ;;  %s11630_s5 = sshll.u32 %s15982_s15, 4 }
0x124a   : > { %v10210_v23 = vld [vmem:[%s17874_s6] sm:$0xff]  ;;  %v10211_v43 = vld [vmem:[%s17874_s6 + $0x8] sm:$0xff]  ;;  %v10212_v25 = vld [vmem:[%s17874_s6 + $0x10] sm:$0xff] }
0x124b   : > { %14042 = vmatpush3.bf16.msra.mxu0 %v17676_v26  ;;  %14015 = vmatpush3.bf16.msra.mxu1 %v14014_v2  ;;  %v14052_v37 = vpack.c.bf16 %v10211_v43, %v10210_v23  ;;  %v10214_v20 = vld [vmem:[%s17874_s6 + $0x20] sm:$0xff]  ;;  %v10215_v35 = vld [vmem:[%s17874_s6 + $0x28] sm:$0xff]  ;;  %v10213_v49 = vld [vmem:[%s17874_s6 + $0x18] sm:$0xff] }
0x124c   : > { %14044 = vmatprep.subr.bf16.mxu0 %v17682_v42  ;;  %14016 = vmatprep.subr.bf16.mxu1 %v15241_v19  ;;  %v14058_v34 = vpack.c.bf16 %v10215_v35, %v10214_v20  ;;  %v14055_v40 = vpack.c.bf16 %v10213_v49, %v10212_v25  ;;  %v10216_v41 = vld [vmem:[%s17874_s6 + $0x30] sm:$0xff]  ;;  %v10217_v16 = vld [vmem:[%s17874_s6 + $0x38] sm:$0xff]  ;;  %v10218_v27 = vld [vmem:[%s17874_s6 + $0x40] sm:$0xff] }
0x124d   : > { %v14061_v29 = vpack.c.bf16 %v10217_v16, %v10216_v41  ;;  %v10233_v20 = vld [vmem:[%s17874_s6 + $0xb8] sm:$0xff]  ;;  %v10235_v25 = vld [vmem:[%s17874_s6 + $0xc8] sm:$0xff]  ;;  %v10240_v44 = vld [vmem:[%s17874_s6 + $0xf0] sm:$0xff] }
0x124e   : > { %v10239_v41 = vld [vmem:[%s17874_s6 + $0xe8] sm:$0xff]  ;;  %v10241_v33 = vld [vmem:[%s17874_s6 + $0xf8] sm:$0xff] }
0x124f   : > { %14046 = vmatpush3.bf16.msra.mxu0 %v17682_v42  ;;  %14018 = vmatpush3.bf16.msra.mxu1 %v14017_v62  ;;  %v10219_v62 = vld [vmem:[%s17874_s6 + $0x48] sm:$0xff] }
0x1250   : > { %14048 = vmatprep.subr.bf16.mxu0 %v17680_v63  ;;  %14051 = vmatprep.subr.bf16.mxu1 %v15241_v19 }
0x1253   : > { %14050 = vmatpush3.bf16.msra.mxu0 %v17680_v63  ;;  %v17861_v63 = vshrl.u32 %v9918_v18, 7  ;;  %v10222_v18 = vld [vmem:[%s17874_s6 + $0x60] sm:$0xff] }
0x1254   : > { %14057 = vmatprep.subr.bf16.mxu0 %v15241_v19 }
0x1255   : > { %v9920_v3 = vsub.s32 0, %v17861_v63  ;;  %v10118_v5 = vsub.s32 %v10115_v56, %v17861_v63 }
0x1257   : > { %v9921_v52 = vrot.slane %v9916_v24, %v9920_v3 }
0x1290   : > { %v9811_v26 = vpop.f32.mrb[144].mxu0 }
0x1291   : > { %v13735_v42 = vpop.f32.mrb[145].mxu0 }
0x1292   : > { %v9814_v30 = vpop.f32.mrb[146].mxu0 }
0x1293   : > { %v13736_v47 = vpop.f32.mrb[147].mxu0 }
0x1305   : > { %v9857_v17 = vpop.f32.mrb[192].mxu1 }
0x1306   : > { %v9858_v21 = vadd.f32 %v9857_v17, %v9811_v26  ;;  %v13741_v39 = vpop.f32.mrb[193].mxu1  ;;  %v10223_v17 = vld [vmem:[%s17874_s6 + $0x68] sm:$0xff] }
0x1307   : > { %v9860_v46 = vpop.f32.mrb[194].mxu1  ;;  %v14064_v39 = vpack.c.bf16 %v10219_v62, %v10218_v27  ;;  %v10244_v27 = vld [vmem:[%s17874_s6 + $0x110] sm:$0xff]  ;;  %v10245_v62 = vld [vmem:[%s17874_s6 + $0x118] sm:$0xff] }
0x1308   : > { %v13742_v31 = vpop.f32.mrb[195].mxu1 }
0x1309   : > { %v9905_v32 = vpop.f32.mrb[148].mxu0 }
0x130a   : > { %v9911_v55 = vadd.f32 %v9905_v32, %v9858_v21  ;;  %v13747_v60 = vpop.f32.mrb[149].mxu0  ;;  %v10220_v32 = vld [vmem:[%s17874_s6 + $0x50] sm:$0xff] }
0x130b   : > { %v9908_v58 = vpop.f32.mrb[150].mxu0 }
0x130c   : > { %v9922_v48 = vadd.f32 %v9921_v52, %v9911_v55  ;;  %v13748_v12 = vpop.f32.mrb[151].mxu0  ;;  %v10221_v52 = vld [vmem:[%s17874_s6 + $0x58] sm:$0xff] }
0x130e   : > { %v9924_v13 = vmul.f32 0.02, %v9922_v48  ;;  %vm9923_vm6 = vcmp.ge.f32.partialorder %v9922_v48, 0.0 }
0x1310   : > { %v9925_v38 = vsel %vm9923_vm6, %v9922_v48, %v9924_v13  ;;  %v14070_v48 = vpack.c.bf16 %v10223_v17, %v10222_v18  ;;  %v14103_v18 = vpack.c.bf16 %v10245_v62, %v10244_v27  ;;  %v10250_v17 = vld [vmem:[%s17874_s6 + $0x140] sm:$0xff] }
0x1311   : > { %13782 = vmatmul.mubr.f32.vlgmr.msra.gmra.mrb[196].mxu1 %v9925_v38 }
0x1312   : > { %13827 = vmatprep.mubr.msk.f32.mxu1 %vm15238_vm3, %v15237_v1  ;;  %14053 = vmatpush3.bf16.msra.mxu1 %v14052_v37  ;;  %v10232_v37 = vld [vmem:[%s17874_s6 + $0xb0] sm:$0xff] }
0x1313   : > { %14054 = vmatprep.subr.bf16.mxu1 %v15241_v19  ;;  %v14085_v49 = vpack.c.bf16 %v10233_v20, %v10232_v37  ;;  %v10268_v20 = vld [vmem:[%s17874_s6 + $0x1d0] sm:$0xff] }
0x1316   : > { %14056 = vmatpush3.bf16.msra.mxu1 %v14055_v40  ;;  %v10238_v40 = vld [vmem:[%s17874_s6 + $0xe0] sm:$0xff] }
0x1317   : > { %14063 = vmatprep.subr.bf16.mxu1 %v15241_v19 }
0x13e4   : > { %v10009_v61 = vpop.f32.mrb[196].mxu1 }
0x13e5   : > { %v10010_v50 = vadd.f32 %v10009_v61, %v9942_v53  ;;  %v13783_v45 = vpop.f32.mrb[197].mxu1  ;;  %v10224_v53 = vld [vmem:[%s17874_s6 + $0x70] sm:$0xff]  ;;  %v10225_v61 = vld [vmem:[%s17874_s6 + $0x78] sm:$0xff] }
0x13e6   : > { %v14067_v45 = vpack.c.bf16 %v10221_v52, %v10220_v32  ;;  %v10253_v32 = vld [vmem:[%s17874_s6 + $0x158] sm:$0xff] }
0x13e7   : > { %v10013_v0 = vsel %vm9773_vm4, %v10010_v50, -inf }
0x13e8   : > { %10014 = vmax.xlane.f32.xlu1 %v10013_v0 }
0x1475   : > { %v10015_v7 = vpop.xlane.xlu1 %10014 }
0x1476   : > { %v10016_v8 = vsub.f32 %v10010_v50, %v10015_v7  ;;  %v10226_v7 = vld [vmem:[%s17874_s6 + $0x80] sm:$0xff] }
0x1478   : > { %v10017_v4 = vmul.f32 1.442695, %v10016_v8  ;;  %v10227_v8 = vld [vmem:[%s17874_s6 + $0x88] sm:$0xff] }
0x147a   : > { %15121 = vpow2.f32 %v10017_v4  ;;  %v14073_v4 = vpack.c.bf16 %v10225_v61, %v10224_v53  ;;  %v10262_v61 = vld [vmem:[%s17874_s6 + $0x1a0] sm:$0xff] }
0x1484   : > { %v15122_v11 = vpop.eup %15121 }
0x1485   : > { %v10024_v36 = vrot.slane %v15122_v11, %v9920_v3  ;;  %v10230_v11 = vld [vmem:[%s17874_s6 + $0xa0] sm:$0xff] }
0x1487   : > { %v10026_v6 = vmul.f32 %v10024_v36, %v10020_v28  ;;  %v10025_v54 = vmul.f32 %v10024_v36, %v10019_v51  ;;  %v10231_v28 = vld [vmem:[%s17874_s6 + $0xa8] sm:$0xff]  ;;  %v14076_v51 = vpack.c.bf16 %v10227_v8, %v10226_v7  ;;  %v10260_v8 = vld [vmem:[%s17874_s6 + $0x190] sm:$0xff] }
0x1488   : > { %v14082_v23 = vpack.c.bf16 %v10231_v28, %v10230_v11 }
0x1489   : > { %10029 = vadd.xlane.f32.xlu1 %v10026_v6  ;;  %10027 = vadd.xlane.f32.xlu0 %v10025_v54 }
0x148a   : > { %13816 = vmatprep.mubr.f32.mxu0 %v10025_v54  ;;  %v10229_v54 = vld [vmem:[%s17874_s6 + $0x98] sm:$0xff] }
0x148b   : > { %13817 = vmatmul.mubr.f32.vlgmr.msra.gmra.mrb[152].mxu0 %v10026_v6  ;;  %v10228_v6 = vld [vmem:[%s17874_s6 + $0x90] sm:$0xff] }
0x148c   : > { %13838 = vmatprep.mubr.msk.f32.mxu0 %vm15238_vm3, %v15237_v1  ;;  %14059 = vmatpush3.bf16.msra.mxu0 %v14058_v34  ;;  %v14079_v35 = vpack.c.bf16 %v10229_v54, %v10228_v6  ;;  %v10234_v34 = vld [vmem:[%s17874_s6 + $0xc0] sm:$0xff]  ;;  %v10267_v6 = vld [vmem:[%s17874_s6 + $0x1c8] sm:$0xff] }
0x148d   : > { %14060 = vmatprep.subr.bf16.mxu0 %v15241_v19  ;;  %v14088_v16 = vpack.c.bf16 %v10235_v25, %v10234_v34  ;;  %v10272_v25 = vld [vmem:[%s17874_s6 + $0x1f0] sm:$0xff] }
0x1490   : > { %14062 = vmatpush3.bf16.msra.mxu0 %v14061_v29  ;;  %v10236_v29 = vld [vmem:[%s17874_s6 + $0xd0] sm:$0xff] }
0x1491   : > { %14069 = vmatprep.subr.bf16.mxu0 %v15241_v19 }
0x1516   : > { %v10030_v15 = vpop.xlane.xlu1 %10029  ;;  %v10028_v59 = vpop.xlane.xlu0 %10027 }
0x1517   : > { %15123 = vrcp.f32 %v10030_v15  ;;  %v10237_v15 = vld [vmem:[%s17874_s6 + $0xd8] sm:$0xff] }
0x1518   : > { %15125 = vrcp.f32 %v10028_v59  ;;  %v14094_v59 = vpack.c.bf16 %v10239_v41, %v10238_v40  ;;  %v14091_v56 = vpack.c.bf16 %v10237_v15, %v10236_v29 }
0x1521   : > { %v15124_v10 = vpop.eup %15123 }
0x1522   : > { %v15126_v22 = vpop.eup %15125 }
0x155e   : > { %v13818_v14 = vpop.f32.mrb[152].mxu0 }
0x155f   : > { %v10109_v9 = vmul.f32 %v15124_v10, %v13818_v14  ;;  %v10097_v2 = vpop.f32.mrb[153].mxu0  ;;  %v10243_v10 = vld [vmem:[%s17874_s6 + $0x108] sm:$0xff]  ;;  %v14097_v14 = vpack.c.bf16 %v10241_v33, %v10240_v44 }
0x1560   : > { %v10108_v57 = vmul.f32 %v15126_v22, %v10097_v2  ;;  %v10246_v22 = vld [vmem:[%s17874_s6 + $0x120] sm:$0xff] }
0x1561   : > { %v10161_v26 = vcombine.high %v10109_v9, %v10109_v9  ;;  %v10168_v42 = vrot.slane %v10109_v9, %v10118_v5  ;;  %v10247_v9 = vld [vmem:[%s17874_s6 + $0x128] sm:$0xff] }
0x1562   : > { %v10112_v30 = vcombine.high %v10108_v57, %v10108_v57  ;;  %v10119_v47 = vrot.slane %v10108_v57, %v10118_v5 }
0x1563   : > { %v10175_v3 = vrot.slane %v10161_v26, %v10118_v5  ;;  %v10176_v21 = vcombine.high %v10168_v42, %v10168_v42  ;;  %v17893_v63 = vrot.slane %v10168_v42, %v10118_v5  ;;  %v14106_v26 = vpack.c.bf16 %v10247_v9, %v10246_v22 }
0x1564   : > { %v10126_v24 = vrot.slane %v10112_v30, %v10118_v5  ;;  %v10127_v46 = vcombine.high %v10119_v47, %v10119_v47  ;;  %v10135_v31 = vrot.slane %v10119_v47, %v10118_v5  ;;  %v10248_v30 = vld [vmem:[%s17874_s6 + $0x130] sm:$0xff]  ;;  %v10249_v47 = vld [vmem:[%s17874_s6 + $0x138] sm:$0xff] }
0x1565   : > { %v10177_v55 = vcombine.high %v10175_v3, %v10175_v3  ;;  %v17897_v60 = vrot.slane %v10175_v3, %v10118_v5  ;;  %v17899_v58 = vrot.slane %v10176_v21, %v10118_v5  ;;  %v10251_v3 = vld [vmem:[%s17874_s6 + $0x148] sm:$0xff]  ;;  %v14109_v21 = vpack.c.bf16 %v10249_v47, %v10248_v30 }
0x1566   : > { %v10128_v12 = vcombine.high %v10126_v24, %v10126_v24  ;;  %v17901_v13 = vrot.slane %v10126_v24, %v10118_v5  ;;  %v10149_v38 = vrot.slane %v10127_v46, %v10118_v5  ;;  %13828 = vmatmul.mubr.msk.f32.vlgmr.msra.gmra.mrb[198].mxu1 %vm2647_vm0, %v10135_v31  ;;  %v10157_v36 = vcombine.high %v10135_v31, %v10135_v31  ;;  %v10255_v24 = vld [vmem:[%s17874_s6 + $0x168] sm:$0xff]  ;;  %v10252_v31 = vld [vmem:[%s17874_s6 + $0x150] sm:$0xff] }
0x1567   : > { %v17906_v50 = vrot.slane %v10177_v55, %v10118_v5  ;;  %14065 = vmatpush3.bf16.msra.mxu1 %v14064_v39  ;;  %13849 = vmatprep.mubr.msk.f32.mxu1 %vm15238_vm3, %v15237_v1  ;;  %v10254_v39 = vld [vmem:[%s17874_s6 + $0x160] sm:$0xff]  ;;  %v14112_v46 = vpack.c.bf16 %v10251_v3, %v10250_v17  ;;  %v10256_v55 = vld [vmem:[%s17874_s6 + $0x170] sm:$0xff]  ;;  %v10206_v7 = vcombine.high %v17893_v63, %v17893_v63 }
0x1568   : > { %v17910_v0 = vrot.slane %v10128_v12, %v10118_v5  ;;  %13839 = vmatmul.mubr.msk.f32.vlgmr.msra.gmra.mrb[154].mxu0 %vm2647_vm0, %v10149_v38  ;;  %14066 = vmatprep.subr.bf16.mxu1 %v15241_v19  ;;  %v10159_v43 = vcombine.high %v10149_v38, %v10149_v38  ;;  %v10242_v5 = vld [vmem:[%s17874_s6 + $0x100] sm:$0xff]  ;;  %v10158_v57 = vcombine.high %v17901_v13, %v17901_v13  ;;  %v10259_v38 = vld [vmem:[%s17874_s6 + $0x188] sm:$0xff] }
0x1569   : > { %14071 = vmatpush3.bf16.msra.mxu0 %v14070_v48  ;;  %13860 = vmatprep.mubr.msk.f32.mxu0 %vm15238_vm3, %v15237_v1  ;;  %v14100_v2 = vpack.c.bf16 %v10243_v10, %v10242_v5  ;;  %v14118_v52 = vpack.c.bf16 %v10255_v24, %v10254_v39  ;;  %v10257_v48 = vld [vmem:[%s17874_s6 + $0x178] sm:$0xff]  ;;  %v14115_v12 = vpack.c.bf16 %v10253_v32, %v10252_v31 }
0x156a   : > { %14072 = vmatprep.subr.bf16.mxu0 %v15241_v19  ;;  %v10160_v42 = vcombine.high %v17910_v0, %v17910_v0  ;;  %v14121_v53 = vpack.c.bf16 %v10257_v48, %v10256_v55  ;;  %v10208_v28 = vcombine.high %v17899_v58, %v17899_v58  ;;  %v10209_v29 = vcombine.high %v17906_v50, %v17906_v50 }
0x156b   : > { %14068 = vmatpush3.bf16.msra.mxu1 %v14067_v45  ;;  %v10263_v45 = vld [vmem:[%s17874_s6 + $0x1a8] sm:$0xff] }
0x156c   : > { %14075 = vmatprep.subr.bf16.mxu1 %v15241_v19  ;;  %v14130_v11 = vpack.c.bf16 %v10263_v45, %v10262_v61 }
0x156d   : > { %14074 = vmatpush3.bf16.msra.mxu0 %v14073_v4  ;;  %v10261_v4 = vld [vmem:[%s17874_s6 + $0x198] sm:$0xff] }
0x156e   : > { %13850 = vmatmul.mubr.msk.f32.vlgmr.msra.gmra.mrb[200].mxu1 %vm2647_vm0, %v10157_v36  ;;  %14081 = vmatprep.subr.bf16.mxu0 %v15241_v19  ;;  %v10265_v36 = vld [vmem:[%s17874_s6 + $0x1b8] sm:$0xff] }
0x156f   : > { %14077 = vmatpush3.bf16.msra.mxu1 %v14076_v51  ;;  %13871 = vmatprep.mubr.msk.f32.mxu1 %vm15238_vm3, %v15237_v1  ;;  %v10264_v51 = vld [vmem:[%s17874_s6 + $0x1b0] sm:$0xff] }
0x1570   : > { %13861 = vmatmul.mubr.msk.f32.vlgmr.msra.gmra.mrb[156].mxu0 %vm2647_vm0, %v10159_v43  ;;  %14078 = vmatprep.subr.bf16.mxu1 %v15241_v19  ;;  %v14133_v54 = vpack.c.bf16 %v10265_v36, %v10264_v51  ;;  %v10271_v43 = vld [vmem:[%s17874_s6 + $0x1e8] sm:$0xff] }
0x1571   : > { %14083 = vmatpush3.bf16.msra.mxu0 %v14082_v23  ;;  %13882 = vmatprep.mubr.msk.f32.mxu0 %vm15238_vm3, %v15237_v1  ;;  %v10270_v23 = vld [vmem:[%s17874_s6 + $0x1e0] sm:$0xff] }
0x1572   : > { %14084 = vmatprep.subr.bf16.mxu0 %v15241_v19  ;;  %v14142_v34 = vpack.c.bf16 %v10271_v43, %v10270_v23 }
0x1573   : > { %14080 = vmatpush3.bf16.msra.mxu1 %v14079_v35  ;;  %v10269_v35 = vld [vmem:[%s17874_s6 + $0x1d8] sm:$0xff] }
0x1574   : > { %14087 = vmatprep.subr.bf16.mxu1 %v15241_v19  ;;  %v14139_v40 = vpack.c.bf16 %v10269_v35, %v10268_v20 }
0x1575   : > { %14086 = vmatpush3.bf16.msra.mxu0 %v14085_v49  ;;  %v10273_v49 = vld [vmem:[%s17874_s6 + $0x1f8] sm:$0xff] }
0x1576   : > { %13872 = vmatmul.mubr.msk.f32.vlgmr.msra.gmra.mrb[202].mxu1 %vm2647_vm0, %v17901_v13  ;;  %14093 = vmatprep.subr.bf16.mxu0 %v15241_v19  ;;  %v10258_v13 = vld [vmem:[%s17874_s6 + $0x180] sm:$0xff]  ;;  %v14145_v41 = vpack.c.bf16 %v10273_v49, %v10272_v25 }
0x1577   : > { %14089 = vmatpush3.bf16.msra.mxu1 %v14088_v16  ;;  %13893 = vmatprep.mubr.msk.f32.mxu1 %vm15238_vm3, %v15237_v1  ;;  %v10207_v16 = vcombine.high %v17897_v60, %v17897_v60 }
0x1578   : > { %13883 = vmatmul.mubr.msk.f32.vlgmr.msra.gmra.mrb[158].mxu0 %vm2647_vm0, %v17910_v0  ;;  %14090 = vmatprep.subr.bf16.mxu1 %v15241_v19  ;;  %v14124_v0 = vpack.c.bf16 %v10259_v38, %v10258_v13 }
0x1579   : > { %14095 = vmatpush3.bf16.msra.mxu0 %v14094_v59  ;;  %13904 = vmatprep.mubr.msk.f32.mxu0 %vm15238_vm3, %v15237_v1 }
0x157a   : > { %14096 = vmatprep.subr.bf16.mxu0 %v15241_v19 }
0x157b   : > { %14092 = vmatpush3.bf16.msra.mxu1 %v14091_v56 }
0x157c   : > { %14099 = vmatprep.subr.bf16.mxu1 %v15241_v19 }
0x157d   : > { %14098 = vmatpush3.bf16.msra.mxu0 %v14097_v14 }
0x157e   : > { %13894 = vmatmul.mubr.msk.f32.vlgmr.msra.gmra.mrb[204].mxu1 %vm2647_vm0, %v10158_v57  ;;  %14105 = vmatprep.subr.bf16.mxu0 %v15241_v19 }
0x157f   : > { %14101 = vmatpush3.bf16.msra.mxu1 %v14100_v2  ;;  %13915 = vmatprep.mubr.msk.f32.mxu1 %vm15238_vm3, %v15237_v1 }
0x1580   : > { %13905 = vmatmul.mubr.msk.f32.vlgmr.msra.gmra.mrb[160].mxu0 %vm2647_vm0, %v10160_v42  ;;  %14102 = vmatprep.subr.bf16.mxu1 %v15241_v19 }
0x1581   : > { %14107 = vmatpush3.bf16.msra.mxu0 %v14106_v26  ;;  %13926 = vmatprep.mubr.msk.f32.mxu0 %vm15238_vm3, %v15237_v1 }
0x1582   : > { %14108 = vmatprep.subr.bf16.mxu0 %v15241_v19 }
0x1583   : > { %14104 = vmatpush3.bf16.msra.mxu1 %v14103_v18 }
0x1584   : > { %14111 = vmatprep.subr.bf16.mxu1 %v15241_v19 }
0x1585   : > { %14110 = vmatpush3.bf16.msra.mxu0 %v14109_v21 }
0x1586   : > { %13916 = vmatmul.mubr.msk.f32.vlgmr.msra.gmra.mrb[206].mxu1 %vm2647_vm0, %v17893_v63  ;;  %14117 = vmatprep.subr.bf16.mxu0 %v15241_v19  ;;  %v14127_v63 = vpack.c.bf16 %v10261_v4, %v10260_v8 }
0x1587   : > { %14113 = vmatpush3.bf16.msra.mxu1 %v14112_v46  ;;  %13937 = vmatprep.mubr.msk.f32.mxu1 %vm15238_vm3, %v15237_v1 }
0x1588   : > { %13927 = vmatmul.mubr.msk.f32.vlgmr.msra.gmra.mrb[162].mxu0 %vm2647_vm0, %v17899_v58  ;;  %14114 = vmatprep.subr.bf16.mxu1 %v15241_v19  ;;  %v10266_v58 = vld [vmem:[%s17874_s6 + $0x1c0] sm:$0xff]  ;;  %s18053_s6 = scalar_lea.vmem [#allocation4], %s11630_s5  ;;  %s18067_s5 = scalar_lea.hbm %s15407_s17, %s12250_s3 }
0x1589   : > { %14119 = vmatpush3.bf16.msra.mxu0 %v14118_v52  ;;  %13948 = vmatprep.mubr.msk.f32.mxu0 %vm15238_vm3, %v15237_v1  ;;  %v14136_v37 = vpack.c.bf16 %v10267_v6, %v10266_v58  ;;  %s11511_s2 = sshll.u32 %s18053_s6, 4  ;;  %s18063_s2 = int_to_ptr.vmem [resolvable:$true] %s11511_s2 }
0x158a   : > { %14120 = vmatprep.subr.bf16.mxu0 %v15241_v19  ;;  %s15141_s7 = scalar_lea.vmem %s18063_s2, 256  ;;  %p15148_p3 = scmp.lt.s32.totalorder %s18063_s2, %s15146_s8 }
0x158b   : > { %14116 = vmatpush3.bf16.msra.mxu1 %v14115_v12  ;;  %p15142_p0 = scmp.ne.s32.totalorder %s18063_s2, %s15141_s7  ;;  %p15149_p4 = scmp.lt.s32.totalorder %s15147_s9, %s15141_s7 }
0x158c   : > { %14123 = vmatprep.subr.bf16.mxu1 %v15241_v19 }
0x158d   : > { %14122 = vmatpush3.bf16.msra.mxu0 %v14121_v53  ;;  %p15143_p1 = pnand %p15142_p0, %p15448_p6  ;;  %p15150_p5 = por %p15149_p4, %p15148_p3 }
0x158e   : > { %13938 = vmatmul.mubr.msk.f32.vlgmr.msra.gmra.mrb[208].mxu1 %vm2647_vm0, %v10206_v7  ;;  %14129 = vmatprep.subr.bf16.mxu0 %v15241_v19 }
0x158f   : > { %14125 = vmatpush3.bf16.msra.mxu1 %v14124_v0  ;;  %13959 = vmatprep.mubr.msk.f32.mxu1 %vm15238_vm3, %v15237_v1  ;;  %p15144_p2 = pneg %p15143_p1 }
0x1590   : > { %13949 = vmatmul.mubr.msk.f32.vlgmr.msra.gmra.mrb[164].mxu0 %vm2647_vm0, %v10208_v28  ;;  %14126 = vmatprep.subr.bf16.mxu1 %v15241_v19 }
0x1591   : > { %14131 = vmatpush3.bf16.msra.mxu0 %v14130_v11  ;;  %13970 = vmatprep.mubr.msk.f32.mxu0 %vm15238_vm3, %v15237_v1  ;;  %p15151_p7 = pnand %p15150_p5, %p15144_p2 }
0x1592   : > { %14132 = vmatprep.subr.bf16.mxu0 %v15241_v19 }
0x1593   : > { %14128 = vmatpush3.bf16.msra.mxu1 %v14127_v63 }
0x1594   : > { %14135 = vmatprep.subr.bf16.mxu1 %v15241_v19 }
0x1595   : > { %14134 = vmatpush3.bf16.msra.mxu0 %v14133_v54 }
0x1596   : > { %13960 = vmatmul.mubr.msk.f32.vlgmr.msra.gmra.mrb[210].mxu1 %vm2647_vm0, %v17897_v60  ;;  %14141 = vmatprep.subr.bf16.mxu0 %v15241_v19 }
0x1597   : > { %14137 = vmatpush3.bf16.msra.mxu1 %v14136_v37  ;;  %13981 = vmatprep.mubr.msk.f32.mxu1 %vm15238_vm3, %v15237_v1 }
0x1598   : > { %13971 = vmatmul.mubr.msk.f32.vlgmr.msra.gmra.mrb[166].mxu0 %vm2647_vm0, %v17906_v50  ;;  %14138 = vmatprep.subr.bf16.mxu1 %v15241_v19 }
0x1599   : > { %14143 = vmatpush3.bf16.msra.mxu0 %v14142_v34  ;;  %13992 = vmatprep.mubr.msk.f32.mxu0 %vm15238_vm3, %v15237_v1  ;;  %vm11462_vm3 = vcmask 1042434  }
0x159a   : > { %14144 = vmatprep.subr.bf16.mxu0 %v15241_v19 }
0x159b   : > { %14140 = vmatpush3.bf16.msra.mxu1 %v14139_v40 }
0x159d   : > { %14146 = vmatpush3.bf16.msra.mxu0 %v14145_v41 }
0x159e   : > { %13982 = vmatmul.mubr.msk.f32.vlgmr.msra.gmra.mrb[212].mxu1 %vm2647_vm0, %v10207_v16 }
0x15a0   : > { %13993 = vmatmul.mubr.msk.f32.vlgmr.msra.gmra.mrb[168].mxu0 %vm2647_vm0, %v10209_v29  ;;  %vm11468_vm0 = vcmask 1044484  }
0x1639   : > { %v10342_v15 = vpop.f32.mrb[198].mxu1 }
0x163a   : > { %v13829_v59 = vpop.f32.mrb[199].mxu1  ;;  %v11426_v1 = vmul.f32 10.0, %v10342_v15 }
0x163b   : > { %v10414_v44 = vpop.f32.mrb[154].mxu0 }
0x163c   : > { %v11427_v33 = vmul.f32 10.0, %v10414_v44  ;;  %v13840_v56 = vpop.f32.mrb[155].mxu0 }
0x163e   : > { %v11458_v19 = vrot.slane %v11427_v33, 7 }
0x1640   : > { %v11460_v5 = vsel %vm11459_vm7, %v11458_v19, %v11426_v1 }
0x1641   : > { %v10486_v10 = vpop.f32.mrb[200].mxu1 }
0x1642   : > { %v11428_v60 = vmul.f32 10.0, %v10486_v10  ;;  %v13851_v14 = vpop.f32.mrb[201].mxu1 }
0x1643   : > { %v10558_v22 = vpop.f32.mrb[156].mxu0 }
0x1644   : > { %v11461_v50 = vrot.slane %v11428_v60, 6  ;;  %v11429_v9 = vmul.f32 10.0, %v10558_v22  ;;  %v13862_v2 = vpop.f32.mrb[157].mxu0 }
0x1646   : > { %v11463_v57 = vsel %vm11462_vm3, %v11461_v50, %v11460_v5  ;;  %v11464_v27 = vrot.slane %v11429_v9, 5 }
0x1648   : > { %v11466_v62 = vsel %vm11465_vm8, %v11464_v27, %v11463_v57 }
0x1649   : > { %v10630_v26 = vpop.f32.mrb[202].mxu1 }
0x164a   : > { %v11430_v42 = vmul.f32 10.0, %v10630_v26  ;;  %v13873_v30 = vpop.f32.mrb[203].mxu1 }
0x164b   : > { %v10702_v47 = vpop.f32.mrb[158].mxu0 }
0x164c   : > { %v11467_v18 = vrot.slane %v11430_v42, 4  ;;  %v11431_v17 = vmul.f32 10.0, %v10702_v47  ;;  %v13884_v3 = vpop.f32.mrb[159].mxu0 }
0x164e   : > { %v11469_v21 = vsel %vm11468_vm0, %v11467_v18, %v11466_v62  ;;  %v11470_v39 = vrot.slane %v11431_v17, 3 }
0x1650   : > { %v11472_v24 = vsel %vm11471_vm9, %v11470_v39, %v11469_v21 }
0x1651   : > { %v10774_v46 = vpop.f32.mrb[204].mxu1 }
0x1652   : > { %v11432_v31 = vmul.f32 10.0, %v10774_v46  ;;  %v13895_v32 = vpop.f32.mrb[205].mxu1 }
0x1653   : > { %v10846_v52 = vpop.f32.mrb[160].mxu0 }
0x1654   : > { %v11473_v55 = vrot.slane %v11432_v31, 2  ;;  %v11433_v48 = vmul.f32 10.0, %v10846_v52  ;;  %v13906_v12 = vpop.f32.mrb[161].mxu0 }
0x1656   : > { %v11475_v13 = vsel %vm11474_vm10, %v11473_v55, %v11472_v24  ;;  %v11476_v38 = vrot.slane %v11433_v48, 1 }
0x1658   : > { %v11478_v53 = vsel %vm11477_vm11, %v11476_v38, %v11475_v13 }
0x1659   : > { %11495 = vst [vmem:[%s18053_s6] sm:$0xff] %v11478_v53  ;;  %v10918_v61 = vpop.f32.mrb[206].mxu1 }
0x165a   : > { %v13917_v45 = vpop.f32.mrb[207].mxu1  ;;  %v11434_v4 = vmul.f32 10.0, %v10918_v61 }
0x165b   : > { %v10990_v0 = vpop.f32.mrb[162].mxu0 }
0x165c   : > { %v11435_v7 = vmul.f32 10.0, %v10990_v0  ;;  %v13928_v8 = vpop.f32.mrb[163].mxu0 }
0x165e   : > { %v11479_v11 = vrot.slane %v11435_v7, 7 }
0x1660   : > { %v11480_v28 = vsel %vm11459_vm7, %v11479_v11, %v11434_v4 }
0x1661   : > { %v11062_v51 = vpop.f32.mrb[208].mxu1 }
0x1662   : > { %v11436_v36 = vmul.f32 10.0, %v11062_v51  ;;  %v13939_v63 = vpop.f32.mrb[209].mxu1 }
0x1663   : > { %v11134_v58 = vpop.f32.mrb[164].mxu0 }
0x1664   : > { %v11481_v6 = vrot.slane %v11436_v36, 6  ;;  %v11437_v54 = vmul.f32 10.0, %v11134_v58  ;;  %v13950_v23 = vpop.f32.mrb[165].mxu0 }
0x1666   : > { %v11482_v43 = vsel %vm11462_vm3, %v11481_v6, %v11480_v28  ;;  %v11483_v37 = vrot.slane %v11437_v54, 5 }
0x1668   : > { %v11484_v20 = vsel %vm11465_vm8, %v11483_v37, %v11482_v43 }
0x1669   : > { %v11206_v35 = vpop.f32.mrb[210].mxu1 }
0x166a   : > { %v11438_v34 = vmul.f32 10.0, %v11206_v35  ;;  %v13961_v25 = vpop.f32.mrb[211].mxu1 }
0x166b   : > { %v11278_v49 = vpop.f32.mrb[166].mxu0 }
0x166c   : > { %v11485_v40 = vrot.slane %v11438_v34, 4  ;;  %v11439_v41 = vmul.f32 10.0, %v11278_v49  ;;  %v13972_v16 = vpop.f32.mrb[167].mxu0 }
0x166e   : > { %v11486_v29 = vsel %vm11468_vm0, %v11485_v40, %v11484_v20  ;;  %v11487_v15 = vrot.slane %v11439_v41, 3 }
0x1670   : > { %v11488_v59 = vsel %vm11471_vm9, %v11487_v15, %v11486_v29 }
0x1671   : > { %v11350_v44 = vpop.f32.mrb[212].mxu1 }
0x1672   : > { %v11440_v33 = vmul.f32 10.0, %v11350_v44  ;;  %v13983_v56 = vpop.f32.mrb[213].mxu1 }
0x1673   : > { %v11422_v1 = vpop.f32.mrb[168].mxu0 }
0x1674   : > { %v11489_v19 = vrot.slane %v11440_v33, 2  ;;  %v11441_v5 = vmul.f32 10.0, %v11422_v1  ;;  %v13994_v10 = vpop.f32.mrb[169].mxu0 }
0x1676   : > { %v11490_v60 = vsel %vm11474_vm10, %v11489_v19, %v11488_v59  ;;  %v11491_v14 = vrot.slane %v11441_v5, 1 }
0x1678   : > { %v11492_v22 = vsel %vm11477_vm11, %v11491_v14, %v11490_v60 }
0x1679   : > { %11496 = vst [vmem:[%s18053_s6 + $0x8] sm:$0xff] %v11492_v22 }
0x167a   : > { %15154 = shalt.err (!%p15151_p7)
}
0x167b   : > { %s15155_s6 = scalar_lea.hbm %s18067_s5, 256  ;;  %s15159_s3 = scalar_lea.hbm %s15407_s17, 512 }
0x167c   : > { %p15156_p10 = scmp.ne.s32.totalorder %s18067_s5, %s15155_s6  ;;  %p15160_p13 = scmp.lt.u32.totalorder %s18067_s5, %s15407_s17 }
0x167d   : > { %p15161_p0 = scmp.lt.u32.totalorder %s15159_s3, %s15155_s6  ;;  %p15163_p9 = scmp.lt.u32.totalorder %s15155_s6, %s18067_s5 }
0x167e   : > { %p15157_p11 = pnand %p15156_p10, %p15448_p6 }
0x167f   : > { %p15162_p1 = por %p15161_p0, %p15160_p13 }
0x1680   : > { %p15158_p12 = pneg %p15157_p11 }
0x1681   : > { %p15164_p3 = por %p15163_p9, %p15162_p1 }
0x1683   : > { %p15165_p2 = pnand %p15164_p3, %p15158_p12 }
0x1685   : > { %15168 = shalt.err (!%p15165_p2)
}
0x1686   : > { %s15244_s9 = smov 128   ;;  %s15245_s8 = smov 8  }
0x1687   : > { %14835 = dma.vmem_to_hbm [thread:$0]  (%p15448_p6), %s18063_s2, 256, %s18067_s5, %s11498_s4, %s15244_s9, %s15244_s9, %s15245_s8  }
0x1688 PF: > { %s11526_s7 = sand.u32 1, %s15191_s22   ;;  %p18369_p4 = scmp.ge.s32.totalorder %s15203_s28, 2 }
0x1689   : > { %s11527_s0 = scalar_lea.sflag [#allocation5], %s11526_s7 }
0x168a   : > { %p14838_p5 = pnand %p18369_p4, %p15452_p8 }
0x168c   : > { %15186 = dma.done.wait (!%p14838_p5), %s11527_s0, 256  }
0x168d   : > { %15188 = vsyncadd (!%p14838_p5), %s11527_s0, 4294967040  ;;  %p75_p9 = scmp.ge.s32.totalorder %s15434_s1, 4   ;;  %s18370_s22 = smov %s15195_s23 }
0x168e   : > { %s18371_s23 = smov %s15199_s26  ;;  %s18372_s26 = smov %s15446_s10 }
0x168f   : > { %s18373_s28 = smov %s15434_s1  ;;  %77 = sbr.rel (!%p75_p9) target bundleno = 62 (0x3e), region = 277 }
0x1696   :  { %11532 = vsyncpa [#allocation5], 1 }
0x1697   :  { %11534 = vsyncpa [#allocation5 + $0x1], 1 }

</bundles_post_ra>
